<compile_context>
chip_gen: v6e
topology: v6e:2x2x1
jax: 0.10.0
libtpu: 0.0.40
codegen_flags: <defaults>
</compile_context>

<pallas_src>
import functools
import math

import jax
import jax.numpy as jnp
from jax.experimental import pallas as pl
from jax.experimental.pallas import tpu as pltpu  # noqa: F401  (kept per convention)

# ---------------- configuration (stands in for get_config()) ----------------
CFG = dict(
    FEAT_DIM=8,      # raw features per time step
    hidden=32,       # H
    heads=4,         # attention heads (head_dim = 8)
    dropout=0.1,     # unused at inference (eval mode)
    num_stocks=10,   # embedding table rows (>= S)
    MINUTE_IDX=0,
    VOLUME_IDX=1,
    STD_IDX=2,
)

T2V_DIM = 8
NEG_BIAS = -1e9   # additive mask value (exp() underflows to exactly 0 in f32)


# ============================ fully fused kernel =============================

def _encoder_fused_kernel(
    x_cat_ref,                       # (B*S*T, F + T2V)
    bias_t_ref,                      # (B*S*T, B*S*T)  block-diag (blocks of T)
    bias_p_ref,                      # (B*S,   B*S*T)  pooling-query group mask
    bias_c_ref,                      # (B*S,   B*S)    block-diag (blocks of S)
    proj_w_ref, proj_b_ref,          # (F+T2V, H), (1, H)
    wqkv_ref, bqkv_ref,              # (3, H, 3H), (3, 1, 3H)
    wo_ref, bo_ref,                  # (3, H, H), (3, 1, H)
    ln1g_ref, ln1b_ref,              # (3, 1, H)
    w1_ref, b1_ref, w2_ref, b2_ref,  # (3, H, H), (3, 1, H), (3, H, H), (3, 1, H)
    ln2g_ref, ln2b_ref,              # (3, 1, H)
    pool_tok_ref,                    # (1, H)
    pq_w_ref, pq_b_ref,              # (H, H), (1, H)
    pkv_w_ref, pkv_b_ref,            # (H, 2H), (1, 2H)
    po_w_ref, po_b_ref,              # (H, H), (1, H)
    emb_ref,                         # (B*S, H)  pre-gathered stock embeddings
    sh_w1_ref, sh_b1_ref,            # (H, H), (1, H)
    sh_lng_ref, sh_lnb_ref,          # (1, H)
    sh_w2_ref, sh_b2_ref,            # (H, 1), (1, 1)
    out_ref,                         # (B*S, 1)
    *, H, nh):
    f32 = jnp.float32
    dh = H // nh
    scale = 1.0 / math.sqrt(dh)
    BS = emb_ref.shape[0]

    def layer_norm(v, g, b, eps=1e-5):
        m = jnp.mean(v, axis=-1, keepdims=True)
        var = jnp.mean((v - m) ** 2, axis=-1, keepdims=True)
        return (v - m) * jax.lax.rsqrt(var + eps) * g + b

    def softmax_rows(s):
        s = s - jnp.max(s, axis=-1, keepdims=True)
        p = jnp.exp(s)
        return p * pl.reciprocal(jnp.sum(p, axis=-1, keepdims=True), approx=True)

    def self_attention(h2, l, bias):
        # Fused QKV projection (one matmul); per-head masked attention; the
        # output projection is split per head and summed (no concat needed).
        qkv = jnp.dot(h2, wqkv_ref[l], preferred_element_type=f32) + bqkv_ref[l]
        wo = wo_ref[l]
        acc = None
        for hd in range(nh):
            qh = qkv[:, hd * dh:(hd + 1) * dh]
            kh = qkv[:, H + hd * dh:H + (hd + 1) * dh]
            vh = qkv[:, 2 * H + hd * dh:2 * H + (hd + 1) * dh]
            s = jax.lax.dot_general(qh, kh, (((1,), (1,)), ((), ())),
                                    preferred_element_type=f32) * scale + bias
            p = softmax_rows(s)
            oh = jnp.dot(p, vh, preferred_element_type=f32)
            c = jnp.dot(oh, wo[hd * dh:(hd + 1) * dh, :],
                        preferred_element_type=f32)
            acc = c if acc is None else acc + c
        return acc + bo_ref[l]

    def encoder_layer(h2, l, bias):
        # nn.TransformerEncoderLayer: post-norm, ReLU, dim_feedforward == H.
        a = self_attention(h2, l, bias)
        h2 = layer_norm(h2 + a, ln1g_ref[l], ln1b_ref[l])
        f = jnp.maximum(
            jnp.dot(h2, w1_ref[l], preferred_element_type=f32) + b1_ref[l], 0.0)
        f = jnp.dot(f, w2_ref[l], preferred_element_type=f32) + b2_ref[l]
        return layer_norm(h2 + f, ln2g_ref[l], ln2b_ref[l])

    # ---- input projection ----
    h = jnp.dot(x_cat_ref[...], proj_w_ref[...],
                preferred_element_type=f32) + proj_b_ref[...]          # (MT, H)

    # ---- temporal transformer stack (2 layers, sequences of length T) ----
    bias_t = bias_t_ref[...]
    h = encoder_layer(h, 0, bias_t)
    h = encoder_layer(h, 1, bias_t)

    # ---- attention pooling: learned pool token is the single query --------
    q = jnp.dot(pool_tok_ref[...], pq_w_ref[...],
                preferred_element_type=f32) + pq_b_ref[...]            # (1, H)
    kv = jnp.dot(h, pkv_w_ref[...],
                 preferred_element_type=f32) + pkv_b_ref[...]          # (MT, 2H)
    po_w = po_w_ref[...]
    bias_p = bias_p_ref[...]
    zeros_q = jnp.zeros((BS, dh), f32)     # broadcast helper (1,dh)->(BS,dh)
    acc = None
    for hd in range(nh):
        qh = q[:, hd * dh:(hd + 1) * dh] + zeros_q
        kh = kv[:, hd * dh:(hd + 1) * dh]
        vh = kv[:, H + hd * dh:H + (hd + 1) * dh]
        s = jax.lax.dot_general(qh, kh, (((1,), (1,)), ((), ())),
                                preferred_element_type=f32) * scale + bias_p
        p = softmax_rows(s)
        oh = jnp.dot(p, vh, preferred_element_type=f32)                # (BS, dh)
        c = jnp.dot(oh, po_w[hd * dh:(hd + 1) * dh, :],
                    preferred_element_type=f32)
        acc = c if acc is None else acc + c
    pooled = acc + po_b_ref[...]           # (BS, H); dropout == identity (eval)

    # ---- stock embedding + cross-stock attention (sequences of length S) ---
    h_tok = pooled + emb_ref[...]
    h_tok = h_tok + encoder_layer(h_tok, 2, bias_c_ref[...])

    # ---- score head: Linear -> ReLU -> LayerNorm -> Linear -----------------
    s1 = jnp.maximum(
        jnp.dot(h_tok, sh_w1_ref[...], preferred_element_type=f32) + sh_b1_ref[...],
        0.0)
    s1 = layer_norm(s1, sh_lng_ref[...], sh_lnb_ref[...])
    scores = jnp.dot(s1, sh_w2_ref[...],
                     preferred_element_type=f32) + sh_b2_ref[...]      # (BS, 1)
    out_ref[...] = scores.astype(out_ref.dtype)


# ================================ parameters =================================

def make_params(key, cfg):
    H = cfg['hidden']
    F = cfg['FEAT_DIM']
    L = 3  # temporal-0, temporal-1, cross
    keys = iter(jax.random.split(key, 64))

    def randn(shape, scale=None):
        if scale is None:
            fan_in = shape[-2] if len(shape) >= 2 else 1
            scale = 1.0 / math.sqrt(max(fan_in, 1))
        return (scale * jax.random.normal(next(keys), shape)).astype(jnp.float32)

    return dict(
        # Time2Vec (applied in JAX glue; tiny elementwise)
        t2v_w0=randn((1,), 1.0), t2v_b0=randn((1,), 1.0),
        t2v_W=randn((T2V_DIM - 1,), 1.0), t2v_phi=randn((T2V_DIM - 1,), 1.0),
        # input projection
        proj_w=randn((F + T2V_DIM, H)), proj_b=jnp.zeros((1, H), jnp.float32),
        # 3 stacked transformer-encoder layers (2 temporal + 1 cross),
        # QKV fused as (H, 3H); dim_feedforward == H per the reference module.
        lyr_wqkv=randn((L, H, 3 * H)), lyr_bqkv=jnp.zeros((L, 1, 3 * H), jnp.float32),
        lyr_wo=randn((L, H, H)), lyr_bo=jnp.zeros((L, 1, H), jnp.float32),
        lyr_ln1g=jnp.ones((L, 1, H), jnp.float32), lyr_ln1b=jnp.zeros((L, 1, H), jnp.float32),
        lyr_w1=randn((L, H, H)), lyr_b1=jnp.zeros((L, 1, H), jnp.float32),
        lyr_w2=randn((L, H, H)), lyr_b2=jnp.zeros((L, 1, H), jnp.float32),
        lyr_ln2g=jnp.ones((L, 1, H), jnp.float32), lyr_ln2b=jnp.zeros((L, 1, H), jnp.float32),
        # attention pooling (learned pool token + MultiheadAttention, K/V fused)
        pool_token=randn((1, H), 1.0),
        pq_w=randn((H, H)), pq_b=jnp.zeros((1, H), jnp.float32),
        pkv_w=randn((H, 2 * H)), pkv_b=jnp.zeros((1, 2 * H), jnp.float32),
        po_w=randn((H, H)), po_b=jnp.zeros((1, H), jnp.float32),
        # stock embedding + score head
        stock_emb=randn((cfg['num_stocks'], H), 0.1),
        sh_w1=randn((H, H)), sh_b1=jnp.zeros((1, H), jnp.float32),
        sh_ln_g=jnp.ones((1, H), jnp.float32), sh_ln_b=jnp.zeros((1, H), jnp.float32),
        sh_w2=randn((H, 1)), sh_b2=jnp.zeros((1, 1), jnp.float32),
    )


# ================================= forward ===================================

def encoder_forward(params, x):
    cfg = CFG
    B, S, T, F = x.shape
    H, nh = cfg['hidden'], cfg['heads']
    BS, MT = B * S, B * S * T

    # --- Time2Vec + feature concat (tiny elementwise glue, fused by XLA) ---
    minute = x[..., cfg['MINUTE_IDX']]                                     # (B,S,T)
    lin = params['t2v_w0'] * minute + params['t2v_b0']
    per = jnp.sin(minute[..., None] * params['t2v_W'] + params['t2v_phi'])
    t2v = jnp.concatenate([lin[..., None], per], axis=-1)                  # (B,S,T,8)
    x_cat = jnp.concatenate([x, t2v], axis=-1).reshape(MT, F + T2V_DIM)

    # NOTE: the reference also computes a vol/std `attn_bias` that is never
    # consumed downstream (dead code) -> intentionally omitted here.

    # --- constant block-diagonal attention biases (folded by XLA) ---
    rt = jnp.arange(MT) // T
    bias_t = jnp.where(rt[:, None] == rt[None, :], 0.0, NEG_BIAS).astype(jnp.float32)
    bias_p = jnp.where(jnp.arange(BS)[:, None] == rt[None, :], 0.0, NEG_BIAS).astype(jnp.float32)
    rc = jnp.arange(BS) // S
    bias_c = jnp.where(rc[:, None] == rc[None, :], 0.0, NEG_BIAS).astype(jnp.float32)

    # --- stock embedding rows: arange(S) repeated B times (static gather) ---
    emb_g = jnp.tile(params['stock_emb'][:S], (B, 1))                      # (BS, H)

    scores = pl.pallas_call(
        functools.partial(_encoder_fused_kernel, H=H, nh=nh),
        out_shape=jax.ShapeDtypeStruct((BS, 1), jnp.float32),
    )(
        x_cat, bias_t, bias_p, bias_c,
        params['proj_w'], params['proj_b'],
        params['lyr_wqkv'], params['lyr_bqkv'],
        params['lyr_wo'], params['lyr_bo'],
        params['lyr_ln1g'], params['lyr_ln1b'],
        params['lyr_w1'], params['lyr_b1'],
        params['lyr_w2'], params['lyr_b2'],
        params['lyr_ln2g'], params['lyr_ln2b'],
        params['pool_token'],
        params['pq_w'], params['pq_b'],
        params['pkv_w'], params['pkv_b'],
        params['po_w'], params['po_b'],
        emb_g,
        params['sh_w1'], params['sh_b1'],
        params['sh_ln_g'], params['sh_ln_b'],
        params['sh_w2'], params['sh_b2'],
    )
    return scores.reshape(B, S)


# =================================== main ====================================

if __name__ == "__main__":
    key = jax.random.PRNGKey(0)
    kp, kx = jax.random.split(key)

    B, S, T = 2, 3, 8
    F = CFG['FEAT_DIM']

    params = make_params(kp, CFG)
    x = jax.random.normal(kx, (B, S, T, F), dtype=jnp.float32)

    fwd = jax.jit(encoder_forward)
    scores = fwd(params, x)
    jax.block_until_ready(scores)

    assert scores.shape == (B, S)
    assert bool(jnp.all(jnp.isfinite(scores)))
    print("KERNEL_OK")
</pallas_src>

<mosaic_0001>
module attributes {stable_mosaic.version = 11 : i64} {
  func.func @_encoder_fused_kernel(%arg0: memref<48x16xf32, #tpu.memory_space<vmem>>, %arg1: memref<48x48xf32, #tpu.memory_space<vmem>>, %arg2: memref<6x48xf32, #tpu.memory_space<vmem>>, %arg3: memref<6x6xf32, #tpu.memory_space<vmem>>, %arg4: memref<16x32xf32, #tpu.memory_space<vmem>>, %arg5: memref<1x32xf32, #tpu.memory_space<vmem>>, %arg6: memref<3x32x96xf32, #tpu.memory_space<vmem>>, %arg7: memref<3x1x96xf32, #tpu.memory_space<vmem>>, %arg8: memref<3x32x32xf32, #tpu.memory_space<vmem>>, %arg9: memref<3x1x32xf32, #tpu.memory_space<vmem>>, %arg10: memref<3x1x32xf32, #tpu.memory_space<vmem>>, %arg11: memref<3x1x32xf32, #tpu.memory_space<vmem>>, %arg12: memref<3x32x32xf32, #tpu.memory_space<vmem>>, %arg13: memref<3x1x32xf32, #tpu.memory_space<vmem>>, %arg14: memref<3x32x32xf32, #tpu.memory_space<vmem>>, %arg15: memref<3x1x32xf32, #tpu.memory_space<vmem>>, %arg16: memref<3x1x32xf32, #tpu.memory_space<vmem>>, %arg17: memref<3x1x32xf32, #tpu.memory_space<vmem>>, %arg18: memref<1x32xf32, #tpu.memory_space<vmem>>, %arg19: memref<32x32xf32, #tpu.memory_space<vmem>>, %arg20: memref<1x32xf32, #tpu.memory_space<vmem>>, %arg21: memref<32x64xf32, #tpu.memory_space<vmem>>, %arg22: memref<1x64xf32, #tpu.memory_space<vmem>>, %arg23: memref<32x32xf32, #tpu.memory_space<vmem>>, %arg24: memref<1x32xf32, #tpu.memory_space<vmem>>, %arg25: memref<6x32xf32, #tpu.memory_space<vmem>>, %arg26: memref<32x32xf32, #tpu.memory_space<vmem>>, %arg27: memref<1x32xf32, #tpu.memory_space<vmem>>, %arg28: memref<1x32xf32, #tpu.memory_space<vmem>>, %arg29: memref<1x32xf32, #tpu.memory_space<vmem>>, %arg30: memref<32x1xf32, #tpu.memory_space<vmem>>, %arg31: memref<1x1xf32, #tpu.memory_space<vmem>>, %arg32: memref<6x1xf32, #tpu.memory_space<vmem>>) attributes {dimension_semantics = [], scalar_prefetch = 0 : i64, scratch_operands = 0 : i64, tpu.core_type = #tpu.core_type<tc>} {
    %c0 = arith.constant 0 : index
    %c0_0 = arith.constant 0 : index
    %0 = vector.load %arg0[%c0, %c0_0] : memref<48x16xf32, #tpu.memory_space<vmem>>, vector<48x16xf32>
    %c0_1 = arith.constant 0 : index
    %c0_2 = arith.constant 0 : index
    %1 = vector.load %arg4[%c0_1, %c0_2] : memref<16x32xf32, #tpu.memory_space<vmem>>, vector<16x32xf32>
    %cst = arith.constant dense<0.000000e+00> : vector<48x32xf32>
    %2 = tpu.matmul %0, %1, %cst {dimension_numbers = #tpu.dot_dimension_numbers<[1], [0], [0], [1], [0, 0, 1, 1], [], []>} : vector<48x16xf32>, vector<16x32xf32>, vector<48x32xf32> -> vector<48x32xf32>
    %c0_3 = arith.constant 0 : index
    %c0_4 = arith.constant 0 : index
    %3 = vector.load %arg5[%c0_3, %c0_4] : memref<1x32xf32, #tpu.memory_space<vmem>>, vector<1x32xf32>
    %4 = vector.broadcast %3 : vector<1x32xf32> to vector<48x32xf32>
    %5 = arith.addf %2, %4 : vector<48x32xf32>
    %c0_5 = arith.constant 0 : index
    %c0_6 = arith.constant 0 : index
    %6 = vector.load %arg1[%c0_5, %c0_6] : memref<48x48xf32, #tpu.memory_space<vmem>>, vector<48x48xf32>
    %c0_7 = arith.constant 0 : index
    %c0_8 = arith.constant 0 : index
    %c0_9 = arith.constant 0 : index
    %7 = vector.load %arg6[%c0_7, %c0_8, %c0_9] : memref<3x32x96xf32, #tpu.memory_space<vmem>>, vector<1x32x96xf32>
    %8 = vector.shape_cast %7 : vector<1x32x96xf32> to vector<32x96xf32>
    %cst_10 = arith.constant dense<0.000000e+00> : vector<48x96xf32>
    %9 = tpu.matmul %5, %8, %cst_10 {dimension_numbers = #tpu.dot_dimension_numbers<[1], [0], [0], [1], [0, 0, 1, 1], [], []>} : vector<48x32xf32>, vector<32x96xf32>, vector<48x96xf32> -> vector<48x96xf32>
    %c0_11 = arith.constant 0 : index
    %c0_12 = arith.constant 0 : index
    %c0_13 = arith.constant 0 : index
    %10 = vector.load %arg7[%c0_11, %c0_12, %c0_13] : memref<3x1x96xf32, #tpu.memory_space<vmem>>, vector<1x1x96xf32>
    %11 = vector.shape_cast %10 : vector<1x1x96xf32> to vector<1x96xf32>
    %12 = vector.broadcast %11 : vector<1x96xf32> to vector<48x96xf32>
    %13 = arith.addf %9, %12 : vector<48x96xf32>
    %c0_14 = arith.constant 0 : index
    %c0_15 = arith.constant 0 : index
    %c0_16 = arith.constant 0 : index
    %14 = vector.load %arg8[%c0_14, %c0_15, %c0_16] : memref<3x32x32xf32, #tpu.memory_space<vmem>>, vector<1x32x32xf32>
    %15 = vector.shape_cast %14 : vector<1x32x32xf32> to vector<32x32xf32>
    %16 = vector.extract_strided_slice %13 {offsets = [0, 0], sizes = [48, 8], strides = [1, 1]} : vector<48x96xf32> to vector<48x8xf32>
    %17 = vector.extract_strided_slice %13 {offsets = [0, 32], sizes = [48, 8], strides = [1, 1]} : vector<48x96xf32> to vector<48x8xf32>
    %18 = vector.extract_strided_slice %13 {offsets = [0, 64], sizes = [48, 8], strides = [1, 1]} : vector<48x96xf32> to vector<48x8xf32>
    %cst_17 = arith.constant dense<0.000000e+00> : vector<48x48xf32>
    %19 = tpu.matmul %16, %17, %cst_17 {dimension_numbers = #tpu.dot_dimension_numbers<[1], [1], [0], [0], [0, 0, 1, 0], [], []>} : vector<48x8xf32>, vector<48x8xf32>, vector<48x48xf32> -> vector<48x48xf32>
    %cst_18 = arith.constant 0.353553385 : f32
    %20 = vector.broadcast %cst_18 : f32 to vector<48x48xf32>
    %21 = arith.mulf %19, %20 : vector<48x48xf32>
    %22 = arith.addf %21, %6 : vector<48x48xf32>
    %cst_19 = arith.constant dense<0xFF800000> : vector<48xf32>
    %23 = vector.multi_reduction <maximumf>, %22, %cst_19 [1] : vector<48x48xf32> to vector<48xf32>
    %24 = vector.shape_cast %23 : vector<48xf32> to vector<48x1xf32>
    %25 = vector.broadcast %24 : vector<48x1xf32> to vector<48x48xf32>
    %26 = arith.subf %22, %25 : vector<48x48xf32>
    %27 = math.exp %26 : vector<48x48xf32>
    %cst_20 = arith.constant dense<0.000000e+00> : vector<48xf32>
    %28 = vector.multi_reduction <add>, %27, %cst_20 [1] : vector<48x48xf32> to vector<48xf32>
    %29 = vector.shape_cast %28 : vector<48xf32> to vector<48x1xf32>
    %30 = tpu.reciprocal %29 {approx = true} : vector<48x1xf32> -> vector<48x1xf32>
    %31 = vector.broadcast %30 : vector<48x1xf32> to vector<48x48xf32>
    %32 = arith.mulf %27, %31 : vector<48x48xf32>
    %cst_21 = arith.constant dense<0.000000e+00> : vector<48x8xf32>
    %33 = tpu.matmul %32, %18, %cst_21 {dimension_numbers = #tpu.dot_dimension_numbers<[1], [0], [0], [1], [0, 0, 1, 1], [], []>} : vector<48x48xf32>, vector<48x8xf32>, vector<48x8xf32> -> vector<48x8xf32>
    %34 = vector.extract_strided_slice %15 {offsets = [0, 0], sizes = [8, 32], strides = [1, 1]} : vector<32x32xf32> to vector<8x32xf32>
    %cst_22 = arith.constant dense<0.000000e+00> : vector<48x32xf32>
    %35 = tpu.matmul %33, %34, %cst_22 {dimension_numbers = #tpu.dot_dimension_numbers<[1], [0], [0], [1], [0, 0, 1, 1], [], []>} : vector<48x8xf32>, vector<8x32xf32>, vector<48x32xf32> -> vector<48x32xf32>
    %36 = vector.extract_strided_slice %13 {offsets = [0, 8], sizes = [48, 8], strides = [1, 1]} : vector<48x96xf32> to vector<48x8xf32>
    %37 = vector.extract_strided_slice %13 {offsets = [0, 40], sizes = [48, 8], strides = [1, 1]} : vector<48x96xf32> to vector<48x8xf32>
    %38 = vector.extract_strided_slice %13 {offsets = [0, 72], sizes = [48, 8], strides = [1, 1]} : vector<48x96xf32> to vector<48x8xf32>
    %cst_23 = arith.constant dense<0.000000e+00> : vector<48x48xf32>
    %39 = tpu.matmul %36, %37, %cst_23 {dimension_numbers = #tpu.dot_dimension_numbers<[1], [1], [0], [0], [0, 0, 1, 0], [], []>} : vector<48x8xf32>, vector<48x8xf32>, vector<48x48xf32> -> vector<48x48xf32>
    %cst_24 = arith.constant 0.353553385 : f32
    %40 = vector.broadcast %cst_24 : f32 to vector<48x48xf32>
    %41 = arith.mulf %39, %40 : vector<48x48xf32>
    %42 = arith.addf %41, %6 : vector<48x48xf32>
    %cst_25 = arith.constant dense<0xFF800000> : vector<48xf32>
    %43 = vector.multi_reduction <maximumf>, %42, %cst_25 [1] : vector<48x48xf32> to vector<48xf32>
    %44 = vector.shape_cast %43 : vector<48xf32> to vector<48x1xf32>
    %45 = vector.broadcast %44 : vector<48x1xf32> to vector<48x48xf32>
    %46 = arith.subf %42, %45 : vector<48x48xf32>
    %47 = math.exp %46 : vector<48x48xf32>
    %cst_26 = arith.constant dense<0.000000e+00> : vector<48xf32>
    %48 = vector.multi_reduction <add>, %47, %cst_26 [1] : vector<48x48xf32> to vector<48xf32>
    %49 = vector.shape_cast %48 : vector<48xf32> to vector<48x1xf32>
    %50 = tpu.reciprocal %49 {approx = true} : vector<48x1xf32> -> vector<48x1xf32>
    %51 = vector.broadcast %50 : vector<48x1xf32> to vector<48x48xf32>
    %52 = arith.mulf %47, %51 : vector<48x48xf32>
    %cst_27 = arith.constant dense<0.000000e+00> : vector<48x8xf32>
    %53 = tpu.matmul %52, %38, %cst_27 {dimension_numbers = #tpu.dot_dimension_numbers<[1], [0], [0], [1], [0, 0, 1, 1], [], []>} : vector<48x48xf32>, vector<48x8xf32>, vector<48x8xf32> -> vector<48x8xf32>
    %54 = vector.extract_strided_slice %15 {offsets = [8, 0], sizes = [8, 32], strides = [1, 1]} : vector<32x32xf32> to vector<8x32xf32>
    %cst_28 = arith.constant dense<0.000000e+00> : vector<48x32xf32>
    %55 = tpu.matmul %53, %54, %cst_28 {dimension_numbers = #tpu.dot_dimension_numbers<[1], [0], [0], [1], [0, 0, 1, 1], [], []>} : vector<48x8xf32>, vector<8x32xf32>, vector<48x32xf32> -> vector<48x32xf32>
    %56 = arith.addf %35, %55 : vector<48x32xf32>
    %57 = vector.extract_strided_slice %13 {offsets = [0, 16], sizes = [48, 8], strides = [1, 1]} : vector<48x96xf32> to vector<48x8xf32>
    %58 = vector.extract_strided_slice %13 {offsets = [0, 48], sizes = [48, 8], strides = [1, 1]} : vector<48x96xf32> to vector<48x8xf32>
    %59 = vector.extract_strided_slice %13 {offsets = [0, 80], sizes = [48, 8], strides = [1, 1]} : vector<48x96xf32> to vector<48x8xf32>
    %cst_29 = arith.constant dense<0.000000e+00> : vector<48x48xf32>
    %60 = tpu.matmul %57, %58, %cst_29 {dimension_numbers = #tpu.dot_dimension_numbers<[1], [1], [0], [0], [0, 0, 1, 0], [], []>} : vector<48x8xf32>, vector<48x8xf32>, vector<48x48xf32> -> vector<48x48xf32>
    %cst_30 = arith.constant 0.353553385 : f32
    %61 = vector.broadcast %cst_30 : f32 to vector<48x48xf32>
    %62 = arith.mulf %60, %61 : vector<48x48xf32>
    %63 = arith.addf %62, %6 : vector<48x48xf32>
    %cst_31 = arith.constant dense<0xFF800000> : vector<48xf32>
    %64 = vector.multi_reduction <maximumf>, %63, %cst_31 [1] : vector<48x48xf32> to vector<48xf32>
    %65 = vector.shape_cast %64 : vector<48xf32> to vector<48x1xf32>
    %66 = vector.broadcast %65 : vector<48x1xf32> to vector<48x48xf32>
    %67 = arith.subf %63, %66 : vector<48x48xf32>
    %68 = math.exp %67 : vector<48x48xf32>
    %cst_32 = arith.constant dense<0.000000e+00> : vector<48xf32>
    %69 = vector.multi_reduction <add>, %68, %cst_32 [1] : vector<48x48xf32> to vector<48xf32>
    %70 = vector.shape_cast %69 : vector<48xf32> to vector<48x1xf32>
    %71 = tpu.reciprocal %70 {approx = true} : vector<48x1xf32> -> vector<48x1xf32>
    %72 = vector.broadcast %71 : vector<48x1xf32> to vector<48x48xf32>
    %73 = arith.mulf %68, %72 : vector<48x48xf32>
    %cst_33 = arith.constant dense<0.000000e+00> : vector<48x8xf32>
    %74 = tpu.matmul %73, %59, %cst_33 {dimension_numbers = #tpu.dot_dimension_numbers<[1], [0], [0], [1], [0, 0, 1, 1], [], []>} : vector<48x48xf32>, vector<48x8xf32>, vector<48x8xf32> -> vector<48x8xf32>
    %75 = vector.extract_strided_slice %15 {offsets = [16, 0], sizes = [8, 32], strides = [1, 1]} : vector<32x32xf32> to vector<8x32xf32>
    %cst_34 = arith.constant dense<0.000000e+00> : vector<48x32xf32>
    %76 = tpu.matmul %74, %75, %cst_34 {dimension_numbers = #tpu.dot_dimension_numbers<[1], [0], [0], [1], [0, 0, 1, 1], [], []>} : vector<48x8xf32>, vector<8x32xf32>, vector<48x32xf32> -> vector<48x32xf32>
    %77 = arith.addf %56, %76 : vector<48x32xf32>
    %78 = vector.extract_strided_slice %13 {offsets = [0, 24], sizes = [48, 8], strides = [1, 1]} : vector<48x96xf32> to vector<48x8xf32>
    %79 = vector.extract_strided_slice %13 {offsets = [0, 56], sizes = [48, 8], strides = [1, 1]} : vector<48x96xf32> to vector<48x8xf32>
    %80 = vector.extract_strided_slice %13 {offsets = [0, 88], sizes = [48, 8], strides = [1, 1]} : vector<48x96xf32> to vector<48x8xf32>
    %cst_35 = arith.constant dense<0.000000e+00> : vector<48x48xf32>
    %81 = tpu.matmul %78, %79, %cst_35 {dimension_numbers = #tpu.dot_dimension_numbers<[1], [1], [0], [0], [0, 0, 1, 0], [], []>} : vector<48x8xf32>, vector<48x8xf32>, vector<48x48xf32> -> vector<48x48xf32>
    %cst_36 = arith.constant 0.353553385 : f32
    %82 = vector.broadcast %cst_36 : f32 to vector<48x48xf32>
    %83 = arith.mulf %81, %82 : vector<48x48xf32>
    %84 = arith.addf %83, %6 : vector<48x48xf32>
    %cst_37 = arith.constant dense<0xFF800000> : vector<48xf32>
    %85 = vector.multi_reduction <maximumf>, %84, %cst_37 [1] : vector<48x48xf32> to vector<48xf32>
    %86 = vector.shape_cast %85 : vector<48xf32> to vector<48x1xf32>
    %87 = vector.broadcast %86 : vector<48x1xf32> to vector<48x48xf32>
    %88 = arith.subf %84, %87 : vector<48x48xf32>
    %89 = math.exp %88 : vector<48x48xf32>
    %cst_38 = arith.constant dense<0.000000e+00> : vector<48xf32>
    %90 = vector.multi_reduction <add>, %89, %cst_38 [1] : vector<48x48xf32> to vector<48xf32>
    %91 = vector.shape_cast %90 : vector<48xf32> to vector<48x1xf32>
    %92 = tpu.reciprocal %91 {approx = true} : vector<48x1xf32> -> vector<48x1xf32>
    %93 = vector.broadcast %92 : vector<48x1xf32> to vector<48x48xf32>
    %94 = arith.mulf %89, %93 : vector<48x48xf32>
    %cst_39 = arith.constant dense<0.000000e+00> : vector<48x8xf32>
    %95 = tpu.matmul %94, %80, %cst_39 {dimension_numbers = #tpu.dot_dimension_numbers<[1], [0], [0], [1], [0, 0, 1, 1], [], []>} : vector<48x48xf32>, vector<48x8xf32>, vector<48x8xf32> -> vector<48x8xf32>
    %96 = vector.extract_strided_slice %15 {offsets = [24, 0], sizes = [8, 32], strides = [1, 1]} : vector<32x32xf32> to vector<8x32xf32>
    %cst_40 = arith.constant dense<0.000000e+00> : vector<48x32xf32>
    %97 = tpu.matmul %95, %96, %cst_40 {dimension_numbers = #tpu.dot_dimension_numbers<[1], [0], [0], [1], [0, 0, 1, 1], [], []>} : vector<48x8xf32>, vector<8x32xf32>, vector<48x32xf32> -> vector<48x32xf32>
    %98 = arith.addf %77, %97 : vector<48x32xf32>
    %c0_41 = arith.constant 0 : index
    %c0_42 = arith.constant 0 : index
    %c0_43 = arith.constant 0 : index
    %99 = vector.load %arg9[%c0_41, %c0_42, %c0_43] : memref<3x1x32xf32, #tpu.memory_space<vmem>>, vector<1x1x32xf32>
    %100 = vector.shape_cast %99 : vector<1x1x32xf32> to vector<1x32xf32>
    %101 = vector.broadcast %100 : vector<1x32xf32> to vector<48x32xf32>
    %102 = arith.addf %98, %101 : vector<48x32xf32>
    %103 = arith.addf %5, %102 : vector<48x32xf32>
    %c0_44 = arith.constant 0 : index
    %c0_45 = arith.constant 0 : index
    %c0_46 = arith.constant 0 : index
    %104 = vector.load %arg10[%c0_44, %c0_45, %c0_46] : memref<3x1x32xf32, #tpu.memory_space<vmem>>, vector<1x1x32xf32>
    %105 = vector.shape_cast %104 : vector<1x1x32xf32> to vector<1x32xf32>
    %c0_47 = arith.constant 0 : index
    %c0_48 = arith.constant 0 : index
    %c0_49 = arith.constant 0 : index
    %106 = vector.load %arg11[%c0_47, %c0_48, %c0_49] : memref<3x1x32xf32, #tpu.memory_space<vmem>>, vector<1x1x32xf32>
    %107 = vector.shape_cast %106 : vector<1x1x32xf32> to vector<1x32xf32>
    %cst_50 = arith.constant dense<0.000000e+00> : vector<48xf32>
    %108 = vector.multi_reduction <add>, %103, %cst_50 [1] : vector<48x32xf32> to vector<48xf32>
    %109 = vector.shape_cast %108 : vector<48xf32> to vector<48x1xf32>
    %cst_51 = arith.constant 3.200000e+01 : f32
    %110 = vector.broadcast %cst_51 : f32 to vector<48x1xf32>
    %111 = arith.divf %109, %110 : vector<48x1xf32>
    %112 = vector.broadcast %111 : vector<48x1xf32> to vector<48x32xf32>
    %113 = arith.subf %103, %112 : vector<48x32xf32>
    %114 = arith.mulf %113, %113 : vector<48x32xf32>
    %cst_52 = arith.constant dense<0.000000e+00> : vector<48xf32>
    %115 = vector.multi_reduction <add>, %114, %cst_52 [1] : vector<48x32xf32> to vector<48xf32>
    %116 = vector.shape_cast %115 : vector<48xf32> to vector<48x1xf32>
    %cst_53 = arith.constant 3.200000e+01 : f32
    %117 = vector.broadcast %cst_53 : f32 to vector<48x1xf32>
    %118 = arith.divf %116, %117 : vector<48x1xf32>
    %119 = vector.broadcast %111 : vector<48x1xf32> to vector<48x32xf32>
    %120 = arith.subf %103, %119 : vector<48x32xf32>
    %cst_54 = arith.constant 9.99999974E-6 : f32
    %121 = vector.broadcast %cst_54 : f32 to vector<48x1xf32>
    %122 = arith.addf %118, %121 : vector<48x1xf32>
    %123 = math.rsqrt %122 : vector<48x1xf32>
    %124 = vector.broadcast %123 : vector<48x1xf32> to vector<48x32xf32>
    %125 = arith.mulf %120, %124 : vector<48x32xf32>
    %126 = vector.broadcast %105 : vector<1x32xf32> to vector<48x32xf32>
    %127 = arith.mulf %125, %126 : vector<48x32xf32>
    %128 = vector.broadcast %107 : vector<1x32xf32> to vector<48x32xf32>
    %129 = arith.addf %127, %128 : vector<48x32xf32>
    %c0_55 = arith.constant 0 : index
    %c0_56 = arith.constant 0 : index
    %c0_57 = arith.constant 0 : index
    %130 = vector.load %arg12[%c0_55, %c0_56, %c0_57] : memref<3x32x32xf32, #tpu.memory_space<vmem>>, vector<1x32x32xf32>
    %131 = vector.shape_cast %130 : vector<1x32x32xf32> to vector<32x32xf32>
    %cst_58 = arith.constant dense<0.000000e+00> : vector<48x32xf32>
    %132 = tpu.matmul %129, %131, %cst_58 {dimension_numbers = #tpu.dot_dimension_numbers<[1], [0], [0], [1], [0, 0, 1, 1], [], []>} : vector<48x32xf32>, vector<32x32xf32>, vector<48x32xf32> -> vector<48x32xf32>
    %c0_59 = arith.constant 0 : index
    %c0_60 = arith.constant 0 : index
    %c0_61 = arith.constant 0 : index
    %133 = vector.load %arg13[%c0_59, %c0_60, %c0_61] : memref<3x1x32xf32, #tpu.memory_space<vmem>>, vector<1x1x32xf32>
    %134 = vector.shape_cast %133 : vector<1x1x32xf32> to vector<1x32xf32>
    %135 = vector.broadcast %134 : vector<1x32xf32> to vector<48x32xf32>
    %136 = arith.addf %132, %135 : vector<48x32xf32>
    %cst_62 = arith.constant 0.000000e+00 : f32
    %137 = vector.broadcast %cst_62 : f32 to vector<48x32xf32>
    %138 = arith.maximumf %136, %137 : vector<48x32xf32>
    %c0_63 = arith.constant 0 : index
    %c0_64 = arith.constant 0 : index
    %c0_65 = arith.constant 0 : index
    %139 = vector.load %arg14[%c0_63, %c0_64, %c0_65] : memref<3x32x32xf32, #tpu.memory_space<vmem>>, vector<1x32x32xf32>
    %140 = vector.shape_cast %139 : vector<1x32x32xf32> to vector<32x32xf32>
    %cst_66 = arith.constant dense<0.000000e+00> : vector<48x32xf32>
    %141 = tpu.matmul %138, %140, %cst_66 {dimension_numbers = #tpu.dot_dimension_numbers<[1], [0], [0], [1], [0, 0, 1, 1], [], []>} : vector<48x32xf32>, vector<32x32xf32>, vector<48x32xf32> -> vector<48x32xf32>
    %c0_67 = arith.constant 0 : index
    %c0_68 = arith.constant 0 : index
    %c0_69 = arith.constant 0 : index
    %142 = vector.load %arg15[%c0_67, %c0_68, %c0_69] : memref<3x1x32xf32, #tpu.memory_space<vmem>>, vector<1x1x32xf32>
    %143 = vector.shape_cast %142 : vector<1x1x32xf32> to vector<1x32xf32>
    %144 = vector.broadcast %143 : vector<1x32xf32> to vector<48x32xf32>
    %145 = arith.addf %141, %144 : vector<48x32xf32>
    %146 = arith.addf %129, %145 : vector<48x32xf32>
    %c0_70 = arith.constant 0 : index
    %c0_71 = arith.constant 0 : index
    %c0_72 = arith.constant 0 : index
    %147 = vector.load %arg16[%c0_70, %c0_71, %c0_72] : memref<3x1x32xf32, #tpu.memory_space<vmem>>, vector<1x1x32xf32>
    %148 = vector.shape_cast %147 : vector<1x1x32xf32> to vector<1x32xf32>
    %c0_73 = arith.constant 0 : index
    %c0_74 = arith.constant 0 : index
    %c0_75 = arith.constant 0 : index
    %149 = vector.load %arg17[%c0_73, %c0_74, %c0_75] : memref<3x1x32xf32, #tpu.memory_space<vmem>>, vector<1x1x32xf32>
    %150 = vector.shape_cast %149 : vector<1x1x32xf32> to vector<1x32xf32>
    %cst_76 = arith.constant dense<0.000000e+00> : vector<48xf32>
    %151 = vector.multi_reduction <add>, %146, %cst_76 [1] : vector<48x32xf32> to vector<48xf32>
    %152 = vector.shape_cast %151 : vector<48xf32> to vector<48x1xf32>
    %cst_77 = arith.constant 3.200000e+01 : f32
    %153 = vector.broadcast %cst_77 : f32 to vector<48x1xf32>
    %154 = arith.divf %152, %153 : vector<48x1xf32>
    %155 = vector.broadcast %154 : vector<48x1xf32> to vector<48x32xf32>
    %156 = arith.subf %146, %155 : vector<48x32xf32>
    %157 = arith.mulf %156, %156 : vector<48x32xf32>
    %cst_78 = arith.constant dense<0.000000e+00> : vector<48xf32>
    %158 = vector.multi_reduction <add>, %157, %cst_78 [1] : vector<48x32xf32> to vector<48xf32>
    %159 = vector.shape_cast %158 : vector<48xf32> to vector<48x1xf32>
    %cst_79 = arith.constant 3.200000e+01 : f32
    %160 = vector.broadcast %cst_79 : f32 to vector<48x1xf32>
    %161 = arith.divf %159, %160 : vector<48x1xf32>
    %162 = vector.broadcast %154 : vector<48x1xf32> to vector<48x32xf32>
    %163 = arith.subf %146, %162 : vector<48x32xf32>
    %cst_80 = arith.constant 9.99999974E-6 : f32
    %164 = vector.broadcast %cst_80 : f32 to vector<48x1xf32>
    %165 = arith.addf %161, %164 : vector<48x1xf32>
    %166 = math.rsqrt %165 : vector<48x1xf32>
    %167 = vector.broadcast %166 : vector<48x1xf32> to vector<48x32xf32>
    %168 = arith.mulf %163, %167 : vector<48x32xf32>
    %169 = vector.broadcast %148 : vector<1x32xf32> to vector<48x32xf32>
    %170 = arith.mulf %168, %169 : vector<48x32xf32>
    %171 = vector.broadcast %150 : vector<1x32xf32> to vector<48x32xf32>
    %172 = arith.addf %170, %171 : vector<48x32xf32>
    %c1 = arith.constant 1 : index
    %c0_81 = arith.constant 0 : index
    %c0_82 = arith.constant 0 : index
    %173 = vector.load %arg6[%c1, %c0_81, %c0_82] : memref<3x32x96xf32, #tpu.memory_space<vmem>>, vector<1x32x96xf32>
    %174 = vector.shape_cast %173 : vector<1x32x96xf32> to vector<32x96xf32>
    %cst_83 = arith.constant dense<0.000000e+00> : vector<48x96xf32>
    %175 = tpu.matmul %172, %174, %cst_83 {dimension_numbers = #tpu.dot_dimension_numbers<[1], [0], [0], [1], [0, 0, 1, 1], [], []>} : vector<48x32xf32>, vector<32x96xf32>, vector<48x96xf32> -> vector<48x96xf32>
    %c1_84 = arith.constant 1 : index
    %c0_85 = arith.constant 0 : index
    %c0_86 = arith.constant 0 : index
    %176 = vector.load %arg7[%c1_84, %c0_85, %c0_86] : memref<3x1x96xf32, #tpu.memory_space<vmem>>, vector<1x1x96xf32>
    %177 = vector.shape_cast %176 : vector<1x1x96xf32> to vector<1x96xf32>
    %178 = vector.broadcast %177 : vector<1x96xf32> to vector<48x96xf32>
    %179 = arith.addf %175, %178 : vector<48x96xf32>
    %c1_87 = arith.constant 1 : index
    %c0_88 = arith.constant 0 : index
    %c0_89 = arith.constant 0 : index
    %180 = vector.load %arg8[%c1_87, %c0_88, %c0_89] : memref<3x32x32xf32, #tpu.memory_space<vmem>>, vector<1x32x32xf32>
    %181 = vector.shape_cast %180 : vector<1x32x32xf32> to vector<32x32xf32>
    %182 = vector.extract_strided_slice %179 {offsets = [0, 0], sizes = [48, 8], strides = [1, 1]} : vector<48x96xf32> to vector<48x8xf32>
    %183 = vector.extract_strided_slice %179 {offsets = [0, 32], sizes = [48, 8], strides = [1, 1]} : vector<48x96xf32> to vector<48x8xf32>
    %184 = vector.extract_strided_slice %179 {offsets = [0, 64], sizes = [48, 8], strides = [1, 1]} : vector<48x96xf32> to vector<48x8xf32>
    %cst_90 = arith.constant dense<0.000000e+00> : vector<48x48xf32>
    %185 = tpu.matmul %182, %183, %cst_90 {dimension_numbers = #tpu.dot_dimension_numbers<[1], [1], [0], [0], [0, 0, 1, 0], [], []>} : vector<48x8xf32>, vector<48x8xf32>, vector<48x48xf32> -> vector<48x48xf32>
    %cst_91 = arith.constant 0.353553385 : f32
    %186 = vector.broadcast %cst_91 : f32 to vector<48x48xf32>
    %187 = arith.mulf %185, %186 : vector<48x48xf32>
    %188 = arith.addf %187, %6 : vector<48x48xf32>
    %cst_92 = arith.constant dense<0xFF800000> : vector<48xf32>
    %189 = vector.multi_reduction <maximumf>, %188, %cst_92 [1] : vector<48x48xf32> to vector<48xf32>
    %190 = vector.shape_cast %189 : vector<48xf32> to vector<48x1xf32>
    %191 = vector.broadcast %190 : vector<48x1xf32> to vector<48x48xf32>
    %192 = arith.subf %188, %191 : vector<48x48xf32>
    %193 = math.exp %192 : vector<48x48xf32>
    %cst_93 = arith.constant dense<0.000000e+00> : vector<48xf32>
    %194 = vector.multi_reduction <add>, %193, %cst_93 [1] : vector<48x48xf32> to vector<48xf32>
    %195 = vector.shape_cast %194 : vector<48xf32> to vector<48x1xf32>
    %196 = tpu.reciprocal %195 {approx = true} : vector<48x1xf32> -> vector<48x1xf32>
    %197 = vector.broadcast %196 : vector<48x1xf32> to vector<48x48xf32>
    %198 = arith.mulf %193, %197 : vector<48x48xf32>
    %cst_94 = arith.constant dense<0.000000e+00> : vector<48x8xf32>
    %199 = tpu.matmul %198, %184, %cst_94 {dimension_numbers = #tpu.dot_dimension_numbers<[1], [0], [0], [1], [0, 0, 1, 1], [], []>} : vector<48x48xf32>, vector<48x8xf32>, vector<48x8xf32> -> vector<48x8xf32>
    %200 = vector.extract_strided_slice %181 {offsets = [0, 0], sizes = [8, 32], strides = [1, 1]} : vector<32x32xf32> to vector<8x32xf32>
    %cst_95 = arith.constant dense<0.000000e+00> : vector<48x32xf32>
    %201 = tpu.matmul %199, %200, %cst_95 {dimension_numbers = #tpu.dot_dimension_numbers<[1], [0], [0], [1], [0, 0, 1, 1], [], []>} : vector<48x8xf32>, vector<8x32xf32>, vector<48x32xf32> -> vector<48x32xf32>
    %202 = vector.extract_strided_slice %179 {offsets = [0, 8], sizes = [48, 8], strides = [1, 1]} : vector<48x96xf32> to vector<48x8xf32>
    %203 = vector.extract_strided_slice %179 {offsets = [0, 40], sizes = [48, 8], strides = [1, 1]} : vector<48x96xf32> to vector<48x8xf32>
    %204 = vector.extract_strided_slice %179 {offsets = [0, 72], sizes = [48, 8], strides = [1, 1]} : vector<48x96xf32> to vector<48x8xf32>
    %cst_96 = arith.constant dense<0.000000e+00> : vector<48x48xf32>
    %205 = tpu.matmul %202, %203, %cst_96 {dimension_numbers = #tpu.dot_dimension_numbers<[1], [1], [0], [0], [0, 0, 1, 0], [], []>} : vector<48x8xf32>, vector<48x8xf32>, vector<48x48xf32> -> vector<48x48xf32>
    %cst_97 = arith.constant 0.353553385 : f32
    %206 = vector.broadcast %cst_97 : f32 to vector<48x48xf32>
    %207 = arith.mulf %205, %206 : vector<48x48xf32>
    %208 = arith.addf %207, %6 : vector<48x48xf32>
    %cst_98 = arith.constant dense<0xFF800000> : vector<48xf32>
    %209 = vector.multi_reduction <maximumf>, %208, %cst_98 [1] : vector<48x48xf32> to vector<48xf32>
    %210 = vector.shape_cast %209 : vector<48xf32> to vector<48x1xf32>
    %211 = vector.broadcast %210 : vector<48x1xf32> to vector<48x48xf32>
    %212 = arith.subf %208, %211 : vector<48x48xf32>
    %213 = math.exp %212 : vector<48x48xf32>
    %cst_99 = arith.constant dense<0.000000e+00> : vector<48xf32>
    %214 = vector.multi_reduction <add>, %213, %cst_99 [1] : vector<48x48xf32> to vector<48xf32>
    %215 = vector.shape_cast %214 : vector<48xf32> to vector<48x1xf32>
    %216 = tpu.reciprocal %215 {approx = true} : vector<48x1xf32> -> vector<48x1xf32>
    %217 = vector.broadcast %216 : vector<48x1xf32> to vector<48x48xf32>
    %218 = arith.mulf %213, %217 : vector<48x48xf32>
    %cst_100 = arith.constant dense<0.000000e+00> : vector<48x8xf32>
    %219 = tpu.matmul %218, %204, %cst_100 {dimension_numbers = #tpu.dot_dimension_numbers<[1], [0], [0], [1], [0, 0, 1, 1], [], []>} : vector<48x48xf32>, vector<48x8xf32>, vector<48x8xf32> -> vector<48x8xf32>
    %220 = vector.extract_strided_slice %181 {offsets = [8, 0], sizes = [8, 32], strides = [1, 1]} : vector<32x32xf32> to vector<8x32xf32>
    %cst_101 = arith.constant dense<0.000000e+00> : vector<48x32xf32>
    %221 = tpu.matmul %219, %220, %cst_101 {dimension_numbers = #tpu.dot_dimension_numbers<[1], [0], [0], [1], [0, 0, 1, 1], [], []>} : vector<48x8xf32>, vector<8x32xf32>, vector<48x32xf32> -> vector<48x32xf32>
    %222 = arith.addf %201, %221 : vector<48x32xf32>
    %223 = vector.extract_strided_slice %179 {offsets = [0, 16], sizes = [48, 8], strides = [1, 1]} : vector<48x96xf32> to vector<48x8xf32>
    %224 = vector.extract_strided_slice %179 {offsets = [0, 48], sizes = [48, 8], strides = [1, 1]} : vector<48x96xf32> to vector<48x8xf32>
    %225 = vector.extract_strided_slice %179 {offsets = [0, 80], sizes = [48, 8], strides = [1, 1]} : vector<48x96xf32> to vector<48x8xf32>
    %cst_102 = arith.constant dense<0.000000e+00> : vector<48x48xf32>
    %226 = tpu.matmul %223, %224, %cst_102 {dimension_numbers = #tpu.dot_dimension_numbers<[1], [1], [0], [0], [0, 0, 1, 0], [], []>} : vector<48x8xf32>, vector<48x8xf32>, vector<48x48xf32> -> vector<48x48xf32>
    %cst_103 = arith.constant 0.353553385 : f32
    %227 = vector.broadcast %cst_103 : f32 to vector<48x48xf32>
    %228 = arith.mulf %226, %227 : vector<48x48xf32>
    %229 = arith.addf %228, %6 : vector<48x48xf32>
    %cst_104 = arith.constant dense<0xFF800000> : vector<48xf32>
    %230 = vector.multi_reduction <maximumf>, %229, %cst_104 [1] : vector<48x48xf32> to vector<48xf32>
    %231 = vector.shape_cast %230 : vector<48xf32> to vector<48x1xf32>
    %232 = vector.broadcast %231 : vector<48x1xf32> to vector<48x48xf32>
    %233 = arith.subf %229, %232 : vector<48x48xf32>
    %234 = math.exp %233 : vector<48x48xf32>
    %cst_105 = arith.constant dense<0.000000e+00> : vector<48xf32>
    %235 = vector.multi_reduction <add>, %234, %cst_105 [1] : vector<48x48xf32> to vector<48xf32>
    %236 = vector.shape_cast %235 : vector<48xf32> to vector<48x1xf32>
    %237 = tpu.reciprocal %236 {approx = true} : vector<48x1xf32> -> vector<48x1xf32>
    %238 = vector.broadcast %237 : vector<48x1xf32> to vector<48x48xf32>
    %239 = arith.mulf %234, %238 : vector<48x48xf32>
    %cst_106 = arith.constant dense<0.000000e+00> : vector<48x8xf32>
    %240 = tpu.matmul %239, %225, %cst_106 {dimension_numbers = #tpu.dot_dimension_numbers<[1], [0], [0], [1], [0, 0, 1, 1], [], []>} : vector<48x48xf32>, vector<48x8xf32>, vector<48x8xf32> -> vector<48x8xf32>
    %241 = vector.extract_strided_slice %181 {offsets = [16, 0], sizes = [8, 32], strides = [1, 1]} : vector<32x32xf32> to vector<8x32xf32>
    %cst_107 = arith.constant dense<0.000000e+00> : vector<48x32xf32>
    %242 = tpu.matmul %240, %241, %cst_107 {dimension_numbers = #tpu.dot_dimension_numbers<[1], [0], [0], [1], [0, 0, 1, 1], [], []>} : vector<48x8xf32>, vector<8x32xf32>, vector<48x32xf32> -> vector<48x32xf32>
    %243 = arith.addf %222, %242 : vector<48x32xf32>
    %244 = vector.extract_strided_slice %179 {offsets = [0, 24], sizes = [48, 8], strides = [1, 1]} : vector<48x96xf32> to vector<48x8xf32>
    %245 = vector.extract_strided_slice %179 {offsets = [0, 56], sizes = [48, 8], strides = [1, 1]} : vector<48x96xf32> to vector<48x8xf32>
    %246 = vector.extract_strided_slice %179 {offsets = [0, 88], sizes = [48, 8], strides = [1, 1]} : vector<48x96xf32> to vector<48x8xf32>
    %cst_108 = arith.constant dense<0.000000e+00> : vector<48x48xf32>
    %247 = tpu.matmul %244, %245, %cst_108 {dimension_numbers = #tpu.dot_dimension_numbers<[1], [1], [0], [0], [0, 0, 1, 0], [], []>} : vector<48x8xf32>, vector<48x8xf32>, vector<48x48xf32> -> vector<48x48xf32>
    %cst_109 = arith.constant 0.353553385 : f32
    %248 = vector.broadcast %cst_109 : f32 to vector<48x48xf32>
    %249 = arith.mulf %247, %248 : vector<48x48xf32>
    %250 = arith.addf %249, %6 : vector<48x48xf32>
    %cst_110 = arith.constant dense<0xFF800000> : vector<48xf32>
    %251 = vector.multi_reduction <maximumf>, %250, %cst_110 [1] : vector<48x48xf32> to vector<48xf32>
    %252 = vector.shape_cast %251 : vector<48xf32> to vector<48x1xf32>
    %253 = vector.broadcast %252 : vector<48x1xf32> to vector<48x48xf32>
    %254 = arith.subf %250, %253 : vector<48x48xf32>
    %255 = math.exp %254 : vector<48x48xf32>
    %cst_111 = arith.constant dense<0.000000e+00> : vector<48xf32>
    %256 = vector.multi_reduction <add>, %255, %cst_111 [1] : vector<48x48xf32> to vector<48xf32>
    %257 = vector.shape_cast %256 : vector<48xf32> to vector<48x1xf32>
    %258 = tpu.reciprocal %257 {approx = true} : vector<48x1xf32> -> vector<48x1xf32>
    %259 = vector.broadcast %258 : vector<48x1xf32> to vector<48x48xf32>
    %260 = arith.mulf %255, %259 : vector<48x48xf32>
    %cst_112 = arith.constant dense<0.000000e+00> : vector<48x8xf32>
    %261 = tpu.matmul %260, %246, %cst_112 {dimension_numbers = #tpu.dot_dimension_numbers<[1], [0], [0], [1], [0, 0, 1, 1], [], []>} : vector<48x48xf32>, vector<48x8xf32>, vector<48x8xf32> -> vector<48x8xf32>
    %262 = vector.extract_strided_slice %181 {offsets = [24, 0], sizes = [8, 32], strides = [1, 1]} : vector<32x32xf32> to vector<8x32xf32>
    %cst_113 = arith.constant dense<0.000000e+00> : vector<48x32xf32>
    %263 = tpu.matmul %261, %262, %cst_113 {dimension_numbers = #tpu.dot_dimension_numbers<[1], [0], [0], [1], [0, 0, 1, 1], [], []>} : vector<48x8xf32>, vector<8x32xf32>, vector<48x32xf32> -> vector<48x32xf32>
    %264 = arith.addf %243, %263 : vector<48x32xf32>
    %c1_114 = arith.constant 1 : index
    %c0_115 = arith.constant 0 : index
    %c0_116 = arith.constant 0 : index
    %265 = vector.load %arg9[%c1_114, %c0_115, %c0_116] : memref<3x1x32xf32, #tpu.memory_space<vmem>>, vector<1x1x32xf32>
    %266 = vector.shape_cast %265 : vector<1x1x32xf32> to vector<1x32xf32>
    %267 = vector.broadcast %266 : vector<1x32xf32> to vector<48x32xf32>
    %268 = arith.addf %264, %267 : vector<48x32xf32>
    %269 = arith.addf %172, %268 : vector<48x32xf32>
    %c1_117 = arith.constant 1 : index
    %c0_118 = arith.constant 0 : index
    %c0_119 = arith.constant 0 : index
    %270 = vector.load %arg10[%c1_117, %c0_118, %c0_119] : memref<3x1x32xf32, #tpu.memory_space<vmem>>, vector<1x1x32xf32>
    %271 = vector.shape_cast %270 : vector<1x1x32xf32> to vector<1x32xf32>
    %c1_120 = arith.constant 1 : index
    %c0_121 = arith.constant 0 : index
    %c0_122 = arith.constant 0 : index
    %272 = vector.load %arg11[%c1_120, %c0_121, %c0_122] : memref<3x1x32xf32, #tpu.memory_space<vmem>>, vector<1x1x32xf32>
    %273 = vector.shape_cast %272 : vector<1x1x32xf32> to vector<1x32xf32>
    %cst_123 = arith.constant dense<0.000000e+00> : vector<48xf32>
    %274 = vector.multi_reduction <add>, %269, %cst_123 [1] : vector<48x32xf32> to vector<48xf32>
    %275 = vector.shape_cast %274 : vector<48xf32> to vector<48x1xf32>
    %cst_124 = arith.constant 3.200000e+01 : f32
    %276 = vector.broadcast %cst_124 : f32 to vector<48x1xf32>
    %277 = arith.divf %275, %276 : vector<48x1xf32>
    %278 = vector.broadcast %277 : vector<48x1xf32> to vector<48x32xf32>
    %279 = arith.subf %269, %278 : vector<48x32xf32>
    %280 = arith.mulf %279, %279 : vector<48x32xf32>
    %cst_125 = arith.constant dense<0.000000e+00> : vector<48xf32>
    %281 = vector.multi_reduction <add>, %280, %cst_125 [1] : vector<48x32xf32> to vector<48xf32>
    %282 = vector.shape_cast %281 : vector<48xf32> to vector<48x1xf32>
    %cst_126 = arith.constant 3.200000e+01 : f32
    %283 = vector.broadcast %cst_126 : f32 to vector<48x1xf32>
    %284 = arith.divf %282, %283 : vector<48x1xf32>
    %285 = vector.broadcast %277 : vector<48x1xf32> to vector<48x32xf32>
    %286 = arith.subf %269, %285 : vector<48x32xf32>
    %cst_127 = arith.constant 9.99999974E-6 : f32
    %287 = vector.broadcast %cst_127 : f32 to vector<48x1xf32>
    %288 = arith.addf %284, %287 : vector<48x1xf32>
    %289 = math.rsqrt %288 : vector<48x1xf32>
    %290 = vector.broadcast %289 : vector<48x1xf32> to vector<48x32xf32>
    %291 = arith.mulf %286, %290 : vector<48x32xf32>
    %292 = vector.broadcast %271 : vector<1x32xf32> to vector<48x32xf32>
    %293 = arith.mulf %291, %292 : vector<48x32xf32>
    %294 = vector.broadcast %273 : vector<1x32xf32> to vector<48x32xf32>
    %295 = arith.addf %293, %294 : vector<48x32xf32>
    %c1_128 = arith.constant 1 : index
    %c0_129 = arith.constant 0 : index
    %c0_130 = arith.constant 0 : index
    %296 = vector.load %arg12[%c1_128, %c0_129, %c0_130] : memref<3x32x32xf32, #tpu.memory_space<vmem>>, vector<1x32x32xf32>
    %297 = vector.shape_cast %296 : vector<1x32x32xf32> to vector<32x32xf32>
    %cst_131 = arith.constant dense<0.000000e+00> : vector<48x32xf32>
    %298 = tpu.matmul %295, %297, %cst_131 {dimension_numbers = #tpu.dot_dimension_numbers<[1], [0], [0], [1], [0, 0, 1, 1], [], []>} : vector<48x32xf32>, vector<32x32xf32>, vector<48x32xf32> -> vector<48x32xf32>
    %c1_132 = arith.constant 1 : index
    %c0_133 = arith.constant 0 : index
    %c0_134 = arith.constant 0 : index
    %299 = vector.load %arg13[%c1_132, %c0_133, %c0_134] : memref<3x1x32xf32, #tpu.memory_space<vmem>>, vector<1x1x32xf32>
    %300 = vector.shape_cast %299 : vector<1x1x32xf32> to vector<1x32xf32>
    %301 = vector.broadcast %300 : vector<1x32xf32> to vector<48x32xf32>
    %302 = arith.addf %298, %301 : vector<48x32xf32>
    %cst_135 = arith.constant 0.000000e+00 : f32
    %303 = vector.broadcast %cst_135 : f32 to vector<48x32xf32>
    %304 = arith.maximumf %302, %303 : vector<48x32xf32>
    %c1_136 = arith.constant 1 : index
    %c0_137 = arith.constant 0 : index
    %c0_138 = arith.constant 0 : index
    %305 = vector.load %arg14[%c1_136, %c0_137, %c0_138] : memref<3x32x32xf32, #tpu.memory_space<vmem>>, vector<1x32x32xf32>
    %306 = vector.shape_cast %305 : vector<1x32x32xf32> to vector<32x32xf32>
    %cst_139 = arith.constant dense<0.000000e+00> : vector<48x32xf32>
    %307 = tpu.matmul %304, %306, %cst_139 {dimension_numbers = #tpu.dot_dimension_numbers<[1], [0], [0], [1], [0, 0, 1, 1], [], []>} : vector<48x32xf32>, vector<32x32xf32>, vector<48x32xf32> -> vector<48x32xf32>
    %c1_140 = arith.constant 1 : index
    %c0_141 = arith.constant 0 : index
    %c0_142 = arith.constant 0 : index
    %308 = vector.load %arg15[%c1_140, %c0_141, %c0_142] : memref<3x1x32xf32, #tpu.memory_space<vmem>>, vector<1x1x32xf32>
    %309 = vector.shape_cast %308 : vector<1x1x32xf32> to vector<1x32xf32>
    %310 = vector.broadcast %309 : vector<1x32xf32> to vector<48x32xf32>
    %311 = arith.addf %307, %310 : vector<48x32xf32>
    %312 = arith.addf %295, %311 : vector<48x32xf32>
    %c1_143 = arith.constant 1 : index
    %c0_144 = arith.constant 0 : index
    %c0_145 = arith.constant 0 : index
    %313 = vector.load %arg16[%c1_143, %c0_144, %c0_145] : memref<3x1x32xf32, #tpu.memory_space<vmem>>, vector<1x1x32xf32>
    %314 = vector.shape_cast %313 : vector<1x1x32xf32> to vector<1x32xf32>
    %c1_146 = arith.constant 1 : index
    %c0_147 = arith.constant 0 : index
    %c0_148 = arith.constant 0 : index
    %315 = vector.load %arg17[%c1_146, %c0_147, %c0_148] : memref<3x1x32xf32, #tpu.memory_space<vmem>>, vector<1x1x32xf32>
    %316 = vector.shape_cast %315 : vector<1x1x32xf32> to vector<1x32xf32>
    %cst_149 = arith.constant dense<0.000000e+00> : vector<48xf32>
    %317 = vector.multi_reduction <add>, %312, %cst_149 [1] : vector<48x32xf32> to vector<48xf32>
    %318 = vector.shape_cast %317 : vector<48xf32> to vector<48x1xf32>
    %cst_150 = arith.constant 3.200000e+01 : f32
    %319 = vector.broadcast %cst_150 : f32 to vector<48x1xf32>
    %320 = arith.divf %318, %319 : vector<48x1xf32>
    %321 = vector.broadcast %320 : vector<48x1xf32> to vector<48x32xf32>
    %322 = arith.subf %312, %321 : vector<48x32xf32>
    %323 = arith.mulf %322, %322 : vector<48x32xf32>
    %cst_151 = arith.constant dense<0.000000e+00> : vector<48xf32>
    %324 = vector.multi_reduction <add>, %323, %cst_151 [1] : vector<48x32xf32> to vector<48xf32>
    %325 = vector.shape_cast %324 : vector<48xf32> to vector<48x1xf32>
    %cst_152 = arith.constant 3.200000e+01 : f32
    %326 = vector.broadcast %cst_152 : f32 to vector<48x1xf32>
    %327 = arith.divf %325, %326 : vector<48x1xf32>
    %328 = vector.broadcast %320 : vector<48x1xf32> to vector<48x32xf32>
    %329 = arith.subf %312, %328 : vector<48x32xf32>
    %cst_153 = arith.constant 9.99999974E-6 : f32
    %330 = vector.broadcast %cst_153 : f32 to vector<48x1xf32>
    %331 = arith.addf %327, %330 : vector<48x1xf32>
    %332 = math.rsqrt %331 : vector<48x1xf32>
    %333 = vector.broadcast %332 : vector<48x1xf32> to vector<48x32xf32>
    %334 = arith.mulf %329, %333 : vector<48x32xf32>
    %335 = vector.broadcast %314 : vector<1x32xf32> to vector<48x32xf32>
    %336 = arith.mulf %334, %335 : vector<48x32xf32>
    %337 = vector.broadcast %316 : vector<1x32xf32> to vector<48x32xf32>
    %338 = arith.addf %336, %337 : vector<48x32xf32>
    %c0_154 = arith.constant 0 : index
    %c0_155 = arith.constant 0 : index
    %339 = vector.load %arg18[%c0_154, %c0_155] : memref<1x32xf32, #tpu.memory_space<vmem>>, vector<1x32xf32>
    %c0_156 = arith.constant 0 : index
    %c0_157 = arith.constant 0 : index
    %340 = vector.load %arg19[%c0_156, %c0_157] : memref<32x32xf32, #tpu.memory_space<vmem>>, vector<32x32xf32>
    %cst_158 = arith.constant dense<0.000000e+00> : vector<1x32xf32>
    %341 = tpu.matmul %339, %340, %cst_158 {dimension_numbers = #tpu.dot_dimension_numbers<[1], [0], [0], [1], [0, 0, 1, 1], [], []>} : vector<1x32xf32>, vector<32x32xf32>, vector<1x32xf32> -> vector<1x32xf32>
    %c0_159 = arith.constant 0 : index
    %c0_160 = arith.constant 0 : index
    %342 = vector.load %arg20[%c0_159, %c0_160] : memref<1x32xf32, #tpu.memory_space<vmem>>, vector<1x32xf32>
    %343 = arith.addf %341, %342 : vector<1x32xf32>
    %c0_161 = arith.constant 0 : index
    %c0_162 = arith.constant 0 : index
    %344 = vector.load %arg21[%c0_161, %c0_162] : memref<32x64xf32, #tpu.memory_space<vmem>>, vector<32x64xf32>
    %cst_163 = arith.constant dense<0.000000e+00> : vector<48x64xf32>
    %345 = tpu.matmul %338, %344, %cst_163 {dimension_numbers = #tpu.dot_dimension_numbers<[1], [0], [0], [1], [0, 0, 1, 1], [], []>} : vector<48x32xf32>, vector<32x64xf32>, vector<48x64xf32> -> vector<48x64xf32>
    %c0_164 = arith.constant 0 : index
    %c0_165 = arith.constant 0 : index
    %346 = vector.load %arg22[%c0_164, %c0_165] : memref<1x64xf32, #tpu.memory_space<vmem>>, vector<1x64xf32>
    %347 = vector.broadcast %346 : vector<1x64xf32> to vector<48x64xf32>
    %348 = arith.addf %345, %347 : vector<48x64xf32>
    %c0_166 = arith.constant 0 : index
    %c0_167 = arith.constant 0 : index
    %349 = vector.load %arg23[%c0_166, %c0_167] : memref<32x32xf32, #tpu.memory_space<vmem>>, vector<32x32xf32>
    %c0_168 = arith.constant 0 : index
    %c0_169 = arith.constant 0 : index
    %350 = vector.load %arg2[%c0_168, %c0_169] : memref<6x48xf32, #tpu.memory_space<vmem>>, vector<6x48xf32>
    %cst_170 = arith.constant 0.000000e+00 : f32
    %351 = vector.broadcast %cst_170 : f32 to vector<6x8xf32>
    %352 = vector.extract_strided_slice %343 {offsets = [0, 0], sizes = [1, 8], strides = [1, 1]} : vector<1x32xf32> to vector<1x8xf32>
    %353 = vector.broadcast %352 : vector<1x8xf32> to vector<6x8xf32>
    %354 = arith.addf %353, %351 : vector<6x8xf32>
    %355 = vector.extract_strided_slice %348 {offsets = [0, 0], sizes = [48, 8], strides = [1, 1]} : vector<48x64xf32> to vector<48x8xf32>
    %356 = vector.extract_strided_slice %348 {offsets = [0, 32], sizes = [48, 8], strides = [1, 1]} : vector<48x64xf32> to vector<48x8xf32>
    %cst_171 = arith.constant dense<0.000000e+00> : vector<6x48xf32>
    %357 = tpu.matmul %354, %355, %cst_171 {dimension_numbers = #tpu.dot_dimension_numbers<[1], [1], [0], [0], [0, 0, 1, 0], [], []>} : vector<6x8xf32>, vector<48x8xf32>, vector<6x48xf32> -> vector<6x48xf32>
    %cst_172 = arith.constant 0.353553385 : f32
    %358 = vector.broadcast %cst_172 : f32 to vector<6x48xf32>
    %359 = arith.mulf %357, %358 : vector<6x48xf32>
    %360 = arith.addf %359, %350 : vector<6x48xf32>
    %cst_173 = arith.constant dense<0xFF800000> : vector<6xf32>
    %361 = vector.multi_reduction <maximumf>, %360, %cst_173 [1] : vector<6x48xf32> to vector<6xf32>
    %362 = vector.shape_cast %361 : vector<6xf32> to vector<6x1xf32>
    %363 = vector.broadcast %362 : vector<6x1xf32> to vector<6x48xf32>
    %364 = arith.subf %360, %363 : vector<6x48xf32>
    %365 = math.exp %364 : vector<6x48xf32>
    %cst_174 = arith.constant dense<0.000000e+00> : vector<6xf32>
    %366 = vector.multi_reduction <add>, %365, %cst_174 [1] : vector<6x48xf32> to vector<6xf32>
    %367 = vector.shape_cast %366 : vector<6xf32> to vector<6x1xf32>
    %368 = tpu.reciprocal %367 {approx = true} : vector<6x1xf32> -> vector<6x1xf32>
    %369 = vector.broadcast %368 : vector<6x1xf32> to vector<6x48xf32>
    %370 = arith.mulf %365, %369 : vector<6x48xf32>
    %cst_175 = arith.constant dense<0.000000e+00> : vector<6x8xf32>
    %371 = tpu.matmul %370, %356, %cst_175 {dimension_numbers = #tpu.dot_dimension_numbers<[1], [0], [0], [1], [0, 0, 1, 1], [], []>} : vector<6x48xf32>, vector<48x8xf32>, vector<6x8xf32> -> vector<6x8xf32>
    %372 = vector.extract_strided_slice %349 {offsets = [0, 0], sizes = [8, 32], strides = [1, 1]} : vector<32x32xf32> to vector<8x32xf32>
    %cst_176 = arith.constant dense<0.000000e+00> : vector<6x32xf32>
    %373 = tpu.matmul %371, %372, %cst_176 {dimension_numbers = #tpu.dot_dimension_numbers<[1], [0], [0], [1], [0, 0, 1, 1], [], []>} : vector<6x8xf32>, vector<8x32xf32>, vector<6x32xf32> -> vector<6x32xf32>
    %374 = vector.extract_strided_slice %343 {offsets = [0, 8], sizes = [1, 8], strides = [1, 1]} : vector<1x32xf32> to vector<1x8xf32>
    %375 = vector.broadcast %374 : vector<1x8xf32> to vector<6x8xf32>
    %376 = arith.addf %375, %351 : vector<6x8xf32>
    %377 = vector.extract_strided_slice %348 {offsets = [0, 8], sizes = [48, 8], strides = [1, 1]} : vector<48x64xf32> to vector<48x8xf32>
    %378 = vector.extract_strided_slice %348 {offsets = [0, 40], sizes = [48, 8], strides = [1, 1]} : vector<48x64xf32> to vector<48x8xf32>
    %cst_177 = arith.constant dense<0.000000e+00> : vector<6x48xf32>
    %379 = tpu.matmul %376, %377, %cst_177 {dimension_numbers = #tpu.dot_dimension_numbers<[1], [1], [0], [0], [0, 0, 1, 0], [], []>} : vector<6x8xf32>, vector<48x8xf32>, vector<6x48xf32> -> vector<6x48xf32>
    %cst_178 = arith.constant 0.353553385 : f32
    %380 = vector.broadcast %cst_178 : f32 to vector<6x48xf32>
    %381 = arith.mulf %379, %380 : vector<6x48xf32>
    %382 = arith.addf %381, %350 : vector<6x48xf32>
    %cst_179 = arith.constant dense<0xFF800000> : vector<6xf32>
    %383 = vector.multi_reduction <maximumf>, %382, %cst_179 [1] : vector<6x48xf32> to vector<6xf32>
    %384 = vector.shape_cast %383 : vector<6xf32> to vector<6x1xf32>
    %385 = vector.broadcast %384 : vector<6x1xf32> to vector<6x48xf32>
    %386 = arith.subf %382, %385 : vector<6x48xf32>
    %387 = math.exp %386 : vector<6x48xf32>
    %cst_180 = arith.constant dense<0.000000e+00> : vector<6xf32>
    %388 = vector.multi_reduction <add>, %387, %cst_180 [1] : vector<6x48xf32> to vector<6xf32>
    %389 = vector.shape_cast %388 : vector<6xf32> to vector<6x1xf32>
    %390 = tpu.reciprocal %389 {approx = true} : vector<6x1xf32> -> vector<6x1xf32>
    %391 = vector.broadcast %390 : vector<6x1xf32> to vector<6x48xf32>
    %392 = arith.mulf %387, %391 : vector<6x48xf32>
    %cst_181 = arith.constant dense<0.000000e+00> : vector<6x8xf32>
    %393 = tpu.matmul %392, %378, %cst_181 {dimension_numbers = #tpu.dot_dimension_numbers<[1], [0], [0], [1], [0, 0, 1, 1], [], []>} : vector<6x48xf32>, vector<48x8xf32>, vector<6x8xf32> -> vector<6x8xf32>
    %394 = vector.extract_strided_slice %349 {offsets = [8, 0], sizes = [8, 32], strides = [1, 1]} : vector<32x32xf32> to vector<8x32xf32>
    %cst_182 = arith.constant dense<0.000000e+00> : vector<6x32xf32>
    %395 = tpu.matmul %393, %394, %cst_182 {dimension_numbers = #tpu.dot_dimension_numbers<[1], [0], [0], [1], [0, 0, 1, 1], [], []>} : vector<6x8xf32>, vector<8x32xf32>, vector<6x32xf32> -> vector<6x32xf32>
    %396 = arith.addf %373, %395 : vector<6x32xf32>
    %397 = vector.extract_strided_slice %343 {offsets = [0, 16], sizes = [1, 8], strides = [1, 1]} : vector<1x32xf32> to vector<1x8xf32>
    %398 = vector.broadcast %397 : vector<1x8xf32> to vector<6x8xf32>
    %399 = arith.addf %398, %351 : vector<6x8xf32>
    %400 = vector.extract_strided_slice %348 {offsets = [0, 16], sizes = [48, 8], strides = [1, 1]} : vector<48x64xf32> to vector<48x8xf32>
    %401 = vector.extract_strided_slice %348 {offsets = [0, 48], sizes = [48, 8], strides = [1, 1]} : vector<48x64xf32> to vector<48x8xf32>
    %cst_183 = arith.constant dense<0.000000e+00> : vector<6x48xf32>
    %402 = tpu.matmul %399, %400, %cst_183 {dimension_numbers = #tpu.dot_dimension_numbers<[1], [1], [0], [0], [0, 0, 1, 0], [], []>} : vector<6x8xf32>, vector<48x8xf32>, vector<6x48xf32> -> vector<6x48xf32>
    %cst_184 = arith.constant 0.353553385 : f32
    %403 = vector.broadcast %cst_184 : f32 to vector<6x48xf32>
    %404 = arith.mulf %402, %403 : vector<6x48xf32>
    %405 = arith.addf %404, %350 : vector<6x48xf32>
    %cst_185 = arith.constant dense<0xFF800000> : vector<6xf32>
    %406 = vector.multi_reduction <maximumf>, %405, %cst_185 [1] : vector<6x48xf32> to vector<6xf32>
    %407 = vector.shape_cast %406 : vector<6xf32> to vector<6x1xf32>
    %408 = vector.broadcast %407 : vector<6x1xf32> to vector<6x48xf32>
    %409 = arith.subf %405, %408 : vector<6x48xf32>
    %410 = math.exp %409 : vector<6x48xf32>
    %cst_186 = arith.constant dense<0.000000e+00> : vector<6xf32>
    %411 = vector.multi_reduction <add>, %410, %cst_186 [1] : vector<6x48xf32> to vector<6xf32>
    %412 = vector.shape_cast %411 : vector<6xf32> to vector<6x1xf32>
    %413 = tpu.reciprocal %412 {approx = true} : vector<6x1xf32> -> vector<6x1xf32>
    %414 = vector.broadcast %413 : vector<6x1xf32> to vector<6x48xf32>
    %415 = arith.mulf %410, %414 : vector<6x48xf32>
    %cst_187 = arith.constant dense<0.000000e+00> : vector<6x8xf32>
    %416 = tpu.matmul %415, %401, %cst_187 {dimension_numbers = #tpu.dot_dimension_numbers<[1], [0], [0], [1], [0, 0, 1, 1], [], []>} : vector<6x48xf32>, vector<48x8xf32>, vector<6x8xf32> -> vector<6x8xf32>
    %417 = vector.extract_strided_slice %349 {offsets = [16, 0], sizes = [8, 32], strides = [1, 1]} : vector<32x32xf32> to vector<8x32xf32>
    %cst_188 = arith.constant dense<0.000000e+00> : vector<6x32xf32>
    %418 = tpu.matmul %416, %417, %cst_188 {dimension_numbers = #tpu.dot_dimension_numbers<[1], [0], [0], [1], [0, 0, 1, 1], [], []>} : vector<6x8xf32>, vector<8x32xf32>, vector<6x32xf32> -> vector<6x32xf32>
    %419 = arith.addf %396, %418 : vector<6x32xf32>
    %420 = vector.extract_strided_slice %343 {offsets = [0, 24], sizes = [1, 8], strides = [1, 1]} : vector<1x32xf32> to vector<1x8xf32>
    %421 = vector.broadcast %420 : vector<1x8xf32> to vector<6x8xf32>
    %422 = arith.addf %421, %351 : vector<6x8xf32>
    %423 = vector.extract_strided_slice %348 {offsets = [0, 24], sizes = [48, 8], strides = [1, 1]} : vector<48x64xf32> to vector<48x8xf32>
    %424 = vector.extract_strided_slice %348 {offsets = [0, 56], sizes = [48, 8], strides = [1, 1]} : vector<48x64xf32> to vector<48x8xf32>
    %cst_189 = arith.constant dense<0.000000e+00> : vector<6x48xf32>
    %425 = tpu.matmul %422, %423, %cst_189 {dimension_numbers = #tpu.dot_dimension_numbers<[1], [1], [0], [0], [0, 0, 1, 0], [], []>} : vector<6x8xf32>, vector<48x8xf32>, vector<6x48xf32> -> vector<6x48xf32>
    %cst_190 = arith.constant 0.353553385 : f32
    %426 = vector.broadcast %cst_190 : f32 to vector<6x48xf32>
    %427 = arith.mulf %425, %426 : vector<6x48xf32>
    %428 = arith.addf %427, %350 : vector<6x48xf32>
    %cst_191 = arith.constant dense<0xFF800000> : vector<6xf32>
    %429 = vector.multi_reduction <maximumf>, %428, %cst_191 [1] : vector<6x48xf32> to vector<6xf32>
    %430 = vector.shape_cast %429 : vector<6xf32> to vector<6x1xf32>
    %431 = vector.broadcast %430 : vector<6x1xf32> to vector<6x48xf32>
    %432 = arith.subf %428, %431 : vector<6x48xf32>
    %433 = math.exp %432 : vector<6x48xf32>
    %cst_192 = arith.constant dense<0.000000e+00> : vector<6xf32>
    %434 = vector.multi_reduction <add>, %433, %cst_192 [1] : vector<6x48xf32> to vector<6xf32>
    %435 = vector.shape_cast %434 : vector<6xf32> to vector<6x1xf32>
    %436 = tpu.reciprocal %435 {approx = true} : vector<6x1xf32> -> vector<6x1xf32>
    %437 = vector.broadcast %436 : vector<6x1xf32> to vector<6x48xf32>
    %438 = arith.mulf %433, %437 : vector<6x48xf32>
    %cst_193 = arith.constant dense<0.000000e+00> : vector<6x8xf32>
    %439 = tpu.matmul %438, %424, %cst_193 {dimension_numbers = #tpu.dot_dimension_numbers<[1], [0], [0], [1], [0, 0, 1, 1], [], []>} : vector<6x48xf32>, vector<48x8xf32>, vector<6x8xf32> -> vector<6x8xf32>
    %440 = vector.extract_strided_slice %349 {offsets = [24, 0], sizes = [8, 32], strides = [1, 1]} : vector<32x32xf32> to vector<8x32xf32>
    %cst_194 = arith.constant dense<0.000000e+00> : vector<6x32xf32>
    %441 = tpu.matmul %439, %440, %cst_194 {dimension_numbers = #tpu.dot_dimension_numbers<[1], [0], [0], [1], [0, 0, 1, 1], [], []>} : vector<6x8xf32>, vector<8x32xf32>, vector<6x32xf32> -> vector<6x32xf32>
    %442 = arith.addf %419, %441 : vector<6x32xf32>
    %c0_195 = arith.constant 0 : index
    %c0_196 = arith.constant 0 : index
    %443 = vector.load %arg24[%c0_195, %c0_196] : memref<1x32xf32, #tpu.memory_space<vmem>>, vector<1x32xf32>
    %444 = vector.broadcast %443 : vector<1x32xf32> to vector<6x32xf32>
    %445 = arith.addf %442, %444 : vector<6x32xf32>
    %c0_197 = arith.constant 0 : index
    %c0_198 = arith.constant 0 : index
    %446 = vector.load %arg25[%c0_197, %c0_198] : memref<6x32xf32, #tpu.memory_space<vmem>>, vector<6x32xf32>
    %447 = arith.addf %445, %446 : vector<6x32xf32>
    %c0_199 = arith.constant 0 : index
    %c0_200 = arith.constant 0 : index
    %448 = vector.load %arg3[%c0_199, %c0_200] : memref<6x6xf32, #tpu.memory_space<vmem>>, vector<6x6xf32>
    %c2 = arith.constant 2 : index
    %c0_201 = arith.constant 0 : index
    %c0_202 = arith.constant 0 : index
    %449 = vector.load %arg6[%c2, %c0_201, %c0_202] : memref<3x32x96xf32, #tpu.memory_space<vmem>>, vector<1x32x96xf32>
    %450 = vector.shape_cast %449 : vector<1x32x96xf32> to vector<32x96xf32>
    %cst_203 = arith.constant dense<0.000000e+00> : vector<6x96xf32>
    %451 = tpu.matmul %447, %450, %cst_203 {dimension_numbers = #tpu.dot_dimension_numbers<[1], [0], [0], [1], [0, 0, 1, 1], [], []>} : vector<6x32xf32>, vector<32x96xf32>, vector<6x96xf32> -> vector<6x96xf32>
    %c2_204 = arith.constant 2 : index
    %c0_205 = arith.constant 0 : index
    %c0_206 = arith.constant 0 : index
    %452 = vector.load %arg7[%c2_204, %c0_205, %c0_206] : memref<3x1x96xf32, #tpu.memory_space<vmem>>, vector<1x1x96xf32>
    %453 = vector.shape_cast %452 : vector<1x1x96xf32> to vector<1x96xf32>
    %454 = vector.broadcast %453 : vector<1x96xf32> to vector<6x96xf32>
    %455 = arith.addf %451, %454 : vector<6x96xf32>
    %c2_207 = arith.constant 2 : index
    %c0_208 = arith.constant 0 : index
    %c0_209 = arith.constant 0 : index
    %456 = vector.load %arg8[%c2_207, %c0_208, %c0_209] : memref<3x32x32xf32, #tpu.memory_space<vmem>>, vector<1x32x32xf32>
    %457 = vector.shape_cast %456 : vector<1x32x32xf32> to vector<32x32xf32>
    %458 = vector.extract_strided_slice %455 {offsets = [0, 0], sizes = [6, 8], strides = [1, 1]} : vector<6x96xf32> to vector<6x8xf32>
    %459 = vector.extract_strided_slice %455 {offsets = [0, 32], sizes = [6, 8], strides = [1, 1]} : vector<6x96xf32> to vector<6x8xf32>
    %460 = vector.extract_strided_slice %455 {offsets = [0, 64], sizes = [6, 8], strides = [1, 1]} : vector<6x96xf32> to vector<6x8xf32>
    %cst_210 = arith.constant dense<0.000000e+00> : vector<6x6xf32>
    %461 = tpu.matmul %458, %459, %cst_210 {dimension_numbers = #tpu.dot_dimension_numbers<[1], [1], [0], [0], [0, 0, 1, 0], [], []>} : vector<6x8xf32>, vector<6x8xf32>, vector<6x6xf32> -> vector<6x6xf32>
    %cst_211 = arith.constant 0.353553385 : f32
    %462 = vector.broadcast %cst_211 : f32 to vector<6x6xf32>
    %463 = arith.mulf %461, %462 : vector<6x6xf32>
    %464 = arith.addf %463, %448 : vector<6x6xf32>
    %cst_212 = arith.constant dense<0xFF800000> : vector<6xf32>
    %465 = vector.multi_reduction <maximumf>, %464, %cst_212 [1] : vector<6x6xf32> to vector<6xf32>
    %466 = vector.shape_cast %465 : vector<6xf32> to vector<6x1xf32>
    %467 = vector.broadcast %466 : vector<6x1xf32> to vector<6x6xf32>
    %468 = arith.subf %464, %467 : vector<6x6xf32>
    %469 = math.exp %468 : vector<6x6xf32>
    %cst_213 = arith.constant dense<0.000000e+00> : vector<6xf32>
    %470 = vector.multi_reduction <add>, %469, %cst_213 [1] : vector<6x6xf32> to vector<6xf32>
    %471 = vector.shape_cast %470 : vector<6xf32> to vector<6x1xf32>
    %472 = tpu.reciprocal %471 {approx = true} : vector<6x1xf32> -> vector<6x1xf32>
    %473 = vector.broadcast %472 : vector<6x1xf32> to vector<6x6xf32>
    %474 = arith.mulf %469, %473 : vector<6x6xf32>
    %cst_214 = arith.constant dense<0.000000e+00> : vector<6x8xf32>
    %475 = tpu.matmul %474, %460, %cst_214 {dimension_numbers = #tpu.dot_dimension_numbers<[1], [0], [0], [1], [0, 0, 1, 1], [], []>} : vector<6x6xf32>, vector<6x8xf32>, vector<6x8xf32> -> vector<6x8xf32>
    %476 = vector.extract_strided_slice %457 {offsets = [0, 0], sizes = [8, 32], strides = [1, 1]} : vector<32x32xf32> to vector<8x32xf32>
    %cst_215 = arith.constant dense<0.000000e+00> : vector<6x32xf32>
    %477 = tpu.matmul %475, %476, %cst_215 {dimension_numbers = #tpu.dot_dimension_numbers<[1], [0], [0], [1], [0, 0, 1, 1], [], []>} : vector<6x8xf32>, vector<8x32xf32>, vector<6x32xf32> -> vector<6x32xf32>
    %478 = vector.extract_strided_slice %455 {offsets = [0, 8], sizes = [6, 8], strides = [1, 1]} : vector<6x96xf32> to vector<6x8xf32>
    %479 = vector.extract_strided_slice %455 {offsets = [0, 40], sizes = [6, 8], strides = [1, 1]} : vector<6x96xf32> to vector<6x8xf32>
    %480 = vector.extract_strided_slice %455 {offsets = [0, 72], sizes = [6, 8], strides = [1, 1]} : vector<6x96xf32> to vector<6x8xf32>
    %cst_216 = arith.constant dense<0.000000e+00> : vector<6x6xf32>
    %481 = tpu.matmul %478, %479, %cst_216 {dimension_numbers = #tpu.dot_dimension_numbers<[1], [1], [0], [0], [0, 0, 1, 0], [], []>} : vector<6x8xf32>, vector<6x8xf32>, vector<6x6xf32> -> vector<6x6xf32>
    %cst_217 = arith.constant 0.353553385 : f32
    %482 = vector.broadcast %cst_217 : f32 to vector<6x6xf32>
    %483 = arith.mulf %481, %482 : vector<6x6xf32>
    %484 = arith.addf %483, %448 : vector<6x6xf32>
    %cst_218 = arith.constant dense<0xFF800000> : vector<6xf32>
    %485 = vector.multi_reduction <maximumf>, %484, %cst_218 [1] : vector<6x6xf32> to vector<6xf32>
    %486 = vector.shape_cast %485 : vector<6xf32> to vector<6x1xf32>
    %487 = vector.broadcast %486 : vector<6x1xf32> to vector<6x6xf32>
    %488 = arith.subf %484, %487 : vector<6x6xf32>
    %489 = math.exp %488 : vector<6x6xf32>
    %cst_219 = arith.constant dense<0.000000e+00> : vector<6xf32>
    %490 = vector.multi_reduction <add>, %489, %cst_219 [1] : vector<6x6xf32> to vector<6xf32>
    %491 = vector.shape_cast %490 : vector<6xf32> to vector<6x1xf32>
    %492 = tpu.reciprocal %491 {approx = true} : vector<6x1xf32> -> vector<6x1xf32>
    %493 = vector.broadcast %492 : vector<6x1xf32> to vector<6x6xf32>
    %494 = arith.mulf %489, %493 : vector<6x6xf32>
    %cst_220 = arith.constant dense<0.000000e+00> : vector<6x8xf32>
    %495 = tpu.matmul %494, %480, %cst_220 {dimension_numbers = #tpu.dot_dimension_numbers<[1], [0], [0], [1], [0, 0, 1, 1], [], []>} : vector<6x6xf32>, vector<6x8xf32>, vector<6x8xf32> -> vector<6x8xf32>
    %496 = vector.extract_strided_slice %457 {offsets = [8, 0], sizes = [8, 32], strides = [1, 1]} : vector<32x32xf32> to vector<8x32xf32>
    %cst_221 = arith.constant dense<0.000000e+00> : vector<6x32xf32>
    %497 = tpu.matmul %495, %496, %cst_221 {dimension_numbers = #tpu.dot_dimension_numbers<[1], [0], [0], [1], [0, 0, 1, 1], [], []>} : vector<6x8xf32>, vector<8x32xf32>, vector<6x32xf32> -> vector<6x32xf32>
    %498 = arith.addf %477, %497 : vector<6x32xf32>
    %499 = vector.extract_strided_slice %455 {offsets = [0, 16], sizes = [6, 8], strides = [1, 1]} : vector<6x96xf32> to vector<6x8xf32>
    %500 = vector.extract_strided_slice %455 {offsets = [0, 48], sizes = [6, 8], strides = [1, 1]} : vector<6x96xf32> to vector<6x8xf32>
    %501 = vector.extract_strided_slice %455 {offsets = [0, 80], sizes = [6, 8], strides = [1, 1]} : vector<6x96xf32> to vector<6x8xf32>
    %cst_222 = arith.constant dense<0.000000e+00> : vector<6x6xf32>
    %502 = tpu.matmul %499, %500, %cst_222 {dimension_numbers = #tpu.dot_dimension_numbers<[1], [1], [0], [0], [0, 0, 1, 0], [], []>} : vector<6x8xf32>, vector<6x8xf32>, vector<6x6xf32> -> vector<6x6xf32>
    %cst_223 = arith.constant 0.353553385 : f32
    %503 = vector.broadcast %cst_223 : f32 to vector<6x6xf32>
    %504 = arith.mulf %502, %503 : vector<6x6xf32>
    %505 = arith.addf %504, %448 : vector<6x6xf32>
    %cst_224 = arith.constant dense<0xFF800000> : vector<6xf32>
    %506 = vector.multi_reduction <maximumf>, %505, %cst_224 [1] : vector<6x6xf32> to vector<6xf32>
    %507 = vector.shape_cast %506 : vector<6xf32> to vector<6x1xf32>
    %508 = vector.broadcast %507 : vector<6x1xf32> to vector<6x6xf32>
    %509 = arith.subf %505, %508 : vector<6x6xf32>
    %510 = math.exp %509 : vector<6x6xf32>
    %cst_225 = arith.constant dense<0.000000e+00> : vector<6xf32>
    %511 = vector.multi_reduction <add>, %510, %cst_225 [1] : vector<6x6xf32> to vector<6xf32>
    %512 = vector.shape_cast %511 : vector<6xf32> to vector<6x1xf32>
    %513 = tpu.reciprocal %512 {approx = true} : vector<6x1xf32> -> vector<6x1xf32>
    %514 = vector.broadcast %513 : vector<6x1xf32> to vector<6x6xf32>
    %515 = arith.mulf %510, %514 : vector<6x6xf32>
    %cst_226 = arith.constant dense<0.000000e+00> : vector<6x8xf32>
    %516 = tpu.matmul %515, %501, %cst_226 {dimension_numbers = #tpu.dot_dimension_numbers<[1], [0], [0], [1], [0, 0, 1, 1], [], []>} : vector<6x6xf32>, vector<6x8xf32>, vector<6x8xf32> -> vector<6x8xf32>
    %517 = vector.extract_strided_slice %457 {offsets = [16, 0], sizes = [8, 32], strides = [1, 1]} : vector<32x32xf32> to vector<8x32xf32>
    %cst_227 = arith.constant dense<0.000000e+00> : vector<6x32xf32>
    %518 = tpu.matmul %516, %517, %cst_227 {dimension_numbers = #tpu.dot_dimension_numbers<[1], [0], [0], [1], [0, 0, 1, 1], [], []>} : vector<6x8xf32>, vector<8x32xf32>, vector<6x32xf32> -> vector<6x32xf32>
    %519 = arith.addf %498, %518 : vector<6x32xf32>
    %520 = vector.extract_strided_slice %455 {offsets = [0, 24], sizes = [6, 8], strides = [1, 1]} : vector<6x96xf32> to vector<6x8xf32>
    %521 = vector.extract_strided_slice %455 {offsets = [0, 56], sizes = [6, 8], strides = [1, 1]} : vector<6x96xf32> to vector<6x8xf32>
    %522 = vector.extract_strided_slice %455 {offsets = [0, 88], sizes = [6, 8], strides = [1, 1]} : vector<6x96xf32> to vector<6x8xf32>
    %cst_228 = arith.constant dense<0.000000e+00> : vector<6x6xf32>
    %523 = tpu.matmul %520, %521, %cst_228 {dimension_numbers = #tpu.dot_dimension_numbers<[1], [1], [0], [0], [0, 0, 1, 0], [], []>} : vector<6x8xf32>, vector<6x8xf32>, vector<6x6xf32> -> vector<6x6xf32>
    %cst_229 = arith.constant 0.353553385 : f32
    %524 = vector.broadcast %cst_229 : f32 to vector<6x6xf32>
    %525 = arith.mulf %523, %524 : vector<6x6xf32>
    %526 = arith.addf %525, %448 : vector<6x6xf32>
    %cst_230 = arith.constant dense<0xFF800000> : vector<6xf32>
    %527 = vector.multi_reduction <maximumf>, %526, %cst_230 [1] : vector<6x6xf32> to vector<6xf32>
    %528 = vector.shape_cast %527 : vector<6xf32> to vector<6x1xf32>
    %529 = vector.broadcast %528 : vector<6x1xf32> to vector<6x6xf32>
    %530 = arith.subf %526, %529 : vector<6x6xf32>
    %531 = math.exp %530 : vector<6x6xf32>
    %cst_231 = arith.constant dense<0.000000e+00> : vector<6xf32>
    %532 = vector.multi_reduction <add>, %531, %cst_231 [1] : vector<6x6xf32> to vector<6xf32>
    %533 = vector.shape_cast %532 : vector<6xf32> to vector<6x1xf32>
    %534 = tpu.reciprocal %533 {approx = true} : vector<6x1xf32> -> vector<6x1xf32>
    %535 = vector.broadcast %534 : vector<6x1xf32> to vector<6x6xf32>
    %536 = arith.mulf %531, %535 : vector<6x6xf32>
    %cst_232 = arith.constant dense<0.000000e+00> : vector<6x8xf32>
    %537 = tpu.matmul %536, %522, %cst_232 {dimension_numbers = #tpu.dot_dimension_numbers<[1], [0], [0], [1], [0, 0, 1, 1], [], []>} : vector<6x6xf32>, vector<6x8xf32>, vector<6x8xf32> -> vector<6x8xf32>
    %538 = vector.extract_strided_slice %457 {offsets = [24, 0], sizes = [8, 32], strides = [1, 1]} : vector<32x32xf32> to vector<8x32xf32>
    %cst_233 = arith.constant dense<0.000000e+00> : vector<6x32xf32>
    %539 = tpu.matmul %537, %538, %cst_233 {dimension_numbers = #tpu.dot_dimension_numbers<[1], [0], [0], [1], [0, 0, 1, 1], [], []>} : vector<6x8xf32>, vector<8x32xf32>, vector<6x32xf32> -> vector<6x32xf32>
    %540 = arith.addf %519, %539 : vector<6x32xf32>
    %c2_234 = arith.constant 2 : index
    %c0_235 = arith.constant 0 : index
    %c0_236 = arith.constant 0 : index
    %541 = vector.load %arg9[%c2_234, %c0_235, %c0_236] : memref<3x1x32xf32, #tpu.memory_space<vmem>>, vector<1x1x32xf32>
    %542 = vector.shape_cast %541 : vector<1x1x32xf32> to vector<1x32xf32>
    %543 = vector.broadcast %542 : vector<1x32xf32> to vector<6x32xf32>
    %544 = arith.addf %540, %543 : vector<6x32xf32>
    %545 = arith.addf %447, %544 : vector<6x32xf32>
    %c2_237 = arith.constant 2 : index
    %c0_238 = arith.constant 0 : index
    %c0_239 = arith.constant 0 : index
    %546 = vector.load %arg10[%c2_237, %c0_238, %c0_239] : memref<3x1x32xf32, #tpu.memory_space<vmem>>, vector<1x1x32xf32>
    %547 = vector.shape_cast %546 : vector<1x1x32xf32> to vector<1x32xf32>
    %c2_240 = arith.constant 2 : index
    %c0_241 = arith.constant 0 : index
    %c0_242 = arith.constant 0 : index
    %548 = vector.load %arg11[%c2_240, %c0_241, %c0_242] : memref<3x1x32xf32, #tpu.memory_space<vmem>>, vector<1x1x32xf32>
    %549 = vector.shape_cast %548 : vector<1x1x32xf32> to vector<1x32xf32>
    %cst_243 = arith.constant dense<0.000000e+00> : vector<6xf32>
    %550 = vector.multi_reduction <add>, %545, %cst_243 [1] : vector<6x32xf32> to vector<6xf32>
    %551 = vector.shape_cast %550 : vector<6xf32> to vector<6x1xf32>
    %cst_244 = arith.constant 3.200000e+01 : f32
    %552 = vector.broadcast %cst_244 : f32 to vector<6x1xf32>
    %553 = arith.divf %551, %552 : vector<6x1xf32>
    %554 = vector.broadcast %553 : vector<6x1xf32> to vector<6x32xf32>
    %555 = arith.subf %545, %554 : vector<6x32xf32>
    %556 = arith.mulf %555, %555 : vector<6x32xf32>
    %cst_245 = arith.constant dense<0.000000e+00> : vector<6xf32>
    %557 = vector.multi_reduction <add>, %556, %cst_245 [1] : vector<6x32xf32> to vector<6xf32>
    %558 = vector.shape_cast %557 : vector<6xf32> to vector<6x1xf32>
    %cst_246 = arith.constant 3.200000e+01 : f32
    %559 = vector.broadcast %cst_246 : f32 to vector<6x1xf32>
    %560 = arith.divf %558, %559 : vector<6x1xf32>
    %561 = vector.broadcast %553 : vector<6x1xf32> to vector<6x32xf32>
    %562 = arith.subf %545, %561 : vector<6x32xf32>
    %cst_247 = arith.constant 9.99999974E-6 : f32
    %563 = vector.broadcast %cst_247 : f32 to vector<6x1xf32>
    %564 = arith.addf %560, %563 : vector<6x1xf32>
    %565 = math.rsqrt %564 : vector<6x1xf32>
    %566 = vector.broadcast %565 : vector<6x1xf32> to vector<6x32xf32>
    %567 = arith.mulf %562, %566 : vector<6x32xf32>
    %568 = vector.broadcast %547 : vector<1x32xf32> to vector<6x32xf32>
    %569 = arith.mulf %567, %568 : vector<6x32xf32>
    %570 = vector.broadcast %549 : vector<1x32xf32> to vector<6x32xf32>
    %571 = arith.addf %569, %570 : vector<6x32xf32>
    %c2_248 = arith.constant 2 : index
    %c0_249 = arith.constant 0 : index
    %c0_250 = arith.constant 0 : index
    %572 = vector.load %arg12[%c2_248, %c0_249, %c0_250] : memref<3x32x32xf32, #tpu.memory_space<vmem>>, vector<1x32x32xf32>
    %573 = vector.shape_cast %572 : vector<1x32x32xf32> to vector<32x32xf32>
    %cst_251 = arith.constant dense<0.000000e+00> : vector<6x32xf32>
    %574 = tpu.matmul %571, %573, %cst_251 {dimension_numbers = #tpu.dot_dimension_numbers<[1], [0], [0], [1], [0, 0, 1, 1], [], []>} : vector<6x32xf32>, vector<32x32xf32>, vector<6x32xf32> -> vector<6x32xf32>
    %c2_252 = arith.constant 2 : index
    %c0_253 = arith.constant 0 : index
    %c0_254 = arith.constant 0 : index
    %575 = vector.load %arg13[%c2_252, %c0_253, %c0_254] : memref<3x1x32xf32, #tpu.memory_space<vmem>>, vector<1x1x32xf32>
    %576 = vector.shape_cast %575 : vector<1x1x32xf32> to vector<1x32xf32>
    %577 = vector.broadcast %576 : vector<1x32xf32> to vector<6x32xf32>
    %578 = arith.addf %574, %577 : vector<6x32xf32>
    %cst_255 = arith.constant 0.000000e+00 : f32
    %579 = vector.broadcast %cst_255 : f32 to vector<6x32xf32>
    %580 = arith.maximumf %578, %579 : vector<6x32xf32>
    %c2_256 = arith.constant 2 : index
    %c0_257 = arith.constant 0 : index
    %c0_258 = arith.constant 0 : index
    %581 = vector.load %arg14[%c2_256, %c0_257, %c0_258] : memref<3x32x32xf32, #tpu.memory_space<vmem>>, vector<1x32x32xf32>
    %582 = vector.shape_cast %581 : vector<1x32x32xf32> to vector<32x32xf32>
    %cst_259 = arith.constant dense<0.000000e+00> : vector<6x32xf32>
    %583 = tpu.matmul %580, %582, %cst_259 {dimension_numbers = #tpu.dot_dimension_numbers<[1], [0], [0], [1], [0, 0, 1, 1], [], []>} : vector<6x32xf32>, vector<32x32xf32>, vector<6x32xf32> -> vector<6x32xf32>
    %c2_260 = arith.constant 2 : index
    %c0_261 = arith.constant 0 : index
    %c0_262 = arith.constant 0 : index
    %584 = vector.load %arg15[%c2_260, %c0_261, %c0_262] : memref<3x1x32xf32, #tpu.memory_space<vmem>>, vector<1x1x32xf32>
    %585 = vector.shape_cast %584 : vector<1x1x32xf32> to vector<1x32xf32>
    %586 = vector.broadcast %585 : vector<1x32xf32> to vector<6x32xf32>
    %587 = arith.addf %583, %586 : vector<6x32xf32>
    %588 = arith.addf %571, %587 : vector<6x32xf32>
    %c2_263 = arith.constant 2 : index
    %c0_264 = arith.constant 0 : index
    %c0_265 = arith.constant 0 : index
    %589 = vector.load %arg16[%c2_263, %c0_264, %c0_265] : memref<3x1x32xf32, #tpu.memory_space<vmem>>, vector<1x1x32xf32>
    %590 = vector.shape_cast %589 : vector<1x1x32xf32> to vector<1x32xf32>
    %c2_266 = arith.constant 2 : index
    %c0_267 = arith.constant 0 : index
    %c0_268 = arith.constant 0 : index
    %591 = vector.load %arg17[%c2_266, %c0_267, %c0_268] : memref<3x1x32xf32, #tpu.memory_space<vmem>>, vector<1x1x32xf32>
    %592 = vector.shape_cast %591 : vector<1x1x32xf32> to vector<1x32xf32>
    %cst_269 = arith.constant dense<0.000000e+00> : vector<6xf32>
    %593 = vector.multi_reduction <add>, %588, %cst_269 [1] : vector<6x32xf32> to vector<6xf32>
    %594 = vector.shape_cast %593 : vector<6xf32> to vector<6x1xf32>
    %cst_270 = arith.constant 3.200000e+01 : f32
    %595 = vector.broadcast %cst_270 : f32 to vector<6x1xf32>
    %596 = arith.divf %594, %595 : vector<6x1xf32>
    %597 = vector.broadcast %596 : vector<6x1xf32> to vector<6x32xf32>
    %598 = arith.subf %588, %597 : vector<6x32xf32>
    %599 = arith.mulf %598, %598 : vector<6x32xf32>
    %cst_271 = arith.constant dense<0.000000e+00> : vector<6xf32>
    %600 = vector.multi_reduction <add>, %599, %cst_271 [1] : vector<6x32xf32> to vector<6xf32>
    %601 = vector.shape_cast %600 : vector<6xf32> to vector<6x1xf32>
    %cst_272 = arith.constant 3.200000e+01 : f32
    %602 = vector.broadcast %cst_272 : f32 to vector<6x1xf32>
    %603 = arith.divf %601, %602 : vector<6x1xf32>
    %604 = vector.broadcast %596 : vector<6x1xf32> to vector<6x32xf32>
    %605 = arith.subf %588, %604 : vector<6x32xf32>
    %cst_273 = arith.constant 9.99999974E-6 : f32
    %606 = vector.broadcast %cst_273 : f32 to vector<6x1xf32>
    %607 = arith.addf %603, %606 : vector<6x1xf32>
    %608 = math.rsqrt %607 : vector<6x1xf32>
    %609 = vector.broadcast %608 : vector<6x1xf32> to vector<6x32xf32>
    %610 = arith.mulf %605, %609 : vector<6x32xf32>
    %611 = vector.broadcast %590 : vector<1x32xf32> to vector<6x32xf32>
    %612 = arith.mulf %610, %611 : vector<6x32xf32>
    %613 = vector.broadcast %592 : vector<1x32xf32> to vector<6x32xf32>
    %614 = arith.addf %612, %613 : vector<6x32xf32>
    %615 = arith.addf %447, %614 : vector<6x32xf32>
    %c0_274 = arith.constant 0 : index
    %c0_275 = arith.constant 0 : index
    %616 = vector.load %arg26[%c0_274, %c0_275] : memref<32x32xf32, #tpu.memory_space<vmem>>, vector<32x32xf32>
    %cst_276 = arith.constant dense<0.000000e+00> : vector<6x32xf32>
    %617 = tpu.matmul %615, %616, %cst_276 {dimension_numbers = #tpu.dot_dimension_numbers<[1], [0], [0], [1], [0, 0, 1, 1], [], []>} : vector<6x32xf32>, vector<32x32xf32>, vector<6x32xf32> -> vector<6x32xf32>
    %c0_277 = arith.constant 0 : index
    %c0_278 = arith.constant 0 : index
    %618 = vector.load %arg27[%c0_277, %c0_278] : memref<1x32xf32, #tpu.memory_space<vmem>>, vector<1x32xf32>
    %619 = vector.broadcast %618 : vector<1x32xf32> to vector<6x32xf32>
    %620 = arith.addf %617, %619 : vector<6x32xf32>
    %cst_279 = arith.constant 0.000000e+00 : f32
    %621 = vector.broadcast %cst_279 : f32 to vector<6x32xf32>
    %622 = arith.maximumf %620, %621 : vector<6x32xf32>
    %c0_280 = arith.constant 0 : index
    %c0_281 = arith.constant 0 : index
    %623 = vector.load %arg28[%c0_280, %c0_281] : memref<1x32xf32, #tpu.memory_space<vmem>>, vector<1x32xf32>
    %c0_282 = arith.constant 0 : index
    %c0_283 = arith.constant 0 : index
    %624 = vector.load %arg29[%c0_282, %c0_283] : memref<1x32xf32, #tpu.memory_space<vmem>>, vector<1x32xf32>
    %cst_284 = arith.constant dense<0.000000e+00> : vector<6xf32>
    %625 = vector.multi_reduction <add>, %622, %cst_284 [1] : vector<6x32xf32> to vector<6xf32>
    %626 = vector.shape_cast %625 : vector<6xf32> to vector<6x1xf32>
    %cst_285 = arith.constant 3.200000e+01 : f32
    %627 = vector.broadcast %cst_285 : f32 to vector<6x1xf32>
    %628 = arith.divf %626, %627 : vector<6x1xf32>
    %629 = vector.broadcast %628 : vector<6x1xf32> to vector<6x32xf32>
    %630 = arith.subf %622, %629 : vector<6x32xf32>
    %631 = arith.mulf %630, %630 : vector<6x32xf32>
    %cst_286 = arith.constant dense<0.000000e+00> : vector<6xf32>
    %632 = vector.multi_reduction <add>, %631, %cst_286 [1] : vector<6x32xf32> to vector<6xf32>
    %633 = vector.shape_cast %632 : vector<6xf32> to vector<6x1xf32>
    %cst_287 = arith.constant 3.200000e+01 : f32
    %634 = vector.broadcast %cst_287 : f32 to vector<6x1xf32>
    %635 = arith.divf %633, %634 : vector<6x1xf32>
    %636 = vector.broadcast %628 : vector<6x1xf32> to vector<6x32xf32>
    %637 = arith.subf %622, %636 : vector<6x32xf32>
    %cst_288 = arith.constant 9.99999974E-6 : f32
    %638 = vector.broadcast %cst_288 : f32 to vector<6x1xf32>
    %639 = arith.addf %635, %638 : vector<6x1xf32>
    %640 = math.rsqrt %639 : vector<6x1xf32>
    %641 = vector.broadcast %640 : vector<6x1xf32> to vector<6x32xf32>
    %642 = arith.mulf %637, %641 : vector<6x32xf32>
    %643 = vector.broadcast %623 : vector<1x32xf32> to vector<6x32xf32>
    %644 = arith.mulf %642, %643 : vector<6x32xf32>
    %645 = vector.broadcast %624 : vector<1x32xf32> to vector<6x32xf32>
    %646 = arith.addf %644, %645 : vector<6x32xf32>
    %c0_289 = arith.constant 0 : index
    %c0_290 = arith.constant 0 : index
    %647 = vector.load %arg30[%c0_289, %c0_290] : memref<32x1xf32, #tpu.memory_space<vmem>>, vector<32x1xf32>
    %cst_291 = arith.constant dense<0.000000e+00> : vector<6x1xf32>
    %648 = tpu.matmul %646, %647, %cst_291 {dimension_numbers = #tpu.dot_dimension_numbers<[1], [0], [0], [1], [0, 0, 1, 1], [], []>} : vector<6x32xf32>, vector<32x1xf32>, vector<6x1xf32> -> vector<6x1xf32>
    %c0_292 = arith.constant 0 : index
    %c0_293 = arith.constant 0 : index
    %649 = vector.load %arg31[%c0_292, %c0_293] : memref<1x1xf32, #tpu.memory_space<vmem>>, vector<1x1xf32>
    %650 = vector.broadcast %649 : vector<1x1xf32> to vector<6x1xf32>
    %651 = arith.addf %648, %650 : vector<6x1xf32>
    %c0_294 = arith.constant 0 : index
    %c0_295 = arith.constant 0 : index
    %652 = vector.load %arg32[%c0_294, %c0_295] : memref<6x1xf32, #tpu.memory_space<vmem>>, vector<6x1xf32>
    tpu.vector_store %arg32[%c0_294, %c0_295], %651 {strides = array<i32>} : memref<6x1xf32, #tpu.memory_space<vmem>>, vector<6x1xf32>,
    return
  }
}

</mosaic_0001>

<bundles_post_ra>
// kernel: tile.9
= control target key start
LH: loop header
LB: loop body
LE: loop exit
PB: predicated region body
PF: predicated region fallthrough
CT: control target
= control target key end

     0   :  { %vm12_vm0 = vcmask 261120   ;;  %s43_s0 = inlined_call_operand.vmem [shape: f32[2,3,32], index: 0, kind: input, shape index: {}]   ;;  %s44_s1 = inlined_call_operand.vmem [shape: f32[6,32], index: 1, kind: output, shape index: {}]  }
   0x1   :  { %v19_v0 = vld [vmem:[%s43_s0 + $0x4] sm:$0xf]  ;;  %v9_v1 = vld [vmem:[%s43_s0] sm:$0xf] }
   0x2   :  { %8 = vst [vmem:[#allocation0 + $0x8] sm:$0xf] %v19_v0  ;;  %10 = vst [vmem:[#allocation0] sm:$0xf] %v9_v1 }
   0x9   :  { %v11_v2 = vld [vmem:[#allocation0] sm:$0x7]   ;;  %v15_v3 = vld [vmem:[#allocation0 + $0x8] sm:$0x7]  }
   0xa   :  { %13 = vst.msk [vmem:[%s44_s1] sm:$0x7] %vm12_vm0, %v11_v2   ;;  %20 = vst.msk [vmem:[%s44_s1 + $0x3] sm:$0x7] %vm12_vm0, %v15_v3  }

// kernel: encoder_forward.1
= control target key start
LH: loop header
LB: loop body
LE: loop exit
PB: predicated region body
PF: predicated region fallthrough
CT: control target
= control target key end

     0   :  { %s10638_s6 = smov 1   ;;  %s10639_s10 = smov 2   ;;  %s12653_s0 = inlined_call_operand.smem [shape: u32[33], index: -1, kind: input, shape index: {}] }
   0x1   :  { %s10711_s5 = sld [smem:[%s12653_s0]]   ;;  %s10640_s14 = smov 3  }
   0x2   :  { %s10716_s9 = sld [smem:[%s12653_s0 + %s10638_s6]]   ;;  %s10641_s18 = smov 4  }
   0x3   :  { %s10721_s13 = sld [smem:[%s12653_s0 + %s10639_s10]]   ;;  %s10642_s22 = smov 5  }
   0x4   :  { %s10726_s17 = sld [smem:[%s12653_s0 + %s10640_s14]]   ;;  %s10643_s26 = smov 6  }
   0x5   :  { %s10731_s21 = sld [smem:[%s12653_s0 + %s10641_s18]]   ;;  %s10644_s30 = smov 7  }
   0x6   :  { %s10736_s25 = sld [smem:[%s12653_s0 + %s10642_s22]]   ;;  %s10645_s4 = smov 8  }
   0x7   :  { %12662 = sst [smem:[#allocation37_spill]] %s10711_s5  ;;  %s10646_s10 = smov 9  }
   0x8   :  { %12663 = sst [smem:[#allocation38_spill]] %s10716_s9  ;;  %s10647_s15 = smov 10  }
   0x9   :  { %12664 = sst [smem:[#allocation39_spill]] %s10721_s13  ;;  %s10648_s20 = smov 11  }
   0xa   :  { %12665 = sst [smem:[#allocation40_spill]] %s10726_s17  ;;  %s10650_s1 = smov 13  }
   0xb   :  { %s10741_s29 = sld [smem:[%s12653_s0 + %s10643_s26]]   ;;  %s10649_s26 = smov 12  }
   0xc   :  { %12666 = sst [smem:[#allocation41_spill]] %s10736_s25  ;;  %s10651_s7 = smov 14  }
   0xd   :  { %s10746_s3 = sld [smem:[%s12653_s0 + %s10644_s30]]   ;;  %s10653_s22 = smov 16  }
   0xe   :  { %s10751_s8 = sld [smem:[%s12653_s0 + %s10645_s4]]   ;;  %s10654_s28 = smov 17  }
   0xf   :  { %s10756_s14 = sld [smem:[%s12653_s0 + %s10646_s10]]   ;;  %s10669_s23 = smov 32  }
  0x10   :  { %s10761_s19 = sld [smem:[%s12653_s0 + %s10647_s15]]   ;;  %s10652_s15 = smov 15  }
  0x11   :  { %12667 = sst [smem:[#allocation42_spill]] %s10741_s29 }
  0x12   :  { %s10766_s24 = sld [smem:[%s12653_s0 + %s10648_s20]]  }
  0x13   :  { %s10771_s30 = sld [smem:[%s12653_s0 + %s10649_s26]]  }
  0x14   :  { %12668 = sst [smem:[#allocation43_spill]] %s10751_s8 }
  0x15   :  { %s10776_s6 = sld [smem:[%s12653_s0 + %s10650_s1]]  }
  0x16   :  { %s10781_s12 = sld [smem:[%s12653_s0 + %s10651_s7]]   ;;  %s10655_s7 = smov 18  }
  0x17   :  { %s10786_s20 = sld [smem:[%s12653_s0 + %s10652_s15]]   ;;  %s10656_s15 = smov 19  }
  0x18   :  { %s10791_s27 = sld [smem:[%s12653_s0 + %s10653_s22]]   ;;  %s10657_s22 = smov 20  }
  0x19   :  { %12669 = sst [smem:[#allocation44_spill]] %s10771_s30 }
  0x1a   :  { %s10796_s4 = sld [smem:[%s12653_s0 + %s10654_s28]]   ;;  %s10658_s28 = smov 21  }
  0x1b   :  { %s10801_s17 = sld [smem:[%s12653_s0 + %s10655_s7]]   ;;  %s10659_s7 = smov 22  }
  0x1c   :  { %s10806_s13 = sld [smem:[%s12653_s0 + %s10656_s15]]   ;;  %s10660_s15 = smov 23  }
  0x1d   :  { %s10811_s30 = sld [smem:[%s12653_s0 + %s10657_s22]]   ;;  %s10661_s22 = smov 24  }
  0x1e   :  { %s10816_s8 = sld [smem:[%s12653_s0 + %s10658_s28]]   ;;  %s10662_s28 = smov 25  }
  0x1f   :  { %s10821_s9 = sld [smem:[%s12653_s0 + %s10659_s7]]   ;;  %s10663_s7 = smov 26  }
  0x20   :  { %s10831_s25 = sld [smem:[%s12653_s0 + %s10661_s22]]   ;;  %s10665_s22 = smov 28  }
  0x21   :  { %s10841_s29 = sld [smem:[%s12653_s0 + %s10663_s7]]   ;;  %s10667_s7 = smov 30  }
  0x22   :  { %12670 = sst [smem:[#allocation45_spill]] %s10806_s13 }
  0x23   :  { %s10826_s13 = sld [smem:[%s12653_s0 + %s10660_s15]]   ;;  %s10664_s15 = smov 27  }
  0x24   :  { %12671 = sst [smem:[#allocation46_spill]] %s10816_s8 }
  0x25   :  { %s10836_s8 = sld [smem:[%s12653_s0 + %s10662_s28]]   ;;  %s10666_s28 = smov 29  }
  0x26   :  { %12672 = sst [smem:[#allocation47_spill]] %s10831_s25 }
  0x27   :  { %12674 = sst [smem:[#allocation49_spill]] %s10841_s29 }
  0x28   :  { %s10846_s5 = sld [smem:[%s12653_s0 + %s10664_s15]]   ;;  %s10668_s15 = smov 31  }
  0x29   :  { %s10851_s25 = sld [smem:[%s12653_s0 + %s10665_s22]]  }
  0x2a   :  { %s10861_s29 = sld [smem:[%s12653_s0 + %s10667_s7]]  }
  0x2b   :  { %12673 = sst [smem:[#allocation48_spill]] %s10836_s8 }
  0x2c   :  { %s10856_s8 = sld [smem:[%s12653_s0 + %s10666_s28]]  }
  0x2e   :  { %12675 = sst [smem:[#allocation50_spill]] %s10846_s5 }
  0x2f   :  { %12676 = sst [smem:[#allocation51_spill]] %s10851_s25 }
  0x30   :  { %s8326_s5 = sld [smem:[%s12653_s0 + %s10668_s15]]  }
  0x31   :  { %s10869_s25 = sld [smem:[%s12653_s0 + %s10669_s23]]  }
  0x36   :  { %v70_v0 = vstv %s8326_s5 }
  0x37   :  { %71 = vst [vmem:[#allocation2] sm:$0x1] %v70_v0 }
  0x38   :  { %72 = vsyncpa [#allocation4], 0 }
  0x39   :  { %73 = vsyncpa [#allocation6], 0 }
  0x3a   :  { %74 = vsyncpa [#allocation9], 0 }
  0x3b   :  { %75 = vsyncpa [#allocation12], 0 }
  0x3c   :  { %76 = vsyncpa [#allocation15], 0 }
  0x3d   :  { %77 = vsyncpa [#allocation18], 0 }
  0x3e   :  { %78 = vsyncpa [#allocation21], 0 }
  0x3f   :  { %79 = vsyncpa [#allocation24], 0 }
  0x40   :  { %80 = vsyncpa [#allocation27], 0  ;;  %s10670_s28 = smov [#allocation5]  }
  0x41   :  { %s110_s1 = sshll.u32 %s10670_s28, 4  ;;  %s111_s1 = int_to_ptr.vmem [resolvable:$true] %s110_s1 }
  0x42   :  { %s10308_s2 = scalar_lea.vmem %s111_s1, 48  ;;  %s10312_s7 = scalar_lea.vmem %s111_s1, 64 }
  0x43   :  { %p10309_p0 = scmp.ne.s32.totalorder %s111_s1, %s10308_s2  ;;  %p10313_p1 = scmp.lt.s32.totalorder %s111_s1, %s111_s1 }
  0x44   :  { %p10314_p2 = scmp.lt.s32.totalorder %s10312_s7, %s10308_s2 }
  0x46   :  { %p10315_p3 = por %p10314_p2, %p10313_p1 }
  0x48   :  { %p10316_p4 = pnand %p10315_p3, %p10309_p0 }
  0x4a   :  { %10319 = shalt.err (!%p10316_p4)
}
  0x4b   :  { %s10671_s0 = smov 16   ;;  %s10672_s5 = smov 1  }
  0x4c   :  { %116 = dma.hbm_to_vmem [thread:$0]  %s10746_s3, 48, %s111_s1, [#allocation6], %s10671_s0, %s10671_s0, %s10672_s5  }
  0x4d   :  { %s10673_s10 = smov [#allocation8]   ;;  %s10674_s15 = smov [#allocation11]  }
  0x4e   :  { %s136_s11 = sshll.u32 %s10673_s10, 4  ;;  %s162_s16 = sshll.u32 %s10674_s15, 4  ;;  %s137_s11 = int_to_ptr.vmem [resolvable:$true] %s136_s11  ;;  %s163_s16 = int_to_ptr.vmem [resolvable:$true] %s162_s16 }
  0x4f   :  { %s10328_s18 = scalar_lea.vmem %s137_s11, 48  ;;  %s10332_s23 = scalar_lea.vmem %s137_s11, 64 }
  0x50   :  { %p10329_p5 = scmp.ne.s32.totalorder %s137_s11, %s10328_s18  ;;  %p10333_p6 = scmp.lt.s32.totalorder %s137_s11, %s137_s11 }
  0x51   :  { %p10334_p7 = scmp.lt.s32.totalorder %s10332_s23, %s10328_s18 }
  0x53   :  { %p10335_p8 = por %p10334_p7, %p10333_p6 }
  0x55   :  { %p10336_p9 = pnand %p10335_p8, %p10329_p5 }
  0x57   :  { %10339 = shalt.err (!%p10336_p9)
}
  0x58   :  { %142 = dma.hbm_to_vmem [thread:$0]  %s10761_s19, 48, %s137_s11, [#allocation9], %s10671_s0, %s10671_s0, %s10672_s5  }
  0x59   :  { %s10348_s3 = scalar_lea.vmem %s163_s16, 48  ;;  %s10352_s22 = scalar_lea.vmem %s163_s16, 64 }
  0x5a   :  { %p10349_p10 = scmp.ne.s32.totalorder %s163_s16, %s10348_s3  ;;  %p10353_p11 = scmp.lt.s32.totalorder %s163_s16, %s163_s16 }
  0x5b   :  { %p10354_p12 = scmp.lt.s32.totalorder %s10352_s22, %s10348_s3 }
  0x5d   :  { %p10355_p13 = por %p10354_p12, %p10353_p11 }
  0x5f   :  { %p10356_p0 = pnand %p10355_p13, %p10349_p10 }
  0x61   :  { %10359 = shalt.err (!%p10356_p0)
}
  0x62   :  { %168 = dma.hbm_to_vmem [thread:$0]  %s10776_s6, 48, %s163_s16, [#allocation12], %s10671_s0, %s10671_s0, %s10672_s5  }
  0x63   :  { %s10675_s26 = smov [#allocation14]   ;;  %s10676_s1 = smov [#allocation17]  }
  0x64   :  { %s186_s28 = sshll.u32 %s10675_s26, 4  ;;  %s210_s2 = sshll.u32 %s10676_s1, 4  ;;  %s187_s28 = int_to_ptr.vmem [resolvable:$true] %s186_s28  ;;  %s211_s2 = int_to_ptr.vmem [resolvable:$true] %s210_s2 }
  0x65   :  { %s10368_s19 = scalar_lea.vmem %s187_s28, 48  ;;  %s10372_s7 = scalar_lea.vmem %s187_s28, 64 }
  0x66   :  { %p10369_p1 = scmp.ne.s32.totalorder %s187_s28, %s10368_s19  ;;  %p10373_p2 = scmp.lt.s32.totalorder %s187_s28, %s187_s28 }
  0x67   :  { %p10374_p3 = scmp.lt.s32.totalorder %s10372_s7, %s10368_s19 }
  0x69   :  { %p10375_p4 = por %p10374_p3, %p10373_p2 }
  0x6b   :  { %p10376_p5 = pnand %p10375_p4, %p10369_p1 }
  0x6d   :  { %10379 = shalt.err (!%p10376_p5)
}
  0x6e   :  { %192 = dma.hbm_to_vmem [thread:$0]  %s10786_s20, 48, %s187_s28, [#allocation15], %s10671_s0, %s10671_s0, %s10672_s5  }
  0x6f   :  { %s10388_s6 = scalar_lea.vmem %s211_s2, 48  ;;  %s10392_s10 = scalar_lea.vmem %s211_s2, 64 }
  0x70   :  { %p10389_p6 = scmp.ne.s32.totalorder %s211_s2, %s10388_s6  ;;  %p10393_p7 = scmp.lt.s32.totalorder %s211_s2, %s211_s2 }
  0x71   :  { %p10394_p8 = scmp.lt.s32.totalorder %s10392_s10, %s10388_s6 }
  0x73   :  { %p10395_p9 = por %p10394_p8, %p10393_p7 }
  0x75   :  { %p10396_p10 = pnand %p10395_p9, %p10389_p6 }
  0x77   :  { %10399 = shalt.err (!%p10396_p10)
}
  0x78   :  { %216 = dma.hbm_to_vmem [thread:$0]  %s10796_s4, 48, %s211_s2, [#allocation18], %s10671_s0, %s10671_s0, %s10672_s5  }
  0x79   :  { %s10677_s11 = smov [#allocation20]  }
  0x7a   :  { %s235_s15 = sshll.u32 %s10677_s11, 4  ;;  %s236_s15 = int_to_ptr.vmem [resolvable:$true] %s235_s15 }
  0x7b   :  { %s10408_s16 = scalar_lea.vmem %s236_s15, 16  ;;  %s10412_s20 = scalar_lea.vmem %s236_s15, 32 }
  0x7c   :  { %p10409_p11 = scmp.ne.s32.totalorder %s236_s15, %s10408_s16  ;;  %p10413_p12 = scmp.lt.s32.totalorder %s236_s15, %s236_s15 }
  0x7d   :  { %p10414_p13 = scmp.lt.s32.totalorder %s10412_s20, %s10408_s16 }
  0x7f   :  { %p10415_p0 = por %p10414_p13, %p10413_p12 }
  0x81   :  { %p10416_p1 = pnand %p10415_p0, %p10409_p11 }
  0x83   :  { %10419 = shalt.err (!%p10416_p1)
}
  0x84   :  { %238 = dma.hbm_to_vmem [thread:$0]  %s10811_s30, 16, %s236_s15, [#allocation21]  }
  0x85   :  { %s10678_s18 = smov [#allocation23]   ;;  %s10679_s3 = smov [#allocation3]  }
  0x86   :  { %s256_s23 = sshll.u32 %s10678_s18, 4  ;;  %s94_s22 = sshll.u32 %s10679_s3, 4  ;;  %s257_s23 = int_to_ptr.vmem [resolvable:$true] %s256_s23  ;;  %s95_s22 = int_to_ptr.vmem [resolvable:$true] %s94_s22 }
  0x87   :  { %s10428_s4 = scalar_lea.vmem %s257_s23, 512  ;;  %p10433_p3 = scmp.lt.s32.totalorder %s257_s23, %s257_s23 }
  0x88   :  { %p10429_p2 = scmp.ne.s32.totalorder %s257_s23, %s10428_s4  ;;  %p10434_p4 = scmp.lt.s32.totalorder %s10428_s4, %s10428_s4 }
  0x8a   :  { %p10435_p5 = por %p10434_p4, %p10433_p3 }
  0x8c   :  { %p10436_p6 = pnand %p10435_p5, %p10429_p2 }
  0x8e   :  { %10439 = shalt.err (!%p10436_p6)
}
  0x8f   :  { %s10680_s26 = smov 128   ;;  %s10681_s28 = smov 8  }
  0x90   :  { %262 = dma.hbm_to_vmem [thread:$0]  %s10826_s13, 512, %s257_s23, [#allocation24], %s10680_s26, %s10680_s26, %s10681_s28  }
  0x91   :  { %s10448_s30 = scalar_lea.vmem %s95_s22, 256  ;;  %p10453_p8 = scmp.lt.s32.totalorder %s95_s22, %s95_s22 }
  0x92   :  { %p10449_p7 = scmp.ne.s32.totalorder %s95_s22, %s10448_s30  ;;  %p10454_p9 = scmp.lt.s32.totalorder %s10448_s30, %s10448_s30 }
  0x94   :  { %p10455_p10 = por %p10454_p9, %p10453_p8 }
  0x96   :  { %p10456_p11 = pnand %p10455_p10, %p10449_p7 }
  0x98   :  { %10459 = shalt.err (!%p10456_p11)
}
  0x99   :  { %100 = dma.hbm_to_vmem [thread:$0]  %s10731_s21, 256, %s95_s22, [#allocation4], %s10680_s26, %s10680_s26, %s10681_s28  }
  0x9a   :  { %s10682_s1 = smov [#allocation7]   ;;  %s10683_s19 = smov [#allocation10]  }
  0x9b   :  { %s124_s2 = sshll.u32 %s10682_s1, 4  ;;  %s148_s7 = sshll.u32 %s10683_s19, 4  ;;  %s125_s2 = int_to_ptr.vmem [resolvable:$true] %s124_s2  ;;  %s149_s7 = int_to_ptr.vmem [resolvable:$true] %s148_s7 }
  0x9c   :  { %s10468_s6 = scalar_lea.vmem %s125_s2, 48  ;;  %s10472_s13 = scalar_lea.vmem %s125_s2, 64 }
  0x9d   :  { %p10469_p12 = scmp.ne.s32.totalorder %s125_s2, %s10468_s6  ;;  %p10473_p13 = scmp.lt.s32.totalorder %s125_s2, %s125_s2 }
  0x9e   :  { %p10474_p0 = scmp.lt.s32.totalorder %s10472_s13, %s10468_s6 }
  0xa0   :  { %p10475_p1 = por %p10474_p0, %p10473_p13 }
  0xa2   :  { %p10476_p2 = pnand %p10475_p1, %p10469_p12 }
  0xa4   :  { %10479 = shalt.err (!%p10476_p2)
}
  0xa5   :  { %130 = dma.hbm_to_vmem [thread:$0]  %s10756_s14, 48, %s125_s2, [#allocation6], %s10671_s0, %s10671_s0, %s10672_s5  }
  0xa6   :  { %s10488_s21 = scalar_lea.vmem %s149_s7, 48  ;;  %s10492_s10 = scalar_lea.vmem %s149_s7, 64 }
  0xa7   :  { %p10489_p3 = scmp.ne.s32.totalorder %s149_s7, %s10488_s21  ;;  %p10493_p4 = scmp.lt.s32.totalorder %s149_s7, %s149_s7 }
  0xa8   :  { %p10494_p5 = scmp.lt.s32.totalorder %s10492_s10, %s10488_s21 }
  0xaa   :  { %p10495_p6 = por %p10494_p5, %p10493_p4 }
  0xac   :  { %p10496_p7 = pnand %p10495_p6, %p10489_p3 }
  0xae   :  { %10499 = shalt.err (!%p10496_p7)
}
  0xaf   :  { %154 = dma.hbm_to_vmem [thread:$0]  %s10766_s24, 48, %s149_s7, [#allocation9], %s10671_s0, %s10671_s0, %s10672_s5  }
  0xb0   :  { %s10684_s11 = smov [#allocation13]   ;;  %s10685_s16 = smov [#allocation16]  }
  0xb1   :  { %s174_s15 = sshll.u32 %s10684_s11, 4  ;;  %s198_s20 = sshll.u32 %s10685_s16, 4  ;;  %s175_s15 = int_to_ptr.vmem [resolvable:$true] %s174_s15  ;;  %s199_s20 = int_to_ptr.vmem [resolvable:$true] %s198_s20 }
  0xb2   :  { %s10508_s14 = scalar_lea.vmem %s175_s15, 1536  ;;  %p10513_p9 = scmp.lt.s32.totalorder %s175_s15, %s175_s15 }
  0xb3   :  { %p10509_p8 = scmp.ne.s32.totalorder %s175_s15, %s10508_s14  ;;  %p10514_p10 = scmp.lt.s32.totalorder %s10508_s14, %s10508_s14 }
  0xb5   :  { %p10515_p11 = por %p10514_p10, %p10513_p9 }
  0xb7   :  { %p10516_p12 = pnand %p10515_p11, %p10509_p8 }
  0xb9   :  { %10519 = shalt.err (!%p10516_p12)
}
  0xba   :  { %180 = dma.hbm_to_vmem [thread:$0]  %s10781_s12, 1536, %s175_s15, [#allocation12], %s10680_s26, %s10680_s26, %s10681_s28  }
  0xbb   :  { %s10528_s18 = scalar_lea.vmem %s199_s20, 48  ;;  %s10532_s24 = scalar_lea.vmem %s199_s20, 64 }
  0xbc   :  { %p10529_p13 = scmp.ne.s32.totalorder %s199_s20, %s10528_s18  ;;  %p10533_p0 = scmp.lt.s32.totalorder %s199_s20, %s199_s20 }
  0xbd   :  { %p10534_p1 = scmp.lt.s32.totalorder %s10532_s24, %s10528_s18 }
  0xbf   :  { %p10535_p2 = por %p10534_p1, %p10533_p0 }
  0xc1   :  { %p10536_p3 = pnand %p10535_p2, %p10529_p13 }
  0xc3   :  { %10539 = shalt.err (!%p10536_p3)
}
  0xc4   :  { %204 = dma.hbm_to_vmem [thread:$0]  %s10791_s27, 48, %s199_s20, [#allocation15], %s10671_s0, %s10671_s0, %s10672_s5  }
  0xc5   :  { %s10686_s23 = smov [#allocation19]   ;;  %s10687_s22 = smov [#allocation22]  }
  0xc6   :  { %s223_s3 = sshll.u32 %s10686_s23, 4  ;;  %s247_s4 = sshll.u32 %s10687_s22, 4  ;;  %s224_s3 = int_to_ptr.vmem [resolvable:$true] %s223_s3  ;;  %s248_s4 = int_to_ptr.vmem [resolvable:$true] %s247_s4 }
  0xc7   :  { %s10548_s12 = scalar_lea.vmem %s224_s3, 16  ;;  %s10552_s26 = scalar_lea.vmem %s224_s3, 32 }
  0xc8   :  { %p10549_p4 = scmp.ne.s32.totalorder %s224_s3, %s10548_s12  ;;  %p10553_p5 = scmp.lt.s32.totalorder %s224_s3, %s224_s3 }
  0xc9   :  { %p10554_p6 = scmp.lt.s32.totalorder %s10552_s26, %s10548_s12 }
  0xcb   :  { %p10555_p7 = por %p10554_p6, %p10553_p5 }
  0xcd   :  { %p10556_p8 = pnand %p10555_p7, %p10549_p4 }
  0xcf   :  { %10559 = shalt.err (!%p10556_p8)
}
  0xd0   :  { %226 = dma.hbm_to_vmem [thread:$0]  %s10801_s17, 16, %s224_s3, [#allocation18]  }
  0xd1   :  { %s10568_s28 = scalar_lea.vmem %s248_s4, 16  ;;  %s10572_s30 = scalar_lea.vmem %s248_s4, 32 }
  0xd2   :  { %p10569_p9 = scmp.ne.s32.totalorder %s248_s4, %s10568_s28  ;;  %p10573_p10 = scmp.lt.s32.totalorder %s248_s4, %s248_s4 }
  0xd3   :  { %p10574_p11 = scmp.lt.s32.totalorder %s10572_s30, %s10568_s28 }
  0xd5   :  { %p10575_p12 = por %p10574_p11, %p10573_p10 }
  0xd7   :  { %p10576_p13 = pnand %p10575_p12, %p10569_p9 }
  0xd9   :  { %10579 = shalt.err (!%p10576_p13)
}
  0xda   :  { %250 = dma.hbm_to_vmem [thread:$0]  %s10821_s9, 16, %s248_s4, [#allocation21]  }
  0xdb   :  { %s10688_s27 = smov [#allocation25]   ;;  %s10689_s5 = smov [#allocation26]  }
  0xdc   :  { %s269_s0 = sshll.u32 %s10688_s27, 4  ;;  %s283_s1 = sshll.u32 %s10689_s5, 4  ;;  %s270_s0 = int_to_ptr.vmem [resolvable:$true] %s269_s0  ;;  %s284_s1 = int_to_ptr.vmem [resolvable:$true] %s283_s1 }
  0xdd   :  { %s10588_s2 = scalar_lea.vmem %s270_s0, 16  ;;  %s10592_s19 = scalar_lea.vmem %s270_s0, 32 }
  0xde   :  { %p10589_p0 = scmp.ne.s32.totalorder %s270_s0, %s10588_s2  ;;  %p10593_p1 = scmp.lt.s32.totalorder %s270_s0, %s270_s0 }
  0xdf   :  { %p10594_p2 = scmp.lt.s32.totalorder %s10592_s19, %s10588_s2 }
  0xe1   :  { %p10595_p3 = por %p10594_p2, %p10593_p1 }
  0xe3   :  { %p10596_p4 = pnand %p10595_p3, %p10589_p0 }
  0xe5   :  { %10599 = shalt.err (!%p10596_p4)
}
  0xe6   :  { %s12677_s17 = sld [smem:[#allocation47_spill]]  ;;  %s10608_s7 = scalar_lea.vmem %s284_s1, 16 }
  0xe7   :  { %p10609_p5 = scmp.ne.s32.totalorder %s284_s1, %s10608_s7  ;;  %s10612_s6 = scalar_lea.vmem %s284_s1, 32 }
  0xe8   :  { %p10613_p6 = scmp.lt.s32.totalorder %s284_s1, %s284_s1  ;;  %p10614_p7 = scmp.lt.s32.totalorder %s10612_s6, %s10608_s7 }
  0xea   :  { %p10615_p8 = por %p10614_p7, %p10613_p6 }
  0xec   :  { %272 = dma.hbm_to_vmem [thread:$0]  %s12677_s17, 16, %s270_s0, [#allocation24]  }
  0xed   :  { %p10616_p9 = pnand %p10615_p8, %p10609_p5 }
  0xef   :  { %10619 = shalt.err (!%p10616_p9)
}
  0xf0   :  { %s12678_s9 = sld [smem:[#allocation50_spill]] }
  0xf6   :  { %286 = dma.hbm_to_vmem [thread:$0]  %s12678_s9, 16, %s284_s1, [#allocation27]  }
  0xf7   :  { %10620 = dma.done.wait [#allocation4], 256  }
  0xf8   :  { %10621 = vsyncadd [#allocation4], 4294967040 }
  0xf9   :  { %10622 = dma.done.wait [#allocation6], 96  }
  0xfa   :  { %10623 = vsyncadd [#allocation6], 4294967200 }
  0xfb   :  { %10624 = dma.done.wait [#allocation9], 96  }
  0xfc   :  { %10625 = vsyncadd [#allocation9], 4294967200 }
  0xfd   :  { %10626 = dma.done.wait [#allocation12], 1584  }
  0xfe   :  { %10627 = vsyncadd [#allocation12], 4294965712 }
  0xff   :  { %10628 = dma.done.wait [#allocation15], 96  }
 0x100   :  { %10629 = vsyncadd [#allocation15], 4294967200 }
 0x101   :  { %10630 = dma.done.wait [#allocation18], 64  }
 0x102   :  { %10631 = vsyncadd [#allocation18], 4294967232 }
 0x103   :  { %10632 = dma.done.wait [#allocation21], 32  }
 0x104   :  { %10633 = vsyncadd [#allocation21], 4294967264 }
 0x105   :  { %10634 = dma.done.wait [#allocation24], 528  }
 0x106   :  { %10635 = vsyncadd [#allocation24], 4294966768 }
 0x107   :  { %10636 = dma.done.wait [#allocation27], 16  }
 0x108   :  { %10637 = vsyncadd [#allocation27], 4294967280  ;;  %s12679_s13 = sld [smem:[#allocation37_spill]]  ;;  %vm358_vm0 = vcmask 130048   ;;  %v350_v1 = vld [vmem:[#allocation3 + $0x8] sm:$0xff]  ;;  %v349_v2 = vld [vmem:[#allocation3] sm:$0xff] }
 0x109   :  { %s12680_s21 = sld [smem:[#allocation42_spill]]  ;;  %9129 = vmatprep.subr.mxu0 %v350_v1  ;;  %vm489_vm1 = vcmask 261120   ;;  %v8335_v27 = vld [vmem:[#allocation5] ss:$0 sm:$0xff]  ;;  %vm625_vm2 = vcmask 64512   ;;  %s10690_s11 = smov 96  }
 0x10a   :  { %9130 = vmatpush3.msra.mxu0 %v350_v1  ;;  %s12681_s10 = sld [smem:[#allocation41_spill]]  ;;  %s10691_s15 = smov 64   ;;  %vm757_vm3 = vcmask 392192   ;;  %vm10702_vm4 = vmmov 0   ;;  %vm5762_vm5 = vcmask 390144   ;;  %vm6946_vm6 = vcmask 46080  }
 0x10b   :  { %9131 = vmatprep.subr.mxu0 %v349_v2  ;;  %s10692_s16 = smov 88   ;;  %s12682_s20 = sld [smem:[#allocation38_spill]]  ;;  %vm6964_vm7 = vcmask 1045504   ;;  %vm6960_vm8 = vcmask 48128   ;;  %vm7849_vm9 = vcmask 259072   ;;  %vm8281_vm10 = vcmask 5120  }
 0x10c   :  { %9132 = vmatpush3.msra.mxu0 %v349_v2  ;;  %s10693_s14 = smov 120   ;;  %s12683_s18 = sld [smem:[#allocation43_spill]] }
 0x10d   :  { %s10694_s24 = smov 56   ;;  %s10695_s23 = smov 80  }
 0x10e   :  { %v343_v3 = vld [vmem:[%s12679_s13] sm:$0xff]  ;;  %v344_v4 = vld [vmem:[%s12679_s13 + $0x8] sm:$0xff]  ;;  %v345_v6 = vld [vmem:[%s12679_s13 + $0x10] sm:$0xff]  ;;  %s10696_s3 = smov 112   ;;  %s10697_s22 = smov 72  }
 0x10f   :  { %9133 = vmatprep.mubr.msk.f32.mxu0 %vm358_vm0, %v343_v3  ;;  %v481_v5 = vld [vmem:[%s12680_s21 + $0x18] sm:$0xff]  ;;  %v347_v8 = vld [vmem:[%s12679_s13 + $0x20] sm:$0xff]  ;;  %v348_v9 = vld [vmem:[%s12679_s13 + $0x28] sm:$0xff]  ;;  %s10698_s4 = smov 104   ;;  %s10699_s12 = smov 48  }
 0x110   :  { %9142 = vmatprep.subr.mxu1 %v481_v5  ;;  %9134 = vmatmul.mubr.msk.f32.vlgmr.msra.gmra.mxu0 %vm358_vm0, %v344_v4  ;;  %v346_v7 = vld [vmem:[%s12679_s13 + $0x18] sm:$0xff]  ;;  %v480_v10 = vld [vmem:[%s12680_s21 + $0x10] sm:$0xff]  ;;  %v479_v11 = vld [vmem:[%s12680_s21 + $0x8] sm:$0xff]  ;;  %s10700_s26 = smov 40   ;;  %s12684_s28 = sld [smem:[#allocation44_spill]] }
 0x111   :  { %9143 = vmatpush3.msra.mxu1 %v481_v5  ;;  %9136 = vmatprep.mubr.msk.f32.mxu0 %vm358_vm0, %v345_v6  ;;  %v478_v12 = vld [vmem:[%s12680_s21] sm:$0xff]  ;;  %v11030_v53 = vld [vmem:[%s12682_s20 + $0x8] sm:$0xff]  ;;  %v11037_v60 = vld [vmem:[%s12682_s20 + $0x18] sm:$0xff]  ;;  %s12685_s30 = sld [smem:[#allocation46_spill]] }
 0x112   :  { %9144 = vmatprep.subr.mxu1 %v480_v10  ;;  %v8328_v14 = vld [vmem:[%s12681_s10] ss:$0 sm:$0xff]  ;;  %v11044_v5 = vld [vmem:[%s12682_s20 + $0x10] sm:$0xff]  ;;  %s12686_s27 = sld [smem:[#allocation45_spill]] }
 0x113   :  { %9145 = vmatpush3.msra.mxu1 %v480_v10  ;;  %v11033_v56 = vld [vmem:[%s12682_s20] sm:$0xff]  ;;  %s12687_s0 = sld [smem:[#allocation39_spill]] }
 0x114   :  { %9137 = vmatmul.mubr.msk.f32.gmra.mxu0 %vm358_vm0, %v346_v7  ;;  %9146 = vmatprep.subr.mxu1 %v479_v11  ;;  %v11047_v7 = vld [vmem:[%s12682_s20 + $0x20] sm:$0xff]  ;;  %s12688_s5 = sld [smem:[#allocation48_spill]] }
 0x115   :  { %9139 = vmatprep.mubr.msk.f32.mxu0 %vm358_vm0, %v347_v8  ;;  %9147 = vmatpush3.msra.mxu1 %v479_v11  ;;  %s12689_s1 = sld [smem:[#allocation40_spill]] }
 0x116   :  { %9148 = vmatprep.subr.mxu1 %v478_v12  ;;  %s12690_s2 = sld [smem:[#allocation49_spill]] }
 0x117   :  { %9149 = vmatpush3.msra.mxu1 %v478_v12  ;;  %v11052_v12 = vld [vmem:[%s12682_s20 + $0x28] sm:$0xff]  ;;  %s12691_s19 = sld [smem:[#allocation51_spill]] }
 0x118   :  { %9140 = vmatmul.mubr.msk.f32.gmra.mxu0 %vm358_vm0, %v348_v9 }
 0x1d0   :  { %v9135_v13 = vpop.f32.mrf.mxu0 }
 0x1d1   :  { %v10939_v17 = vadd.f32 %v9135_v13, %v8328_v14 }
 0x1d2   :  { %v443_v15 = vpop.f32.mrf.mxu0 }
 0x1d3   :  { %v10937_v16 = vadd.f32 %v8328_v14, %v443_v15 }
 0x1d4   :  { %v9138_v18 = vpop.f32.mrf.mxu0 }
 0x1d5   :  { %9150 = vmatprep.mubr.msk.f32.mxu1 %vm489_vm1, %v10937_v16  ;;  %v10947_v21 = vadd.f32 %v9138_v18, %v8328_v14 }
 0x1d6   :  { %v453_v19 = vpop.f32.mrf.mxu0  ;;  %9151 = vmatmul.mubr.msk.f32.vlgmr.msra.gmra.mxu1 %vm489_vm1, %v10939_v17 }
 0x1d7   :  { %v10945_v20 = vadd.f32 %v8328_v14, %v453_v19 }
 0x1d8   :  { %v9141_v22 = vpop.f32.mrf.mxu0 }
 0x1d9   :  { %9153 = vmatprep.mubr.msk.f32.mxu1 %vm489_vm1, %v10945_v20  ;;  %v10955_v25 = vadd.f32 %v9141_v22, %v8328_v14 }
 0x1da   :  { %v463_v23 = vpop.f32.mrf.mxu0  ;;  %9154 = vmatmul.mubr.msk.f32.gmra.mxu1 %vm489_vm1, %v10947_v21 }
 0x1db   :  { %v10953_v24 = vadd.f32 %v8328_v14, %v463_v23 }
 0x1dd   :  { %9156 = vmatprep.mubr.msk.f32.mxu1 %vm489_vm1, %v10953_v24 }
 0x1de   :  { %9157 = vmatmul.mubr.msk.f32.gmra.mxu1 %vm489_vm1, %v10955_v25 }
 0x296   :  { %v9152_v26 = vpop.f32.mrf.mxu1 }
 0x297   :  { %v10983_v38 = vadd.f32 %v9152_v26, %v8335_v27 }
 0x298   :  { %v574_v28 = vpop.f32.mrf.mxu1 }
 0x299   :  { %v10961_v29 = vadd.f32 %v8335_v27, %v574_v28 }
 0x29a   :  { %v9155_v30 = vpop.f32.mrf.mxu1 }
 0x29b   :  { %v10963_v31 = vadd.f32 %v9155_v30, %v8335_v27  ;;  %9171 = vmatprep.mubr.msk.f32.mxu0 %vm625_vm2, %v10961_v29 }
 0x29c   :  { %v584_v32 = vpop.f32.mrf.mxu1 }
 0x29d   :  { %619 = vrot.lane.b32.xlu1 %v10963_v31, %s10690_s11  ;;  %v10969_v34 = vadd.f32 %v8335_v27, %v584_v32 }
 0x29e   :  { %v9158_v33 = vpop.f32.mrf.mxu1 }
 0x29f   :  { %v10971_v35 = vadd.f32 %v9158_v33, %v8335_v27 }
 0x2a0   :  { %v594_v36 = vpop.f32.mrf.mxu1 }
 0x2a1   :  { %623 = vrot.lane.b32.xlu0 %v10971_v35, %s10690_s11  ;;  %617 = vrot.lane.b32.xlu1 %v10969_v34, %s10690_s11  ;;  %v10977_v37 = vadd.f32 %v8335_v27, %v594_v36 }
 0x2a5   :  { %621 = vrot.lane.b32.xlu0 %v10977_v37, %s10690_s11  ;;  %613 = vrot.lane.b32.xlu1 %v10961_v29, %s10690_s11 }
 0x2a9   :  { %615 = vrot.lane.b32.xlu0 %v10983_v38, %s10690_s11  ;;  %834 = vrot.lane.b32.xlu1 %v10971_v35, %s10691_s15 }
 0x2ad   :  { %828 = vrot.lane.b32.xlu0 %v10969_v34, %s10691_s15  ;;  %830 = vrot.lane.b32.xlu1 %v10963_v31, %s10691_s15 }
 0x2b1   :  { %977 = vrot.lane.b32.xlu0 %v10971_v35, %s10692_s16  ;;  %826 = vrot.lane.b32.xlu1 %v10983_v38, %s10691_s15 }
 0x2b5   :  { %832 = vrot.lane.b32.xlu0 %v10977_v37, %s10691_s15  ;;  %824 = vrot.lane.b32.xlu1 %v10961_v29, %s10691_s15 }
 0x2b9   :  { %975 = vrot.lane.b32.xlu1 %v10977_v37, %s10692_s16 }
 0x30f   :  { %v620_v39 = vpop.permute.xlu1 %619 }
 0x313   :  { %v624_v40 = vpop.permute.xlu0 %623  ;;  %v618_v41 = vpop.permute.xlu1 %617 }
 0x314   :  { %9159 = vmatprep.subr.msk.mxu0 %vm625_vm2, %v624_v40 }
 0x315   :  { %9160 = vmatpush3.xpose.msk.msra.mxu0 %vm625_vm2, %v624_v40 }
 0x317   :  { %v622_v42 = vpop.permute.xlu0 %621  ;;  %v614_v43 = vpop.permute.xlu1 %613 }
 0x318   :  { %9161 = vmatprep.subr.msk.mxu0 %vm625_vm2, %v622_v42 }
 0x319   :  { %9162 = vmatpush3.xpose.msk.msra.mxu0 %vm625_vm2, %v622_v42 }
 0x31a   :  { %9163 = vmatprep.subr.msk.mxu0 %vm625_vm2, %v620_v39 }
 0x31b   :  { %v616_v44 = vpop.permute.xlu0 %615  ;;  %v835_v45 = vpop.permute.xlu1 %834 }
 0x31c   :  { %9180 = vmatprep.subr.mxu1 %v835_v45 }
 0x31d   :  { %9164 = vmatpush3.xpose.msk.msra.mxu0 %vm625_vm2, %v620_v39  ;;  %9181 = vmatpush3.msra.mxu1 %v835_v45 }
 0x31e   :  { %9165 = vmatprep.subr.msk.mxu0 %vm625_vm2, %v618_v41 }
 0x31f   :  { %v829_v46 = vpop.permute.xlu0 %828  ;;  %v831_v47 = vpop.permute.xlu1 %830 }
 0x321   :  { %9166 = vmatpush3.xpose.msk.msra.mxu0 %vm625_vm2, %v618_v41 }
 0x322   :  { %9167 = vmatprep.subr.msk.mxu0 %vm625_vm2, %v616_v44 }
 0x323   :  { %v11012_v48 = vpop.permute.xlu0 %977  ;;  %v827_v50 = vpop.permute.xlu1 %826 }
 0x325   :  { %9168 = vmatpush3.xpose.msk.msra.mxu0 %vm625_vm2, %v616_v44 }
 0x326   :  { %9169 = vmatprep.subr.msk.mxu0 %vm625_vm2, %v614_v43 }
 0x327   :  { %v833_v49 = vpop.permute.xlu0 %832  ;;  %v825_v51 = vpop.permute.xlu1 %824 }
 0x328   :  { %9182 = vmatprep.subr.mxu1 %v833_v49 }
 0x329   :  { %9170 = vmatpush3.xpose.msk.msra.mxu0 %vm625_vm2, %v614_v43  ;;  %9183 = vmatpush3.msra.mxu1 %v833_v49 }
 0x32a   :  { %9184 = vmatprep.subr.mxu1 %v831_v47 }
 0x32b   :  { %9185 = vmatpush3.msra.mxu1 %v831_v47  ;;  %v11063_v22 = vpop.permute.xlu1 %975 }
 0x32c   :  { %9172 = vmatmul.mubr.msk.f32.vlgmr.msra.gmra.mxu0 %vm625_vm2, %v10983_v38  ;;  %9186 = vmatprep.subr.mxu1 %v829_v46 }
 0x32d   :  { %9174 = vmatprep.mubr.msk.f32.mxu0 %vm625_vm2, %v10969_v34  ;;  %9187 = vmatpush3.msra.mxu1 %v829_v46 }
 0x32e   :  { %9188 = vmatprep.subr.mxu1 %v827_v50 }
 0x32f   :  { %9189 = vmatpush3.msra.mxu1 %v827_v50 }
 0x330   :  { %9175 = vmatmul.mubr.msk.f32.gmra.mxu0 %vm625_vm2, %v10963_v31  ;;  %9190 = vmatprep.subr.mxu1 %v825_v51 }
 0x331   :  { %9177 = vmatprep.mubr.msk.f32.mxu0 %vm625_vm2, %v10977_v37  ;;  %9191 = vmatpush3.msra.mxu1 %v825_v51 }
 0x332   :  { %9201 = vmatprep.subr.msk.mxu1 %vm625_vm2, %v11012_v48 }
 0x334   :  { %9178 = vmatmul.mubr.msk.f32.gmra.mxu0 %vm625_vm2, %v10971_v35 }
 0x3ec   :  { %v9173_v52 = vpop.f32.mrf.mxu0 }
 0x3ed   :  { %v746_v54 = vmul.f32 0.35355338, %v9173_v52 }
 0x3ee   :  { %v716_v55 = vpop.f32.mrf.mxu0 }
 0x3ef   :  { %v745_v57 = vmul.f32 0.35355338, %v716_v55  ;;  %v752_v58 = vadd.f32 %v746_v54, %v11030_v53 }
 0x3f0   :  { %v9176_v59 = vpop.f32.mrf.mxu0 }
 0x3f1   :  { %v748_v61 = vmul.f32 0.35355338, %v9176_v59  ;;  %v761_v62 = vsel %vm757_vm3, %v752_v58, -inf  ;;  %v751_v63 = vadd.f32 %v745_v57, %v11033_v56 }
 0x3f2   :  { %762 = vmax.xlane.f32.xlu1 %v761_v62  ;;  %v726_v0 = vpop.f32.mrf.mxu0 }
 0x3f3   :  { %v747_v1 = vmul.f32 0.35355338, %v726_v0  ;;  %v758_v2 = vsel %vm757_vm3, %v751_v63, -inf  ;;  %v754_v3 = vadd.f32 %v748_v61, %v11037_v60 }
 0x3f4   :  { %759 = vmax.xlane.f32.xlu0 %v758_v2  ;;  %v9179_v4 = vpop.f32.mrf.mxu0 }
 0x3f5   :  { %v750_v8 = vmul.f32 0.35355338, %v9179_v4  ;;  %v767_v10 = vsel %vm757_vm3, %v754_v3, -inf  ;;  %v753_v11 = vadd.f32 %v747_v1, %v11044_v5 }
 0x3f6   :  { %v736_v6 = vpop.f32.mrf.mxu0 }
 0x3f7   :  { %v749_v9 = vmul.f32 0.35355338, %v736_v6  ;;  %v764_v14 = vsel %vm757_vm3, %v753_v11, -inf  ;;  %v756_v18 = vadd.f32 %v750_v8, %v11052_v12 }
 0x3f8   :  { %768 = vmax.xlane.f32.xlu0 %v767_v10 }
 0x3f9   :  { %v755_v13 = vadd.f32 %v749_v9, %v11047_v7  ;;  %v773_v19 = vsel %vm757_vm3, %v756_v18, -inf }
 0x3fb   :  { %v770_v15 = vsel %vm757_vm3, %v755_v13, -inf }
 0x3fc   :  { %765 = vmax.xlane.f32.xlu0 %v764_v14  ;;  %771 = vmax.xlane.f32.xlu1 %v770_v15 }
 0x400   :  { %774 = vmax.xlane.f32.xlu0 %v773_v19 }
 0x40d   :  { %971 = vrot.lane.b32.xlu1 %v10969_v34, %s10692_s16 }
 0x416   :  { %973 = vrot.lane.b32.xlu0 %v10963_v31, %s10692_s16 }
 0x47b   :  { %v763_v23 = vpop.xlane.xlu1 %762 }
 0x47c   :  { %v777_v26 = vsub.f32 %v752_v58, %v763_v23 }
 0x47d   :  { %v760_v27 = vpop.xlane.xlu0 %759 }
 0x47e   :  { %v784_v28 = vmul.f32 1.442695, %v777_v26  ;;  %v776_v30 = vsub.f32 %v751_v63, %v760_v27 }
 0x480   :  { %10016 = vpow2.f32 %v784_v28  ;;  %v782_v32 = vmul.f32 1.442695, %v776_v30 }
 0x481   :  { %v769_v41 = vpop.xlane.xlu0 %768 }
 0x482   :  { %10018 = vpow2.f32 %v782_v32  ;;  %v779_v43 = vsub.f32 %v754_v3, %v769_v41 }
 0x484   :  { %v788_v47 = vmul.f32 1.442695, %v779_v43 }
 0x485   :  { %v766_v42 = vpop.xlane.xlu0 %765  ;;  %v772_v46 = vpop.xlane.xlu1 %771 }
 0x486   :  { %v778_v45 = vsub.f32 %v753_v11, %v766_v42  ;;  %v780_v51 = vsub.f32 %v755_v13, %v772_v46  ;;  %10020 = vpow2.f32 %v788_v47  ;;  %v603_v42 = vld [vmem:[%s12683_s18] sm:$0xff] }
 0x488   :  { %v786_v50 = vmul.f32 1.442695, %v778_v45  ;;  %v790_v54 = vmul.f32 1.442695, %v780_v51 }
 0x489   :  { %v775_v44 = vpop.xlane.xlu0 %774  ;;  %v972_v2 = vpop.permute.xlu1 %971 }
 0x48a   :  { %v781_v49 = vsub.f32 %v756_v18, %v775_v44  ;;  %10022 = vpow2.f32 %v786_v50 }
 0x48c   :  { %v792_v52 = vmul.f32 1.442695, %v781_v49 }
 0x48d   :  { %v10017_v33 = vpop.eup %10016  ;;  %v974_v1 = vpop.permute.xlu0 %973 }
 0x48e   :  { %v797_v36 = vsel %vm757_vm3, %v10017_v33, 0.0  ;;  %10024 = vpow2.f32 %v792_v52 }
 0x48f   :  { %v10019_v39 = vpop.eup %10018  ;;  %798 = vadd.xlane.f32.xlu0 %v797_v36  ;;  %10026 = vpow2.f32 %v790_v54 }
 0x490   :  { %v794_v40 = vsel %vm757_vm3, %v10019_v39, 0.0 }
 0x491   :  { %795 = vadd.xlane.f32.xlu1 %v794_v40 }
 0x493   :  { %v10021_v55 = vpop.eup %10020 }
 0x494   :  { %v803_v58 = vsel %vm757_vm3, %v10021_v55, 0.0 }
 0x497   :  { %v10023_v57 = vpop.eup %10022 }
 0x498   :  { %v800_v61 = vsel %vm757_vm3, %v10023_v57, 0.0 }
 0x49b   :  { %v10025_v59 = vpop.eup %10024 }
 0x49c   :  { %v10027_v62 = vpop.eup %10026  ;;  %v809_v63 = vsel %vm757_vm3, %v10025_v59, 0.0 }
 0x49d   :  { %v806_v0 = vsel %vm757_vm3, %v10027_v62, 0.0 }
 0x4a2   :  { %967 = vrot.lane.b32.xlu1 %v10961_v29, %s10692_s16 }
 0x4a5   :  { %969 = vrot.lane.b32.xlu0 %v10983_v38, %s10692_s16 }
 0x4c4   :  { %804 = vadd.xlane.f32.xlu0 %v803_v58 }
 0x4c6   :  { %801 = vadd.xlane.f32.xlu1 %v800_v61 }
 0x4c8   :  { %810 = vadd.xlane.f32.xlu0 %v809_v63 }
 0x4ca   :  { %807 = vadd.xlane.f32.xlu1 %v806_v0 }
 0x4db   :  { %957 = vrot.lane.b32.xlu1 %v10983_v38, %s10693_s14 }
 0x4de   :  { %955 = vrot.lane.b32.xlu0 %v10961_v29, %s10693_s14 }
 0x4df   :  { %961 = vrot.lane.b32.xlu1 %v10963_v31, %s10693_s14 }
 0x4e2   :  { %959 = vrot.lane.b32.xlu0 %v10969_v34, %s10693_s14 }
 0x4e3   :  { %965 = vrot.lane.b32.xlu1 %v10971_v35, %s10693_s14 }
 0x4e6   :  { %963 = vrot.lane.b32.xlu0 %v10977_v37, %s10693_s14 }
 0x518   :  { %v799_v3 = vpop.xlane.xlu0 %798 }
 0x519   :  { %10028 = vrcp.f32 %v799_v3 }
 0x51a   :  { %v796_v4 = vpop.xlane.xlu1 %795 }
 0x51b   :  { %10030 = vrcp.f32 %v796_v4 }
 0x51c   :  { %v970_v11 = vpop.permute.xlu0 %969 }
 0x51e   :  { %v968_v13 = vpop.permute.xlu1 %967 }
 0x526   :  { %v10029_v6 = vpop.eup %10028 }
 0x527   :  { %v819_v10 = vmul.f32 %v10029_v6, %v10017_v33 }
 0x528   :  { %v10031_v8 = vpop.eup %10030 }
 0x529   :  { %v818_v9 = vmul.f32 %v10031_v8, %v10019_v39 }
 0x52b   :  { %9192 = vmatprep.mubr.msk.f32.mxu1 %vm757_vm3, %v818_v9 }
 0x52c   :  { %9193 = vmatmul.mubr.msk.f32.vlgmr.msra.gmra.mxu1 %vm757_vm3, %v819_v10 }
 0x52d   :  { %9202 = vmatpush3.xpose.msk.msra.mxu1 %vm625_vm2, %v11012_v48 }
 0x52e   :  { %9203 = vmatprep.subr.msk.mxu1 %vm625_vm2, %v11063_v22 }
 0x531   :  { %9204 = vmatpush3.xpose.msk.msra.mxu1 %vm625_vm2, %v11063_v22 }
 0x532   :  { %9205 = vmatprep.subr.msk.mxu1 %vm625_vm2, %v974_v1 }
 0x535   :  { %9206 = vmatpush3.xpose.msk.msra.mxu1 %vm625_vm2, %v974_v1 }
 0x536   :  { %9207 = vmatprep.subr.msk.mxu1 %vm625_vm2, %v972_v2 }
 0x539   :  { %9208 = vmatpush3.xpose.msk.msra.mxu1 %vm625_vm2, %v972_v2 }
 0x53a   :  { %9209 = vmatprep.subr.msk.mxu1 %vm625_vm2, %v970_v11 }
 0x53d   :  { %9210 = vmatpush3.xpose.msk.msra.mxu1 %vm625_vm2, %v970_v11 }
 0x53e   :  { %9211 = vmatprep.subr.msk.mxu1 %vm625_vm2, %v968_v13 }
 0x541   :  { %9212 = vmatpush3.xpose.msk.msra.mxu1 %vm625_vm2, %v968_v13 }
 0x542   :  { %9254 = vmatprep.subr.mxu1 %v603_v42 }
 0x54d   :  { %v805_v48 = vpop.xlane.xlu0 %804 }
 0x54e   :  { %10032 = vrcp.f32 %v805_v48 }
 0x54f   :  { %v802_v14 = vpop.xlane.xlu1 %801 }
 0x550   :  { %10034 = vrcp.f32 %v802_v14 }
 0x551   :  { %v811_v15 = vpop.xlane.xlu0 %810 }
 0x552   :  { %10036 = vrcp.f32 %v811_v15 }
 0x553   :  { %v808_v18 = vpop.xlane.xlu1 %807 }
 0x554   :  { %10038 = vrcp.f32 %v808_v18 }
 0x555   :  { %v956_v30 = vpop.permute.xlu0 %955 }
 0x557   :  { %v958_v36 = vpop.permute.xlu1 %957 }
 0x559   :  { %v960_v39 = vpop.permute.xlu0 %959 }
 0x55b   :  { %v10033_v19 = vpop.eup %10032  ;;  %v962_v40 = vpop.permute.xlu1 %961 }
 0x55c   :  { %v821_v26 = vmul.f32 %v10033_v19, %v10021_v55 }
 0x55d   :  { %v10035_v22 = vpop.eup %10034  ;;  %v964_v41 = vpop.permute.xlu0 %963 }
 0x55e   :  { %v820_v23 = vmul.f32 %v10035_v22, %v10023_v57 }
 0x55f   :  { %v10037_v27 = vpop.eup %10036  ;;  %v966_v43 = vpop.permute.xlu1 %965 }
 0x560   :  { %9195 = vmatprep.mubr.msk.f32.mxu1 %vm757_vm3, %v820_v23  ;;  %v823_v33 = vmul.f32 %v10037_v27, %v10025_v59 }
 0x561   :  { %v10039_v28 = vpop.eup %10038  ;;  %9196 = vmatmul.mubr.msk.f32.gmra.mxu1 %vm757_vm3, %v821_v26 }
 0x562   :  { %v822_v32 = vmul.f32 %v10039_v28, %v10027_v62 }
 0x564   :  { %9198 = vmatprep.mubr.msk.f32.mxu1 %vm757_vm3, %v822_v32 }
 0x565   :  { %9199 = vmatmul.mubr.msk.f32.gmra.mxu1 %vm757_vm3, %v823_v33 }
 0x566   :  { %9213 = vmatprep.mubr.msk.f32.mxu1 %vm625_vm2, %v956_v30 }
 0x569   :  { %9214 = vmatmul.mubr.msk.f32.vlgmr.msra.gmra.mxu1 %vm625_vm2, %v958_v36 }
 0x56a   :  { %9216 = vmatprep.mubr.msk.f32.mxu1 %vm625_vm2, %v960_v39  ;;  %9255 = vmatpush3.msra.mxu1 %v603_v42 }
 0x56d   :  { %9217 = vmatmul.mubr.msk.f32.gmra.mxu1 %vm625_vm2, %v962_v40 }
 0x56e   :  { %9219 = vmatprep.mubr.msk.f32.mxu1 %vm625_vm2, %v964_v41 }
 0x571   :  { %9220 = vmatmul.mubr.msk.f32.gmra.mxu1 %vm625_vm2, %v966_v43 }
 0x5ec   :  { %v9194_v44 = vpop.f32.mrf.mxu1 }
 0x5ee   :  { %v926_v45 = vpop.f32.mrf.mxu1 }
 0x5ef   :  { %9256 = vmatprep.mubr.msk.f32.mxu1 %vm625_vm2, %v926_v45 }
 0x5f0   :  { %9257 = vmatmul.mubr.msk.f32.vlgmr.msra.gmra.mxu1 %vm625_vm2, %v9194_v44 }
 0x621   :  { %v9197_v46 = vpop.f32.mrf.mxu1 }
 0x623   :  { %v936_v47 = vpop.f32.mrf.mxu1 }
 0x624   :  { %9259 = vmatprep.mubr.msk.f32.mxu1 %vm625_vm2, %v936_v47 }
 0x625   :  { %v9200_v49 = vpop.f32.mrf.mxu1  ;;  %9260 = vmatmul.mubr.msk.f32.gmra.mxu1 %vm625_vm2, %v9197_v46 }
 0x627   :  { %v946_v50 = vpop.f32.mrf.mxu1 }
 0x628   :  { %9262 = vmatprep.mubr.msk.f32.mxu1 %vm625_vm2, %v946_v50 }
 0x629   :  { %v9215_v51 = vpop.f32.mrf.mxu1  ;;  %9263 = vmatmul.mubr.msk.f32.gmra.mxu1 %vm625_vm2, %v9200_v49 }
 0x62a   :  { %v1099_v52 = vmul.f32 0.35355338, %v9215_v51 }
 0x62b   :  { %v1069_v54 = vpop.f32.mrf.mxu1 }
 0x62c   :  { %v1098_v55 = vmul.f32 0.35355338, %v1069_v54  ;;  %v1105_v57 = vadd.f32 %v1099_v52, %v11030_v53 }
 0x62d   :  { %v9218_v58 = vpop.f32.mrf.mxu1 }
 0x62e   :  { %v1101_v59 = vmul.f32 0.35355338, %v9218_v58  ;;  %v1113_v61 = vsel %vm757_vm3, %v1105_v57, -inf  ;;  %v1104_v62 = vadd.f32 %v1098_v55, %v11033_v56 }
 0x62f   :  { %1114 = vmax.xlane.f32.xlu1 %v1113_v61  ;;  %v1079_v63 = vpop.f32.mrf.mxu1 }
 0x630   :  { %v1100_v0 = vmul.f32 0.35355338, %v1079_v63  ;;  %v1110_v1 = vsel %vm757_vm3, %v1104_v62, -inf  ;;  %v1107_v2 = vadd.f32 %v1101_v59, %v11037_v60 }
 0x631   :  { %1111 = vmax.xlane.f32.xlu0 %v1110_v1  ;;  %v9221_v3 = vpop.f32.mrf.mxu1 }
 0x632   :  { %v1103_v6 = vmul.f32 0.35355338, %v9221_v3  ;;  %v1119_v9 = vsel %vm757_vm3, %v1107_v2, -inf  ;;  %v1106_v10 = vadd.f32 %v1100_v0, %v11044_v5 }
 0x633   :  { %v1089_v4 = vpop.f32.mrf.mxu1 }
 0x634   :  { %v1102_v8 = vmul.f32 0.35355338, %v1089_v4  ;;  %v1116_v13 = vsel %vm757_vm3, %v1106_v10, -inf  ;;  %v1109_v14 = vadd.f32 %v1103_v6, %v11052_v12 }
 0x635   :  { %1120 = vmax.xlane.f32.xlu0 %v1119_v9 }
 0x636   :  { %v1108_v11 = vadd.f32 %v1102_v8, %v11047_v7  ;;  %v1125_v15 = vsel %vm757_vm3, %v1109_v14, -inf }
 0x638   :  { %v1122_v48 = vsel %vm757_vm3, %v1108_v11, -inf }
 0x639   :  { %1117 = vmax.xlane.f32.xlu0 %v1116_v13  ;;  %1123 = vmax.xlane.f32.xlu1 %v1122_v48 }
 0x63d   :  { %1126 = vmax.xlane.f32.xlu0 %v1125_v15 }
 0x6b8   :  { %v1115_v18 = vpop.xlane.xlu1 %1114 }
 0x6b9   :  { %v1129_v19 = vsub.f32 %v1105_v57, %v1115_v18  ;;  %v604_v18 = vld [vmem:[%s12683_s18 + $0x8] sm:$0xff] }
 0x6ba   :  { %v1112_v22 = vpop.xlane.xlu0 %1111 }
 0x6bb   :  { %v1136_v23 = vmul.f32 1.442695, %v1129_v19  ;;  %v1128_v26 = vsub.f32 %v1104_v62, %v1112_v22 }
 0x6bd   :  { %10040 = vpow2.f32 %v1136_v23  ;;  %v1134_v27 = vmul.f32 1.442695, %v1128_v26 }
 0x6be   :  { %v1121_v28 = vpop.xlane.xlu0 %1120 }
 0x6bf   :  { %10042 = vpow2.f32 %v1134_v27  ;;  %v1131_v30 = vsub.f32 %v1107_v2, %v1121_v28 }
 0x6c1   :  { %v1140_v32 = vmul.f32 1.442695, %v1131_v30 }
 0x6c2   :  { %v1118_v33 = vpop.xlane.xlu0 %1117  ;;  %v1124_v52 = vpop.xlane.xlu1 %1123 }
 0x6c3   :  { %10044 = vpow2.f32 %v1140_v32  ;;  %v1130_v36 = vsub.f32 %v1106_v10, %v1118_v33  ;;  %v1132_v54 = vsub.f32 %v1108_v11, %v1124_v52 }
 0x6c5   :  { %v1138_v39 = vmul.f32 1.442695, %v1130_v36  ;;  %v1142_v55 = vmul.f32 1.442695, %v1132_v54 }
 0x6c6   :  { %v1127_v49 = vpop.xlane.xlu0 %1126 }
 0x6c7   :  { %10046 = vpow2.f32 %v1138_v39  ;;  %v1133_v50 = vsub.f32 %v1109_v14, %v1127_v49 }
 0x6c9   :  { %v1144_v51 = vmul.f32 1.442695, %v1133_v50 }
 0x6ca   :  { %v11132_v40 = vpop.eup %10040 }
 0x6cb   :  { %v1149_v41 = vsel %vm757_vm3, %v11132_v40, 0.0  ;;  %10048 = vpow2.f32 %v1144_v51 }
 0x6cc   :  { %v11136_v42 = vpop.eup %10042  ;;  %1150 = vadd.xlane.f32.xlu0 %v1149_v41  ;;  %10050 = vpow2.f32 %v1142_v55 }
 0x6cd   :  { %v1146_v43 = vsel %vm757_vm3, %v11136_v42, 0.0 }
 0x6ce   :  { %1147 = vadd.xlane.f32.xlu1 %v1146_v43 }
 0x6d0   :  { %v11140_v44 = vpop.eup %10044 }
 0x6d1   :  { %v1155_v45 = vsel %vm757_vm3, %v11140_v44, 0.0 }
 0x6d2   :  { %1156 = vadd.xlane.f32.xlu0 %v1155_v45 }
 0x6d4   :  { %v11144_v46 = vpop.eup %10046 }
 0x6d5   :  { %v1152_v47 = vsel %vm757_vm3, %v11144_v46, 0.0 }
 0x6d6   :  { %1153 = vadd.xlane.f32.xlu1 %v1152_v47 }
 0x6d8   :  { %v11158_v57 = vpop.eup %10048 }
 0x6d9   :  { %v1161_v58 = vsel %vm757_vm3, %v11158_v57, 0.0  ;;  %v11162_v59 = vpop.eup %10050 }
 0x6da   :  { %v1158_v61 = vsel %vm757_vm3, %v11162_v59, 0.0 }
 0x6e7   :  { %1186 = vrot.lane.b32.xlu1 %v10971_v35, %s10694_s24 }
 0x6e8   :  { %1184 = vrot.lane.b32.xlu0 %v10977_v37, %s10694_s24 }
 0x6ec   :  { %1182 = vrot.lane.b32.xlu0 %v10963_v31, %s10694_s24 }
 0x6f0   :  { %1180 = vrot.lane.b32.xlu0 %v10969_v34, %s10694_s24 }
 0x6f4   :  { %1178 = vrot.lane.b32.xlu0 %v10983_v38, %s10694_s24 }
 0x70b   :  { %1162 = vadd.xlane.f32.xlu1 %v1161_v58 }
 0x713   :  { %1159 = vadd.xlane.f32.xlu0 %v1158_v61 }
 0x71c   :  { %1549 = vrot.lane.b32.xlu1 %v10969_v34, %s10695_s23 }
 0x720   :  { %1537 = vrot.lane.b32.xlu1 %v10969_v34, %s10696_s3 }
 0x724   :  { %1541 = vrot.lane.b32.xlu1 %v10977_v37, %s10696_s3 }
 0x728   :  { %2026 = vrot.lane.b32.xlu1 %v10971_v35, %s10697_s22 }
 0x729   :  { %1176 = vrot.lane.b32.xlu0 %v10961_v29, %s10694_s24 }
 0x72c   :  { %2022 = vrot.lane.b32.xlu1 %v10963_v31, %s10697_s22 }
 0x72d   :  { %1555 = vrot.lane.b32.xlu0 %v10971_v35, %s10695_s23 }
 0x730   :  { %2018 = vrot.lane.b32.xlu1 %v10983_v38, %s10697_s22 }
 0x731   :  { %1553 = vrot.lane.b32.xlu0 %v10977_v37, %s10695_s23 }
 0x734   :  { %2004 = vrot.lane.b32.xlu1 %v10961_v29, %s10698_s4 }
 0x735   :  { %1551 = vrot.lane.b32.xlu0 %v10963_v31, %s10695_s23 }
 0x738   :  { %2008 = vrot.lane.b32.xlu1 %v10969_v34, %s10698_s4 }
 0x739   :  { %1547 = vrot.lane.b32.xlu0 %v10983_v38, %s10695_s23 }
 0x73c   :  { %2012 = vrot.lane.b32.xlu1 %v10977_v37, %s10698_s4 }
 0x73d   :  { %1545 = vrot.lane.b32.xlu0 %v10961_v29, %s10695_s23 }
 0x741   :  { %1533 = vrot.lane.b32.xlu0 %v10961_v29, %s10696_s3 }
 0x745   :  { %1535 = vrot.lane.b32.xlu0 %v10983_v38, %s10696_s3 }
 0x749   :  { %1539 = vrot.lane.b32.xlu0 %v10963_v31, %s10696_s3 }
 0x74d   :  { %1543 = vrot.lane.b32.xlu0 %v10971_v35, %s10696_s3 }
 0x751   :  { %2024 = vrot.lane.b32.xlu0 %v10977_v37, %s10697_s22 }
 0x755   :  { %2020 = vrot.lane.b32.xlu0 %v10969_v34, %s10697_s22  ;;  %v1151_v62 = vpop.xlane.xlu0 %1150 }
 0x757   :  { %v1148_v63 = vpop.xlane.xlu1 %1147 }
 0x758   :  { %10052 = vrcp.f32 %v1148_v63 }
 0x759   :  { %2016 = vrot.lane.b32.xlu0 %v10961_v29, %s10697_s22  ;;  %10054 = vrcp.f32 %v1151_v62 }
 0x75b   :  { %v1157_v0 = vpop.xlane.xlu0 %1156 }
 0x75d   :  { %2006 = vrot.lane.b32.xlu0 %v10983_v38, %s10698_s4 }
 0x75f   :  { %v1185_v1 = vpop.permute.xlu0 %1184  ;;  %v1154_v2 = vpop.xlane.xlu1 %1153 }
 0x760   :  { %10056 = vrcp.f32 %v1154_v2 }
 0x761   :  { %2010 = vrot.lane.b32.xlu0 %v10963_v31, %s10698_s4  ;;  %10058 = vrcp.f32 %v1157_v0 }
 0x763   :  { %v1183_v3 = vpop.permute.xlu0 %1182  ;;  %v1187_v4 = vpop.permute.xlu1 %1186 }
 0x764   :  { %9222 = vmatprep.subr.mxu0 %v1187_v4 }
 0x765   :  { %v10053_v6 = vpop.eup %10052  ;;  %2014 = vrot.lane.b32.xlu0 %v10971_v35, %s10698_s4  ;;  %9223 = vmatpush3.msra.mxu0 %v1187_v4 }
 0x766   :  { %9224 = vmatprep.subr.mxu0 %v1185_v1  ;;  %v1170_v8 = vmul.f32 %v10053_v6, %v11136_v42  ;;  %v10055_v48 = vpop.eup %10054 }
 0x767   :  { %v1181_v9 = vpop.permute.xlu0 %1180  ;;  %9225 = vmatpush3.msra.mxu0 %v1185_v1  ;;  %v1171_v19 = vmul.f32 %v10055_v48, %v11132_v40 }
 0x768   :  { %9226 = vmatprep.subr.mxu0 %v1183_v3  ;;  %9234 = vmatprep.mubr.msk.f32.mxu0 %vm757_vm3, %v1170_v8 }
 0x769   :  { %9227 = vmatpush3.msra.mxu0 %v1183_v3 }
 0x76a   :  { %9228 = vmatprep.subr.mxu0 %v1181_v9 }
 0x76b   :  { %v1179_v10 = vpop.permute.xlu0 %1178  ;;  %9229 = vmatpush3.msra.mxu0 %v1181_v9 }
 0x76c   :  { %9230 = vmatprep.subr.mxu0 %v1179_v10 }
 0x76d   :  { %9231 = vmatpush3.msra.mxu0 %v1179_v10  ;;  %v10057_v14 = vpop.eup %10056 }
 0x76e   :  { %v10059_v22 = vpop.eup %10058  ;;  %v1172_v23 = vmul.f32 %v10057_v14, %v11144_v46 }
 0x76f   :  { %v1173_v27 = vmul.f32 %v10059_v22, %v11140_v44 }
 0x794   :  { %v1163_v11 = vpop.xlane.xlu1 %1162 }
 0x795   :  { %10060 = vrcp.f32 %v1163_v11 }
 0x798   :  { %v1550_v42 = vpop.permute.xlu1 %1549 }
 0x79c   :  { %v1160_v13 = vpop.xlane.xlu0 %1159  ;;  %v1538_v47 = vpop.permute.xlu1 %1537 }
 0x79d   :  { %10062 = vrcp.f32 %v1160_v13 }
 0x7a0   :  { %v1177_v15 = vpop.permute.xlu0 %1176  ;;  %v1542_v52 = vpop.permute.xlu1 %1541 }
 0x7a1   :  { %9232 = vmatprep.subr.mxu0 %v1177_v15 }
 0x7a2   :  { %9233 = vmatpush3.msra.mxu0 %v1177_v15  ;;  %v10061_v28 = vpop.eup %10060 }
 0x7a3   :  { %9235 = vmatmul.mubr.msk.f32.vlgmr.msra.gmra.mxu0 %vm757_vm3, %v1171_v19  ;;  %9243 = vmatprep.subr.mxu0 %v604_v18  ;;  %v1175_v33 = vmul.f32 %v10061_v28, %v11158_v57 }
 0x7a4   :  { %v1556_v26 = vpop.permute.xlu0 %1555  ;;  %9237 = vmatprep.mubr.msk.f32.mxu0 %vm757_vm3, %v1172_v23  ;;  %9244 = vmatpush3.msra.mxu0 %v604_v18  ;;  %v2027_v57 = vpop.permute.xlu1 %2026 }
 0x7a5   :  { %9265 = vmatprep.subr.msk.mxu0 %vm625_vm2, %v1556_v26 }
 0x7a7   :  { %9238 = vmatmul.mubr.msk.f32.gmra.mxu0 %vm757_vm3, %v1173_v27 }
 0x7a8   :  { %v1554_v36 = vpop.permute.xlu0 %1553 }
 0x7aa   :  { %v10063_v30 = vpop.eup %10062 }
 0x7ab   :  { %v1174_v32 = vmul.f32 %v10063_v30, %v11162_v59  ;;  %v2023_v59 = vpop.permute.xlu1 %2022 }
 0x7ac   :  { %v1552_v39 = vpop.permute.xlu0 %1551 }
 0x7ad   :  { %9240 = vmatprep.mubr.msk.f32.mxu0 %vm757_vm3, %v1174_v32 }
 0x7ae   :  { %9241 = vmatmul.mubr.msk.f32.gmra.mxu0 %vm757_vm3, %v1175_v33 }
 0x7af   :  { %v2019_v62 = vpop.permute.xlu1 %2018 }
 0x7b0   :  { %v1548_v40 = vpop.permute.xlu0 %1547 }
 0x7b3   :  { %v2005_v0 = vpop.permute.xlu1 %2004 }
 0x7b4   :  { %v1546_v41 = vpop.permute.xlu0 %1545 }
 0x7b7   :  { %v2009_v3 = vpop.permute.xlu1 %2008 }
 0x7b8   :  { %v1534_v46 = vpop.permute.xlu0 %1533 }
 0x7bb   :  { %v2013_v6 = vpop.permute.xlu1 %2012 }
 0x7bc   :  { %v1536_v50 = vpop.permute.xlu0 %1535 }
 0x7c0   :  { %v1540_v55 = vpop.permute.xlu0 %1539 }
 0x7c4   :  { %v1544_v58 = vpop.permute.xlu0 %1543 }
 0x7c8   :  { %v2025_v61 = vpop.permute.xlu0 %2024 }
 0x7cc   :  { %v2021_v63 = vpop.permute.xlu0 %2020 }
 0x7d0   :  { %v2017_v1 = vpop.permute.xlu0 %2016 }
 0x7d4   :  { %v2007_v2 = vpop.permute.xlu0 %2006 }
 0x7d8   :  { %v2011_v4 = vpop.permute.xlu0 %2010 }
 0x7dc   :  { %v2015_v8 = vpop.permute.xlu0 %2014 }
 0x863   :  { %v9236_v43 = vpop.f32.mrf.mxu0 }
 0x865   :  { %v1278_v45 = vpop.f32.mrf.mxu0 }
 0x866   :  { %9245 = vmatprep.mubr.msk.f32.mxu0 %vm625_vm2, %v1278_v45 }
 0x867   :  { %v9239_v44 = vpop.f32.mrf.mxu0  ;;  %9246 = vmatmul.mubr.msk.f32.vlgmr.msra.gmra.mxu0 %vm625_vm2, %v9236_v43 }
 0x868   :  { %9266 = vmatpush3.xpose.msk.msra.mxu0 %vm625_vm2, %v1556_v26 }
 0x869   :  { %9267 = vmatprep.subr.msk.mxu0 %vm625_vm2, %v1554_v36  ;;  %v1288_v49 = vpop.f32.mrf.mxu0 }
 0x86a   :  { %9248 = vmatprep.mubr.msk.f32.mxu0 %vm625_vm2, %v1288_v49 }
 0x86b   :  { %9249 = vmatmul.mubr.msk.f32.gmra.mxu0 %vm625_vm2, %v9239_v44 }
 0x86c   :  { %9268 = vmatpush3.xpose.msk.msra.mxu0 %vm625_vm2, %v1554_v36 }
 0x86d   :  { %9269 = vmatprep.subr.msk.mxu0 %vm625_vm2, %v1552_v39 }
 0x86e   :  { %v9242_v51 = vpop.f32.mrf.mxu0 }
 0x870   :  { %9270 = vmatpush3.xpose.msk.msra.mxu0 %vm625_vm2, %v1552_v39  ;;  %v1298_v54 = vpop.f32.mrf.mxu0 }
 0x871   :  { %9271 = vmatprep.subr.msk.mxu0 %vm625_vm2, %v1550_v42  ;;  %9251 = vmatprep.mubr.msk.f32.mxu0 %vm625_vm2, %v1298_v54 }
 0x872   :  { %9252 = vmatmul.mubr.msk.f32.gmra.mxu0 %vm625_vm2, %v9242_v51 }
 0x873   :  { %9277 = vmatprep.mubr.msk.f32.mxu0 %vm625_vm2, %v1534_v46 }
 0x874   :  { %9272 = vmatpush3.xpose.msk.msra.mxu0 %vm625_vm2, %v1550_v42 }
 0x875   :  { %9273 = vmatprep.subr.msk.mxu0 %vm625_vm2, %v1548_v40 }
 0x878   :  { %9274 = vmatpush3.xpose.msk.msra.mxu0 %vm625_vm2, %v1548_v40 }
 0x879   :  { %9275 = vmatprep.subr.msk.mxu0 %vm625_vm2, %v1546_v41 }
 0x87c   :  { %9276 = vmatpush3.xpose.msk.msra.mxu0 %vm625_vm2, %v1546_v41 }
 0x87d   :  { %9318 = vmatprep.subr.msk.mxu0 %vm625_vm2, %v2027_v57 }
 0x87f   :  { %9278 = vmatmul.mubr.msk.f32.vlgmr.msra.gmra.mxu0 %vm625_vm2, %v1536_v50 }
 0x880   :  { %9280 = vmatprep.mubr.msk.f32.mxu0 %vm625_vm2, %v1538_v47  ;;  %9319 = vmatpush3.xpose.msk.msra.mxu0 %vm625_vm2, %v2027_v57 }
 0x881   :  { %9320 = vmatprep.subr.msk.mxu0 %vm625_vm2, %v2025_v61 }
 0x883   :  { %9281 = vmatmul.mubr.msk.f32.gmra.mxu0 %vm625_vm2, %v1540_v55 }
 0x884   :  { %9283 = vmatprep.mubr.msk.f32.mxu0 %vm625_vm2, %v1542_v52  ;;  %9321 = vmatpush3.xpose.msk.msra.mxu0 %vm625_vm2, %v2025_v61 }
 0x885   :  { %9322 = vmatprep.subr.msk.mxu0 %vm625_vm2, %v2023_v59 }
 0x887   :  { %9284 = vmatmul.mubr.msk.f32.gmra.mxu0 %vm625_vm2, %v1544_v58 }
 0x888   :  { %9323 = vmatpush3.xpose.msk.msra.mxu0 %vm625_vm2, %v2023_v59  ;;  %9330 = vmatprep.mubr.msk.f32.mxu0 %vm625_vm2, %v2005_v0 }
 0x889   :  { %9324 = vmatprep.subr.msk.mxu0 %vm625_vm2, %v2021_v63 }
 0x88c   :  { %9325 = vmatpush3.xpose.msk.msra.mxu0 %vm625_vm2, %v2021_v63 }
 0x88d   :  { %9326 = vmatprep.subr.msk.mxu0 %vm625_vm2, %v2019_v62 }
 0x890   :  { %9327 = vmatpush3.xpose.msk.msra.mxu0 %vm625_vm2, %v2019_v62 }
 0x891   :  { %9328 = vmatprep.subr.msk.mxu0 %vm625_vm2, %v2017_v1 }
 0x894   :  { %9329 = vmatpush3.xpose.msk.msra.mxu0 %vm625_vm2, %v2017_v1 }
 0x897   :  { %9331 = vmatmul.mubr.msk.f32.vlgmr.msra.gmra.mxu0 %vm625_vm2, %v2007_v2 }
 0x898   :  { %9333 = vmatprep.mubr.msk.f32.mxu0 %vm625_vm2, %v2009_v3 }
 0x89b   :  { %9334 = vmatmul.mubr.msk.f32.gmra.mxu0 %vm625_vm2, %v2011_v4 }
 0x89c   :  { %9336 = vmatprep.mubr.msk.f32.mxu0 %vm625_vm2, %v2013_v6 }
 0x89f   :  { %9337 = vmatmul.mubr.msk.f32.gmra.mxu0 %vm625_vm2, %v2015_v8 }
 0x927   :  { %v11271_v9 = vpop.f32.mrf.mxu0 }
 0x929   :  { %v11273_v10 = vpop.f32.mrf.mxu0 }
 0x92b   :  { %v11275_v11 = vpop.f32.mrf.mxu0 }
 0x92d   :  { %v11277_v13 = vpop.f32.mrf.mxu0 }
 0x932   :  { %v11279_v48 = vpop.f32.mrf.mxu0 }
 0x934   :  { %v11281_v14 = vpop.f32.mrf.mxu0 }
 0x93f   :  { %v9279_v15 = vpop.f32.mrf.mxu0 }
 0x940   :  { %v1677_v18 = vmul.f32 0.35355338, %v9279_v15 }
 0x941   :  { %v1647_v19 = vpop.f32.mrf.mxu0 }
 0x942   :  { %v1676_v22 = vmul.f32 0.35355338, %v1647_v19  ;;  %v1683_v23 = vadd.f32 %v1677_v18, %v11030_v53 }
 0x943   :  { %v9282_v26 = vpop.f32.mrf.mxu0 }
 0x944   :  { %v1679_v27 = vmul.f32 0.35355338, %v9282_v26  ;;  %v1691_v28 = vsel %vm757_vm3, %v1683_v23, -inf  ;;  %v1682_v30 = vadd.f32 %v1676_v22, %v11033_v56 }
 0x945   :  { %1692 = vmax.xlane.f32.xlu0 %v1691_v28  ;;  %v1657_v32 = vpop.f32.mrf.mxu0 }
 0x946   :  { %v1678_v33 = vmul.f32 0.35355338, %v1657_v32  ;;  %v1688_v36 = vsel %vm757_vm3, %v1682_v30, -inf  ;;  %v1685_v39 = vadd.f32 %v1679_v27, %v11037_v60 }
 0x947   :  { %1689 = vmax.xlane.f32.xlu1 %v1688_v36  ;;  %v9285_v40 = vpop.f32.mrf.mxu0 }
 0x948   :  { %v1681_v41 = vmul.f32 0.35355338, %v9285_v40  ;;  %v1684_v42 = vadd.f32 %v1678_v33, %v11044_v5  ;;  %v1697_v44 = vsel %vm757_vm3, %v1685_v39, -inf }
 0x949   :  { %v1667_v43 = vpop.f32.mrf.mxu0 }
 0x94a   :  { %v1680_v45 = vmul.f32 0.35355338, %v1667_v43  ;;  %v1694_v46 = vsel %vm757_vm3, %v1684_v42, -inf  ;;  %v1687_v47 = vadd.f32 %v1681_v41, %v11052_v12 }
 0x94b   :  { %1698 = vmax.xlane.f32.xlu1 %v1697_v44  ;;  %1695 = vmax.xlane.f32.xlu0 %v1694_v46 }
 0x94c   :  { %v1686_v49 = vadd.f32 %v1680_v45, %v11047_v7  ;;  %v1703_v50 = vsel %vm757_vm3, %v1687_v47, -inf }
 0x94e   :  { %v1700_v51 = vsel %vm757_vm3, %v1686_v49, -inf }
 0x94f   :  { %1704 = vmax.xlane.f32.xlu1 %v1703_v50  ;;  %1701 = vmax.xlane.f32.xlu0 %v1700_v51 }
 0x957   :  { %v9332_v44 = vpop.f32.mrf.mxu0 }
 0x958   :  { %v2148_v50 = vmul.f32 0.35355338, %v9332_v44 }
 0x959   :  { %v2118_v46 = vpop.f32.mrf.mxu0 }
 0x95a   :  { %v2147_v51 = vmul.f32 0.35355338, %v2118_v46 }
 0x960   :  { %1762 = vrot.lane.b32.xlu1 %v10977_v37, %s10699_s12 }
 0x964   :  { %1760 = vrot.lane.b32.xlu1 %v10963_v31, %s10699_s12 }
 0x965   :  { %1764 = vrot.lane.b32.xlu0 %v10971_v35, %s10699_s12 }
 0x969   :  { %1758 = vrot.lane.b32.xlu0 %v10969_v34, %s10699_s12 }
 0x9ce   :  { %v1693_v52 = vpop.xlane.xlu0 %1692 }
 0x9cf   :  { %v1707_v54 = vsub.f32 %v1683_v23, %v1693_v52 }
 0x9d0   :  { %v1690_v55 = vpop.xlane.xlu1 %1689 }
 0x9d1   :  { %v1714_v57 = vmul.f32 1.442695, %v1707_v54  ;;  %v1706_v58 = vsub.f32 %v1682_v30, %v1690_v55  ;;  %v11332_v54 = vadd.f32 %v2148_v50, %v11030_v53 }
 0x9d3   :  { %10064 = vpow2.f32 %v1714_v57  ;;  %v1712_v59 = vmul.f32 1.442695, %v1706_v58 }
 0x9d4   :  { %v1696_v61 = vpop.xlane.xlu0 %1695  ;;  %v1699_v62 = vpop.xlane.xlu1 %1698 }
 0x9d5   :  { %10066 = vpow2.f32 %v1712_v59  ;;  %v1708_v63 = vsub.f32 %v1684_v42, %v1696_v61  ;;  %v1709_v0 = vsub.f32 %v1685_v39, %v1699_v62  ;;  %v11335_v59 = vadd.f32 %v2147_v51, %v11033_v56 }
 0x9d7   :  { %v1716_v1 = vmul.f32 1.442695, %v1708_v63  ;;  %v1718_v2 = vmul.f32 1.442695, %v1709_v0  ;;  %v2162_v63 = vsel %vm757_vm3, %v11332_v54, -inf }
 0x9d8   :  { %v1702_v3 = vpop.xlane.xlu0 %1701  ;;  %v1705_v4 = vpop.xlane.xlu1 %1704 }
 0x9d9   :  { %10068 = vpow2.f32 %v1716_v1  ;;  %v1710_v6 = vsub.f32 %v1686_v49, %v1702_v3  ;;  %v1711_v8 = vsub.f32 %v1687_v47, %v1705_v4  ;;  %v9335_v47 = vpop.f32.mrf.mxu0  ;;  %v2159_v1 = vsel %vm757_vm3, %v11335_v59, -inf }
 0x9da   :  { %10070 = vpow2.f32 %v1718_v2  ;;  %v2150_v57 = vmul.f32 0.35355338, %v9335_v47 }
 0x9db   :  { %v1720_v15 = vmul.f32 1.442695, %v1710_v6  ;;  %v1722_v18 = vmul.f32 1.442695, %v1711_v8  ;;  %v2128_v49 = vpop.f32.mrf.mxu0 }
 0x9dc   :  { %v1765_v19 = vpop.permute.xlu0 %1764  ;;  %v1763_v22 = vpop.permute.xlu1 %1762  ;;  %v2149_v55 = vmul.f32 0.35355338, %v2128_v49  ;;  %v11345_v53 = vadd.f32 %v2150_v57, %v11037_v60 }
 0x9dd   :  { %10072 = vpow2.f32 %v1720_v15  ;;  %9286 = vmatprep.subr.mxu1 %v1765_v19  ;;  %v9338_v52 = vpop.f32.mrf.mxu0 }
 0x9de   :  { %10074 = vpow2.f32 %v1722_v18  ;;  %9287 = vmatpush3.msra.mxu1 %v1765_v19  ;;  %v11338_v61 = vadd.f32 %v2149_v55, %v11044_v5  ;;  %v2152_v0 = vmul.f32 0.35355338, %v9338_v52  ;;  %v2168_v5 = vsel %vm757_vm3, %v11345_v53, -inf }
 0x9df   :  { %9288 = vmatprep.subr.mxu1 %v1763_v22  ;;  %v2138_v58 = vpop.f32.mrf.mxu0 }
 0x9e0   :  { %v11303_v23 = vpop.eup %10064  ;;  %9289 = vmatpush3.msra.mxu1 %v1763_v22  ;;  %v1761_v26 = vpop.permute.xlu1 %1760  ;;  %v2151_v62 = vmul.f32 0.35355338, %v2138_v58  ;;  %v2165_v56 = vsel %vm757_vm3, %v11338_v61, -inf  ;;  %v11355_v3 = vadd.f32 %v2152_v0, %v11052_v12  ;;  %v605_v22 = vld [vmem:[%s12683_s18 + $0x10] sm:$0xff] }
 0x9e1   :  { %9290 = vmatprep.subr.mxu1 %v1761_v26  ;;  %v1727_v27 = vsel %vm757_vm3, %v11303_v23, 0.0  ;;  %v1759_v30 = vpop.permute.xlu0 %1758 }
 0x9e2   :  { %v11307_v28 = vpop.eup %10066  ;;  %1728 = vadd.xlane.f32.xlu1 %v1727_v27  ;;  %9291 = vmatpush3.msra.mxu1 %v1761_v26  ;;  %v11348_v2 = vadd.f32 %v2151_v62, %v11047_v7  ;;  %v2174_v60 = vsel %vm757_vm3, %v11355_v3, -inf }
 0x9e3   :  { %9292 = vmatprep.subr.mxu1 %v1759_v30  ;;  %v1724_v32 = vsel %vm757_vm3, %v11307_v28, 0.0 }
 0x9e4   :  { %1725 = vadd.xlane.f32.xlu0 %v1724_v32  ;;  %9293 = vmatpush3.msra.mxu1 %v1759_v30  ;;  %v2171_v4 = vsel %vm757_vm3, %v11348_v2, -inf }
 0x9e6   :  { %v11311_v33 = vpop.eup %10068 }
 0x9e7   :  { %v11313_v36 = vpop.eup %10070  ;;  %v1730_v39 = vsel %vm757_vm3, %v11311_v33, 0.0 }
 0x9e8   :  { %1731 = vadd.xlane.f32.xlu0 %v1730_v39  ;;  %v1733_v40 = vsel %vm757_vm3, %v11313_v36, 0.0 }
 0x9e9   :  { %1734 = vadd.xlane.f32.xlu1 %v1733_v40 }
 0x9ea   :  { %v11319_v41 = vpop.eup %10072 }
 0x9eb   :  { %v11321_v42 = vpop.eup %10074  ;;  %v1736_v43 = vsel %vm757_vm3, %v11319_v41, 0.0 }
 0x9ec   :  { %1737 = vadd.xlane.f32.xlu0 %v1736_v43  ;;  %v1739_v45 = vsel %vm757_vm3, %v11321_v42, 0.0 }
 0x9ed   :  { %1740 = vadd.xlane.f32.xlu1 %v1739_v45 }
 0x9fe   :  { %1756 = vrot.lane.b32.xlu1 %v10983_v38, %s10699_s12 }
 0xa02   :  { %1754 = vrot.lane.b32.xlu0 %v10961_v29, %s10699_s12 }
 0xa21   :  { %2163 = vmax.xlane.f32.xlu0 %v2162_v63 }
 0xa22   :  { %2160 = vmax.xlane.f32.xlu1 %v2159_v1 }
 0xa25   :  { %2166 = vmax.xlane.f32.xlu0 %v2165_v56 }
 0xa26   :  { %2169 = vmax.xlane.f32.xlu1 %v2168_v5 }
 0xa29   :  { %2172 = vmax.xlane.f32.xlu0 %v2171_v4 }
 0xa2a   :  { %2175 = vmax.xlane.f32.xlu1 %v2174_v60 }
 0xa3b   :  { %2233 = vrot.lane.b32.xlu1 %v10977_v37, %s10700_s26 }
 0xa3f   :  { %2231 = vrot.lane.b32.xlu1 %v10963_v31, %s10700_s26  ;;  %2235 = vrot.lane.b32.xlu0 %v10971_v35, %s10700_s26 }
 0xa43   :  { %2229 = vrot.lane.b32.xlu0 %v10969_v34, %s10700_s26 }
 0xa6b   :  { %v1729_v7 = vpop.xlane.xlu1 %1728 }
 0xa6c   :  { %10076 = vrcp.f32 %v1729_v7 }
 0xa6d   :  { %v1726_v12 = vpop.xlane.xlu0 %1725 }
 0xa6e   :  { %10078 = vrcp.f32 %v1726_v12 }
 0xa71   :  { %v1732_v6 = vpop.xlane.xlu0 %1731 }
 0xa72   :  { %10080 = vrcp.f32 %v1732_v6  ;;  %v1735_v8 = vpop.xlane.xlu1 %1734  ;;  %v11416_v6 = vpop.f32.mrf.mxu1 }
 0xa73   :  { %10082 = vrcp.f32 %v1735_v8 }
 0xa74   :  { %v11418_v8 = vpop.f32.mrf.mxu1 }
 0xa75   :  { %v1738_v15 = vpop.xlane.xlu0 %1737 }
 0xa76   :  { %10084 = vrcp.f32 %v1738_v15  ;;  %v1741_v37 = vpop.xlane.xlu1 %1740  ;;  %v11420_v15 = vpop.f32.mrf.mxu1 }
 0xa77   :  { %10086 = vrcp.f32 %v1741_v37 }
 0xa78   :  { %v11422_v37 = vpop.f32.mrf.mxu1 }
 0xa79   :  { %v10077_v31 = vpop.eup %10076  ;;  %v1755_v35 = vpop.permute.xlu0 %1754 }
 0xa7a   :  { %v1757_v18 = vpop.permute.xlu1 %1756  ;;  %v1749_v26 = vmul.f32 %v10077_v31, %v11303_v23  ;;  %v11424_v31 = vpop.f32.mrf.mxu1 }
 0xa7b   :  { %v10079_v19 = vpop.eup %10078  ;;  %9294 = vmatprep.subr.mxu1 %v1757_v18 }
 0xa7c   :  { %9295 = vmatpush3.msra.mxu1 %v1757_v18  ;;  %v1748_v34 = vmul.f32 %v10079_v19, %v11307_v28  ;;  %v11426_v18 = vpop.f32.mrf.mxu1 }
 0xa7d   :  { %9296 = vmatprep.subr.mxu1 %v1755_v35 }
 0xa7e   :  { %9297 = vmatpush3.msra.mxu1 %v1755_v35  ;;  %9298 = vmatprep.mubr.msk.f32.mxu1 %vm757_vm3, %v1748_v34 }
 0xa7f   :  { %v10081_v27 = vpop.eup %10080  ;;  %9299 = vmatmul.mubr.msk.f32.vlgmr.msra.gmra.mxu1 %vm757_vm3, %v1749_v26  ;;  %9307 = vmatprep.subr.mxu1 %v605_v22 }
 0xa80   :  { %v10083_v30 = vpop.eup %10082  ;;  %v1750_v32 = vmul.f32 %v10081_v27, %v11311_v33  ;;  %9308 = vmatpush3.msra.mxu1 %v605_v22 }
 0xa81   :  { %v1751_v39 = vmul.f32 %v10083_v30, %v11313_v36 }
 0xa82   :  { %9301 = vmatprep.mubr.msk.f32.mxu1 %vm757_vm3, %v1750_v32 }
 0xa83   :  { %v10085_v28 = vpop.eup %10084  ;;  %9302 = vmatmul.mubr.msk.f32.gmra.mxu1 %vm757_vm3, %v1751_v39 }
 0xa84   :  { %v10087_v23 = vpop.eup %10086  ;;  %v1752_v40 = vmul.f32 %v10085_v28, %v11319_v41 }
 0xa85   :  { %v1753_v43 = vmul.f32 %v10087_v23, %v11321_v42 }
 0xa86   :  { %9304 = vmatprep.mubr.msk.f32.mxu1 %vm757_vm3, %v1752_v40 }
 0xa87   :  { %9305 = vmatmul.mubr.msk.f32.gmra.mxu1 %vm757_vm3, %v1753_v43 }
 0xaaa   :  { %v2164_v45 = vpop.xlane.xlu0 %2163 }
 0xaab   :  { %v2178_v33 = vsub.f32 %v11332_v54, %v2164_v45  ;;  %v2161_v44 = vpop.xlane.xlu1 %2160 }
 0xaac   :  { %v2177_v36 = vsub.f32 %v11335_v59, %v2161_v44 }
 0xaad   :  { %v2185_v46 = vmul.f32 1.442695, %v2178_v33 }
 0xaae   :  { %v2183_v47 = vmul.f32 1.442695, %v2177_v36  ;;  %v2167_v49 = vpop.xlane.xlu0 %2166 }
 0xaaf   :  { %10088 = vpow2.f32 %v2185_v46  ;;  %v2179_v50 = vsub.f32 %v11338_v61, %v2167_v49  ;;  %v2170_v51 = vpop.xlane.xlu1 %2169 }
 0xab0   :  { %10090 = vpow2.f32 %v2183_v47  ;;  %v2180_v41 = vsub.f32 %v11345_v53, %v2170_v51 }
 0xab1   :  { %v2187_v42 = vmul.f32 1.442695, %v2179_v50 }
 0xab2   :  { %v2189_v52 = vmul.f32 1.442695, %v2180_v41  ;;  %v2173_v55 = vpop.xlane.xlu0 %2172 }
 0xab3   :  { %10092 = vpow2.f32 %v2187_v42  ;;  %v2181_v57 = vsub.f32 %v11348_v2, %v2173_v55  ;;  %v2176_v54 = vpop.xlane.xlu1 %2175 }
 0xab4   :  { %10094 = vpow2.f32 %v2189_v52  ;;  %v2182_v58 = vsub.f32 %v11355_v3, %v2176_v54  ;;  %v606_v54 = vld [vmem:[%s12683_s18 + $0x18] sm:$0xff] }
 0xab5   :  { %v2191_v59 = vmul.f32 1.442695, %v2181_v57 }
 0xab6   :  { %v2193_v62 = vmul.f32 1.442695, %v2182_v58  ;;  %v2236_v63 = vpop.permute.xlu0 %2235  ;;  %v1510_v58 = vadd.f32 %v11416_v6, %v11271_v9 }
 0xab7   :  { %10096 = vpow2.f32 %v2191_v59  ;;  %9339 = vmatprep.subr.mxu1 %v2236_v63  ;;  %v2234_v19 = vpop.permute.xlu1 %2233 }
 0xab8   :  { %10098 = vpow2.f32 %v2193_v62  ;;  %v1505_v62 = vadd.f32 %v11418_v8, %v11273_v10  ;;  %v1525_v10 = vadd.f32 %v11426_v18, %v11281_v14 }
 0xabc   :  { %v11388_v61 = vpop.eup %10088 }
 0xabd   :  { %v11390_v0 = vpop.eup %10090  ;;  %v2198_v1 = vsel %vm757_vm3, %v11388_v61, 0.0 }
 0xabe   :  { %2199 = vadd.xlane.f32.xlu1 %v2198_v1  ;;  %v2195_v53 = vsel %vm757_vm3, %v11390_v0, 0.0 }
 0xabf   :  { %2196 = vadd.xlane.f32.xlu0 %v2195_v53 }
 0xac0   :  { %v11396_v2 = vpop.eup %10092 }
 0xac1   :  { %v11398_v56 = vpop.eup %10094  ;;  %v2201_v5 = vsel %vm757_vm3, %v11396_v2, 0.0 }
 0xac2   :  { %v2204_v3 = vsel %vm757_vm3, %v11398_v56, 0.0 }
 0xac3   :  { %2202 = vadd.xlane.f32.xlu0 %v2201_v5  ;;  %2205 = vadd.xlane.f32.xlu1 %v2204_v3  ;;  %v1530_v3 = vadd.f32 %v11424_v31, %v11279_v48 }
 0xac4   :  { %v11404_v4 = vpop.eup %10096 }
 0xac5   :  { %v11406_v60 = vpop.eup %10098  ;;  %v2207_v7 = vsel %vm757_vm3, %v11404_v4, 0.0 }
 0xac6   :  { %v2210_v12 = vsel %vm757_vm3, %v11406_v60, 0.0 }
 0xac7   :  { %2208 = vadd.xlane.f32.xlu0 %v2207_v7  ;;  %2211 = vadd.xlane.f32.xlu1 %v2210_v12 }
 0xad8   :  { %2227 = vrot.lane.b32.xlu1 %v10983_v38, %s10700_s26  ;;  %v2232_v38 = vpop.permute.xlu1 %2231 }
 0xadd   :  { %2225 = vrot.lane.b32.xlu0 %v10961_v29, %s10700_s26  ;;  %v2230_v29 = vpop.permute.xlu0 %2229 }
 0xb3f   :  { %v9300_v35 = vpop.f32.mrf.mxu1 }
 0xb41   :  { %v1856_v34 = vpop.f32.mrf.mxu1 }
 0xb42   :  { %9309 = vmatprep.mubr.msk.f32.mxu1 %vm625_vm2, %v1856_v34 }
 0xb43   :  { %v9303_v22 = vpop.f32.mrf.mxu1  ;;  %9310 = vmatmul.mubr.msk.f32.vlgmr.msra.gmra.mxu1 %vm625_vm2, %v9300_v35 }
 0xb44   :  { %9340 = vmatpush3.msra.mxu1 %v2236_v63 }
 0xb45   :  { %9341 = vmatprep.subr.mxu1 %v2234_v19  ;;  %v1866_v26 = vpop.f32.mrf.mxu1 }
 0xb46   :  { %9342 = vmatpush3.msra.mxu1 %v2234_v19  ;;  %9312 = vmatprep.mubr.msk.f32.mxu1 %vm625_vm2, %v1866_v26 }
 0xb47   :  { %9343 = vmatprep.subr.mxu1 %v2232_v38  ;;  %v9306_v27 = vpop.f32.mrf.mxu1  ;;  %9313 = vmatmul.mubr.msk.f32.gmra.mxu1 %vm625_vm2, %v9303_v22  ;;  %v2200_v30 = vpop.xlane.xlu1 %2199 }
 0xb48   :  { %v2197_v32 = vpop.xlane.xlu0 %2196  ;;  %9344 = vmatpush3.msra.mxu1 %v2232_v38  ;;  %10100 = vrcp.f32 %v2200_v30 }
 0xb49   :  { %10102 = vrcp.f32 %v2197_v32  ;;  %9345 = vmatprep.subr.mxu1 %v2230_v29  ;;  %v1876_v39 = vpop.f32.mrf.mxu1 }
 0xb4a   :  { %9346 = vmatpush3.msra.mxu1 %v2230_v29  ;;  %9315 = vmatprep.mubr.msk.f32.mxu1 %vm625_vm2, %v1876_v39 }
 0xb4b   :  { %9316 = vmatmul.mubr.msk.f32.gmra.mxu1 %vm625_vm2, %v9306_v27 }
 0xb4c   :  { %v2203_v28 = vpop.xlane.xlu0 %2202  ;;  %v2206_v23 = vpop.xlane.xlu1 %2205 }
 0xb4d   :  { %10104 = vrcp.f32 %v2203_v28 }
 0xb4e   :  { %10106 = vrcp.f32 %v2206_v23 }
 0xb50   :  { %v2209_v40 = vpop.xlane.xlu0 %2208  ;;  %v2212_v43 = vpop.xlane.xlu1 %2211 }
 0xb51   :  { %10108 = vrcp.f32 %v2209_v40 }
 0xb52   :  { %10110 = vrcp.f32 %v2212_v43 }
 0xb54   :  { %v2228_v45 = vpop.permute.xlu1 %2227  ;;  %v2226_v46 = vpop.permute.xlu0 %2225 }
 0xb55   :  { %v10101_v33 = vpop.eup %10100  ;;  %9347 = vmatprep.subr.mxu1 %v2228_v45 }
 0xb56   :  { %v10103_v44 = vpop.eup %10102  ;;  %v2220_v36 = vmul.f32 %v10101_v33, %v11388_v61  ;;  %9348 = vmatpush3.msra.mxu1 %v2228_v45 }
 0xb57   :  { %9349 = vmatprep.subr.mxu1 %v2226_v46  ;;  %v2219_v47 = vmul.f32 %v10103_v44, %v11390_v0  ;;  %v1520_v0 = vadd.f32 %v11420_v15, %v11275_v11 }
 0xb58   :  { %9350 = vmatpush3.msra.mxu1 %v2226_v46 }
 0xb59   :  { %9351 = vmatprep.mubr.msk.f32.mxu1 %vm757_vm3, %v2219_v47  ;;  %9360 = vmatprep.subr.mxu1 %v606_v54 }
 0xb5a   :  { %v10105_v49 = vpop.eup %10104  ;;  %9352 = vmatmul.mubr.msk.f32.vlgmr.msra.gmra.mxu1 %vm757_vm3, %v2220_v36 }
 0xb5b   :  { %v10107_v50 = vpop.eup %10106  ;;  %v2221_v51 = vmul.f32 %v10105_v49, %v11396_v2  ;;  %9361 = vmatpush3.msra.mxu1 %v606_v54  ;;  %v1515_v2 = vadd.f32 %v11422_v37, %v11277_v13  ;;  %v8438_v37 = vld [vmem:[#allocation7] ss:$0 sm:$0xff] }
 0xb5c   :  { %v2222_v41 = vmul.f32 %v10107_v50, %v11398_v56 }
 0xb5d   :  { %9354 = vmatprep.mubr.msk.f32.mxu1 %vm757_vm3, %v2221_v51 }
 0xb5e   :  { %v10109_v42 = vpop.eup %10108  ;;  %9355 = vmatmul.mubr.msk.f32.gmra.mxu1 %vm757_vm3, %v2222_v41 }
 0xb5f   :  { %v10111_v52 = vpop.eup %10110  ;;  %v2223_v55 = vmul.f32 %v10109_v42, %v11404_v4 }
 0xb60   :  { %v2224_v57 = vmul.f32 %v10111_v52, %v11406_v60 }
 0xb61   :  { %9357 = vmatprep.mubr.msk.f32.mxu1 %vm757_vm3, %v2223_v55 }
 0xb62   :  { %9358 = vmatmul.mubr.msk.f32.gmra.mxu1 %vm757_vm3, %v2224_v57 }
 0xc03   :  { %v9311_v59 = vpop.f32.mrf.mxu1 }
 0xc04   :  { %v1999_v63 = vadd.f32 %v9311_v59, %v1510_v58 }
 0xc05   :  { %v1969_v61 = vpop.f32.mrf.mxu1 }
 0xc06   :  { %v1998_v1 = vadd.f32 %v1969_v61, %v1505_v62 }
 0xc07   :  { %v9314_v53 = vpop.f32.mrf.mxu1 }
 0xc08   :  { %v2001_v56 = vadd.f32 %v9314_v53, %v1520_v0 }
 0xc09   :  { %v1979_v5 = vpop.f32.mrf.mxu1 }
 0xc0a   :  { %v2000_v9 = vadd.f32 %v1979_v5, %v1515_v2 }
 0xc0b   :  { %v9317_v4 = vpop.f32.mrf.mxu1 }
 0xc0c   :  { %v2003_v60 = vadd.f32 %v9317_v4, %v1530_v3 }
 0xc0d   :  { %v1989_v7 = vpop.f32.mrf.mxu1 }
 0xc0e   :  { %v2002_v12 = vadd.f32 %v1989_v7, %v1525_v10 }
 0xc1a   :  { %v9353_v6 = vpop.f32.mrf.mxu1 }
 0xc1c   :  { %v2327_v11 = vpop.f32.mrf.mxu1 }
 0xc1d   :  { %9362 = vmatprep.mubr.msk.f32.mxu1 %vm625_vm2, %v2327_v11 }
 0xc1e   :  { %v9356_v8 = vpop.f32.mrf.mxu1  ;;  %9363 = vmatmul.mubr.msk.f32.vlgmr.msra.gmra.mxu1 %vm625_vm2, %v9353_v6 }
 0xc20   :  { %v2337_v13 = vpop.f32.mrf.mxu1 }
 0xc21   :  { %9365 = vmatprep.mubr.msk.f32.mxu1 %vm625_vm2, %v2337_v13  ;;  %v2602_v13 = vld [vmem:[%s12684_s28 + $0x18] sm:$0xff] }
 0xc22   :  { %v9359_v15 = vpop.f32.mrf.mxu1  ;;  %9366 = vmatmul.mubr.msk.f32.gmra.mxu1 %vm625_vm2, %v9356_v8  ;;  %9371 = vmatprep.subr.mxu0 %v2602_v13 }
 0xc23   :  { %9372 = vmatpush3.msra.mxu0 %v2602_v13 }
 0xc24   :  { %v2347_v48 = vpop.f32.mrf.mxu1 }
 0xc25   :  { %9368 = vmatprep.mubr.msk.f32.mxu1 %vm625_vm2, %v2347_v48  ;;  %v2600_v48 = vld [vmem:[%s12684_s28 + $0x8] sm:$0xff] }
 0xc26   :  { %9369 = vmatmul.mubr.msk.f32.gmra.mxu1 %vm625_vm2, %v9359_v15  ;;  %v2601_v15 = vld [vmem:[%s12684_s28 + $0x10] sm:$0xff] }
 0xc27   :  { %9373 = vmatprep.subr.mxu0 %v2601_v15 }
 0xc28   :  { %9374 = vmatpush3.msra.mxu0 %v2601_v15 }
 0xc29   :  { %9375 = vmatprep.subr.mxu0 %v2600_v48 }
 0xc2a   :  { %9376 = vmatpush3.msra.mxu0 %v2600_v48 }
 0xcde   :  { %v9364_v14 = vpop.f32.mrf.mxu1 }
 0xcdf   :  { %v2470_v31 = vadd.f32 %v9364_v14, %v1999_v63  ;;  %v2599_v14 = vld [vmem:[%s12684_s28] sm:$0xff] }
 0xce0   :  { %v2440_v18 = vpop.f32.mrf.mxu1  ;;  %9377 = vmatprep.subr.mxu0 %v2599_v14 }
 0xce1   :  { %v2483_v19 = vadd.f32 %v8438_v37, %v2470_v31  ;;  %v2469_v35 = vadd.f32 %v2440_v18, %v1998_v1  ;;  %9378 = vmatpush3.msra.mxu0 %v2599_v14  ;;  %v2731_v31 = vld [vmem:[#allocation13 + $0x10] sm:$0xff] }
 0xce2   :  { %v9367_v34 = vpop.f32.mrf.mxu1 }
 0xce3   :  { %v2482_v38 = vadd.f32 %v8438_v37, %v2469_v35  ;;  %v2472_v22 = vadd.f32 %v9367_v34, %v2001_v56  ;;  %v2489_v29 = vadd.f32 %v2483_v19, %v10939_v17 }
 0xce4   :  { %v2450_v26 = vpop.f32.mrf.mxu1 }
 0xce5   :  { %v2485_v27 = vadd.f32 %v8438_v37, %v2472_v22  ;;  %v2471_v30 = vadd.f32 %v2450_v26, %v2000_v9  ;;  %v2499_v32 = vsel %vm489_vm1, %v2489_v29, 0.0  ;;  %v2488_v39 = vadd.f32 %v2482_v38, %v10937_v16 }
 0xce6   :  { %2500 = vadd.xlane.f32.xlu0 %v2499_v32  ;;  %v9370_v28 = vpop.f32.mrf.mxu1 }
 0xce7   :  { %v2484_v23 = vadd.f32 %v8438_v37, %v2471_v30  ;;  %v2474_v40 = vadd.f32 %v9370_v28, %v2003_v60  ;;  %v2496_v43 = vsel %vm489_vm1, %v2488_v39, 0.0  ;;  %v2491_v45 = vadd.f32 %v2485_v27, %v10947_v21 }
 0xce8   :  { %2497 = vadd.xlane.f32.xlu1 %v2496_v43  ;;  %v2460_v33 = vpop.f32.mrf.mxu1 }
 0xce9   :  { %v2487_v44 = vadd.f32 %v8438_v37, %v2474_v40  ;;  %v2473_v36 = vadd.f32 %v2460_v33, %v2002_v12  ;;  %v2490_v17 = vadd.f32 %v2484_v23, %v10945_v20  ;;  %v2505_v47 = vsel %vm489_vm1, %v2491_v45, 0.0 }
 0xceb   :  { %v2486_v46 = vadd.f32 %v8438_v37, %v2473_v36  ;;  %v2502_v49 = vsel %vm489_vm1, %v2490_v17, 0.0  ;;  %v2493_v16 = vadd.f32 %v2487_v44, %v10955_v25  ;;  %v2732_v37 = vld [vmem:[#allocation13 + $0x18] sm:$0xff] }
 0xcec   :  { %2506 = vadd.xlane.f32.xlu1 %v2505_v47  ;;  %2503 = vadd.xlane.f32.xlu0 %v2502_v49 }
 0xced   :  { %v2492_v50 = vadd.f32 %v2486_v46, %v10953_v24  ;;  %v2511_v51 = vsel %vm489_vm1, %v2493_v16, 0.0  ;;  %9388 = vmatprep.subr.mxu1 %v2732_v37 }
 0xcee   :  { %9389 = vmatpush3.msra.mxu1 %v2732_v37 }
 0xcef   :  { %v2508_v21 = vsel %vm489_vm1, %v2492_v50, 0.0  ;;  %9390 = vmatprep.subr.mxu1 %v2731_v31 }
 0xcf0   :  { %2512 = vadd.xlane.f32.xlu1 %v2511_v51  ;;  %2509 = vadd.xlane.f32.xlu0 %v2508_v21 }
 0xcf1   :  { %9391 = vmatpush3.msra.mxu1 %v2731_v31 }
 0xd6f   :  { %v2501_v41 = vpop.xlane.xlu0 %2500 }
 0xd70   :  { %v2516_v42 = vmul.f32 0.03125, %v2501_v41 }
 0xd71   :  { %v2498_v20 = vpop.xlane.xlu1 %2497 }
 0xd72   :  { %v11477_v52 = vsub.f32 %v2489_v29, %v2516_v42  ;;  %v2515_v55 = vmul.f32 0.03125, %v2498_v20 }
 0xd74   :  { %v11479_v57 = vsub.f32 %v2488_v39, %v2515_v55  ;;  %v2528_v25 = vmul.f32 %v11477_v52, %v11477_v52 }
 0xd75   :  { %v2507_v54 = vpop.xlane.xlu1 %2506  ;;  %v2504_v58 = vpop.xlane.xlu0 %2503 }
 0xd76   :  { %v2518_v24 = vmul.f32 0.03125, %v2507_v54  ;;  %v2517_v59 = vmul.f32 0.03125, %v2504_v58  ;;  %v2536_v62 = vsel %vm489_vm1, %v2528_v25, 0.0  ;;  %v2527_v63 = vmul.f32 %v11479_v57, %v11479_v57 }
 0xd77   :  { %2537 = vadd.xlane.f32.xlu1 %v2536_v62 }
 0xd78   :  { %v11486_v61 = vsub.f32 %v2491_v45, %v2518_v24  ;;  %v11488_v0 = vsub.f32 %v2490_v17, %v2517_v59  ;;  %v2533_v1 = vsel %vm489_vm1, %v2527_v63, 0.0  ;;  %v8439_v17 = vld [vmem:[#allocation8] ss:$0 sm:$0xff] }
 0xd79   :  { %v2513_v53 = vpop.xlane.xlu1 %2512  ;;  %2534 = vadd.xlane.f32.xlu0 %v2533_v1  ;;  %v2510_v2 = vpop.xlane.xlu0 %2509 }
 0xd7a   :  { %v2520_v56 = vmul.f32 0.03125, %v2513_v53  ;;  %v2519_v5 = vmul.f32 0.03125, %v2510_v2  ;;  %v2530_v3 = vmul.f32 %v11486_v61, %v11486_v61  ;;  %v2529_v9 = vmul.f32 %v11488_v0, %v11488_v0  ;;  %v2730_v53 = vld [vmem:[#allocation13 + $0x8] sm:$0xff]  ;;  %v2729_v2 = vld [vmem:[#allocation13] sm:$0xff] }
 0xd7b   :  { %9392 = vmatprep.subr.mxu1 %v2730_v53 }
 0xd7c   :  { %v11495_v4 = vsub.f32 %v2493_v16, %v2520_v56  ;;  %v11497_v10 = vsub.f32 %v2492_v50, %v2519_v5  ;;  %v2542_v60 = vsel %vm489_vm1, %v2530_v3, 0.0  ;;  %v2539_v7 = vsel %vm489_vm1, %v2529_v9, 0.0  ;;  %v8440_v16 = vld [vmem:[#allocation10] ss:$0 sm:$0xff]  ;;  %9393 = vmatpush3.msra.mxu1 %v2730_v53  ;;  %v8441_v56 = vld [vmem:[#allocation11] ss:$0 sm:$0xff] }
 0xd7d   :  { %2543 = vadd.xlane.f32.xlu1 %v2542_v60  ;;  %2540 = vadd.xlane.f32.xlu0 %v2539_v7 }
 0xd7e   :  { %v2532_v12 = vmul.f32 %v11495_v4, %v11495_v4  ;;  %v2531_v6 = vmul.f32 %v11497_v10, %v11497_v10  ;;  %9394 = vmatprep.subr.mxu1 %v2729_v2 }
 0xd7f   :  { %9395 = vmatpush3.msra.mxu1 %v2729_v2 }
 0xd80   :  { %v2548_v11 = vsel %vm489_vm1, %v2532_v12, 0.0  ;;  %v2545_v8 = vsel %vm489_vm1, %v2531_v6, 0.0 }
 0xd81   :  { %2549 = vadd.xlane.f32.xlu1 %v2548_v11  ;;  %2546 = vadd.xlane.f32.xlu0 %v2545_v8 }
 0xe00   :  { %v2538_v18 = vpop.xlane.xlu1 %2537 }
 0xe01   :  { %v2552_v19 = vmul.f32 0.03125, %v2538_v18 }
 0xe02   :  { %v2535_v35 = vpop.xlane.xlu0 %2534 }
 0xe03   :  { %v2558_v34 = vadd.f32 1e-05, %v2552_v19  ;;  %v2551_v38 = vmul.f32 0.03125, %v2535_v35  ;;  %v8448_v19 = vld [vmem:[#allocation14] ss:$0 sm:$0xff] }
 0xe05   :  { %10112 = vrsqrt.f32 %v2558_v34  ;;  %v2557_v22 = vadd.f32 1e-05, %v2551_v38 }
 0xe06   :  { %v2544_v29 = vpop.xlane.xlu1 %2543  ;;  %v2541_v26 = vpop.xlane.xlu0 %2540 }
 0xe07   :  { %10114 = vrsqrt.f32 %v2557_v22  ;;  %v2554_v27 = vmul.f32 0.03125, %v2544_v29  ;;  %v2553_v30 = vmul.f32 0.03125, %v2541_v26 }
 0xe09   :  { %v2560_v32 = vadd.f32 1e-05, %v2554_v27  ;;  %v2559_v39 = vadd.f32 1e-05, %v2553_v30 }
 0xe0a   :  { %v2550_v28 = vpop.xlane.xlu1 %2549  ;;  %v2547_v23 = vpop.xlane.xlu0 %2546 }
 0xe0b   :  { %10116 = vrsqrt.f32 %v2560_v32  ;;  %v2556_v40 = vmul.f32 0.03125, %v2550_v28  ;;  %v2555_v43 = vmul.f32 0.03125, %v2547_v23 }
 0xe0c   :  { %10118 = vrsqrt.f32 %v2559_v39 }
 0xe0d   :  { %v2562_v45 = vadd.f32 1e-05, %v2556_v40  ;;  %v2561_v33 = vadd.f32 1e-05, %v2555_v43 }
 0xe0f   :  { %10120 = vrsqrt.f32 %v2562_v45 }
 0xe10   :  { %10122 = vrsqrt.f32 %v2561_v33 }
 0xe12   :  { %v10113_v44 = vpop.eup %10112 }
 0xe13   :  { %v2570_v36 = vmul.f32 %v10113_v44, %v11477_v52 }
 0xe14   :  { %v10115_v46 = vpop.eup %10114 }
 0xe15   :  { %v2569_v47 = vmul.f32 %v10115_v46, %v11479_v57  ;;  %v2582_v49 = vmul.f32 %v8439_v17, %v2570_v36 }
 0xe17   :  { %v2581_v50 = vmul.f32 %v8439_v17, %v2569_v47  ;;  %v2594_v20 = vadd.f32 %v8440_v16, %v2582_v49 }
 0xe18   :  { %v10117_v51 = vpop.eup %10116 }
 0xe19   :  { %v10119_v21 = vpop.eup %10118  ;;  %v2593_v41 = vadd.f32 %v8440_v16, %v2581_v50  ;;  %v2572_v42 = vmul.f32 %v10117_v51, %v11486_v61 }
 0xe1a   :  { %v2571_v55 = vmul.f32 %v10119_v21, %v11488_v0 }
 0xe1b   :  { %9379 = vmatprep.mubr.msk.f32.mxu0 %vm489_vm1, %v2593_v41  ;;  %v2584_v25 = vmul.f32 %v8439_v17, %v2572_v42 }
 0xe1c   :  { %v10121_v54 = vpop.eup %10120  ;;  %9380 = vmatmul.mubr.msk.f32.vlgmr.msra.gmra.mxu0 %vm489_vm1, %v2594_v20  ;;  %v2583_v52 = vmul.f32 %v8439_v17, %v2571_v55 }
 0xe1d   :  { %v10123_v58 = vpop.eup %10122  ;;  %v2596_v57 = vadd.f32 %v8440_v16, %v2584_v25  ;;  %v2574_v24 = vmul.f32 %v10121_v54, %v11495_v4 }
 0xe1e   :  { %v2595_v59 = vadd.f32 %v8440_v16, %v2583_v52  ;;  %v2573_v62 = vmul.f32 %v10123_v58, %v11497_v10 }
 0xe1f   :  { %v2586_v63 = vmul.f32 %v8439_v17, %v2574_v24 }
 0xe20   :  { %9382 = vmatprep.mubr.msk.f32.mxu0 %vm489_vm1, %v2595_v59  ;;  %v2585_v61 = vmul.f32 %v8439_v17, %v2573_v62 }
 0xe21   :  { %9383 = vmatmul.mubr.msk.f32.gmra.mxu0 %vm489_vm1, %v2596_v57  ;;  %v2598_v0 = vadd.f32 %v8440_v16, %v2586_v63 }
 0xe22   :  { %v2597_v1 = vadd.f32 %v8440_v16, %v2585_v61 }
 0xe24   :  { %9385 = vmatprep.mubr.msk.f32.mxu0 %vm489_vm1, %v2597_v1 }
 0xe25   :  { %9386 = vmatmul.mubr.msk.f32.gmra.mxu0 %vm489_vm1, %v2598_v0 }
 0xedc   :  { %v9381_v5 = vpop.f32.mrf.mxu0 }
 0xedd   :  { %v2700_v3 = vadd.f32 %v9381_v5, %v8441_v56 }
 0xede   :  { %v2694_v9 = vpop.f32.mrf.mxu0 }
 0xedf   :  { %v2695_v4 = vadd.f32 %v8441_v56, %v2694_v9  ;;  %v2724_v7 = vmax.f32 %v2700_v3, 0.0 }
 0xee1   :  { %v2723_v10 = vmax.f32 %v2695_v4, 0.0  ;;  %v9384_v60 = vpop.f32.mrf.mxu0 }
 0xee2   :  { %v2710_v12 = vadd.f32 %v9384_v60, %v8441_v56 }
 0xee3   :  { %v2704_v6 = vpop.f32.mrf.mxu0  ;;  %9396 = vmatprep.mubr.msk.f32.mxu1 %vm489_vm1, %v2723_v10 }
 0xee4   :  { %v2705_v11 = vadd.f32 %v8441_v56, %v2704_v6  ;;  %9397 = vmatmul.mubr.msk.f32.vlgmr.msra.gmra.mxu1 %vm489_vm1, %v2724_v7  ;;  %v2726_v15 = vmax.f32 %v2710_v12, 0.0 }
 0xee5   :  { %v9387_v8 = vpop.f32.mrf.mxu0 }
 0xee6   :  { %v2725_v13 = vmax.f32 %v2705_v11, 0.0  ;;  %v2720_v48 = vadd.f32 %v9387_v8, %v8441_v56  ;;  %v8460_v11 = vld [vmem:[%s12680_s21 + $0x38] sm:$0xff]  ;;  %v8459_v8 = vld [vmem:[%s12680_s21 + $0x30] sm:$0xff] }
 0xee7   :  { %v2714_v14 = vpop.f32.mrf.mxu0  ;;  %9405 = vmatprep.subr.mxu0 %v8460_v11 }
 0xee8   :  { %v2715_v37 = vadd.f32 %v8441_v56, %v2714_v14  ;;  %9399 = vmatprep.mubr.msk.f32.mxu1 %vm489_vm1, %v2725_v13  ;;  %v2728_v18 = vmax.f32 %v2720_v48, 0.0  ;;  %9406 = vmatpush3.msra.mxu0 %v8460_v11  ;;  %v8458_v13 = vld [vmem:[%s12680_s21 + $0x28] sm:$0xff] }
 0xee9   :  { %9400 = vmatmul.mubr.msk.f32.gmra.mxu1 %vm489_vm1, %v2726_v15  ;;  %9407 = vmatprep.subr.mxu0 %v8459_v8  ;;  %v8457_v15 = vld [vmem:[%s12680_s21 + $0x20] sm:$0xff] }
 0xeea   :  { %v2727_v31 = vmax.f32 %v2715_v37, 0.0  ;;  %9408 = vmatpush3.msra.mxu0 %v8459_v8 }
 0xeeb   :  { %9409 = vmatprep.subr.mxu0 %v8458_v13 }
 0xeec   :  { %9402 = vmatprep.mubr.msk.f32.mxu1 %vm489_vm1, %v2727_v31  ;;  %9410 = vmatpush3.msra.mxu0 %v8458_v13 }
 0xeed   :  { %9403 = vmatmul.mubr.msk.f32.gmra.mxu1 %vm489_vm1, %v2728_v18  ;;  %9411 = vmatprep.subr.mxu0 %v8457_v15 }
 0xeee   :  { %9412 = vmatpush3.msra.mxu0 %v8457_v15 }
 0xfa4   :  { %v9398_v35 = vpop.f32.mrf.mxu1 }
 0xfa5   :  { %v2830_v34 = vadd.f32 %v9398_v35, %v8448_v19 }
 0xfa6   :  { %v2824_v38 = vpop.f32.mrf.mxu1 }
 0xfa7   :  { %v2854_v22 = vadd.f32 %v2830_v34, %v2594_v20  ;;  %v2825_v29 = vadd.f32 %v8448_v19, %v2824_v38 }
 0xfa9   :  { %v2853_v26 = vadd.f32 %v2825_v29, %v2593_v41  ;;  %v9401_v27 = vpop.f32.mrf.mxu1  ;;  %v2864_v30 = vsel %vm489_vm1, %v2854_v22, 0.0 }
 0xfaa   :  { %v2840_v32 = vadd.f32 %v9401_v27, %v8448_v19  ;;  %2865 = vadd.xlane.f32.xlu1 %v2864_v30 }
 0xfab   :  { %v2834_v39 = vpop.f32.mrf.mxu1  ;;  %v2861_v28 = vsel %vm489_vm1, %v2853_v26, 0.0 }
 0xfac   :  { %v2856_v23 = vadd.f32 %v2840_v32, %v2596_v57  ;;  %v2835_v40 = vadd.f32 %v8448_v19, %v2834_v39  ;;  %2862 = vadd.xlane.f32.xlu0 %v2861_v28 }
 0xfad   :  { %v9404_v43 = vpop.f32.mrf.mxu1 }
 0xfae   :  { %v2855_v45 = vadd.f32 %v2835_v40, %v2595_v59  ;;  %v2850_v33 = vadd.f32 %v9404_v43, %v8448_v19  ;;  %v2870_v44 = vsel %vm489_vm1, %v2856_v23, 0.0 }
 0xfaf   :  { %2871 = vadd.xlane.f32.xlu1 %v2870_v44  ;;  %v2844_v36 = vpop.f32.mrf.mxu1 }
 0xfb0   :  { %v2858_v17 = vadd.f32 %v2850_v33, %v2598_v0  ;;  %v2845_v46 = vadd.f32 %v8448_v19, %v2844_v36  ;;  %v2867_v47 = vsel %vm489_vm1, %v2855_v45, 0.0 }
 0xfb1   :  { %2868 = vadd.xlane.f32.xlu0 %v2867_v47 }
 0xfb2   :  { %v2857_v49 = vadd.f32 %v2845_v46, %v2597_v1  ;;  %v2876_v16 = vsel %vm489_vm1, %v2858_v17, 0.0  ;;  %v8456_v46 = vld [vmem:[#allocation17] ss:$0 sm:$0xff] }
 0xfb3   :  { %2877 = vadd.xlane.f32.xlu1 %v2876_v16 }
 0xfb4   :  { %v2873_v50 = vsel %vm489_vm1, %v2857_v49, 0.0 }
 0xfb5   :  { %2874 = vadd.xlane.f32.xlu0 %v2873_v50 }
0x1033   :  { %v2866_v51 = vpop.xlane.xlu1 %2865 }
0x1034   :  { %v2880_v21 = vmul.f32 0.03125, %v2866_v51 }
0x1035   :  { %v2863_v41 = vpop.xlane.xlu0 %2862 }
0x1036   :  { %v11535_v42 = vsub.f32 %v2854_v22, %v2880_v21  ;;  %v2879_v20 = vmul.f32 0.03125, %v2863_v41 }
0x1038   :  { %v11537_v55 = vsub.f32 %v2853_v26, %v2879_v20  ;;  %v2872_v25 = vpop.xlane.xlu1 %2871  ;;  %v2892_v54 = vmul.f32 %v11535_v42, %v11535_v42 }
0x1039   :  { %v2882_v52 = vmul.f32 0.03125, %v2872_v25 }
0x103a   :  { %v2869_v58 = vpop.xlane.xlu0 %2868  ;;  %v2900_v57 = vsel %vm489_vm1, %v2892_v54, 0.0  ;;  %v2891_v24 = vmul.f32 %v11537_v55, %v11537_v55 }
0x103b   :  { %v11544_v59 = vsub.f32 %v2856_v23, %v2882_v52  ;;  %v2881_v62 = vmul.f32 0.03125, %v2869_v58  ;;  %2901 = vadd.xlane.f32.xlu1 %v2900_v57 }
0x103c   :  { %v2878_v63 = vpop.xlane.xlu1 %2877  ;;  %v2897_v61 = vsel %vm489_vm1, %v2891_v24, 0.0 }
0x103d   :  { %v11547_v0 = vsub.f32 %v2855_v45, %v2881_v62  ;;  %v2884_v1 = vmul.f32 0.03125, %v2878_v63  ;;  %2898 = vadd.xlane.f32.xlu0 %v2897_v61  ;;  %v2894_v53 = vmul.f32 %v11544_v59, %v11544_v59  ;;  %v8455_v45 = vld [vmem:[#allocation16] ss:$0 sm:$0xff]  ;;  %v8461_v61 = vld [vmem:[#allocation5 + $0x1] ss:$0 sm:$0xff] }
0x103e   :  { %v2875_v2 = vpop.xlane.xlu0 %2874 }
0x103f   :  { %v11551_v56 = vsub.f32 %v2858_v17, %v2884_v1  ;;  %v2883_v5 = vmul.f32 0.03125, %v2875_v2  ;;  %v2906_v3 = vsel %vm489_vm1, %v2894_v53, 0.0  ;;  %v2893_v9 = vmul.f32 %v11547_v0, %v11547_v0 }
0x1040   :  { %2907 = vadd.xlane.f32.xlu1 %v2906_v3 }
0x1041   :  { %v11556_v4 = vsub.f32 %v2857_v49, %v2883_v5  ;;  %v2903_v10 = vsel %vm489_vm1, %v2893_v9, 0.0  ;;  %v2896_v60 = vmul.f32 %v11551_v56, %v11551_v56 }
0x1042   :  { %2904 = vadd.xlane.f32.xlu0 %v2903_v10 }
0x1043   :  { %v2912_v7 = vsel %vm489_vm1, %v2896_v60, 0.0  ;;  %v2895_v12 = vmul.f32 %v11556_v4, %v11556_v4 }
0x1044   :  { %2913 = vadd.xlane.f32.xlu1 %v2912_v7 }
0x1045   :  { %v2909_v6 = vsel %vm489_vm1, %v2895_v12, 0.0 }
0x1046   :  { %2910 = vadd.xlane.f32.xlu0 %v2909_v6 }
0x10c4   :  { %v2902_v48 = vpop.xlane.xlu1 %2901 }
0x10c5   :  { %v2916_v14 = vmul.f32 0.03125, %v2902_v48 }
0x10c6   :  { %v2899_v37 = vpop.xlane.xlu0 %2898 }
0x10c7   :  { %v2922_v31 = vadd.f32 1e-05, %v2916_v14  ;;  %v2915_v18 = vmul.f32 0.03125, %v2899_v37 }
0x10c9   :  { %10124 = vrsqrt.f32 %v2922_v31  ;;  %v2921_v19 = vadd.f32 1e-05, %v2915_v18  ;;  %v2908_v35 = vpop.xlane.xlu1 %2907 }
0x10ca   :  { %v2918_v34 = vmul.f32 0.03125, %v2908_v35 }
0x10cb   :  { %10126 = vrsqrt.f32 %v2921_v19  ;;  %v2905_v38 = vpop.xlane.xlu0 %2904 }
0x10cc   :  { %v2924_v22 = vadd.f32 1e-05, %v2918_v34  ;;  %v2917_v29 = vmul.f32 0.03125, %v2905_v38 }
0x10cd   :  { %v2914_v26 = vpop.xlane.xlu1 %2913 }
0x10ce   :  { %10128 = vrsqrt.f32 %v2924_v22  ;;  %v2923_v27 = vadd.f32 1e-05, %v2917_v29  ;;  %v2920_v30 = vmul.f32 0.03125, %v2914_v26  ;;  %v11666_v22 = vld [vmem:[%s12682_s20 + $0x8] sm:$0xff] }
0x10cf   :  { %v2911_v32 = vpop.xlane.xlu0 %2910 }
0x10d0   :  { %10130 = vrsqrt.f32 %v2923_v27  ;;  %v2926_v39 = vadd.f32 1e-05, %v2920_v30  ;;  %v2919_v28 = vmul.f32 0.03125, %v2911_v32  ;;  %v11670_v30 = vld [vmem:[%s12682_s20] sm:$0xff] }
0x10d2   :  { %10132 = vrsqrt.f32 %v2926_v39  ;;  %v2925_v23 = vadd.f32 1e-05, %v2919_v28 }
0x10d4   :  { %10134 = vrsqrt.f32 %v2925_v23 }
0x10d6   :  { %v10125_v40 = vpop.eup %10124 }
0x10d7   :  { %v2934_v43 = vmul.f32 %v10125_v40, %v11535_v42  ;;  %v11675_v40 = vld [vmem:[%s12682_s20 + $0x18] sm:$0xff] }
0x10d8   :  { %v10127_v33 = vpop.eup %10126 }
0x10d9   :  { %v2933_v44 = vmul.f32 %v10127_v33, %v11537_v55  ;;  %v2946_v36 = vmul.f32 %v8455_v45, %v2934_v43 }
0x10db   :  { %v10129_v17 = vpop.eup %10128  ;;  %v2945_v47 = vmul.f32 %v8455_v45, %v2933_v44  ;;  %v11574_v51 = vadd.f32 %v8456_v46, %v2946_v36  ;;  %v11680_v36 = vld [vmem:[%s12682_s20 + $0x10] sm:$0xff] }
0x10dc   :  { %v2936_v49 = vmul.f32 %v10129_v17, %v11544_v59 }
0x10dd   :  { %v10131_v16 = vpop.eup %10130  ;;  %v11572_v50 = vadd.f32 %v8456_v46, %v2945_v47 }
0x10de   :  { %v2935_v21 = vmul.f32 %v10131_v16, %v11547_v0  ;;  %v2948_v42 = vmul.f32 %v8455_v45, %v2936_v49  ;;  %v11684_v49 = vld [vmem:[%s12682_s20 + $0x28] sm:$0xff] }
0x10df   :  { %v10133_v41 = vpop.eup %10132  ;;  %9413 = vmatprep.mubr.msk.f32.mxu0 %vm489_vm1, %v11572_v50 }
0x10e0   :  { %9414 = vmatmul.mubr.msk.f32.vlgmr.msra.gmra.mxu0 %vm489_vm1, %v11574_v51  ;;  %v2947_v20 = vmul.f32 %v8455_v45, %v2935_v21  ;;  %v2938_v55 = vmul.f32 %v10133_v41, %v11551_v56  ;;  %v11585_v58 = vadd.f32 %v8456_v46, %v2948_v42 }
0x10e1   :  { %v10135_v25 = vpop.eup %10134 }
0x10e2   :  { %v11582_v54 = vadd.f32 %v8456_v46, %v2947_v20  ;;  %v2937_v52 = vmul.f32 %v10135_v25, %v11556_v4  ;;  %v2950_v57 = vmul.f32 %v8455_v45, %v2938_v55  ;;  %v11690_v20 = vld [vmem:[%s12682_s20 + $0x20] sm:$0xff] }
0x10e4   :  { %9416 = vmatprep.mubr.msk.f32.mxu0 %vm489_vm1, %v11582_v54  ;;  %v2949_v24 = vmul.f32 %v8455_v45, %v2937_v52  ;;  %v11593_v62 = vadd.f32 %v8456_v46, %v2950_v57 }
0x10e5   :  { %9417 = vmatmul.mubr.msk.f32.gmra.mxu0 %vm489_vm1, %v11585_v58 }
0x10e6   :  { %v11591_v59 = vadd.f32 %v8456_v46, %v2949_v24 }
0x10e8   :  { %9419 = vmatprep.mubr.msk.f32.mxu0 %vm489_vm1, %v11591_v59 }
0x10e9   :  { %9420 = vmatmul.mubr.msk.f32.gmra.mxu0 %vm489_vm1, %v11593_v62 }
0x11a0   :  { %v9415_v63 = vpop.f32.mrf.mxu0 }
0x11a1   :  { %v11619_v60 = vadd.f32 %v9415_v63, %v8461_v61 }
0x11a2   :  { %v3060_v0 = vpop.f32.mrf.mxu0 }
0x11a3   :  { %v11599_v1 = vadd.f32 %v8461_v61, %v3060_v0 }
0x11a5   :  { %v9418_v53 = vpop.f32.mrf.mxu0  ;;  %9434 = vmatprep.mubr.msk.f32.mxu1 %vm625_vm2, %v11599_v1 }
0x11a6   :  { %v11613_v10 = vadd.f32 %v9418_v53, %v8461_v61 }
0x11a7   :  { %v3070_v2 = vpop.f32.mrf.mxu0 }
0x11a8   :  { %v11609_v4 = vadd.f32 %v8461_v61, %v3070_v2 }
0x11a9   :  { %v9421_v56 = vpop.f32.mrf.mxu0 }
0x11aa   :  { %v11603_v5 = vadd.f32 %v9421_v56, %v8461_v61 }
0x11ab   :  { %v3080_v3 = vpop.f32.mrf.mxu0 }
0x11ac   :  { %v11605_v9 = vadd.f32 %v8461_v61, %v3080_v3  ;;  %3110 = vrot.lane.b32.xlu0 %v11603_v5, %s10690_s11 }
0x11ae   :  { %3108 = vrot.lane.b32.xlu1 %v11605_v9, %s10690_s11 }
0x11b0   :  { %3104 = vrot.lane.b32.xlu0 %v11609_v4, %s10690_s11 }
0x11b2   :  { %3106 = vrot.lane.b32.xlu1 %v11613_v10, %s10690_s11 }
0x11b4   :  { %3100 = vrot.lane.b32.xlu0 %v11599_v1, %s10690_s11 }
0x11b6   :  { %3102 = vrot.lane.b32.xlu1 %v11619_v60, %s10690_s11 }
0x11b8   :  { %3319 = vrot.lane.b32.xlu0 %v11603_v5, %s10691_s15 }
0x11ba   :  { %3313 = vrot.lane.b32.xlu1 %v11609_v4, %s10691_s15 }
0x11bc   :  { %3315 = vrot.lane.b32.xlu0 %v11613_v10, %s10691_s15 }
0x11be   :  { %3311 = vrot.lane.b32.xlu1 %v11619_v60, %s10691_s15 }
0x11c0   :  { %3309 = vrot.lane.b32.xlu0 %v11599_v1, %s10691_s15 }
0x11c2   :  { %3462 = vrot.lane.b32.xlu1 %v11603_v5, %s10692_s16 }
0x11c6   :  { %3317 = vrot.lane.b32.xlu1 %v11605_v9, %s10691_s15 }
0x121e   :  { %v3111_v7 = vpop.permute.xlu0 %3110 }
0x121f   :  { %9422 = vmatprep.subr.msk.mxu1 %vm625_vm2, %v3111_v7 }
0x1220   :  { %9423 = vmatpush3.xpose.msk.msra.mxu1 %vm625_vm2, %v3111_v7  ;;  %v3109_v12 = vpop.permute.xlu1 %3108 }
0x1221   :  { %9424 = vmatprep.subr.msk.mxu1 %vm625_vm2, %v3109_v12 }
0x1222   :  { %v3105_v6 = vpop.permute.xlu0 %3104 }
0x1224   :  { %9425 = vmatpush3.xpose.msk.msra.mxu1 %vm625_vm2, %v3109_v12  ;;  %v3107_v11 = vpop.permute.xlu1 %3106 }
0x1225   :  { %9426 = vmatprep.subr.msk.mxu1 %vm625_vm2, %v3107_v11 }
0x1226   :  { %v3101_v8 = vpop.permute.xlu0 %3100 }
0x1228   :  { %9427 = vmatpush3.xpose.msk.msra.mxu1 %vm625_vm2, %v3107_v11  ;;  %v3103_v13 = vpop.permute.xlu1 %3102 }
0x1229   :  { %9428 = vmatprep.subr.msk.mxu1 %vm625_vm2, %v3105_v6 }
0x122a   :  { %v3320_v15 = vpop.permute.xlu0 %3319 }
0x122b   :  { %9443 = vmatprep.subr.mxu0 %v3320_v15 }
0x122c   :  { %9429 = vmatpush3.xpose.msk.msra.mxu1 %vm625_vm2, %v3105_v6  ;;  %9444 = vmatpush3.msra.mxu0 %v3320_v15  ;;  %v3314_v48 = vpop.permute.xlu1 %3313 }
0x122d   :  { %9430 = vmatprep.subr.msk.mxu1 %vm625_vm2, %v3103_v13 }
0x122e   :  { %v3316_v18 = vpop.permute.xlu0 %3315 }
0x1230   :  { %9431 = vmatpush3.xpose.msk.msra.mxu1 %vm625_vm2, %v3103_v13  ;;  %v3312_v14 = vpop.permute.xlu1 %3311 }
0x1231   :  { %9432 = vmatprep.subr.msk.mxu1 %vm625_vm2, %v3101_v8 }
0x1232   :  { %v3310_v19 = vpop.permute.xlu0 %3309 }
0x1234   :  { %9433 = vmatpush3.xpose.msk.msra.mxu1 %vm625_vm2, %v3101_v8  ;;  %v11651_v37 = vpop.permute.xlu1 %3462 }
0x1237   :  { %9435 = vmatmul.mubr.msk.f32.vlgmr.msra.gmra.mxu1 %vm625_vm2, %v11619_v60 }
0x1238   :  { %9437 = vmatprep.mubr.msk.f32.mxu1 %vm625_vm2, %v11609_v4  ;;  %v3318_v31 = vpop.permute.xlu1 %3317 }
0x1239   :  { %9445 = vmatprep.subr.mxu0 %v3318_v31 }
0x123a   :  { %9446 = vmatpush3.msra.mxu0 %v3318_v31 }
0x123b   :  { %9438 = vmatmul.mubr.msk.f32.gmra.mxu1 %vm625_vm2, %v11613_v10  ;;  %9447 = vmatprep.subr.mxu0 %v3316_v18 }
0x123c   :  { %9440 = vmatprep.mubr.msk.f32.mxu1 %vm625_vm2, %v11605_v9  ;;  %9448 = vmatpush3.msra.mxu0 %v3316_v18 }
0x123d   :  { %9449 = vmatprep.subr.mxu0 %v3314_v48 }
0x123e   :  { %9450 = vmatpush3.msra.mxu0 %v3314_v48 }
0x123f   :  { %9441 = vmatmul.mubr.msk.f32.gmra.mxu1 %vm625_vm2, %v11603_v5  ;;  %9451 = vmatprep.subr.mxu0 %v3312_v14 }
0x1240   :  { %9452 = vmatpush3.msra.mxu0 %v3312_v14 }
0x1241   :  { %9453 = vmatprep.subr.mxu0 %v3310_v19 }
0x1242   :  { %9454 = vmatpush3.msra.mxu0 %v3310_v19 }
0x1243   :  { %9464 = vmatprep.subr.msk.mxu0 %vm625_vm2, %v11651_v37 }
0x12f7   :  { %v9436_v35 = vpop.f32.mrf.mxu1 }
0x12f8   :  { %v3232_v34 = vmul.f32 0.35355338, %v9436_v35 }
0x12f9   :  { %v3202_v38 = vpop.f32.mrf.mxu1 }
0x12fa   :  { %v3238_v29 = vadd.f32 %v11666_v22, %v3232_v34  ;;  %v3231_v26 = vmul.f32 0.35355338, %v3202_v38 }
0x12fb   :  { %v9439_v27 = vpop.f32.mrf.mxu1 }
0x12fc   :  { %v3237_v32 = vadd.f32 %v11670_v30, %v3231_v26  ;;  %v3234_v39 = vmul.f32 0.35355338, %v9439_v27  ;;  %v3246_v28 = vsel %vm757_vm3, %v3238_v29, -inf }
0x12fd   :  { %3247 = vmax.xlane.f32.xlu0 %v3246_v28  ;;  %v3212_v23 = vpop.f32.mrf.mxu1 }
0x12fe   :  { %v3240_v43 = vadd.f32 %v11675_v40, %v3234_v39  ;;  %v3233_v45 = vmul.f32 0.35355338, %v3212_v23  ;;  %v3243_v33 = vsel %vm757_vm3, %v3237_v32, -inf }
0x12ff   :  { %3244 = vmax.xlane.f32.xlu1 %v3243_v33  ;;  %v9442_v44 = vpop.f32.mrf.mxu1 }
0x1300   :  { %v3239_v17 = vadd.f32 %v11680_v36, %v3233_v45  ;;  %v3236_v46 = vmul.f32 0.35355338, %v9442_v44  ;;  %v3252_v41 = vsel %vm757_vm3, %v3240_v43, -inf }
0x1301   :  { %v3222_v47 = vpop.f32.mrf.mxu1 }
0x1302   :  { %v3242_v16 = vadd.f32 %v11684_v49, %v3236_v46  ;;  %v3235_v21 = vmul.f32 0.35355338, %v3222_v47  ;;  %v3249_v42 = vsel %vm757_vm3, %v3239_v17, -inf }
0x1303   :  { %3253 = vmax.xlane.f32.xlu1 %v3252_v41  ;;  %3250 = vmax.xlane.f32.xlu0 %v3249_v42 }
0x1304   :  { %v3241_v55 = vadd.f32 %v11690_v20, %v3235_v21  ;;  %v3258_v25 = vsel %vm757_vm3, %v3242_v16, -inf }
0x1306   :  { %v3255_v52 = vsel %vm757_vm3, %v3241_v55, -inf }
0x1307   :  { %3259 = vmax.xlane.f32.xlu1 %v3258_v25  ;;  %3256 = vmax.xlane.f32.xlu0 %v3255_v52 }
0x1318   :  { %3458 = vrot.lane.b32.xlu1 %v11613_v10, %s10692_s16 }
0x131d   :  { %3460 = vrot.lane.b32.xlu0 %v11605_v9, %s10692_s16 }
0x1386   :  { %v3248_v57 = vpop.xlane.xlu0 %3247 }
0x1387   :  { %v3262_v24 = vsub.f32 %v3238_v29, %v3248_v57 }
0x1388   :  { %v3245_v63 = vpop.xlane.xlu1 %3244 }
0x1389   :  { %v3269_v61 = vmul.f32 1.442695, %v3262_v24  ;;  %v3261_v0 = vsub.f32 %v3237_v32, %v3245_v63 }
0x138b   :  { %10136 = vpow2.f32 %v3269_v61  ;;  %v3267_v53 = vmul.f32 1.442695, %v3261_v0 }
0x138c   :  { %v3251_v12 = vpop.xlane.xlu0 %3250  ;;  %v3254_v6 = vpop.xlane.xlu1 %3253 }
0x138d   :  { %10138 = vpow2.f32 %v3267_v53  ;;  %v3264_v11 = vsub.f32 %v3240_v43, %v3254_v6  ;;  %v3263_v13 = vsub.f32 %v3239_v17, %v3251_v12 }
0x138f   :  { %v3273_v48 = vmul.f32 1.442695, %v3264_v11  ;;  %v3271_v31 = vmul.f32 1.442695, %v3263_v13  ;;  %v8468_v11 = vld [vmem:[%s12683_s18 + $0x20] sm:$0xff] }
0x1390   :  { %v3257_v8 = vpop.xlane.xlu0 %3256  ;;  %v3260_v15 = vpop.xlane.xlu1 %3259 }
0x1391   :  { %v3265_v14 = vsub.f32 %v3241_v55, %v3257_v8  ;;  %v3266_v18 = vsub.f32 %v3242_v16, %v3260_v15  ;;  %10140 = vpow2.f32 %v3273_v48 }
0x1392   :  { %10142 = vpow2.f32 %v3271_v31 }
0x1393   :  { %v3275_v19 = vmul.f32 1.442695, %v3265_v14  ;;  %v3277_v35 = vmul.f32 1.442695, %v3266_v18 }
0x1394   :  { %v3459_v23 = vpop.permute.xlu1 %3458  ;;  %v3461_v43 = vpop.permute.xlu0 %3460 }
0x1395   :  { %10144 = vpow2.f32 %v3275_v19 }
0x1396   :  { %10146 = vpow2.f32 %v3277_v35 }
0x1398   :  { %v10137_v2 = vpop.eup %10136 }
0x1399   :  { %v3282_v56 = vsel %vm757_vm3, %v10137_v2, 0.0 }
0x139a   :  { %v10139_v3 = vpop.eup %10138  ;;  %3283 = vadd.xlane.f32.xlu1 %v3282_v56 }
0x139b   :  { %v3279_v7 = vsel %vm757_vm3, %v10139_v3, 0.0 }
0x139c   :  { %3280 = vadd.xlane.f32.xlu0 %v3279_v7 }
0x139e   :  { %v10141_v34 = vpop.eup %10140 }
0x139f   :  { %v10143_v38 = vpop.eup %10142  ;;  %v3288_v29 = vsel %vm757_vm3, %v10141_v34, 0.0 }
0x13a0   :  { %v3285_v27 = vsel %vm757_vm3, %v10143_v38, 0.0 }
0x13a2   :  { %v10145_v26 = vpop.eup %10144 }
0x13a3   :  { %v10147_v32 = vpop.eup %10146  ;;  %v3291_v39 = vsel %vm757_vm3, %v10145_v26, 0.0 }
0x13a4   :  { %v3294_v28 = vsel %vm757_vm3, %v10147_v32, 0.0 }
0x13ab   :  { %3454 = vrot.lane.b32.xlu1 %v11619_v60, %s10692_s16 }
0x13b2   :  { %3456 = vrot.lane.b32.xlu0 %v11609_v4, %s10692_s16 }
0x13cf   :  { %3289 = vadd.xlane.f32.xlu1 %v3288_v29 }
0x13d1   :  { %3286 = vadd.xlane.f32.xlu0 %v3285_v27 }
0x13d3   :  { %3292 = vadd.xlane.f32.xlu1 %v3291_v39 }
0x13d5   :  { %3295 = vadd.xlane.f32.xlu0 %v3294_v28 }
0x13e4   :  { %3440 = vrot.lane.b32.xlu1 %v11599_v1, %s10693_s14 }
0x13e8   :  { %3444 = vrot.lane.b32.xlu1 %v11609_v4, %s10693_s14 }
0x13eb   :  { %3452 = vrot.lane.b32.xlu0 %v11599_v1, %s10692_s16 }
0x13ec   :  { %3448 = vrot.lane.b32.xlu1 %v11605_v9, %s10693_s14 }
0x13ef   :  { %3442 = vrot.lane.b32.xlu0 %v11619_v60, %s10693_s14 }
0x13f3   :  { %3446 = vrot.lane.b32.xlu0 %v11613_v10, %s10693_s14 }
0x13f7   :  { %3450 = vrot.lane.b32.xlu0 %v11603_v5, %s10693_s14 }
0x1423   :  { %v3284_v45 = vpop.xlane.xlu1 %3283 }
0x1424   :  { %10148 = vrcp.f32 %v3284_v45 }
0x1425   :  { %v3281_v33 = vpop.xlane.xlu0 %3280 }
0x1426   :  { %10150 = vrcp.f32 %v3281_v33 }
0x1427   :  { %v3455_v21 = vpop.permute.xlu1 %3454 }
0x1429   :  { %v3457_v16 = vpop.permute.xlu0 %3456 }
0x1431   :  { %v10149_v44 = vpop.eup %10148 }
0x1432   :  { %v3304_v47 = vmul.f32 %v10149_v44, %v10137_v2 }
0x1433   :  { %v10151_v17 = vpop.eup %10150 }
0x1434   :  { %v3303_v46 = vmul.f32 %v10151_v17, %v10139_v3 }
0x1436   :  { %9455 = vmatprep.mubr.msk.f32.mxu0 %vm757_vm3, %v3303_v46 }
0x1437   :  { %9456 = vmatmul.mubr.msk.f32.vlgmr.msra.gmra.mxu0 %vm757_vm3, %v3304_v47 }
0x1438   :  { %9465 = vmatpush3.xpose.msk.msra.mxu0 %vm625_vm2, %v11651_v37 }
0x1439   :  { %9466 = vmatprep.subr.msk.mxu0 %vm625_vm2, %v3461_v43 }
0x143c   :  { %9467 = vmatpush3.xpose.msk.msra.mxu0 %vm625_vm2, %v3461_v43 }
0x143d   :  { %9468 = vmatprep.subr.msk.mxu0 %vm625_vm2, %v3459_v23 }
0x1440   :  { %9469 = vmatpush3.xpose.msk.msra.mxu0 %vm625_vm2, %v3459_v23 }
0x1441   :  { %9470 = vmatprep.subr.msk.mxu0 %vm625_vm2, %v3457_v16 }
0x1444   :  { %9471 = vmatpush3.xpose.msk.msra.mxu0 %vm625_vm2, %v3457_v16 }
0x1445   :  { %9472 = vmatprep.subr.msk.mxu0 %vm625_vm2, %v3455_v21 }
0x1448   :  { %9473 = vmatpush3.xpose.msk.msra.mxu0 %vm625_vm2, %v3455_v21 }
0x1458   :  { %v3290_v41 = vpop.xlane.xlu1 %3289 }
0x1459   :  { %10152 = vrcp.f32 %v3290_v41 }
0x145a   :  { %v3287_v37 = vpop.xlane.xlu0 %3286 }
0x145b   :  { %10154 = vrcp.f32 %v3287_v37 }
0x145c   :  { %v3293_v42 = vpop.xlane.xlu1 %3292 }
0x145d   :  { %10156 = vrcp.f32 %v3293_v42 }
0x145e   :  { %v3296_v55 = vpop.xlane.xlu0 %3295 }
0x145f   :  { %10158 = vrcp.f32 %v3296_v55 }
0x1460   :  { %v3441_v2 = vpop.permute.xlu1 %3440 }
0x1462   :  { %v3453_v25 = vpop.permute.xlu0 %3452 }
0x1463   :  { %9474 = vmatprep.subr.msk.mxu0 %vm625_vm2, %v3453_v25 }
0x1464   :  { %9475 = vmatpush3.xpose.msk.msra.mxu0 %vm625_vm2, %v3453_v25  ;;  %v3445_v7 = vpop.permute.xlu1 %3444 }
0x1465   :  { %9517 = vmatprep.subr.mxu0 %v8468_v11 }
0x1466   :  { %v10153_v52 = vpop.eup %10152  ;;  %v3443_v3 = vpop.permute.xlu0 %3442 }
0x1467   :  { %v3306_v61 = vmul.f32 %v10153_v52, %v10141_v34 }
0x1468   :  { %v10155_v57 = vpop.eup %10154  ;;  %v3449_v6 = vpop.permute.xlu1 %3448 }
0x1469   :  { %v3305_v24 = vmul.f32 %v10155_v57, %v10143_v38 }
0x146a   :  { %v10157_v63 = vpop.eup %10156  ;;  %v3447_v12 = vpop.permute.xlu0 %3446 }
0x146b   :  { %9458 = vmatprep.mubr.msk.f32.mxu0 %vm757_vm3, %v3305_v24  ;;  %v3307_v0 = vmul.f32 %v10157_v63, %v10145_v26 }
0x146c   :  { %v10159_v53 = vpop.eup %10158  ;;  %9459 = vmatmul.mubr.msk.f32.gmra.mxu0 %vm757_vm3, %v3306_v61 }
0x146d   :  { %9461 = vmatprep.mubr.msk.f32.mxu0 %vm757_vm3, %v3307_v0  ;;  %v3308_v56 = vmul.f32 %v10159_v53, %v10147_v32 }
0x146e   :  { %v3451_v8 = vpop.permute.xlu0 %3450 }
0x1470   :  { %9462 = vmatmul.mubr.msk.f32.gmra.mxu0 %vm757_vm3, %v3308_v56 }
0x1471   :  { %9476 = vmatprep.mubr.msk.f32.mxu0 %vm625_vm2, %v3441_v2 }
0x1474   :  { %9477 = vmatmul.mubr.msk.f32.vlgmr.msra.gmra.mxu0 %vm625_vm2, %v3443_v3 }
0x1475   :  { %9479 = vmatprep.mubr.msk.f32.mxu0 %vm625_vm2, %v3445_v7  ;;  %9518 = vmatpush3.msra.mxu0 %v8468_v11 }
0x1478   :  { %9480 = vmatmul.mubr.msk.f32.gmra.mxu0 %vm625_vm2, %v3447_v12 }
0x1479   :  { %9482 = vmatprep.mubr.msk.f32.mxu0 %vm625_vm2, %v3449_v6 }
0x147c   :  { %9483 = vmatmul.mubr.msk.f32.gmra.mxu0 %vm625_vm2, %v3451_v8 }
0x14f7   :  { %v9457_v13 = vpop.f32.mrf.mxu0 }
0x14f9   :  { %v3411_v15 = vpop.f32.mrf.mxu0 }
0x14fa   :  { %9519 = vmatprep.mubr.msk.f32.mxu0 %vm625_vm2, %v3411_v15 }
0x14fb   :  { %9520 = vmatmul.mubr.msk.f32.vlgmr.msra.gmra.mxu0 %vm625_vm2, %v9457_v13 }
0x152c   :  { %v9460_v48 = vpop.f32.mrf.mxu0 }
0x152e   :  { %v3421_v14 = vpop.f32.mrf.mxu0 }
0x152f   :  { %9522 = vmatprep.mubr.msk.f32.mxu0 %vm625_vm2, %v3421_v14 }
0x1530   :  { %v9463_v31 = vpop.f32.mrf.mxu0  ;;  %9523 = vmatmul.mubr.msk.f32.gmra.mxu0 %vm625_vm2, %v9460_v48 }
0x1532   :  { %v3431_v18 = vpop.f32.mrf.mxu0 }
0x1533   :  { %9525 = vmatprep.mubr.msk.f32.mxu0 %vm625_vm2, %v3431_v18 }
0x1534   :  { %v9478_v19 = vpop.f32.mrf.mxu0  ;;  %9526 = vmatmul.mubr.msk.f32.gmra.mxu0 %vm625_vm2, %v9463_v31 }
0x1535   :  { %v3584_v35 = vmul.f32 0.35355338, %v9478_v19 }
0x1536   :  { %v3554_v34 = vpop.f32.mrf.mxu0 }
0x1537   :  { %v3590_v38 = vadd.f32 %v11666_v22, %v3584_v35  ;;  %v3583_v29 = vmul.f32 0.35355338, %v3554_v34 }
0x1538   :  { %v9481_v26 = vpop.f32.mrf.mxu0 }
0x1539   :  { %v3589_v27 = vadd.f32 %v11670_v30, %v3583_v29  ;;  %v3586_v32 = vmul.f32 0.35355338, %v9481_v26  ;;  %v3598_v39 = vsel %vm757_vm3, %v3590_v38, -inf }
0x153a   :  { %3599 = vmax.xlane.f32.xlu0 %v3598_v39  ;;  %v3564_v28 = vpop.f32.mrf.mxu0 }
0x153b   :  { %v3592_v23 = vadd.f32 %v11675_v40, %v3586_v32  ;;  %v3585_v43 = vmul.f32 0.35355338, %v3564_v28  ;;  %v3595_v45 = vsel %vm757_vm3, %v3589_v27, -inf }
0x153c   :  { %3596 = vmax.xlane.f32.xlu1 %v3595_v45  ;;  %v9484_v33 = vpop.f32.mrf.mxu0 }
0x153d   :  { %v3591_v44 = vadd.f32 %v11680_v36, %v3585_v43  ;;  %v3588_v17 = vmul.f32 0.35355338, %v9484_v33  ;;  %v3604_v21 = vsel %vm757_vm3, %v3592_v23, -inf }
0x153e   :  { %v3574_v46 = vpop.f32.mrf.mxu0 }
0x153f   :  { %v3594_v47 = vadd.f32 %v11684_v49, %v3588_v17  ;;  %v3587_v16 = vmul.f32 0.35355338, %v3574_v46  ;;  %v3601_v41 = vsel %vm757_vm3, %v3591_v44, -inf }
0x1540   :  { %3605 = vmax.xlane.f32.xlu1 %v3604_v21  ;;  %3602 = vmax.xlane.f32.xlu0 %v3601_v41 }
0x1541   :  { %v3593_v37 = vadd.f32 %v11690_v20, %v3587_v16  ;;  %v3610_v42 = vsel %vm757_vm3, %v3594_v47, -inf }
0x1543   :  { %v3607_v55 = vsel %vm757_vm3, %v3593_v37, -inf }
0x1544   :  { %3611 = vmax.xlane.f32.xlu1 %v3610_v42  ;;  %3608 = vmax.xlane.f32.xlu0 %v3607_v55 }
0x15c3   :  { %v3600_v25 = vpop.xlane.xlu0 %3599 }
0x15c4   :  { %v3614_v52 = vsub.f32 %v3590_v38, %v3600_v25  ;;  %v8469_v25 = vld [vmem:[%s12683_s18 + $0x28] sm:$0xff] }
0x15c5   :  { %v3597_v57 = vpop.xlane.xlu1 %3596 }
0x15c6   :  { %v3621_v24 = vmul.f32 1.442695, %v3614_v52  ;;  %v3613_v63 = vsub.f32 %v3589_v27, %v3597_v57 }
0x15c8   :  { %10160 = vpow2.f32 %v3621_v24  ;;  %v3619_v61 = vmul.f32 1.442695, %v3613_v63 }
0x15c9   :  { %v3603_v0 = vpop.xlane.xlu0 %3602  ;;  %v3606_v53 = vpop.xlane.xlu1 %3605 }
0x15ca   :  { %10162 = vpow2.f32 %v3619_v61  ;;  %v3615_v2 = vsub.f32 %v3591_v44, %v3603_v0  ;;  %v3616_v56 = vsub.f32 %v3592_v23, %v3606_v53 }
0x15cc   :  { %v3623_v3 = vmul.f32 1.442695, %v3615_v2  ;;  %v3625_v7 = vmul.f32 1.442695, %v3616_v56 }
0x15cd   :  { %v3612_v31 = vpop.xlane.xlu1 %3611  ;;  %v3609_v35 = vpop.xlane.xlu0 %3608 }
0x15ce   :  { %10164 = vpow2.f32 %v3623_v3  ;;  %v3618_v18 = vsub.f32 %v3594_v47, %v3612_v31  ;;  %v3617_v34 = vsub.f32 %v3593_v37, %v3609_v35 }
0x15cf   :  { %10166 = vpow2.f32 %v3625_v7 }
0x15d0   :  { %v3629_v19 = vmul.f32 1.442695, %v3618_v18  ;;  %v3627_v38 = vmul.f32 1.442695, %v3617_v34 }
0x15d2   :  { %10168 = vpow2.f32 %v3629_v19 }
0x15d3   :  { %10170 = vpow2.f32 %v3627_v38 }
0x15d5   :  { %v11766_v12 = vpop.eup %10160 }
0x15d6   :  { %v3634_v6 = vsel %vm757_vm3, %v11766_v12, 0.0 }
0x15d7   :  { %v11770_v11 = vpop.eup %10162  ;;  %3635 = vadd.xlane.f32.xlu1 %v3634_v6 }
0x15d8   :  { %v3631_v8 = vsel %vm757_vm3, %v11770_v11, 0.0 }
0x15d9   :  { %3632 = vadd.xlane.f32.xlu0 %v3631_v8 }
0x15db   :  { %v11774_v13 = vpop.eup %10164 }
0x15dc   :  { %v11776_v15 = vpop.eup %10166  ;;  %v3637_v48 = vsel %vm757_vm3, %v11774_v13, 0.0 }
0x15dd   :  { %3638 = vadd.xlane.f32.xlu0 %v3637_v48  ;;  %v3640_v14 = vsel %vm757_vm3, %v11776_v15, 0.0 }
0x15de   :  { %3641 = vadd.xlane.f32.xlu1 %v3640_v14 }
0x15df   :  { %v11792_v29 = vpop.eup %10168 }
0x15e0   :  { %v3646_v26 = vsel %vm757_vm3, %v11792_v29, 0.0  ;;  %v11796_v27 = vpop.eup %10170 }
0x15e1   :  { %v3643_v32 = vsel %vm757_vm3, %v11796_v27, 0.0 }
0x15ef   :  { %3669 = vrot.lane.b32.xlu1 %v11605_v9, %s10694_s24 }
0x15f3   :  { %3667 = vrot.lane.b32.xlu1 %v11613_v10, %s10694_s24  ;;  %3671 = vrot.lane.b32.xlu0 %v11603_v5, %s10694_s24 }
0x15f7   :  { %3665 = vrot.lane.b32.xlu1 %v11609_v4, %s10694_s24 }
0x15fb   :  { %3663 = vrot.lane.b32.xlu1 %v11619_v60, %s10694_s24 }
0x1612   :  { %3647 = vadd.xlane.f32.xlu0 %v3646_v26 }
0x161f   :  { %3644 = vadd.xlane.f32.xlu1 %v3643_v32 }
0x1628   :  { %4032 = vrot.lane.b32.xlu0 %v11619_v60, %s10695_s23 }
0x162c   :  { %4026 = vrot.lane.b32.xlu0 %v11605_v9, %s10696_s3 }
0x1630   :  { %3661 = vrot.lane.b32.xlu1 %v11599_v1, %s10694_s24  ;;  %4511 = vrot.lane.b32.xlu0 %v11603_v5, %s10697_s22 }
0x1634   :  { %4040 = vrot.lane.b32.xlu1 %v11603_v5, %s10695_s23  ;;  %4507 = vrot.lane.b32.xlu0 %v11613_v10, %s10697_s22 }
0x1638   :  { %4038 = vrot.lane.b32.xlu1 %v11605_v9, %s10695_s23  ;;  %4503 = vrot.lane.b32.xlu0 %v11619_v60, %s10697_s22 }
0x163c   :  { %4036 = vrot.lane.b32.xlu1 %v11613_v10, %s10695_s23  ;;  %4489 = vrot.lane.b32.xlu0 %v11599_v1, %s10698_s4 }
0x1640   :  { %4034 = vrot.lane.b32.xlu1 %v11609_v4, %s10695_s23  ;;  %4493 = vrot.lane.b32.xlu0 %v11609_v4, %s10698_s4 }
0x1644   :  { %4030 = vrot.lane.b32.xlu1 %v11599_v1, %s10695_s23  ;;  %4497 = vrot.lane.b32.xlu0 %v11605_v9, %s10698_s4 }
0x1648   :  { %4018 = vrot.lane.b32.xlu1 %v11599_v1, %s10696_s3 }
0x164c   :  { %4020 = vrot.lane.b32.xlu1 %v11619_v60, %s10696_s3 }
0x1650   :  { %4022 = vrot.lane.b32.xlu1 %v11609_v4, %s10696_s3 }
0x1654   :  { %4024 = vrot.lane.b32.xlu1 %v11613_v10, %s10696_s3 }
0x1658   :  { %4028 = vrot.lane.b32.xlu1 %v11603_v5, %s10696_s3 }
0x165c   :  { %4509 = vrot.lane.b32.xlu1 %v11605_v9, %s10697_s22 }
0x1660   :  { %4505 = vrot.lane.b32.xlu1 %v11609_v4, %s10697_s22  ;;  %v3636_v28 = vpop.xlane.xlu1 %3635 }
0x1662   :  { %v3633_v39 = vpop.xlane.xlu0 %3632 }
0x1663   :  { %10172 = vrcp.f32 %v3633_v39 }
0x1664   :  { %4501 = vrot.lane.b32.xlu1 %v11599_v1, %s10697_s22  ;;  %10174 = vrcp.f32 %v3636_v28 }
0x1666   :  { %v3639_v23 = vpop.xlane.xlu0 %3638 }
0x1667   :  { %v3642_v43 = vpop.xlane.xlu1 %3641  ;;  %10176 = vrcp.f32 %v3639_v23 }
0x1668   :  { %4491 = vrot.lane.b32.xlu1 %v11619_v60, %s10698_s4  ;;  %10178 = vrcp.f32 %v3642_v43 }
0x166a   :  { %v3672_v45 = vpop.permute.xlu0 %3671 }
0x166b   :  { %v3670_v33 = vpop.permute.xlu1 %3669  ;;  %9485 = vmatprep.subr.mxu1 %v3672_v45 }
0x166c   :  { %4495 = vrot.lane.b32.xlu1 %v11613_v10, %s10698_s4  ;;  %9486 = vmatpush3.msra.mxu1 %v3672_v45 }
0x166d   :  { %9487 = vmatprep.subr.mxu1 %v3670_v33 }
0x166e   :  { %9488 = vmatpush3.msra.mxu1 %v3670_v33 }
0x166f   :  { %v3668_v44 = vpop.permute.xlu1 %3667 }
0x1670   :  { %v10173_v17 = vpop.eup %10172  ;;  %4499 = vrot.lane.b32.xlu1 %v11603_v5, %s10698_s4  ;;  %9489 = vmatprep.subr.mxu1 %v3668_v44 }
0x1671   :  { %9490 = vmatpush3.msra.mxu1 %v3668_v44  ;;  %v3655_v46 = vmul.f32 %v10173_v17, %v11770_v11  ;;  %v10175_v37 = vpop.eup %10174 }
0x1672   :  { %v3656_v52 = vmul.f32 %v10175_v37, %v11766_v12 }
0x1673   :  { %v3666_v47 = vpop.permute.xlu1 %3665  ;;  %9497 = vmatprep.mubr.msk.f32.mxu1 %vm757_vm3, %v3655_v46 }
0x1674   :  { %9491 = vmatprep.subr.mxu1 %v3666_v47  ;;  %v10177_v42 = vpop.eup %10176 }
0x1675   :  { %9492 = vmatpush3.msra.mxu1 %v3666_v47  ;;  %v10179_v57 = vpop.eup %10178  ;;  %v3657_v24 = vmul.f32 %v10177_v42, %v11774_v13 }
0x1676   :  { %v3658_v61 = vmul.f32 %v10179_v57, %v11776_v15 }
0x1677   :  { %v3664_v16 = vpop.permute.xlu1 %3663 }
0x1678   :  { %9493 = vmatprep.subr.mxu1 %v3664_v16 }
0x1679   :  { %9494 = vmatpush3.msra.mxu1 %v3664_v16 }
0x169b   :  { %v3648_v21 = vpop.xlane.xlu0 %3647 }
0x169c   :  { %10180 = vrcp.f32 %v3648_v21 }
0x169f   :  { %v4033_v14 = vpop.permute.xlu0 %4032 }
0x16a3   :  { %v4027_v35 = vpop.permute.xlu0 %4026 }
0x16a8   :  { %v3645_v41 = vpop.xlane.xlu1 %3644 }
0x16a9   :  { %10182 = vrcp.f32 %v3645_v41  ;;  %v10181_v0 = vpop.eup %10180 }
0x16aa   :  { %v3660_v56 = vmul.f32 %v10181_v0, %v11792_v29  ;;  %v4512_v29 = vpop.permute.xlu0 %4511 }
0x16ac   :  { %v3662_v55 = vpop.permute.xlu1 %3661 }
0x16ad   :  { %9495 = vmatprep.subr.mxu1 %v3662_v55 }
0x16ae   :  { %9496 = vmatpush3.msra.mxu1 %v3662_v55 }
0x16af   :  { %9498 = vmatmul.mubr.msk.f32.vlgmr.msra.gmra.mxu1 %vm757_vm3, %v3656_v52  ;;  %9506 = vmatprep.subr.mxu1 %v8469_v25 }
0x16b0   :  { %9500 = vmatprep.mubr.msk.f32.mxu1 %vm757_vm3, %v3657_v24  ;;  %9507 = vmatpush3.msra.mxu1 %v8469_v25  ;;  %v4041_v63 = vpop.permute.xlu1 %4040 }
0x16b1   :  { %9528 = vmatprep.subr.msk.mxu1 %vm625_vm2, %v4041_v63 }
0x16b3   :  { %9501 = vmatmul.mubr.msk.f32.gmra.mxu1 %vm757_vm3, %v3658_v61 }
0x16b4   :  { %v4039_v3 = vpop.permute.xlu1 %4038 }
0x16b6   :  { %v10183_v53 = vpop.eup %10182 }
0x16b7   :  { %v3659_v2 = vmul.f32 %v10183_v53, %v11796_v27  ;;  %v4508_v27 = vpop.permute.xlu0 %4507 }
0x16b8   :  { %v4037_v7 = vpop.permute.xlu1 %4036 }
0x16b9   :  { %9503 = vmatprep.mubr.msk.f32.mxu1 %vm757_vm3, %v3659_v2 }
0x16ba   :  { %9504 = vmatmul.mubr.msk.f32.gmra.mxu1 %vm757_vm3, %v3660_v56 }
0x16bb   :  { %v4504_v39 = vpop.permute.xlu0 %4503 }
0x16bc   :  { %v4035_v12 = vpop.permute.xlu1 %4034 }
0x16bf   :  { %v4490_v23 = vpop.permute.xlu0 %4489 }
0x16c0   :  { %v4031_v6 = vpop.permute.xlu1 %4030 }
0x16c3   :  { %v4494_v33 = vpop.permute.xlu0 %4493 }
0x16c4   :  { %v4019_v11 = vpop.permute.xlu1 %4018 }
0x16c7   :  { %v4498_v17 = vpop.permute.xlu0 %4497 }
0x16c8   :  { %v4021_v48 = vpop.permute.xlu1 %4020 }
0x16cc   :  { %v4023_v18 = vpop.permute.xlu1 %4022 }
0x16d0   :  { %v4025_v38 = vpop.permute.xlu1 %4024 }
0x16d4   :  { %v4029_v26 = vpop.permute.xlu1 %4028 }
0x16d8   :  { %v4510_v32 = vpop.permute.xlu1 %4509 }
0x16dc   :  { %v4506_v28 = vpop.permute.xlu1 %4505 }
0x16e0   :  { %v4502_v43 = vpop.permute.xlu1 %4501 }
0x16e4   :  { %v4492_v45 = vpop.permute.xlu1 %4491 }
0x16e8   :  { %v4496_v44 = vpop.permute.xlu1 %4495 }
0x16ec   :  { %v4500_v46 = vpop.permute.xlu1 %4499 }
0x176f   :  { %v9499_v8 = vpop.f32.mrf.mxu1 }
0x1771   :  { %v3763_v13 = vpop.f32.mrf.mxu1 }
0x1772   :  { %9508 = vmatprep.mubr.msk.f32.mxu1 %vm625_vm2, %v3763_v13 }
0x1773   :  { %v9502_v15 = vpop.f32.mrf.mxu1  ;;  %9509 = vmatmul.mubr.msk.f32.vlgmr.msra.gmra.mxu1 %vm625_vm2, %v9499_v8 }
0x1774   :  { %9529 = vmatpush3.xpose.msk.msra.mxu1 %vm625_vm2, %v4041_v63 }
0x1775   :  { %9530 = vmatprep.subr.msk.mxu1 %vm625_vm2, %v4039_v3  ;;  %v3773_v31 = vpop.f32.mrf.mxu1 }
0x1776   :  { %9511 = vmatprep.mubr.msk.f32.mxu1 %vm625_vm2, %v3773_v31 }
0x1777   :  { %9512 = vmatmul.mubr.msk.f32.gmra.mxu1 %vm625_vm2, %v9502_v15 }
0x1778   :  { %9531 = vmatpush3.xpose.msk.msra.mxu1 %vm625_vm2, %v4039_v3 }
0x1779   :  { %9532 = vmatprep.subr.msk.mxu1 %vm625_vm2, %v4037_v7 }
0x177a   :  { %v9505_v19 = vpop.f32.mrf.mxu1 }
0x177c   :  { %9533 = vmatpush3.xpose.msk.msra.mxu1 %vm625_vm2, %v4037_v7  ;;  %v3783_v34 = vpop.f32.mrf.mxu1 }
0x177d   :  { %9534 = vmatprep.subr.msk.mxu1 %vm625_vm2, %v4035_v12  ;;  %9514 = vmatprep.mubr.msk.f32.mxu1 %vm625_vm2, %v3783_v34 }
0x177e   :  { %9515 = vmatmul.mubr.msk.f32.gmra.mxu1 %vm625_vm2, %v9505_v19 }
0x177f   :  { %9540 = vmatprep.mubr.msk.f32.mxu1 %vm625_vm2, %v4019_v11 }
0x1780   :  { %9535 = vmatpush3.xpose.msk.msra.mxu1 %vm625_vm2, %v4035_v12 }
0x1781   :  { %9536 = vmatprep.subr.msk.mxu1 %vm625_vm2, %v4033_v14 }
0x1784   :  { %9537 = vmatpush3.xpose.msk.msra.mxu1 %vm625_vm2, %v4033_v14 }
0x1785   :  { %9538 = vmatprep.subr.msk.mxu1 %vm625_vm2, %v4031_v6 }
0x1788   :  { %9539 = vmatpush3.xpose.msk.msra.mxu1 %vm625_vm2, %v4031_v6 }
0x1789   :  { %9581 = vmatprep.subr.msk.mxu1 %vm625_vm2, %v4512_v29 }
0x178b   :  { %9541 = vmatmul.mubr.msk.f32.vlgmr.msra.gmra.mxu1 %vm625_vm2, %v4021_v48 }
0x178c   :  { %9543 = vmatprep.mubr.msk.f32.mxu1 %vm625_vm2, %v4023_v18  ;;  %9582 = vmatpush3.xpose.msk.msra.mxu1 %vm625_vm2, %v4512_v29 }
0x178d   :  { %9583 = vmatprep.subr.msk.mxu1 %vm625_vm2, %v4510_v32 }
0x178f   :  { %9544 = vmatmul.mubr.msk.f32.gmra.mxu1 %vm625_vm2, %v4025_v38 }
0x1790   :  { %9546 = vmatprep.mubr.msk.f32.mxu1 %vm625_vm2, %v4027_v35  ;;  %9584 = vmatpush3.xpose.msk.msra.mxu1 %vm625_vm2, %v4510_v32 }
0x1791   :  { %9585 = vmatprep.subr.msk.mxu1 %vm625_vm2, %v4508_v27 }
0x1793   :  { %9547 = vmatmul.mubr.msk.f32.gmra.mxu1 %vm625_vm2, %v4029_v26 }
0x1794   :  { %9586 = vmatpush3.xpose.msk.msra.mxu1 %vm625_vm2, %v4508_v27  ;;  %9593 = vmatprep.mubr.msk.f32.mxu1 %vm625_vm2, %v4490_v23 }
0x1795   :  { %9587 = vmatprep.subr.msk.mxu1 %vm625_vm2, %v4506_v28 }
0x1798   :  { %9588 = vmatpush3.xpose.msk.msra.mxu1 %vm625_vm2, %v4506_v28 }
0x1799   :  { %9589 = vmatprep.subr.msk.mxu1 %vm625_vm2, %v4504_v39 }
0x179c   :  { %9590 = vmatpush3.xpose.msk.msra.mxu1 %vm625_vm2, %v4504_v39 }
0x179d   :  { %9591 = vmatprep.subr.msk.mxu1 %vm625_vm2, %v4502_v43 }
0x17a0   :  { %9592 = vmatpush3.xpose.msk.msra.mxu1 %vm625_vm2, %v4502_v43 }
0x17a3   :  { %9594 = vmatmul.mubr.msk.f32.vlgmr.msra.gmra.mxu1 %vm625_vm2, %v4492_v45 }
0x17a4   :  { %9596 = vmatprep.mubr.msk.f32.mxu1 %vm625_vm2, %v4494_v33 }
0x17a7   :  { %9597 = vmatmul.mubr.msk.f32.gmra.mxu1 %vm625_vm2, %v4496_v44 }
0x17a8   :  { %9599 = vmatprep.mubr.msk.f32.mxu1 %vm625_vm2, %v4498_v17 }
0x17ab   :  { %9600 = vmatmul.mubr.msk.f32.gmra.mxu1 %vm625_vm2, %v4500_v46 }
0x1833   :  { %v11905_v47 = vpop.f32.mrf.mxu1 }
0x1835   :  { %v11907_v16 = vpop.f32.mrf.mxu1 }
0x1837   :  { %v11909_v21 = vpop.f32.mrf.mxu1 }
0x1839   :  { %v11911_v41 = vpop.f32.mrf.mxu1 }
0x183e   :  { %v11913_v37 = vpop.f32.mrf.mxu1 }
0x1840   :  { %v11915_v42 = vpop.f32.mrf.mxu1 }
0x184b   :  { %v9542_v55 = vpop.f32.mrf.mxu1 }
0x184c   :  { %v4162_v25 = vmul.f32 0.35355338, %v9542_v55 }
0x184d   :  { %v4132_v52 = vpop.f32.mrf.mxu1 }
0x184e   :  { %v4168_v57 = vadd.f32 %v11666_v22, %v4162_v25  ;;  %v4161_v24 = vmul.f32 0.35355338, %v4132_v52 }
0x184f   :  { %v9545_v63 = vpop.f32.mrf.mxu1 }
0x1850   :  { %v4167_v61 = vadd.f32 %v11670_v30, %v4161_v24  ;;  %v4176_v0 = vsel %vm757_vm3, %v4168_v57, -inf  ;;  %v4164_v2 = vmul.f32 0.35355338, %v9545_v63 }
0x1851   :  { %4177 = vmax.xlane.f32.xlu1 %v4176_v0  ;;  %v4142_v53 = vpop.f32.mrf.mxu1 }
0x1852   :  { %v4163_v56 = vmul.f32 0.35355338, %v4142_v53  ;;  %v4173_v3 = vsel %vm757_vm3, %v4167_v61, -inf  ;;  %v4170_v11 = vadd.f32 %v11675_v40, %v4164_v2 }
0x1853   :  { %4174 = vmax.xlane.f32.xlu0 %v4173_v3  ;;  %v9548_v7 = vpop.f32.mrf.mxu1 }
0x1854   :  { %v4169_v12 = vadd.f32 %v11680_v36, %v4163_v56  ;;  %v4166_v8 = vmul.f32 0.35355338, %v9548_v7  ;;  %v4182_v31 = vsel %vm757_vm3, %v4170_v11, -inf }
0x1855   :  { %v4152_v6 = vpop.f32.mrf.mxu1 }
0x1856   :  { %v4165_v13 = vmul.f32 0.35355338, %v4152_v6  ;;  %v4179_v15 = vsel %vm757_vm3, %v4169_v12, -inf  ;;  %v4172_v14 = vadd.f32 %v11684_v49, %v4166_v8 }
0x1857   :  { %4180 = vmax.xlane.f32.xlu0 %v4179_v15 }
0x1858   :  { %v4171_v48 = vadd.f32 %v11690_v20, %v4165_v13  ;;  %v4188_v19 = vsel %vm757_vm3, %v4172_v14, -inf }
0x185a   :  { %v4185_v18 = vsel %vm757_vm3, %v4171_v48, -inf }
0x185b   :  { %4183 = vmax.xlane.f32.xlu0 %v4182_v31  ;;  %4186 = vmax.xlane.f32.xlu1 %v4185_v18 }
0x185f   :  { %4189 = vmax.xlane.f32.xlu0 %v4188_v19 }
0x1863   :  { %v9595_v15 = vpop.f32.mrf.mxu1 }
0x1864   :  { %v4633_v19 = vmul.f32 0.35355338, %v9595_v15 }
0x186c   :  { %4249 = vrot.lane.b32.xlu1 %v11603_v5, %s10699_s12 }
0x1870   :  { %4245 = vrot.lane.b32.xlu1 %v11613_v10, %s10699_s12 }
0x1874   :  { %4243 = vrot.lane.b32.xlu1 %v11609_v4, %s10699_s12 }
0x1875   :  { %4247 = vrot.lane.b32.xlu0 %v11605_v9, %s10699_s12 }
0x18da   :  { %v4178_v35 = vpop.xlane.xlu1 %4177 }
0x18db   :  { %v4192_v34 = vsub.f32 %v4168_v57, %v4178_v35 }
0x18dc   :  { %v4175_v38 = vpop.xlane.xlu0 %4174 }
0x18dd   :  { %v4199_v29 = vmul.f32 1.442695, %v4192_v34  ;;  %v4191_v26 = vsub.f32 %v4167_v61, %v4175_v38  ;;  %v11966_v38 = vadd.f32 %v11666_v22, %v4633_v19 }
0x18df   :  { %10184 = vpow2.f32 %v4199_v29  ;;  %v4197_v27 = vmul.f32 1.442695, %v4191_v26 }
0x18e0   :  { %v4181_v32 = vpop.xlane.xlu0 %4180 }
0x18e1   :  { %10186 = vpow2.f32 %v4197_v27  ;;  %v4193_v39 = vsub.f32 %v4169_v12, %v4181_v32 }
0x18e3   :  { %v4201_v28 = vmul.f32 1.442695, %v4193_v39  ;;  %v4647_v39 = vsel %vm757_vm3, %v11966_v38, -inf }
0x18e4   :  { %v4184_v23 = vpop.xlane.xlu0 %4183  ;;  %v4187_v43 = vpop.xlane.xlu1 %4186 }
0x18e5   :  { %10188 = vpow2.f32 %v4201_v28  ;;  %v4194_v45 = vsub.f32 %v4170_v11, %v4184_v23  ;;  %v4195_v33 = vsub.f32 %v4171_v48, %v4187_v43  ;;  %v4603_v48 = vpop.f32.mrf.mxu1 }
0x18e6   :  { %v4632_v34 = vmul.f32 0.35355338, %v4603_v48 }
0x18e7   :  { %v4203_v44 = vmul.f32 1.442695, %v4194_v45  ;;  %v4205_v17 = vmul.f32 1.442695, %v4195_v33 }
0x18e8   :  { %v4190_v46 = vpop.xlane.xlu0 %4189  ;;  %v4250_v55 = vpop.permute.xlu1 %4249  ;;  %v11969_v26 = vadd.f32 %v11670_v30, %v4632_v34 }
0x18e9   :  { %10190 = vpow2.f32 %v4203_v44  ;;  %v4196_v25 = vsub.f32 %v4172_v14, %v4190_v46  ;;  %9549 = vmatprep.subr.mxu0 %v4250_v55  ;;  %v9598_v14 = vpop.f32.mrf.mxu1 }
0x18ea   :  { %10192 = vpow2.f32 %v4205_v17  ;;  %9550 = vmatpush3.msra.mxu0 %v4250_v55  ;;  %v4635_v28 = vmul.f32 0.35355338, %v9598_v14  ;;  %v4644_v22 = vsel %vm757_vm3, %v11969_v26, -inf }
0x18eb   :  { %v4207_v52 = vmul.f32 1.442695, %v4196_v25  ;;  %v4613_v31 = vpop.f32.mrf.mxu1 }
0x18ec   :  { %v11937_v57 = vpop.eup %10184  ;;  %v4248_v24 = vpop.permute.xlu0 %4247  ;;  %v4634_v27 = vmul.f32 0.35355338, %v4613_v31  ;;  %v11984_v43 = vadd.f32 %v11675_v40, %v4635_v28 }
0x18ed   :  { %v4246_v63 = vpop.permute.xlu1 %4245  ;;  %10194 = vpow2.f32 %v4207_v52  ;;  %9551 = vmatprep.subr.mxu0 %v4248_v24  ;;  %v4212_v61 = vsel %vm757_vm3, %v11937_v57, 0.0  ;;  %v9601_v18 = vpop.f32.mrf.mxu1 }
0x18ee   :  { %v11941_v0 = vpop.eup %10186  ;;  %4213 = vadd.xlane.f32.xlu0 %v4212_v61  ;;  %9552 = vmatpush3.msra.mxu0 %v4248_v24  ;;  %v11977_v23 = vadd.f32 %v11680_v36, %v4634_v27  ;;  %v4653_v36 = vsel %vm757_vm3, %v11984_v43, -inf }
0x18ef   :  { %9553 = vmatprep.subr.mxu0 %v4246_v63  ;;  %v4209_v53 = vsel %vm757_vm3, %v11941_v0, 0.0  ;;  %v4623_v35 = vpop.f32.mrf.mxu1 }
0x18f0   :  { %4210 = vadd.xlane.f32.xlu1 %v4209_v53  ;;  %9554 = vmatpush3.msra.mxu0 %v4246_v63  ;;  %v4636_v29 = vmul.f32 0.35355338, %v4623_v35  ;;  %v4650_v45 = vsel %vm757_vm3, %v11977_v23, -inf  ;;  %v8470_v63 = vld [vmem:[%s12683_s18 + $0x30] sm:$0xff] }
0x18f1   :  { %v4244_v2 = vpop.permute.xlu1 %4243 }
0x18f2   :  { %9555 = vmatprep.subr.mxu0 %v4244_v2  ;;  %v11945_v56 = vpop.eup %10188  ;;  %v11972_v32 = vadd.f32 %v11690_v20, %v4636_v29  ;;  %v4637_v20 = vmul.f32 0.35355338, %v9601_v18 }
0x18f3   :  { %9556 = vmatpush3.msra.mxu0 %v4244_v2  ;;  %v4215_v3 = vsel %vm757_vm3, %v11945_v56, 0.0 }
0x18f4   :  { %4216 = vadd.xlane.f32.xlu1 %v4215_v3  ;;  %v4656_v30 = vsel %vm757_vm3, %v11972_v32, -inf  ;;  %v11989_v33 = vadd.f32 %v11684_v49, %v4637_v20 }
0x18f6   :  { %v11949_v7 = vpop.eup %10190  ;;  %v4659_v44 = vsel %vm757_vm3, %v11989_v33, -inf }
0x18f7   :  { %v11951_v12 = vpop.eup %10192  ;;  %v4218_v6 = vsel %vm757_vm3, %v11949_v7, 0.0 }
0x18f8   :  { %4219 = vadd.xlane.f32.xlu0 %v4218_v6  ;;  %v4221_v11 = vsel %vm757_vm3, %v11951_v12, 0.0 }
0x18f9   :  { %4222 = vadd.xlane.f32.xlu1 %v4221_v11 }
0x18fa   :  { %v11957_v8 = vpop.eup %10194 }
0x18fb   :  { %v4224_v13 = vsel %vm757_vm3, %v11957_v8, 0.0 }
0x18fc   :  { %4225 = vadd.xlane.f32.xlu0 %v4224_v13 }
0x190a   :  { %4239 = vrot.lane.b32.xlu1 %v11599_v1, %s10699_s12 }
0x1912   :  { %4241 = vrot.lane.b32.xlu0 %v11619_v60, %s10699_s12 }
0x192e   :  { %4648 = vmax.xlane.f32.xlu1 %v4647_v39 }
0x1931   :  { %4645 = vmax.xlane.f32.xlu0 %v4644_v22 }
0x1932   :  { %4657 = vmax.xlane.f32.xlu1 %v4656_v30 }
0x1935   :  { %4651 = vmax.xlane.f32.xlu0 %v4650_v45 }
0x1939   :  { %4654 = vmax.xlane.f32.xlu0 %v4653_v36 }
0x193d   :  { %4660 = vmax.xlane.f32.xlu0 %v4659_v44 }
0x1943   :  { %4720 = vrot.lane.b32.xlu1 %v11603_v5, %s10700_s26 }
0x1947   :  { %4716 = vrot.lane.b32.xlu1 %v11613_v10, %s10700_s26 }
0x194b   :  { %4714 = vrot.lane.b32.xlu1 %v11609_v4, %s10700_s26 }
0x1953   :  { %4718 = vrot.lane.b32.xlu0 %v11605_v9, %s10700_s26 }
0x1977   :  { %v4214_v40 = vpop.xlane.xlu0 %4213 }
0x1979   :  { %v4211_v49 = vpop.xlane.xlu1 %4210 }
0x197a   :  { %10196 = vrcp.f32 %v4211_v49 }
0x197b   :  { %10198 = vrcp.f32 %v4214_v40 }
0x197d   :  { %v4217_v17 = vpop.xlane.xlu1 %4216 }
0x197e   :  { %10200 = vrcp.f32 %v4217_v17  ;;  %v12047_v17 = vpop.f32.mrf.mxu0 }
0x1981   :  { %v4220_v46 = vpop.xlane.xlu0 %4219 }
0x1982   :  { %10202 = vrcp.f32 %v4220_v46  ;;  %v4223_v55 = vpop.xlane.xlu1 %4222  ;;  %v12049_v46 = vpop.f32.mrf.mxu0 }
0x1983   :  { %10204 = vrcp.f32 %v4223_v55 }
0x1984   :  { %v12051_v55 = vpop.f32.mrf.mxu0 }
0x1985   :  { %v4226_v5 = vpop.xlane.xlu0 %4225 }
0x1986   :  { %10206 = vrcp.f32 %v4226_v5  ;;  %v4240_v24 = vpop.permute.xlu1 %4239  ;;  %v12053_v5 = vpop.f32.mrf.mxu0 }
0x1987   :  { %v10197_v10 = vpop.eup %10196 }
0x1988   :  { %v4233_v25 = vmul.f32 %v10197_v10, %v11941_v0  ;;  %v10199_v4 = vpop.eup %10198  ;;  %v12055_v10 = vpop.f32.mrf.mxu0 }
0x1989   :  { %v4242_v52 = vpop.permute.xlu0 %4241  ;;  %v4234_v61 = vmul.f32 %v10199_v4, %v11937_v57 }
0x198a   :  { %9557 = vmatprep.subr.mxu0 %v4242_v52  ;;  %9561 = vmatprep.mubr.msk.f32.mxu0 %vm757_vm3, %v4233_v25  ;;  %v12057_v25 = vpop.f32.mrf.mxu0 }
0x198b   :  { %v10201_v9 = vpop.eup %10200  ;;  %9558 = vmatpush3.msra.mxu0 %v4242_v52 }
0x198c   :  { %9559 = vmatprep.subr.mxu0 %v4240_v24  ;;  %v4235_v53 = vmul.f32 %v10201_v9, %v11945_v56 }
0x198d   :  { %9560 = vmatpush3.msra.mxu0 %v4240_v24 }
0x198e   :  { %9562 = vmatmul.mubr.msk.f32.vlgmr.msra.gmra.mxu0 %vm757_vm3, %v4234_v61  ;;  %9570 = vmatprep.subr.mxu0 %v8470_v63 }
0x198f   :  { %v10203_v2 = vpop.eup %10202  ;;  %9564 = vmatprep.mubr.msk.f32.mxu0 %vm757_vm3, %v4235_v53  ;;  %9571 = vmatpush3.msra.mxu0 %v8470_v63 }
0x1990   :  { %v10205_v0 = vpop.eup %10204  ;;  %v4236_v3 = vmul.f32 %v10203_v2, %v11949_v7 }
0x1991   :  { %v4237_v6 = vmul.f32 %v10205_v0, %v11951_v12 }
0x1992   :  { %9565 = vmatmul.mubr.msk.f32.gmra.mxu0 %vm757_vm3, %v4236_v3 }
0x1993   :  { %v10207_v11 = vpop.eup %10206  ;;  %9567 = vmatprep.mubr.msk.f32.mxu0 %vm757_vm3, %v4237_v6 }
0x1994   :  { %v4238_v57 = vmul.f32 %v10207_v11, %v11957_v8 }
0x1996   :  { %9568 = vmatmul.mubr.msk.f32.gmra.mxu0 %vm757_vm3, %v4238_v57 }
0x19b7   :  { %v4649_v56 = vpop.xlane.xlu1 %4648 }
0x19b8   :  { %v4663_v13 = vsub.f32 %v11966_v38, %v4649_v56 }
0x19ba   :  { %v4670_v15 = vmul.f32 1.442695, %v4663_v13  ;;  %v4646_v48 = vpop.xlane.xlu0 %4645 }
0x19bb   :  { %v4662_v14 = vsub.f32 %v11969_v26, %v4646_v48  ;;  %v4658_v31 = vpop.xlane.xlu1 %4657 }
0x19bc   :  { %10208 = vpow2.f32 %v4670_v15  ;;  %v4666_v12 = vsub.f32 %v11972_v32, %v4658_v31 }
0x19bd   :  { %v4668_v7 = vmul.f32 1.442695, %v4662_v14 }
0x19be   :  { %v4652_v18 = vpop.xlane.xlu0 %4651  ;;  %v4676_v8 = vmul.f32 1.442695, %v4666_v12 }
0x19bf   :  { %10210 = vpow2.f32 %v4668_v7  ;;  %v4664_v19 = vsub.f32 %v11977_v23, %v4652_v18  ;;  %v4721_v35 = vpop.permute.xlu1 %4720 }
0x19c0   :  { %9602 = vmatprep.subr.mxu0 %v4721_v35 }
0x19c1   :  { %v4672_v34 = vmul.f32 1.442695, %v4664_v19 }
0x19c2   :  { %v4655_v29 = vpop.xlane.xlu0 %4654 }
0x19c3   :  { %10212 = vpow2.f32 %v4672_v34  ;;  %v4665_v38 = vsub.f32 %v11984_v43, %v4655_v29  ;;  %v4717_v4 = vpop.permute.xlu1 %4716 }
0x19c4   :  { %10214 = vpow2.f32 %v4676_v8 }
0x19c5   :  { %v4674_v27 = vmul.f32 1.442695, %v4665_v38  ;;  %v8471_v38 = vld [vmem:[%s12683_s18 + $0x38] sm:$0xff] }
0x19c6   :  { %v4661_v26 = vpop.xlane.xlu0 %4660 }
0x19c7   :  { %10216 = vpow2.f32 %v4674_v27  ;;  %v4667_v39 = vsub.f32 %v11989_v33, %v4661_v26  ;;  %v3995_v27 = vadd.f32 %v12047_v17, %v11905_v47 }
0x19c9   :  { %v12022_v28 = vpop.eup %10208  ;;  %v4678_v32 = vmul.f32 1.442695, %v4667_v39  ;;  %v3990_v39 = vadd.f32 %v12049_v46, %v11907_v16  ;;  %v4010_v16 = vadd.f32 %v12057_v25, %v11915_v42 }
0x19ca   :  { %v4683_v23 = vsel %vm757_vm3, %v12022_v28, 0.0  ;;  %v4719_v24 = vpop.permute.xlu0 %4718 }
0x19cb   :  { %10218 = vpow2.f32 %v4678_v32  ;;  %4684 = vadd.xlane.f32.xlu0 %v4683_v23  ;;  %v4005_v23 = vadd.f32 %v12051_v55, %v11909_v21 }
0x19cc   :  { %v10211_v22 = vpop.eup %10210 }
0x19cd   :  { %v4680_v30 = vsel %vm757_vm3, %v10211_v22, 0.0 }
0x19ce   :  { %4681 = vadd.xlane.f32.xlu1 %v4680_v30 }
0x19d0   :  { %v12027_v20 = vpop.eup %10212 }
0x19d1   :  { %v4686_v43 = vsel %vm757_vm3, %v12027_v20, 0.0  ;;  %v12031_v45 = vpop.eup %10214 }
0x19d2   :  { %4687 = vadd.xlane.f32.xlu1 %v4686_v43  ;;  %v4692_v44 = vsel %vm757_vm3, %v12031_v45, 0.0 }
0x19d4   :  { %v12033_v33 = vpop.eup %10216 }
0x19d5   :  { %v4689_v36 = vsel %vm757_vm3, %v12033_v33, 0.0 }
0x19d6   :  { %4690 = vadd.xlane.f32.xlu0 %v4689_v36  ;;  %4693 = vadd.xlane.f32.xlu1 %v4692_v44 }
0x19d8   :  { %v12039_v40 = vpop.eup %10218 }
0x19d9   :  { %v4695_v49 = vsel %vm757_vm3, %v12039_v40, 0.0 }
0x19da   :  { %4696 = vadd.xlane.f32.xlu0 %v4695_v49 }
0x19e7   :  { %4710 = vrot.lane.b32.xlu1 %v11599_v1, %s10700_s26 }
0x19f0   :  { %4712 = vrot.lane.b32.xlu0 %v11619_v60, %s10700_s26  ;;  %v4715_v60 = vpop.permute.xlu1 %4714 }
0x1a4e   :  { %v9563_v52 = vpop.f32.mrf.mxu0 }
0x1a50   :  { %v4341_v9 = vpop.f32.mrf.mxu0 }
0x1a51   :  { %9572 = vmatprep.mubr.msk.f32.mxu0 %vm625_vm2, %v4341_v9 }
0x1a52   :  { %v9566_v1 = vpop.f32.mrf.mxu0  ;;  %9573 = vmatmul.mubr.msk.f32.vlgmr.msra.gmra.mxu0 %vm625_vm2, %v9563_v52 }
0x1a53   :  { %9603 = vmatpush3.msra.mxu0 %v4721_v35 }
0x1a54   :  { %9604 = vmatprep.subr.mxu0 %v4719_v24  ;;  %v4351_v63 = vpop.f32.mrf.mxu0  ;;  %v4685_v53 = vpop.xlane.xlu0 %4684 }
0x1a55   :  { %9605 = vmatpush3.msra.mxu0 %v4719_v24  ;;  %9575 = vmatprep.mubr.msk.f32.mxu0 %vm625_vm2, %v4351_v63 }
0x1a56   :  { %9606 = vmatprep.subr.mxu0 %v4717_v4  ;;  %v9569_v61 = vpop.f32.mrf.mxu0  ;;  %9576 = vmatmul.mubr.msk.f32.gmra.mxu0 %vm625_vm2, %v9566_v1 }
0x1a57   :  { %9607 = vmatpush3.msra.mxu0 %v4717_v4  ;;  %v4682_v2 = vpop.xlane.xlu1 %4681 }
0x1a58   :  { %9608 = vmatprep.subr.mxu0 %v4715_v60  ;;  %10220 = vrcp.f32 %v4682_v2  ;;  %v4361_v0 = vpop.f32.mrf.mxu0 }
0x1a59   :  { %9609 = vmatpush3.msra.mxu0 %v4715_v60  ;;  %9578 = vmatprep.mubr.msk.f32.mxu0 %vm625_vm2, %v4361_v0  ;;  %10222 = vrcp.f32 %v4685_v53 }
0x1a5a   :  { %9579 = vmatmul.mubr.msk.f32.gmra.mxu0 %vm625_vm2, %v9569_v61 }
0x1a5b   :  { %v4688_v3 = vpop.xlane.xlu1 %4687 }
0x1a5c   :  { %10224 = vrcp.f32 %v4688_v3 }
0x1a5f   :  { %v4691_v6 = vpop.xlane.xlu0 %4690  ;;  %v4694_v11 = vpop.xlane.xlu1 %4693 }
0x1a60   :  { %10226 = vrcp.f32 %v4691_v6 }
0x1a61   :  { %10228 = vrcp.f32 %v4694_v11 }
0x1a63   :  { %v4697_v57 = vpop.xlane.xlu0 %4696  ;;  %v4711_v31 = vpop.permute.xlu1 %4710 }
0x1a64   :  { %10230 = vrcp.f32 %v4697_v57 }
0x1a65   :  { %v10221_v56 = vpop.eup %10220 }
0x1a66   :  { %v4704_v13 = vmul.f32 %v10221_v56, %v10211_v22  ;;  %v10223_v15 = vpop.eup %10222 }
0x1a67   :  { %v4713_v48 = vpop.permute.xlu0 %4712  ;;  %v4705_v7 = vmul.f32 %v10223_v15, %v12022_v28 }
0x1a68   :  { %9610 = vmatprep.subr.mxu0 %v4713_v48  ;;  %9614 = vmatprep.mubr.msk.f32.mxu0 %vm757_vm3, %v4704_v13 }
0x1a69   :  { %v10225_v14 = vpop.eup %10224  ;;  %9611 = vmatpush3.msra.mxu0 %v4713_v48 }
0x1a6a   :  { %9612 = vmatprep.subr.mxu0 %v4711_v31  ;;  %v4706_v12 = vmul.f32 %v10225_v14, %v12027_v20  ;;  %v4000_v20 = vadd.f32 %v12053_v5, %v11911_v41  ;;  %v8568_v5 = vld [vmem:[#allocation7 + $0x1] ss:$0 sm:$0xff] }
0x1a6b   :  { %9613 = vmatpush3.msra.mxu0 %v4711_v31 }
0x1a6c   :  { %9615 = vmatmul.mubr.msk.f32.vlgmr.msra.gmra.mxu0 %vm757_vm3, %v4705_v7  ;;  %9623 = vmatprep.subr.mxu0 %v8471_v38 }
0x1a6d   :  { %v10227_v18 = vpop.eup %10226  ;;  %9617 = vmatprep.mubr.msk.f32.mxu0 %vm757_vm3, %v4706_v12  ;;  %9624 = vmatpush3.msra.mxu0 %v8471_v38 }
0x1a6e   :  { %v10229_v19 = vpop.eup %10228  ;;  %v4707_v35 = vmul.f32 %v10227_v18, %v12033_v33  ;;  %v4015_v33 = vadd.f32 %v12055_v10, %v11913_v37 }
0x1a6f   :  { %v4708_v8 = vmul.f32 %v10229_v19, %v12031_v45 }
0x1a70   :  { %9618 = vmatmul.mubr.msk.f32.gmra.mxu0 %vm757_vm3, %v4707_v35 }
0x1a71   :  { %v10231_v34 = vpop.eup %10230  ;;  %9620 = vmatprep.mubr.msk.f32.mxu0 %vm757_vm3, %v4708_v8 }
0x1a72   :  { %v4709_v29 = vmul.f32 %v10231_v34, %v12039_v40 }
0x1a74   :  { %9621 = vmatmul.mubr.msk.f32.gmra.mxu0 %vm757_vm3, %v4709_v29 }
0x1b12   :  { %v9574_v26 = vpop.f32.mrf.mxu0 }
0x1b13   :  { %v4484_v28 = vadd.f32 %v9574_v26, %v3995_v27 }
0x1b14   :  { %v4454_v32 = vpop.f32.mrf.mxu0 }
0x1b15   :  { %v4483_v22 = vadd.f32 %v4454_v32, %v3990_v39 }
0x1b16   :  { %v9577_v30 = vpop.f32.mrf.mxu0 }
0x1b17   :  { %v4486_v43 = vadd.f32 %v9577_v30, %v4005_v23 }
0x1b18   :  { %v4464_v45 = vpop.f32.mrf.mxu0 }
0x1b19   :  { %v4485_v47 = vadd.f32 %v4464_v45, %v4000_v20 }
0x1b1a   :  { %v9580_v36 = vpop.f32.mrf.mxu0 }
0x1b1b   :  { %v4488_v44 = vadd.f32 %v9580_v36, %v4015_v33 }
0x1b1c   :  { %v4474_v40 = vpop.f32.mrf.mxu0 }
0x1b1d   :  { %v4487_v49 = vadd.f32 %v4474_v40, %v4010_v16 }
0x1b2c   :  { %v9616_v17 = vpop.f32.mrf.mxu0 }
0x1b2e   :  { %v4812_v21 = vpop.f32.mrf.mxu0 }
0x1b2f   :  { %9625 = vmatprep.mubr.msk.f32.mxu0 %vm625_vm2, %v4812_v21 }
0x1b30   :  { %v9619_v46 = vpop.f32.mrf.mxu0  ;;  %9626 = vmatmul.mubr.msk.f32.vlgmr.msra.gmra.mxu0 %vm625_vm2, %v9616_v17 }
0x1b32   :  { %v4822_v41 = vpop.f32.mrf.mxu0 }
0x1b33   :  { %9628 = vmatprep.mubr.msk.f32.mxu0 %vm625_vm2, %v4822_v41  ;;  %v8574_v41 = vld [vmem:[%s12684_s28 + $0x38] sm:$0xff] }
0x1b34   :  { %v9622_v55 = vpop.f32.mrf.mxu0  ;;  %9629 = vmatmul.mubr.msk.f32.gmra.mxu0 %vm625_vm2, %v9619_v46  ;;  %9634 = vmatprep.subr.mxu1 %v8574_v41 }
0x1b35   :  { %9635 = vmatpush3.msra.mxu1 %v8574_v41 }
0x1b36   :  { %v4832_v37 = vpop.f32.mrf.mxu0 }
0x1b37   :  { %9631 = vmatprep.mubr.msk.f32.mxu0 %vm625_vm2, %v4832_v37  ;;  %v8572_v37 = vld [vmem:[%s12684_s28 + $0x28] sm:$0xff] }
0x1b38   :  { %9632 = vmatmul.mubr.msk.f32.gmra.mxu0 %vm625_vm2, %v9622_v55  ;;  %v8573_v55 = vld [vmem:[%s12684_s28 + $0x30] sm:$0xff] }
0x1b39   :  { %9636 = vmatprep.subr.mxu1 %v8573_v55 }
0x1b3a   :  { %9637 = vmatpush3.msra.mxu1 %v8573_v55 }
0x1b3b   :  { %9638 = vmatprep.subr.mxu1 %v8572_v37 }
0x1b3c   :  { %9639 = vmatpush3.msra.mxu1 %v8572_v37 }
0x1bf0   :  { %v9627_v42 = vpop.f32.mrf.mxu0 }
0x1bf1   :  { %v4955_v10 = vadd.f32 %v9627_v42, %v4484_v28  ;;  %v8571_v42 = vld [vmem:[%s12684_s28 + $0x20] sm:$0xff] }
0x1bf2   :  { %v4925_v25 = vpop.f32.mrf.mxu0  ;;  %9640 = vmatprep.subr.mxu1 %v8571_v42 }
0x1bf3   :  { %v4969_v4 = vadd.f32 %v8568_v5, %v4955_v10  ;;  %v4954_v52 = vadd.f32 %v4925_v25, %v4483_v22  ;;  %9641 = vmatpush3.msra.mxu1 %v8571_v42 }
0x1bf4   :  { %v9630_v9 = vpop.f32.mrf.mxu0 }
0x1bf5   :  { %v4968_v1 = vadd.f32 %v8568_v5, %v4954_v52  ;;  %v4957_v60 = vadd.f32 %v9630_v9, %v4486_v43  ;;  %v4975_v24 = vadd.f32 %v4969_v4, %v11574_v51 }
0x1bf6   :  { %v4935_v63 = vpop.f32.mrf.mxu0 }
0x1bf7   :  { %v4956_v61 = vadd.f32 %v4935_v63, %v4485_v47  ;;  %v4987_v53 = vsel %vm489_vm1, %v4975_v24, 0.0  ;;  %v4974_v2 = vadd.f32 %v4968_v1, %v11572_v50  ;;  %v4971_v3 = vadd.f32 %v8568_v5, %v4957_v60 }
0x1bf8   :  { %4988 = vadd.xlane.f32.xlu1 %v4987_v53  ;;  %v9633_v0 = vpop.f32.mrf.mxu0 }
0x1bf9   :  { %v4970_v6 = vadd.f32 %v8568_v5, %v4956_v61  ;;  %v4959_v11 = vadd.f32 %v9633_v0, %v4488_v44  ;;  %v4984_v57 = vsel %vm489_vm1, %v4974_v2, 0.0  ;;  %v4977_v31 = vadd.f32 %v4971_v3, %v11585_v58 }
0x1bfa   :  { %4985 = vadd.xlane.f32.xlu0 %v4984_v57  ;;  %v4945_v56 = vpop.f32.mrf.mxu0 }
0x1bfb   :  { %v4958_v13 = vadd.f32 %v4945_v56, %v4487_v49  ;;  %v4976_v15 = vadd.f32 %v4970_v6, %v11582_v54  ;;  %v4973_v48 = vadd.f32 %v8568_v5, %v4959_v11  ;;  %v4993_v7 = vsel %vm489_vm1, %v4977_v31, 0.0 }
0x1bfd   :  { %v4972_v51 = vadd.f32 %v8568_v5, %v4958_v13  ;;  %v4990_v14 = vsel %vm489_vm1, %v4976_v15, 0.0  ;;  %v4979_v18 = vadd.f32 %v4973_v48, %v11593_v62  ;;  %v5222_v5 = vld [vmem:[#allocation13 + $0x38] sm:$0xff] }
0x1bfe   :  { %4991 = vadd.xlane.f32.xlu0 %v4990_v14  ;;  %9651 = vmatprep.subr.mxu0 %v5222_v5 }
0x1bff   :  { %v4978_v50 = vadd.f32 %v4972_v51, %v11591_v59  ;;  %v4999_v19 = vsel %vm489_vm1, %v4979_v18, 0.0  ;;  %9652 = vmatpush3.msra.mxu0 %v5222_v5 }
0x1c01   :  { %v4996_v12 = vsel %vm489_vm1, %v4978_v50, 0.0 }
0x1c02   :  { %4994 = vadd.xlane.f32.xlu0 %v4993_v7  ;;  %4997 = vadd.xlane.f32.xlu1 %v4996_v12 }
0x1c06   :  { %5000 = vadd.xlane.f32.xlu0 %v4999_v19 }
0x1c81   :  { %v4989_v54 = vpop.xlane.xlu1 %4988 }
0x1c82   :  { %v5003_v35 = vmul.f32 0.03125, %v4989_v54 }
0x1c83   :  { %v4986_v8 = vpop.xlane.xlu0 %4985 }
0x1c84   :  { %v12107_v34 = vsub.f32 %v4975_v24, %v5003_v35  ;;  %v5002_v58 = vmul.f32 0.03125, %v4986_v8 }
0x1c86   :  { %v12109_v29 = vsub.f32 %v4974_v2, %v5002_v58  ;;  %v5015_v59 = vmul.f32 %v12107_v34, %v12107_v34 }
0x1c87   :  { %v4992_v38 = vpop.xlane.xlu0 %4991 }
0x1c88   :  { %v5004_v27 = vmul.f32 0.03125, %v4992_v38  ;;  %v5023_v62 = vsel %vm489_vm1, %v5015_v59, 0.0  ;;  %v5014_v26 = vmul.f32 %v12109_v29, %v12109_v29 }
0x1c89   :  { %5024 = vadd.xlane.f32.xlu0 %v5023_v62 }
0x1c8a   :  { %v12116_v39 = vsub.f32 %v4976_v15, %v5004_v27  ;;  %v5020_v28 = vsel %vm489_vm1, %v5014_v26, 0.0  ;;  %v8569_v15 = vld [vmem:[#allocation8 + $0x1] ss:$0 sm:$0xff] }
0x1c8b   :  { %v4995_v32 = vpop.xlane.xlu0 %4994  ;;  %5021 = vadd.xlane.f32.xlu1 %v5020_v28  ;;  %v4998_v23 = vpop.xlane.xlu1 %4997 }
0x1c8c   :  { %v5005_v22 = vmul.f32 0.03125, %v4995_v32  ;;  %v5006_v30 = vmul.f32 0.03125, %v4998_v23  ;;  %v5016_v20 = vmul.f32 %v12116_v39, %v12116_v39 }
0x1c8e   :  { %v12121_v43 = vsub.f32 %v4977_v31, %v5005_v22  ;;  %v12123_v45 = vsub.f32 %v4978_v50, %v5006_v30  ;;  %v5026_v33 = vsel %vm489_vm1, %v5016_v20, 0.0  ;;  %v8570_v50 = vld [vmem:[#allocation10 + $0x1] ss:$0 sm:$0xff]  ;;  %v5221_v22 = vld [vmem:[#allocation13 + $0x30] sm:$0xff]  ;;  %v5220_v30 = vld [vmem:[#allocation13 + $0x28] sm:$0xff] }
0x1c8f   :  { %v5001_v47 = vpop.xlane.xlu0 %5000  ;;  %5027 = vadd.xlane.f32.xlu1 %v5026_v33  ;;  %9653 = vmatprep.subr.mxu0 %v5221_v22  ;;  %v5219_v20 = vld [vmem:[#allocation13 + $0x20] sm:$0xff] }
0x1c90   :  { %v5007_v36 = vmul.f32 0.03125, %v5001_v47  ;;  %v5017_v16 = vmul.f32 %v12121_v43, %v12121_v43  ;;  %v5018_v44 = vmul.f32 %v12123_v45, %v12123_v45  ;;  %9654 = vmatpush3.msra.mxu0 %v5221_v22 }
0x1c91   :  { %9655 = vmatprep.subr.mxu0 %v5220_v30 }
0x1c92   :  { %v12130_v40 = vsub.f32 %v4979_v18, %v5007_v36  ;;  %v5029_v49 = vsel %vm489_vm1, %v5017_v16, 0.0  ;;  %v5032_v17 = vsel %vm489_vm1, %v5018_v44, 0.0  ;;  %9656 = vmatpush3.msra.mxu0 %v5220_v30 }
0x1c93   :  { %5030 = vadd.xlane.f32.xlu0 %v5029_v49  ;;  %5033 = vadd.xlane.f32.xlu1 %v5032_v17 }
0x1c94   :  { %v5019_v21 = vmul.f32 %v12130_v40, %v12130_v40  ;;  %9657 = vmatprep.subr.mxu0 %v5219_v20 }
0x1c95   :  { %9658 = vmatpush3.msra.mxu0 %v5219_v20 }
0x1c96   :  { %v5035_v46 = vsel %vm489_vm1, %v5019_v21, 0.0 }
0x1c97   :  { %5036 = vadd.xlane.f32.xlu0 %v5035_v46 }
0x1d12   :  { %v5025_v10 = vpop.xlane.xlu0 %5024 }
0x1d13   :  { %v5039_v25 = vmul.f32 0.03125, %v5025_v10 }
0x1d14   :  { %v5022_v4 = vpop.xlane.xlu1 %5021 }
0x1d15   :  { %v5045_v52 = vadd.f32 1e-05, %v5039_v25  ;;  %v5038_v9 = vmul.f32 0.03125, %v5022_v4  ;;  %v8582_v4 = vld [vmem:[#allocation14 + $0x1] ss:$0 sm:$0xff] }
0x1d17   :  { %10232 = vrsqrt.f32 %v5045_v52  ;;  %v5044_v1 = vadd.f32 1e-05, %v5038_v9 }
0x1d18   :  { %v5028_v60 = vpop.xlane.xlu1 %5027 }
0x1d19   :  { %10234 = vrsqrt.f32 %v5044_v1  ;;  %v5040_v24 = vmul.f32 0.03125, %v5028_v60 }
0x1d1b   :  { %v5046_v63 = vadd.f32 1e-05, %v5040_v24 }
0x1d1c   :  { %v5031_v61 = vpop.xlane.xlu0 %5030  ;;  %v5034_v53 = vpop.xlane.xlu1 %5033 }
0x1d1d   :  { %10236 = vrsqrt.f32 %v5046_v63  ;;  %v5041_v2 = vmul.f32 0.03125, %v5031_v61  ;;  %v5042_v0 = vmul.f32 0.03125, %v5034_v53 }
0x1d1f   :  { %v5047_v3 = vadd.f32 1e-05, %v5041_v2  ;;  %v5048_v6 = vadd.f32 1e-05, %v5042_v0 }
0x1d20   :  { %v5037_v11 = vpop.xlane.xlu0 %5036 }
0x1d21   :  { %10238 = vrsqrt.f32 %v5047_v3  ;;  %v5043_v57 = vmul.f32 0.03125, %v5037_v11 }
0x1d22   :  { %10240 = vrsqrt.f32 %v5048_v6 }
0x1d23   :  { %v5049_v56 = vadd.f32 1e-05, %v5043_v57 }
0x1d24   :  { %v10233_v13 = vpop.eup %10232 }
0x1d25   :  { %v5057_v48 = vmul.f32 %v10233_v13, %v12107_v34  ;;  %10242 = vrsqrt.f32 %v5049_v56 }
0x1d26   :  { %v10235_v51 = vpop.eup %10234 }
0x1d27   :  { %v5056_v14 = vmul.f32 %v10235_v51, %v12109_v29  ;;  %v5069_v31 = vmul.f32 %v8569_v15, %v5057_v48 }
0x1d29   :  { %v5068_v7 = vmul.f32 %v8569_v15, %v5056_v14  ;;  %v5081_v54 = vadd.f32 %v8570_v50, %v5069_v31 }
0x1d2a   :  { %v10237_v12 = vpop.eup %10236 }
0x1d2b   :  { %v12143_v18 = vadd.f32 %v8570_v50, %v5068_v7  ;;  %v5058_v19 = vmul.f32 %v10237_v12, %v12116_v39 }
0x1d2d   :  { %9642 = vmatprep.mubr.msk.f32.mxu1 %vm489_vm1, %v12143_v18  ;;  %v5070_v35 = vmul.f32 %v8569_v15, %v5058_v19 }
0x1d2e   :  { %v10239_v8 = vpop.eup %10238  ;;  %9643 = vmatmul.mubr.msk.f32.vlgmr.msra.gmra.mxu1 %vm489_vm1, %v5081_v54 }
0x1d2f   :  { %v10241_v34 = vpop.eup %10240  ;;  %v12149_v58 = vadd.f32 %v8570_v50, %v5070_v35  ;;  %v5059_v29 = vmul.f32 %v10239_v8, %v12121_v43  ;;  %v8575_v43 = vld [vmem:[#allocation11 + $0x1] ss:$0 sm:$0xff] }
0x1d30   :  { %v5060_v59 = vmul.f32 %v10241_v34, %v12123_v45 }
0x1d31   :  { %9645 = vmatprep.mubr.msk.f32.mxu1 %vm489_vm1, %v12149_v58  ;;  %v5071_v38 = vmul.f32 %v8569_v15, %v5059_v29 }
0x1d32   :  { %v10243_v27 = vpop.eup %10242  ;;  %v5072_v62 = vmul.f32 %v8569_v15, %v5060_v59 }
0x1d33   :  { %v5083_v26 = vadd.f32 %v8570_v50, %v5071_v38  ;;  %v5061_v39 = vmul.f32 %v10243_v27, %v12130_v40 }
0x1d34   :  { %v12156_v28 = vadd.f32 %v8570_v50, %v5072_v62 }
0x1d35   :  { %9646 = vmatmul.mubr.msk.f32.gmra.mxu1 %vm489_vm1, %v5083_v26  ;;  %v5073_v32 = vmul.f32 %v8569_v15, %v5061_v39 }
0x1d36   :  { %9648 = vmatprep.mubr.msk.f32.mxu1 %vm489_vm1, %v12156_v28 }
0x1d37   :  { %v5085_v23 = vadd.f32 %v8570_v50, %v5073_v32 }
0x1d39   :  { %9649 = vmatmul.mubr.msk.f32.gmra.mxu1 %vm489_vm1, %v5085_v23 }
0x1dee   :  { %v9644_v45 = vpop.f32.mrf.mxu1 }
0x1def   :  { %v5189_v33 = vadd.f32 %v9644_v45, %v8575_v43 }
0x1df0   :  { %v5183_v47 = vpop.f32.mrf.mxu1 }
0x1df1   :  { %v5184_v36 = vadd.f32 %v8575_v43, %v5183_v47  ;;  %v5213_v44 = vmax.f32 %v5189_v33, 0.0 }
0x1df3   :  { %v5212_v16 = vmax.f32 %v5184_v36, 0.0 }
0x1df5   :  { %v9647_v40 = vpop.f32.mrf.mxu1  ;;  %9659 = vmatprep.mubr.msk.f32.mxu0 %vm489_vm1, %v5212_v16 }
0x1df6   :  { %9660 = vmatmul.mubr.msk.f32.vlgmr.msra.gmra.mxu0 %vm489_vm1, %v5213_v44  ;;  %v5199_v49 = vadd.f32 %v9647_v40, %v8575_v43 }
0x1df7   :  { %v5193_v17 = vpop.f32.mrf.mxu1 }
0x1df8   :  { %v5194_v21 = vadd.f32 %v8575_v43, %v5193_v17  ;;  %v5215_v55 = vmax.f32 %v5199_v49, 0.0 }
0x1df9   :  { %v9650_v46 = vpop.f32.mrf.mxu1 }
0x1dfa   :  { %v5214_v41 = vmax.f32 %v5194_v21, 0.0  ;;  %v5209_v37 = vadd.f32 %v9650_v46, %v8575_v43  ;;  %v5538_v21 = vld [vmem:[%s12685_s30 + $0x18] sm:$0xff]  ;;  %v5537_v46 = vld [vmem:[%s12685_s30 + $0x10] sm:$0xff] }
0x1dfb   :  { %v5203_v42 = vpop.f32.mrf.mxu1  ;;  %9679 = vmatprep.subr.mxu0 %v5538_v21 }
0x1dfc   :  { %v5204_v5 = vadd.f32 %v8575_v43, %v5203_v42  ;;  %9662 = vmatprep.mubr.msk.f32.mxu0 %vm489_vm1, %v5214_v41  ;;  %v5217_v25 = vmax.f32 %v5209_v37, 0.0  ;;  %9680 = vmatpush3.msra.mxu0 %v5538_v21  ;;  %v5536_v41 = vld [vmem:[%s12685_s30 + $0x8] sm:$0xff]  ;;  %v5460_v37 = vld [vmem:[%s12686_s27 + $0x18] sm:$0xff]  ;;  %v10701_v42 = vmov 0.0  }
0x1dfd   :  { %9663 = vmatmul.mubr.msk.f32.gmra.mxu0 %vm489_vm1, %v5215_v55  ;;  %9681 = vmatprep.subr.mxu0 %v5537_v46  ;;  %v5535_v55 = vld [vmem:[%s12685_s30] sm:$0xff] }
0x1dfe   :  { %v5216_v10 = vmax.f32 %v5204_v5, 0.0  ;;  %9682 = vmatpush3.msra.mxu0 %v5537_v46  ;;  %9668 = vmatprep.subr.mxu1 %v10701_v42  ;;  %v5459_v5 = vld [vmem:[%s12686_s27 + $0x10] sm:$0xff] }
0x1dff   :  { %9683 = vmatprep.subr.mxu0 %v5536_v41  ;;  %9676 = vmatprep.mubr.msk.f32.mxu1 %vm10702_vm4, %v10701_v42 }
0x1e00   :  { %9665 = vmatprep.mubr.msk.f32.mxu0 %vm489_vm1, %v5216_v10  ;;  %9684 = vmatpush3.msra.mxu0 %v5536_v41  ;;  %v5458_v10 = vld [vmem:[%s12686_s27 + $0x8] sm:$0xff] }
0x1e01   :  { %9666 = vmatmul.mubr.msk.f32.gmra.mxu0 %vm489_vm1, %v5217_v25  ;;  %9685 = vmatprep.subr.mxu0 %v5535_v55  ;;  %v5457_v25 = vld [vmem:[%s12686_s27] sm:$0xff] }
0x1e02   :  { %9686 = vmatpush3.msra.mxu0 %v5535_v55  ;;  %9669 = vmatpush3.msra.mxu1 %v5460_v37  ;;  %v5664_v55 = vlaneseq }
0x1e03   :  { %9711 = vmatprep.subr.mxu0 %v10701_v42  ;;  %9670 = vmatprep.subr.mxu1 %v10701_v42 }
0x1e04   :  { %9671 = vmatpush3.msra.mxu1 %v5459_v5  ;;  %v5665_v5 = vshrl.u32 %v5664_v55, 7 }
0x1e05   :  { %9672 = vmatprep.subr.mxu1 %v10701_v42 }
0x1e06   :  { %9673 = vmatpush3.msra.mxu1 %v5458_v10  ;;  %v5461_v10 = vld [vmem:[#allocation20] sm:$0x1] }
0x1e07   :  { %9674 = vmatprep.subr.mxu1 %v10701_v42 }
0x1e08   :  { %9675 = vmatpush3.msra.mxu1 %v5457_v25 }
0x1e09   :  { %9696 = vmatprep.subr.mxu1 %v10701_v42 }
0x1eb6   :  { %v9661_v52 = vpop.f32.mrf.mxu0 }
0x1eb7   :  { %v5321_v9 = vadd.f32 %v9661_v52, %v8582_v4 }
0x1eb8   :  { %v5315_v1 = vpop.f32.mrf.mxu0 }
0x1eb9   :  { %v5345_v60 = vadd.f32 %v5321_v9, %v5081_v54  ;;  %v5316_v24 = vadd.f32 %v8582_v4, %v5315_v1 }
0x1ebb   :  { %v5344_v63 = vadd.f32 %v5316_v24, %v12143_v18  ;;  %v5357_v61 = vsel %vm489_vm1, %v5345_v60, 0.0 }
0x1ebc   :  { %5358 = vadd.xlane.f32.xlu0 %v5357_v61 }
0x1ebd   :  { %v9664_v53 = vpop.f32.mrf.mxu0  ;;  %v5354_v2 = vsel %vm489_vm1, %v5344_v63, 0.0 }
0x1ebe   :  { %v5331_v0 = vadd.f32 %v9664_v53, %v8582_v4  ;;  %5355 = vadd.xlane.f32.xlu1 %v5354_v2 }
0x1ebf   :  { %v5325_v3 = vpop.f32.mrf.mxu0 }
0x1ec0   :  { %v5347_v6 = vadd.f32 %v5331_v0, %v5083_v26  ;;  %v5326_v11 = vadd.f32 %v8582_v4, %v5325_v3 }
0x1ec1   :  { %v9667_v57 = vpop.f32.mrf.mxu0 }
0x1ec2   :  { %v5346_v56 = vadd.f32 %v5326_v11, %v12149_v58  ;;  %v5341_v13 = vadd.f32 %v9667_v57, %v8582_v4  ;;  %v5363_v15 = vsel %vm489_vm1, %v5347_v6, 0.0 }
0x1ec3   :  { %5364 = vadd.xlane.f32.xlu0 %v5363_v15  ;;  %v5335_v48 = vpop.f32.mrf.mxu0 }
0x1ec4   :  { %v5349_v51 = vadd.f32 %v5341_v13, %v5085_v23  ;;  %v5336_v14 = vadd.f32 %v8582_v4, %v5335_v48  ;;  %v5360_v31 = vsel %vm489_vm1, %v5346_v56, 0.0  ;;  %v5456_v4 = vld [vmem:[#allocation19] sm:$0x1] }
0x1ec5   :  { %5361 = vadd.xlane.f32.xlu1 %v5360_v31  ;;  %9677 = vmatmul.mubr.msk.f32.vlgmr.msra.gmra.mxu1 %vm489_vm1, %v5456_v4  ;;  %v5666_v4 = vsub.s32 0, %v5665_v5 }
0x1ec6   :  { %v5348_v50 = vadd.f32 %v5336_v14, %v12156_v28  ;;  %v5369_v7 = vsel %vm489_vm1, %v5349_v51, 0.0  ;;  %9708 = vmatprep.mubr.msk.f32.mxu1 %vm10702_vm4, %v10701_v42  ;;  %v8589_v14 = vld [vmem:[#allocation16 + $0x1] ss:$0 sm:$0xff] }
0x1ec7   :  { %5370 = vadd.xlane.f32.xlu0 %v5369_v7 }
0x1ec8   :  { %v5366_v12 = vsel %vm489_vm1, %v5348_v50, 0.0 }
0x1ec9   :  { %5367 = vadd.xlane.f32.xlu1 %v5366_v12 }
0x1f45   :  { %v5359_v18 = vpop.xlane.xlu0 %5358 }
0x1f46   :  { %v5373_v19 = vmul.f32 0.03125, %v5359_v18  ;;  %v8590_v18 = vld [vmem:[#allocation17 + $0x1] ss:$0 sm:$0xff] }
0x1f47   :  { %v5356_v54 = vpop.xlane.xlu1 %5355 }
0x1f48   :  { %v12177_v35 = vsub.f32 %v5345_v60, %v5373_v19  ;;  %v5372_v8 = vmul.f32 0.03125, %v5356_v54 }
0x1f4a   :  { %v12179_v34 = vsub.f32 %v5344_v63, %v5372_v8  ;;  %v5385_v58 = vmul.f32 %v12177_v35, %v12177_v35 }
0x1f4c   :  { %v5365_v29 = vpop.xlane.xlu0 %5364  ;;  %v5393_v59 = vsel %vm489_vm1, %v5385_v58, 0.0  ;;  %v5384_v38 = vmul.f32 %v12179_v34, %v12179_v34 }
0x1f4d   :  { %v5375_v27 = vmul.f32 0.03125, %v5365_v29  ;;  %5394 = vadd.xlane.f32.xlu0 %v5393_v59 }
0x1f4e   :  { %v5362_v62 = vpop.xlane.xlu1 %5361  ;;  %v5390_v26 = vsel %vm489_vm1, %v5384_v38, 0.0 }
0x1f4f   :  { %v12187_v39 = vsub.f32 %v5347_v6, %v5375_v27  ;;  %v5374_v28 = vmul.f32 0.03125, %v5362_v62  ;;  %5391 = vadd.xlane.f32.xlu1 %v5390_v26 }
0x1f50   :  { %v5371_v32 = vpop.xlane.xlu0 %5370 }
0x1f51   :  { %v12189_v23 = vsub.f32 %v5346_v56, %v5374_v28  ;;  %v5377_v22 = vmul.f32 0.03125, %v5371_v32  ;;  %v5387_v30 = vmul.f32 %v12187_v39, %v12187_v39 }
0x1f52   :  { %v5368_v20 = vpop.xlane.xlu1 %5367 }
0x1f53   :  { %v12193_v43 = vsub.f32 %v5349_v51, %v5377_v22  ;;  %v5376_v45 = vmul.f32 0.03125, %v5368_v20  ;;  %v5399_v33 = vsel %vm489_vm1, %v5387_v30, 0.0  ;;  %v5386_v47 = vmul.f32 %v12189_v23, %v12189_v23 }
0x1f54   :  { %5400 = vadd.xlane.f32.xlu0 %v5399_v33 }
0x1f55   :  { %v12198_v36 = vsub.f32 %v5348_v50, %v5376_v45  ;;  %v5396_v16 = vsel %vm489_vm1, %v5386_v47, 0.0  ;;  %v5389_v44 = vmul.f32 %v12193_v43, %v12193_v43 }
0x1f56   :  { %5397 = vadd.xlane.f32.xlu1 %v5396_v16 }
0x1f57   :  { %v5405_v40 = vsel %vm489_vm1, %v5389_v44, 0.0  ;;  %v5388_v49 = vmul.f32 %v12198_v36, %v12198_v36  ;;  %v8592_v44 = vld [vmem:[#allocation22] ss:$0 sm:$0xff] }
0x1f58   :  { %5406 = vadd.xlane.f32.xlu0 %v5405_v40 }
0x1f59   :  { %v5402_v17 = vsel %vm489_vm1, %v5388_v49, 0.0 }
0x1f5a   :  { %5403 = vadd.xlane.f32.xlu1 %v5402_v17 }
0x1fd6   :  { %v5395_v52 = vpop.xlane.xlu0 %5394 }
0x1fd7   :  { %v5409_v9 = vmul.f32 0.03125, %v5395_v52 }
0x1fd8   :  { %v5392_v1 = vpop.xlane.xlu1 %5391 }
0x1fd9   :  { %v5415_v60 = vadd.f32 1e-05, %v5409_v9  ;;  %v5408_v24 = vmul.f32 0.03125, %v5392_v1  ;;  %v12281_v1 = vld [vmem:[%s12687_s0] sm:$0x3f] }
0x1fdb   :  { %10244 = vrsqrt.f32 %v5415_v60  ;;  %v5414_v63 = vadd.f32 1e-05, %v5408_v24 }
0x1fdd   :  { %10246 = vrsqrt.f32 %v5414_v63  ;;  %v5401_v61 = vpop.xlane.xlu0 %5400 }
0x1fde   :  { %v5411_v53 = vmul.f32 0.03125, %v5401_v61 }
0x1fdf   :  { %v5398_v2 = vpop.xlane.xlu1 %5397 }
0x1fe0   :  { %v5417_v0 = vadd.f32 1e-05, %v5411_v53  ;;  %v5410_v3 = vmul.f32 0.03125, %v5398_v2 }
0x1fe1   :  { %v5407_v6 = vpop.xlane.xlu0 %5406 }
0x1fe2   :  { %10248 = vrsqrt.f32 %v5417_v0  ;;  %v5416_v11 = vadd.f32 1e-05, %v5410_v3  ;;  %v5413_v57 = vmul.f32 0.03125, %v5407_v6 }
0x1fe3   :  { %v5404_v56 = vpop.xlane.xlu1 %5403 }
0x1fe4   :  { %10250 = vrsqrt.f32 %v5416_v11  ;;  %v5419_v13 = vadd.f32 1e-05, %v5413_v57  ;;  %v5412_v15 = vmul.f32 0.03125, %v5404_v56 }
0x1fe6   :  { %10252 = vrsqrt.f32 %v5419_v13  ;;  %v5418_v48 = vadd.f32 1e-05, %v5412_v15 }
0x1fe8   :  { %v10245_v51 = vpop.eup %10244  ;;  %10254 = vrsqrt.f32 %v5418_v48 }
0x1fe9   :  { %v5427_v31 = vmul.f32 %v10245_v51, %v12177_v35 }
0x1fea   :  { %v10247_v50 = vpop.eup %10246 }
0x1feb   :  { %v5426_v7 = vmul.f32 %v10247_v50, %v12179_v34  ;;  %v5439_v12 = vmul.f32 %v8589_v14, %v5427_v31 }
0x1fed   :  { %v5438_v19 = vmul.f32 %v8589_v14, %v5426_v7  ;;  %v5451_v58 = vadd.f32 %v8590_v18, %v5439_v12 }
0x1fef   :  { %v10249_v54 = vpop.eup %10248  ;;  %v5450_v8 = vadd.f32 %v8590_v18, %v5438_v19 }
0x1ff0   :  { %v5429_v29 = vmul.f32 %v10249_v54, %v12187_v39 }
0x1ff1   :  { %v10251_v59 = vpop.eup %10250  ;;  %9687 = vmatprep.mubr.msk.f32.mxu0 %vm489_vm1, %v5450_v8 }
0x1ff2   :  { %9688 = vmatmul.mubr.msk.f32.vlgmr.msra.gmra.mxu0 %vm489_vm1, %v5451_v58  ;;  %v5428_v38 = vmul.f32 %v10251_v59, %v12189_v23  ;;  %v5441_v35 = vmul.f32 %v8589_v14, %v5429_v29  ;;  %v5531_v23 = vpop.f32.mrf.mxu1 }
0x1ff3   :  { %v10253_v27 = vpop.eup %10252  ;;  %v5532_v25 = vadd.f32 %v5531_v23, %v5461_v10 }
0x1ff4   :  { %v5440_v62 = vmul.f32 %v8589_v14, %v5428_v38  ;;  %v5431_v34 = vmul.f32 %v10253_v27, %v12193_v43  ;;  %v5453_v22 = vadd.f32 %v8590_v18, %v5441_v35  ;;  %v9678_v43 = vpop.f32.mrf.mxu1 }
0x1ff5   :  { %v10255_v26 = vpop.eup %10254  ;;  %v12271_v9 = vrot.slane %v5532_v25, %v5666_v4 }
0x1ff6   :  { %v5452_v28 = vadd.f32 %v8590_v18, %v5440_v62  ;;  %v5430_v32 = vmul.f32 %v10255_v26, %v12198_v36  ;;  %v5443_v30 = vmul.f32 %v8589_v14, %v5431_v34 }
0x1ff8   :  { %9690 = vmatprep.mubr.msk.f32.mxu0 %vm489_vm1, %v5452_v28  ;;  %v5442_v39 = vmul.f32 %v8589_v14, %v5430_v32  ;;  %v5455_v45 = vadd.f32 %v8590_v18, %v5443_v30 }
0x1ff9   :  { %9691 = vmatmul.mubr.msk.f32.gmra.mxu0 %vm489_vm1, %v5453_v22 }
0x1ffa   :  { %v5454_v20 = vadd.f32 %v8590_v18, %v5442_v39 }
0x1ffc   :  { %9693 = vmatprep.mubr.msk.f32.mxu0 %vm489_vm1, %v5454_v20 }
0x1ffd   :  { %9694 = vmatmul.mubr.msk.f32.gmra.mxu0 %vm489_vm1, %v5455_v45 }
0x1ffe   :  { %9723 = vmatprep.mubr.msk.f32.mxu0 %vm10702_vm4, %v10701_v42 }
0x20b2   :  { %v9689_v33 = vpop.f32.mrf.mxu0 }
0x20b3   :  { %v12249_v46 = vadd.f32 %v9689_v33, %v8592_v44 }
0x20b4   :  { %v5630_v47 = vpop.f32.mrf.mxu0 }
0x20b5   :  { %v12269_v52 = vadd.f32 %v8592_v44, %v5630_v47 }
0x20b9   :  { %v9692_v36 = vpop.f32.mrf.mxu0 }
0x20ba   :  { %v12254_v41 = vadd.f32 %v9692_v36, %v8592_v44 }
0x20bb   :  { %v5640_v16 = vpop.f32.mrf.mxu0 }
0x20bc   :  { %v12261_v37 = vadd.f32 %v8592_v44, %v5640_v16 }
0x20bd   :  { %v9695_v40 = vpop.f32.mrf.mxu0 }
0x20be   :  { %v12240_v49 = vadd.f32 %v9695_v40, %v8592_v44 }
0x20bf   :  { %v5650_v17 = vpop.f32.mrf.mxu0 }
0x20c0   :  { %v12242_v21 = vadd.f32 %v8592_v44, %v5650_v17  ;;  %9697 = vmatpush3.xpose.msk.msra.mxu1 %vm625_vm2, %v12240_v49 }
0x20c1   :  { %9698 = vmatprep.subr.mxu1 %v10701_v42 }
0x20c2   :  { %5782 = vrot.lane.b32.xlu0 %v12242_v21, %s10690_s11 }
0x20c4   :  { %9699 = vmatpush3.xpose.msk.msra.mxu1 %vm625_vm2, %v12242_v21 }
0x20c5   :  { %9700 = vmatprep.subr.mxu1 %v10701_v42 }
0x20c6   :  { %5776 = vrot.lane.b32.xlu0 %v12249_v46, %s10690_s11 }
0x20c8   :  { %9701 = vmatpush3.xpose.msk.msra.mxu1 %vm625_vm2, %v12254_v41 }
0x20c9   :  { %9702 = vmatprep.subr.mxu1 %v10701_v42 }
0x20cc   :  { %9703 = vmatpush3.xpose.msk.msra.mxu1 %vm625_vm2, %v12261_v37 }
0x20cd   :  { %9704 = vmatprep.subr.mxu1 %v10701_v42 }
0x20d0   :  { %9705 = vmatpush3.xpose.msk.msra.mxu1 %vm625_vm2, %v12249_v46 }
0x20d1   :  { %9706 = vmatprep.subr.mxu1 %v10701_v42 }
0x20d4   :  { %9707 = vmatpush3.xpose.msk.msra.mxu1 %vm625_vm2, %v12269_v52 }
0x20d5   :  { %9741 = vmatprep.subr.mxu1 %v10701_v42 }
0x20d7   :  { %9709 = vmatmul.mubr.msk.f32.vlgmr.msra.gmra.mxu1 %vm625_vm2, %v12271_v9 }
0x20d8   :  { %9753 = vmatprep.mubr.msk.f32.mxu1 %vm10702_vm4, %v10701_v42 }
0x2134   :  { %v5783_v11 = vpop.permute.xlu0 %5782 }
0x2138   :  { %v5777_v13 = vpop.permute.xlu0 %5776 }
0x2197   :  { %v5756_v60 = vpop.f32.mrf.mxu1 }
0x2198   :  { %v5760_v24 = vmul.f32 0.35355338, %v5756_v60 }
0x2199   :  { %v9710_v63 = vpop.f32.mrf.mxu1 }
0x219a   :  { %v5761_v61 = vadd.f32 %v5760_v24, %v12281_v1 }
0x219c   :  { %v5763_v53 = vsel %vm5762_vm5, %v5761_v61, -inf }
0x219d   :  { %5764 = vmax.xlane.f32.xlu1 %v5763_v53 }
0x21ae   :  { %5784 = vrot.lane.b32.xlu1 %v12240_v49, %s10690_s11 }
0x21b2   :  { %5780 = vrot.lane.b32.xlu1 %v12254_v41, %s10690_s11 }
0x21b6   :  { %5778 = vrot.lane.b32.xlu1 %v12261_v37, %s10690_s11 }
0x21ba   :  { %5774 = vrot.lane.b32.xlu1 %v12269_v52, %s10690_s11 }
0x21be   :  { %5875 = vrot.lane.b32.xlu1 %v12242_v21, %s10693_s14 }
0x21c2   :  { %5871 = vrot.lane.b32.xlu1 %v12261_v37, %s10693_s14 }
0x21c6   :  { %5867 = vrot.lane.b32.xlu1 %v12269_v52, %s10693_s14 }
0x21ca   :  { %6225 = vrot.lane.b32.xlu1 %v12240_v49, %s10696_s3 }
0x21ce   :  { %6221 = vrot.lane.b32.xlu1 %v12254_v41, %s10696_s3 }
0x21d2   :  { %6217 = vrot.lane.b32.xlu1 %v12249_v46, %s10696_s3 }
0x21d6   :  { %6213 = vrot.lane.b32.xlu1 %v12271_v9, %s10696_s3 }
0x21da   :  { %5984 = vrot.lane.b32.xlu1 %v12242_v21, %s10692_s16 }
0x21de   :  { %5980 = vrot.lane.b32.xlu1 %v12261_v37, %s10692_s16 }
0x2226   :  { %v5765_v2 = vpop.xlane.xlu1 %5764 }
0x2227   :  { %v5766_v0 = vsub.f32 %v5761_v61, %v5765_v2 }
0x2229   :  { %v5767_v3 = vmul.f32 1.442695, %v5766_v0 }
0x222a   :  { %v5785_v6 = vpop.permute.xlu1 %5784 }
0x222b   :  { %10256 = vpow2.f32 %v5767_v3  ;;  %9712 = vmatpush3.msra.mxu0 %v5785_v6 }
0x222c   :  { %9713 = vmatprep.subr.mxu0 %v10701_v42 }
0x222d   :  { %9714 = vmatpush3.msra.mxu0 %v5783_v11 }
0x222e   :  { %9715 = vmatprep.subr.mxu0 %v10701_v42  ;;  %v5781_v57 = vpop.permute.xlu1 %5780 }
0x222f   :  { %9716 = vmatpush3.msra.mxu0 %v5781_v57 }
0x2230   :  { %9717 = vmatprep.subr.mxu0 %v10701_v42 }
0x2232   :  { %v5779_v56 = vpop.permute.xlu1 %5778 }
0x2233   :  { %9718 = vmatpush3.msra.mxu0 %v5779_v56 }
0x2234   :  { %9719 = vmatprep.subr.mxu0 %v10701_v42 }
0x2235   :  { %9720 = vmatpush3.msra.mxu0 %v5777_v13 }
0x2236   :  { %9721 = vmatprep.subr.mxu0 %v10701_v42  ;;  %v5775_v15 = vpop.permute.xlu1 %5774 }
0x2237   :  { %9722 = vmatpush3.msra.mxu0 %v5775_v15 }
0x2238   :  { %v10257_v48 = vpop.eup %10256  ;;  %9726 = vmatprep.subr.mxu0 %v10701_v42 }
0x2239   :  { %v5769_v51 = vsel %vm5762_vm5, %v10257_v48, 0.0 }
0x223a   :  { %5770 = vadd.xlane.f32.xlu0 %v5769_v51  ;;  %v5876_v12 = vpop.permute.xlu1 %5875  ;;  %v5660_v51 = vld [vmem:[#allocation23 + $0x8] sm:$0xff] }
0x223e   :  { %v5872_v19 = vpop.permute.xlu1 %5871 }
0x2242   :  { %v5868_v8 = vpop.permute.xlu1 %5867 }
0x2246   :  { %v6226_v29 = vpop.permute.xlu1 %6225 }
0x224a   :  { %v6222_v38 = vpop.permute.xlu1 %6221 }
0x224e   :  { %v6218_v35 = vpop.permute.xlu1 %6217 }
0x2250   :  { %5877 = vrot.lane.b32.xlu0 %v12240_v49, %s10693_s14 }
0x2252   :  { %v6214_v34 = vpop.permute.xlu1 %6213 }
0x2254   :  { %5873 = vrot.lane.b32.xlu0 %v12254_v41, %s10693_s14 }
0x2256   :  { %v5985_v40 = vpop.permute.xlu1 %5984 }
0x2258   :  { %5869 = vrot.lane.b32.xlu0 %v12249_v46, %s10693_s14 }
0x225a   :  { %v5981_v5 = vpop.permute.xlu1 %5980 }
0x225c   :  { %5865 = vrot.lane.b32.xlu0 %v12271_v9, %s10693_s14 }
0x2260   :  { %6223 = vrot.lane.b32.xlu0 %v12242_v21, %s10696_s3 }
0x2264   :  { %6219 = vrot.lane.b32.xlu0 %v12261_v37, %s10696_s3 }
0x2268   :  { %6215 = vrot.lane.b32.xlu0 %v12269_v52, %s10696_s3 }
0x22c3   :  { %v5771_v14 = vpop.xlane.xlu0 %5770 }
0x22c4   :  { %10258 = vrcp.f32 %v5771_v14 }
0x22c7   :  { %v5878_v7 = vpop.permute.xlu0 %5877 }
0x22cb   :  { %v5874_v18 = vpop.permute.xlu0 %5873 }
0x22cf   :  { %v5870_v54 = vpop.permute.xlu0 %5869 }
0x22d1   :  { %v10259_v31 = vpop.eup %10258 }
0x22d2   :  { %v5773_v50 = vmul.f32 %v10259_v31, %v10257_v48 }
0x22d3   :  { %v5866_v58 = vpop.permute.xlu0 %5865 }
0x22d4   :  { %9724 = vmatmul.mubr.msk.f32.vlgmr.msra.gmra.mxu0 %vm757_vm3, %v5773_v50  ;;  %v5659_v50 = vld [vmem:[#allocation23] sm:$0xff] }
0x22d5   :  { %9727 = vmatpush3.xpose.msk.msra.mxu0 %vm625_vm2, %v5878_v7  ;;  %9738 = vmatprep.mubr.msk.f32.mxu0 %vm10702_vm4, %v10701_v42 }
0x22d6   :  { %9728 = vmatprep.subr.mxu0 %v10701_v42 }
0x22d7   :  { %v6224_v59 = vpop.permute.xlu0 %6223 }
0x22d9   :  { %9729 = vmatpush3.xpose.msk.msra.mxu0 %vm625_vm2, %v5876_v12 }
0x22da   :  { %9730 = vmatprep.subr.mxu0 %v10701_v42 }
0x22db   :  { %v6220_v27 = vpop.permute.xlu0 %6219 }
0x22dd   :  { %9731 = vmatpush3.xpose.msk.msra.mxu0 %vm625_vm2, %v5874_v18 }
0x22de   :  { %9732 = vmatprep.subr.mxu0 %v10701_v42 }
0x22df   :  { %v6216_v62 = vpop.permute.xlu0 %6215 }
0x22e1   :  { %9733 = vmatpush3.xpose.msk.msra.mxu0 %vm625_vm2, %v5872_v19 }
0x22e2   :  { %9734 = vmatprep.subr.mxu0 %v10701_v42 }
0x22e5   :  { %9735 = vmatpush3.xpose.msk.msra.mxu0 %vm625_vm2, %v5870_v54 }
0x22e6   :  { %9736 = vmatprep.subr.mxu0 %v10701_v42 }
0x22e9   :  { %9737 = vmatpush3.xpose.msk.msra.mxu0 %vm625_vm2, %v5868_v8  ;;  %v5661_v8 = vld [vmem:[#allocation23 + $0x10] sm:$0xff] }
0x22ea   :  { %9766 = vmatprep.subr.mxu0 %v10701_v42 }
0x22ec   :  { %9739 = vmatmul.mubr.msk.f32.vlgmr.msra.gmra.mxu0 %vm625_vm2, %v5866_v58 }
0x22ed   :  { %9767 = vmatpush3.xpose.msk.msra.mxu0 %vm625_vm2, %v6226_v29  ;;  %9778 = vmatprep.mubr.msk.f32.mxu0 %vm10702_vm4, %v10701_v42 }
0x22ee   :  { %9768 = vmatprep.subr.mxu0 %v10701_v42 }
0x22f1   :  { %9769 = vmatpush3.xpose.msk.msra.mxu0 %vm625_vm2, %v6224_v59 }
0x22f2   :  { %9770 = vmatprep.subr.mxu0 %v10701_v42 }
0x22f5   :  { %9771 = vmatpush3.xpose.msk.msra.mxu0 %vm625_vm2, %v6222_v38 }
0x22f6   :  { %9772 = vmatprep.subr.mxu0 %v10701_v42 }
0x22f9   :  { %9773 = vmatpush3.xpose.msk.msra.mxu0 %vm625_vm2, %v6220_v27 }
0x22fa   :  { %9774 = vmatprep.subr.mxu0 %v10701_v42 }
0x22fd   :  { %9775 = vmatpush3.xpose.msk.msra.mxu0 %vm625_vm2, %v6218_v35 }
0x22fe   :  { %9776 = vmatprep.subr.mxu0 %v10701_v42 }
0x2301   :  { %9777 = vmatpush3.xpose.msk.msra.mxu0 %vm625_vm2, %v6216_v62 }
0x2302   :  { %9816 = vmatprep.subr.mxu0 %v10701_v42 }
0x2304   :  { %9779 = vmatmul.mubr.msk.f32.vlgmr.msra.gmra.mxu0 %vm625_vm2, %v6214_v34 }
0x2305   :  { %9828 = vmatprep.mubr.msk.f32.mxu0 %vm10702_vm4, %v10701_v42 }
0x2394   :  { %v12365_v26 = vpop.f32.mrf.mxu0 }
0x2396   :  { %v9725_v28 = vpop.f32.mrf.mxu0 }
0x23ac   :  { %v5959_v32 = vpop.f32.mrf.mxu0 }
0x23ad   :  { %v5963_v22 = vmul.f32 0.35355338, %v5959_v32 }
0x23ae   :  { %v9740_v30 = vpop.f32.mrf.mxu0 }
0x23af   :  { %v5964_v39 = vadd.f32 %v5963_v22, %v12281_v1 }
0x23b1   :  { %v5965_v20 = vsel %vm5762_vm5, %v5964_v39, -inf }
0x23b2   :  { %5966 = vmax.xlane.f32.xlu0 %v5965_v20 }
0x23c4   :  { %v6307_v45 = vpop.f32.mrf.mxu0 }
0x23c5   :  { %v6311_v43 = vmul.f32 0.35355338, %v6307_v45 }
0x23c6   :  { %v9780_v23 = vpop.f32.mrf.mxu0 }
0x23c7   :  { %v6312_v33 = vadd.f32 %v6311_v43, %v12281_v1 }
0x23c8   :  { %5986 = vrot.lane.b32.xlu0 %v12240_v49, %s10692_s16 }
0x23c9   :  { %v6313_v47 = vsel %vm5762_vm5, %v6312_v33, -inf }
0x23cc   :  { %5982 = vrot.lane.b32.xlu0 %v12254_v41, %s10692_s16 }
0x23d0   :  { %5978 = vrot.lane.b32.xlu0 %v12249_v46, %s10692_s16 }
0x23ef   :  { %6314 = vmax.xlane.f32.xlu0 %v6313_v47 }
0x2405   :  { %6334 = vrot.lane.b32.xlu0 %v12240_v49, %s10695_s23 }
0x2409   :  { %6330 = vrot.lane.b32.xlu0 %v12254_v41, %s10695_s23 }
0x240d   :  { %6326 = vrot.lane.b32.xlu0 %v12249_v46, %s10695_s23 }
0x2411   :  { %6501 = vrot.lane.b32.xlu0 %v12240_v49, %s10698_s4 }
0x2415   :  { %6497 = vrot.lane.b32.xlu0 %v12254_v41, %s10698_s4 }
0x2419   :  { %6493 = vrot.lane.b32.xlu0 %v12249_v46, %s10698_s4 }
0x241d   :  { %6489 = vrot.lane.b32.xlu0 %v12271_v9, %s10698_s4 }
0x2421   :  { %6610 = vrot.lane.b32.xlu0 %v12240_v49, %s10697_s22 }
0x2425   :  { %6604 = vrot.lane.b32.xlu0 %v12261_v37, %s10697_s22 }
0x243b   :  { %v5967_v36 = vpop.xlane.xlu0 %5966 }
0x243c   :  { %v5968_v16 = vsub.f32 %v5964_v39, %v5967_v36 }
0x243e   :  { %v5969_v44 = vmul.f32 1.442695, %v5968_v16 }
0x243f   :  { %v5987_v17 = vpop.permute.xlu0 %5986 }
0x2440   :  { %10260 = vpow2.f32 %v5969_v44  ;;  %9742 = vmatpush3.msra.mxu1 %v5987_v17 }
0x2441   :  { %9743 = vmatprep.subr.mxu1 %v10701_v42 }
0x2442   :  { %9744 = vmatpush3.msra.mxu1 %v5985_v40 }
0x2443   :  { %v5983_v55 = vpop.permute.xlu0 %5982  ;;  %9745 = vmatprep.subr.mxu1 %v10701_v42 }
0x2444   :  { %9746 = vmatpush3.msra.mxu1 %v5983_v55 }
0x2445   :  { %9747 = vmatprep.subr.mxu1 %v10701_v42 }
0x2446   :  { %9748 = vmatpush3.msra.mxu1 %v5981_v5 }
0x2447   :  { %v5979_v49 = vpop.permute.xlu0 %5978  ;;  %9749 = vmatprep.subr.mxu1 %v10701_v42 }
0x2448   :  { %9750 = vmatpush3.msra.mxu1 %v5979_v49  ;;  %v5662_v49 = vld [vmem:[#allocation23 + $0x18] sm:$0xff] }
0x2449   :  { %9751 = vmatprep.subr.mxu1 %v10701_v42 }
0x244d   :  { %v10261_v10 = vpop.eup %10260 }
0x244e   :  { %v5971_v25 = vsel %vm5762_vm5, %v10261_v10, 0.0 }
0x244f   :  { %5972 = vadd.xlane.f32.xlu1 %v5971_v25  ;;  %v8639_v25 = vld [vmem:[%s12680_s21 + $0x58] sm:$0xff] }
0x2460   :  { %5976 = vrot.lane.b32.xlu1 %v12269_v52, %s10692_s16 }
0x2464   :  { %6332 = vrot.lane.b32.xlu1 %v12242_v21, %s10695_s23 }
0x2468   :  { %6328 = vrot.lane.b32.xlu1 %v12261_v37, %s10695_s23 }
0x2478   :  { %v6315_v4 = vpop.xlane.xlu0 %6314 }
0x2479   :  { %v6316_v9 = vsub.f32 %v6312_v33, %v6315_v4  ;;  %v8638_v4 = vld [vmem:[%s12680_s21 + $0x50] sm:$0xff] }
0x247b   :  { %v6317_v60 = vmul.f32 1.442695, %v6316_v9  ;;  %v8637_v9 = vld [vmem:[%s12680_s21 + $0x48] sm:$0xff] }
0x247c   :  { %v6335_v24 = vpop.permute.xlu0 %6334 }
0x247d   :  { %10262 = vpow2.f32 %v6317_v60  ;;  %v8636_v60 = vld [vmem:[%s12680_s21 + $0x40] sm:$0xff] }
0x2480   :  { %v6331_v63 = vpop.permute.xlu0 %6330 }
0x2484   :  { %v6327_v61 = vpop.permute.xlu0 %6326 }
0x2488   :  { %v12407_v53 = vpop.permute.xlu0 %6501 }
0x248a   :  { %v10263_v2 = vpop.eup %10262 }
0x248b   :  { %v6319_v0 = vsel %vm5762_vm5, %v10263_v2, 0.0 }
0x248c   :  { %6320 = vadd.xlane.f32.xlu1 %v6319_v0  ;;  %v12410_v3 = vpop.permute.xlu0 %6497 }
0x2490   :  { %v12412_v6 = vpop.permute.xlu0 %6493 }
0x2494   :  { %v12414_v11 = vpop.permute.xlu0 %6489 }
0x2498   :  { %v6611_v57 = vpop.permute.xlu0 %6610 }
0x2499   :  { %9817 = vmatpush3.msra.mxu0 %v6611_v57 }
0x249a   :  { %9818 = vmatprep.subr.mxu0 %v10701_v42 }
0x249c   :  { %v6605_v44 = vpop.permute.xlu0 %6604 }
0x249d   :  { %6324 = vrot.lane.b32.xlu1 %v12269_v52, %s10695_s23 }
0x24a1   :  { %6499 = vrot.lane.b32.xlu1 %v12242_v21, %s10698_s4 }
0x24a5   :  { %6495 = vrot.lane.b32.xlu1 %v12261_v37, %s10698_s4 }
0x24a9   :  { %6491 = vrot.lane.b32.xlu1 %v12269_v52, %s10698_s4 }
0x24d8   :  { %v5973_v56 = vpop.xlane.xlu1 %5972 }
0x24d9   :  { %10264 = vrcp.f32 %v5973_v56 }
0x24dc   :  { %v5977_v13 = vpop.permute.xlu1 %5976 }
0x24dd   :  { %9752 = vmatpush3.msra.mxu1 %v5977_v13 }
0x24de   :  { %9756 = vmatprep.subr.mxu1 %v10701_v42 }
0x24e0   :  { %v6333_v37 = vpop.permute.xlu1 %6332 }
0x24e4   :  { %v6329_v14 = vpop.permute.xlu1 %6328 }
0x24e6   :  { %v10265_v15 = vpop.eup %10264 }
0x24e7   :  { %v5975_v48 = vmul.f32 %v10265_v15, %v10261_v10 }
0x24e9   :  { %9754 = vmatmul.mubr.msk.f32.vlgmr.msra.gmra.mxu1 %vm757_vm3, %v5975_v48 }
0x24ea   :  { %9757 = vmatpush3.msra.mxu1 %v5660_v51  ;;  %9758 = vmatprep.mubr.msk.f32.mxu1 %vm10702_vm4, %v10701_v42  ;;  %v12528_v51 = vld [vmem:[%s12689_s1] sm:$0x3f] }
0x24eb   :  { %9761 = vmatprep.subr.mxu1 %v10701_v42 }
0x2515   :  { %v6321_v31 = vpop.xlane.xlu1 %6320 }
0x2516   :  { %10266 = vrcp.f32 %v6321_v31 }
0x2519   :  { %v6325_v19 = vpop.permute.xlu1 %6324 }
0x251d   :  { %v6500_v34 = vpop.permute.xlu1 %6499 }
0x2523   :  { %v10267_v18 = vpop.eup %10266 }
0x2524   :  { %v6323_v54 = vmul.f32 %v10267_v18, %v10263_v2 }
0x25a9   :  { %v6063_v7 = vpop.f32.mrf.mxu1 }
0x25aa   :  { %9759 = vmatmul.mubr.msk.f32.vlgmr.msra.gmra.mxu1 %vm625_vm2, %v6063_v7 }
0x25ab   :  { %v9755_v12 = vpop.f32.mrf.mxu1  ;;  %9762 = vmatpush3.msra.mxu1 %v5659_v50  ;;  %9763 = vmatprep.mubr.msk.f32.mxu1 %vm10702_vm4, %v10701_v42 }
0x25ac   :  { %9781 = vmatprep.subr.mxu1 %v10701_v42 }
0x25ae   :  { %9764 = vmatmul.mubr.msk.f32.vlgmr.msra.gmra.mxu1 %vm625_vm2, %v12365_v26  ;;  %v6496_v26 = vpop.permute.xlu1 %6495 }
0x25af   :  { %9782 = vmatpush3.msra.mxu1 %v6335_v24  ;;  %9793 = vmatprep.mubr.msk.f32.mxu1 %vm10702_vm4, %v10701_v42 }
0x25b0   :  { %9783 = vmatprep.subr.mxu1 %v10701_v42 }
0x25b1   :  { %9784 = vmatpush3.msra.mxu1 %v6333_v37 }
0x25b2   :  { %9785 = vmatprep.subr.mxu1 %v10701_v42  ;;  %v6492_v28 = vpop.permute.xlu1 %6491 }
0x25b3   :  { %9786 = vmatpush3.msra.mxu1 %v6331_v63  ;;  %v8635_v63 = vld [vmem:[#allocation25] ss:$0 sm:$0xff] }
0x25b4   :  { %9787 = vmatprep.subr.mxu1 %v10701_v42 }
0x25b5   :  { %9788 = vmatpush3.msra.mxu1 %v6329_v14 }
0x25b6   :  { %9789 = vmatprep.subr.mxu1 %v10701_v42 }
0x25b7   :  { %9790 = vmatpush3.msra.mxu1 %v6327_v61 }
0x25b8   :  { %9791 = vmatprep.subr.mxu1 %v10701_v42 }
0x25b9   :  { %9792 = vmatpush3.msra.mxu1 %v6325_v19 }
0x25ba   :  { %9794 = vmatmul.mubr.msk.f32.vlgmr.msra.gmra.mxu1 %vm757_vm3, %v6323_v54  ;;  %9796 = vmatprep.subr.mxu1 %v10701_v42 }
0x25bb   :  { %9798 = vmatprep.mubr.msk.f32.mxu1 %vm10702_vm4, %v10701_v42  ;;  %9797 = vmatpush3.msra.mxu1 %v5661_v8 }
0x25bc   :  { %9801 = vmatprep.subr.mxu1 %v10701_v42 }
0x266a   :  { %v6136_v58 = vpop.f32.mrf.mxu1 }
0x266c   :  { %v9760_v29 = vpop.f32.mrf.mxu1 }
0x266e   :  { %v6209_v59 = vpop.f32.mrf.mxu1 }
0x266f   :  { %v6210_v38 = vadd.f32 %v6209_v59, %v6136_v58 }
0x2670   :  { %v9765_v27 = vpop.f32.mrf.mxu1 }
0x267a   :  { %v6411_v35 = vpop.f32.mrf.mxu1 }
0x267b   :  { %9799 = vmatmul.mubr.msk.f32.vlgmr.msra.gmra.mxu1 %vm625_vm2, %v6411_v35 }
0x267c   :  { %9802 = vmatpush3.xpose.msk.msra.mxu1 %vm625_vm2, %v12407_v53  ;;  %v9795_v62 = vpop.f32.mrf.mxu1  ;;  %9813 = vmatprep.mubr.msk.f32.mxu1 %vm10702_vm4, %v10701_v42  ;;  %v6773_v53 = vld [vmem:[%s12688_s5] sm:$0x3f] }
0x267d   :  { %9803 = vmatprep.subr.mxu1 %v10701_v42 }
0x2680   :  { %9804 = vmatpush3.xpose.msk.msra.mxu1 %vm625_vm2, %v6500_v34 }
0x2681   :  { %9805 = vmatprep.subr.mxu1 %v10701_v42 }
0x2684   :  { %9806 = vmatpush3.xpose.msk.msra.mxu1 %vm625_vm2, %v12410_v3 }
0x2685   :  { %9807 = vmatprep.subr.mxu1 %v10701_v42 }
0x2688   :  { %9808 = vmatpush3.xpose.msk.msra.mxu1 %vm625_vm2, %v6496_v26 }
0x2689   :  { %9809 = vmatprep.subr.mxu1 %v10701_v42 }
0x268c   :  { %9810 = vmatpush3.xpose.msk.msra.mxu1 %vm625_vm2, %v12412_v6  ;;  %v8640_v6 = vld [vmem:[#allocation5 + $0x2] ss:$0 sm:$0xff] }
0x268d   :  { %9811 = vmatprep.subr.mxu1 %v10701_v42 }
0x2690   :  { %9812 = vmatpush3.xpose.msk.msra.mxu1 %vm625_vm2, %v6492_v28 }
0x2691   :  { %9847 = vmatprep.subr.mxu1 %v10701_v42 }
0x2693   :  { %9814 = vmatmul.mubr.msk.f32.vlgmr.msra.gmra.mxu1 %vm625_vm2, %v12414_v11 }
0x2694   :  { %9849 = vmatprep.mubr.msk.f32.mxu1 %vm10702_vm4, %v10701_v42 }
0x273b   :  { %v6484_v32 = vpop.f32.mrf.mxu1 }
0x273c   :  { %v6488_v22 = vadd.f32 %v6484_v32, %v6210_v38 }
0x273d   :  { %v9800_v30 = vpop.f32.mrf.mxu1 }
0x2753   :  { %v6583_v39 = vpop.f32.mrf.mxu1 }
0x2754   :  { %v6587_v20 = vmul.f32 0.35355338, %v6583_v39 }
0x2755   :  { %v9815_v45 = vpop.f32.mrf.mxu1 }
0x2756   :  { %v6588_v23 = vadd.f32 %v6587_v20, %v12281_v1 }
0x2758   :  { %v6589_v43 = vsel %vm5762_vm5, %v6588_v23, -inf }
0x2759   :  { %6590 = vmax.xlane.f32.xlu1 %v6589_v43 }
0x276a   :  { %6608 = vrot.lane.b32.xlu1 %v12242_v21, %s10697_s22 }
0x276e   :  { %6606 = vrot.lane.b32.xlu1 %v12254_v41, %s10697_s22 }
0x2772   :  { %6602 = vrot.lane.b32.xlu1 %v12249_v46, %s10697_s22 }
0x27e2   :  { %v6591_v33 = vpop.xlane.xlu1 %6590 }
0x27e3   :  { %v6592_v47 = vsub.f32 %v6588_v23, %v6591_v33  ;;  %v8642_v33 = vld [vmem:[%s12683_s18 + $0x40] sm:$0xff] }
0x27e5   :  { %v6593_v36 = vmul.f32 1.442695, %v6592_v47  ;;  %v8643_v47 = vld [vmem:[%s12683_s18 + $0x48] sm:$0xff] }
0x27e6   :  { %v6609_v16 = vpop.permute.xlu1 %6608 }
0x27e7   :  { %10268 = vpow2.f32 %v6593_v36  ;;  %9819 = vmatpush3.msra.mxu0 %v6609_v16 }
0x27e8   :  { %9820 = vmatprep.subr.mxu0 %v10701_v42 }
0x27ea   :  { %v6607_v1 = vpop.permute.xlu1 %6606 }
0x27eb   :  { %9821 = vmatpush3.msra.mxu0 %v6607_v1 }
0x27ec   :  { %9822 = vmatprep.subr.mxu0 %v10701_v42 }
0x27ed   :  { %9823 = vmatpush3.msra.mxu0 %v6605_v44 }
0x27ee   :  { %9824 = vmatprep.subr.mxu0 %v10701_v42  ;;  %v6603_v21 = vpop.permute.xlu1 %6602 }
0x27ef   :  { %9825 = vmatpush3.msra.mxu0 %v6603_v21 }
0x27f0   :  { %9826 = vmatprep.subr.mxu0 %v10701_v42 }
0x27f4   :  { %v10269_v46 = vpop.eup %10268 }
0x27f5   :  { %v6595_v41 = vsel %vm5762_vm5, %v10269_v46, 0.0 }
0x27f6   :  { %6596 = vadd.xlane.f32.xlu0 %v6595_v41 }
0x280c   :  { %6600 = vrot.lane.b32.xlu0 %v12269_v52, %s10697_s22 }
0x287f   :  { %v6597_v40 = vpop.xlane.xlu0 %6596 }
0x2880   :  { %10270 = vrcp.f32 %v6597_v40 }
0x2883   :  { %v6601_v17 = vpop.permute.xlu0 %6600 }
0x2884   :  { %9827 = vmatpush3.msra.mxu0 %v6601_v17 }
0x2885   :  { %9831 = vmatprep.subr.mxu0 %v10701_v42 }
0x288d   :  { %v10271_v55 = vpop.eup %10270 }
0x288e   :  { %v6599_v5 = vmul.f32 %v10271_v55, %v10269_v46 }
0x2890   :  { %9829 = vmatmul.mubr.msk.f32.vlgmr.msra.gmra.mxu0 %vm757_vm3, %v6599_v5 }
0x2891   :  { %9832 = vmatpush3.msra.mxu0 %v5662_v49  ;;  %9833 = vmatprep.mubr.msk.f32.mxu0 %vm10702_vm4, %v10701_v42 }
0x2892   :  { %9836 = vmatprep.subr.mxu0 %v10701_v42 }
0x2950   :  { %v6687_v52 = vpop.f32.mrf.mxu0 }
0x2951   :  { %9834 = vmatmul.mubr.msk.f32.vlgmr.msra.gmra.mxu0 %vm625_vm2, %v6687_v52 }
0x2952   :  { %v9830_v10 = vpop.f32.mrf.mxu0  ;;  %9844 = vmatprep.mubr.msk.f32.mxu0 %vm10702_vm4, %v10701_v42  ;;  %9837 = vmatpush3.msra.mxu0 %v8639_v25 }
0x2953   :  { %9838 = vmatprep.subr.mxu0 %v10701_v42 }
0x2954   :  { %9839 = vmatpush3.msra.mxu0 %v8638_v4 }
0x2955   :  { %9840 = vmatprep.subr.mxu0 %v10701_v42 }
0x2956   :  { %9841 = vmatpush3.msra.mxu0 %v8637_v9 }
0x2957   :  { %9842 = vmatprep.subr.mxu0 %v10701_v42 }
0x2958   :  { %9843 = vmatpush3.msra.mxu0 %v8636_v60 }
0x2959   :  { %9857 = vmatprep.subr.mxu0 %v10701_v42 }
0x2a11   :  { %v6760_v24 = vpop.f32.mrf.mxu0 }
0x2a12   :  { %v6764_v61 = vadd.f32 %v6760_v24, %v6488_v22 }
0x2a13   :  { %v9835_v2 = vpop.f32.mrf.mxu0 }
0x2a14   :  { %v6772_v0 = vadd.f32 %v8635_v63, %v6764_v61 }
0x2a16   :  { %v12502_v3 = vadd.f32 %v6773_v53, %v6772_v0 }
0x2a18   :  { %9845 = vmatmul.mubr.msk.f32.vlgmr.msra.gmra.mxu0 %vm489_vm1, %v12502_v3 }
0x2a19   :  { %9859 = vmatprep.mubr.msk.f32.mxu0 %vm10702_vm4, %v10701_v42 }
0x2ad8   :  { %v6858_v11 = vpop.f32.mrf.mxu0 }
0x2ad9   :  { %v12508_v57 = vadd.f32 %v8640_v6, %v6858_v11 }
0x2ada   :  { %v9846_v56 = vpop.f32.mrf.mxu0 }
0x2adb   :  { %7039 = vrot.lane.b32.xlu0 %v12508_v57, %s10692_s16  ;;  %6868 = vrot.lane.b32.xlu1 %v12508_v57, %s10690_s11 }
0x2adf   :  { %7037 = vrot.lane.b32.xlu1 %v12508_v57, %s10693_s14 }
0x2b4d   :  { %v7040_v13 = vpop.permute.xlu0 %7039  ;;  %v6869_v15 = vpop.permute.xlu1 %6868 }
0x2b4e   :  { %9848 = vmatpush3.xpose.msk.msra.mxu1 %vm625_vm2, %v6869_v15  ;;  %9858 = vmatpush3.xpose.msk.msra.mxu0 %vm625_vm2, %v7040_v13  ;;  %v8644_v13 = vld [vmem:[%s12683_s18 + $0x50] sm:$0xff] }
0x2b4f   :  { %9852 = vmatprep.subr.mxu1 %v10701_v42  ;;  %9867 = vmatprep.subr.mxu0 %v10701_v42 }
0x2b51   :  { %9850 = vmatmul.mubr.msk.f32.vlgmr.msra.gmra.mxu1 %vm625_vm2, %v12508_v57  ;;  %v7038_v48 = vpop.permute.xlu1 %7037 }
0x2b52   :  { %9860 = vmatmul.mubr.msk.f32.vlgmr.msra.gmra.mxu0 %vm625_vm2, %v7038_v48  ;;  %9854 = vmatprep.mubr.msk.f32.mxu1 %vm10702_vm4, %v10701_v42 }
0x2b53   :  { %9869 = vmatprep.mubr.msk.f32.mxu0 %vm10702_vm4, %v10701_v42  ;;  %9868 = vmatpush3.msra.mxu0 %v8643_v47 }
0x2b54   :  { %9877 = vmatprep.subr.mxu0 %v10701_v42 }
0x2c11   :  { %v6940_v37 = vpop.f32.mrf.mxu1 }
0x2c12   :  { %v6944_v14 = vmul.f32 0.35355338, %v6940_v37  ;;  %v7111_v31 = vpop.f32.mrf.mxu0 }
0x2c13   :  { %v7115_v50 = vmul.f32 0.35355338, %v7111_v31  ;;  %v9851_v7 = vpop.f32.mrf.mxu1 }
0x2c14   :  { %v6945_v12 = vadd.f32 %v6944_v14, %v12528_v51  ;;  %v9861_v18 = vpop.f32.mrf.mxu0 }
0x2c15   :  { %v7116_v19 = vadd.f32 %v7115_v50, %v12528_v51 }
0x2c16   :  { %v6947_v54 = vsel %vm6946_vm6, %v6945_v12, -inf }
0x2c17   :  { %6948 = vmax.xlane.f32.xlu0 %v6947_v54  ;;  %v7117_v8 = vsel %vm6946_vm6, %v7116_v19, -inf }
0x2c18   :  { %7118 = vmax.xlane.f32.xlu1 %v7117_v8 }
0x2c29   :  { %6958 = vrot.lane.b32.xlu1 %v12508_v57, %s10691_s15 }
0x2c2d   :  { %7353 = vrot.lane.b32.xlu1 %v12508_v57, %s10695_s23 }
0x2c31   :  { %7351 = vrot.lane.b32.xlu1 %v12508_v57, %s10696_s3 }
0x2ca0   :  { %v6949_v58 = vpop.xlane.xlu0 %6948 }
0x2ca1   :  { %v6950_v29 = vsub.f32 %v6945_v12, %v6949_v58  ;;  %v7119_v59 = vpop.xlane.xlu1 %7118 }
0x2ca2   :  { %v7120_v38 = vsub.f32 %v7116_v19, %v7119_v59 }
0x2ca3   :  { %v6951_v27 = vmul.f32 1.442695, %v6950_v29  ;;  %v8645_v29 = vld [vmem:[%s12683_s18 + $0x58] sm:$0xff] }
0x2ca4   :  { %v7121_v35 = vmul.f32 1.442695, %v7120_v38 }
0x2ca5   :  { %10272 = vpow2.f32 %v6951_v27  ;;  %v6959_v62 = vpop.permute.xlu1 %6958 }
0x2ca6   :  { %9853 = vmatpush3.msk.msra.mxu1 %vm6964_vm7, %v6959_v62  ;;  %10274 = vpow2.f32 %v7121_v35 }
0x2ca7   :  { %9862 = vmatprep.subr.mxu1 %v10701_v42 }
0x2ca9   :  { %v7354_v16 = vpop.permute.xlu1 %7353 }
0x2cad   :  { %v7352_v46 = vpop.permute.xlu1 %7351 }
0x2cb2   :  { %v10273_v34 = vpop.eup %10272 }
0x2cb3   :  { %v6953_v26 = vsel %vm6946_vm6, %v10273_v34, 0.0  ;;  %v10275_v28 = vpop.eup %10274 }
0x2cb4   :  { %6954 = vadd.xlane.f32.xlu0 %v6953_v26  ;;  %v7123_v32 = vsel %vm6946_vm6, %v10275_v28, 0.0 }
0x2cb8   :  { %7124 = vadd.xlane.f32.xlu0 %v7123_v32 }
0x2cce   :  { %7128 = vrot.lane.b32.xlu0 %v12508_v57, %s10694_s24 }
0x2d3d   :  { %v6955_v22 = vpop.xlane.xlu0 %6954 }
0x2d3e   :  { %10276 = vrcp.f32 %v6955_v22 }
0x2d41   :  { %v7125_v30 = vpop.xlane.xlu0 %7124 }
0x2d42   :  { %10278 = vrcp.f32 %v7125_v30 }
0x2d45   :  { %v7129_v45 = vpop.permute.xlu0 %7128 }
0x2d4b   :  { %v10277_v39 = vpop.eup %10276 }
0x2d4c   :  { %v6957_v20 = vmul.f32 %v10277_v39, %v10273_v34 }
0x2d4e   :  { %9855 = vmatmul.mubr.msk.f32.vlgmr.msra.gmra.mxu1 %vm6960_vm8, %v6957_v20 }
0x2d4f   :  { %v10279_v23 = vpop.eup %10278  ;;  %9863 = vmatpush3.msk.msra.mxu1 %vm6964_vm7, %v7129_v45  ;;  %9864 = vmatprep.mubr.msk.f32.mxu1 %vm10702_vm4, %v10701_v42 }
0x2d50   :  { %v7127_v43 = vmul.f32 %v10279_v23, %v10275_v28  ;;  %9872 = vmatprep.subr.mxu1 %v10701_v42  ;;  %v8666_v28 = vld [vmem:[#allocation7 + $0x2] ss:$0 sm:$0xff] }
0x2d52   :  { %9865 = vmatmul.mubr.msk.f32.vlgmr.msra.gmra.mxu1 %vm6960_vm8, %v7127_v43 }
0x2d53   :  { %9874 = vmatprep.mubr.msk.f32.mxu1 %vm10702_vm4, %v10701_v42  ;;  %9873 = vmatpush3.msra.mxu1 %v8642_v33 }
0x2d54   :  { %9882 = vmatprep.subr.mxu1 %v10701_v42 }
0x2e0e   :  { %v7033_v36 = vpop.f32.mrf.mxu1 }
0x2e0f   :  { %9875 = vmatmul.mubr.msk.f32.vlgmr.msra.gmra.mxu1 %vm625_vm2, %v7033_v36  ;;  %v8672_v36 = vld [vmem:[%s12684_s28 + $0x58] sm:$0xff] }
0x2e10   :  { %v9856_v1 = vpop.f32.mrf.mxu1  ;;  %9884 = vmatprep.mubr.msk.f32.mxu1 %vm10702_vm4, %v10701_v42 }
0x2e11   :  { %v8670_v1 = vld [vmem:[%s12684_s28 + $0x48] sm:$0xff] }
0x2e12   :  { %v7201_v44 = vpop.f32.mrf.mxu1 }
0x2e13   :  { %9870 = vmatmul.mubr.msk.f32.vlgmr.msra.gmra.mxu0 %vm625_vm2, %v7201_v44  ;;  %v8669_v44 = vld [vmem:[%s12684_s28 + $0x40] sm:$0xff] }
0x2e14   :  { %9878 = vmatpush3.xpose.msk.msra.mxu0 %vm625_vm2, %v7354_v16  ;;  %v9866_v21 = vpop.f32.mrf.mxu1  ;;  %9879 = vmatprep.mubr.msk.f32.mxu0 %vm10702_vm4, %v10701_v42  ;;  %v8671_v16 = vld [vmem:[%s12684_s28 + $0x50] sm:$0xff] }
0x2e15   :  { %9887 = vmatprep.subr.mxu0 %v10701_v42  ;;  %v7968_v21 = vld [vmem:[#allocation13 + $0x58] sm:$0xff] }
0x2e17   :  { %9880 = vmatmul.mubr.msk.f32.vlgmr.msra.gmra.mxu0 %vm625_vm2, %v7352_v46 }
0x2e18   :  { %9889 = vmatprep.mubr.msk.f32.mxu0 %vm10702_vm4, %v10701_v42  ;;  %9888 = vmatpush3.msra.mxu0 %v8644_v13 }
0x2e19   :  { %9897 = vmatprep.subr.mxu0 %v10701_v42 }
0x2ecf   :  { %v7347_v41 = vpop.f32.mrf.mxu1 }
0x2ed1   :  { %v9876_v40 = vpop.f32.mrf.mxu1 }
0x2ed3   :  { %v7274_v17 = vpop.f32.mrf.mxu0 }
0x2ed4   :  { %v7348_v55 = vadd.f32 %v7347_v41, %v7274_v17 }
0x2ed5   :  { %v9871_v5 = vpop.f32.mrf.mxu0 }
0x2ed7   :  { %v7425_v49 = vpop.f32.mrf.mxu0 }
0x2ed8   :  { %v7429_v52 = vmul.f32 0.35355338, %v7425_v49  ;;  %v8668_v49 = vld [vmem:[#allocation10 + $0x2] ss:$0 sm:$0xff] }
0x2ed9   :  { %v9881_v10 = vpop.f32.mrf.mxu0 }
0x2eda   :  { %v7430_v25 = vadd.f32 %v7429_v52, %v12528_v51 }
0x2edc   :  { %v7431_v4 = vsel %vm6946_vm6, %v7430_v25, -inf }
0x2edd   :  { %7432 = vmax.xlane.f32.xlu0 %v7431_v4  ;;  %v7966_v4 = vld [vmem:[#allocation13 + $0x48] sm:$0xff] }
0x2ef3   :  { %7442 = vrot.lane.b32.xlu0 %v12508_v57, %s10699_s12 }
0x2ef7   :  { %7593 = vrot.lane.b32.xlu0 %v12508_v57, %s10698_s4 }
0x2f66   :  { %v7433_v9 = vpop.xlane.xlu0 %7432 }
0x2f67   :  { %v7434_v60 = vsub.f32 %v7430_v25, %v7433_v9  ;;  %v7967_v25 = vld [vmem:[#allocation13 + $0x50] sm:$0xff]  ;;  %v7965_v9 = vld [vmem:[#allocation13 + $0x40] sm:$0xff] }
0x2f69   :  { %v7435_v24 = vmul.f32 1.442695, %v7434_v60  ;;  %v8673_v60 = vld [vmem:[#allocation11 + $0x2] ss:$0 sm:$0xff] }
0x2f6a   :  { %v7443_v63 = vpop.permute.xlu0 %7442 }
0x2f6b   :  { %10280 = vpow2.f32 %v7435_v24  ;;  %9883 = vmatpush3.msk.msra.mxu1 %vm6964_vm7, %v7443_v63 }
0x2f6c   :  { %9892 = vmatprep.subr.mxu1 %v10701_v42 }
0x2f6e   :  { %v7594_v56 = vpop.permute.xlu0 %7593 }
0x2f78   :  { %v10281_v61 = vpop.eup %10280 }
0x2f79   :  { %v7437_v53 = vsel %vm6946_vm6, %v10281_v61, 0.0 }
0x2f7a   :  { %7438 = vadd.xlane.f32.xlu1 %v7437_v53 }
0x2f8b   :  { %7595 = vrot.lane.b32.xlu1 %v12508_v57, %s10697_s22 }
0x3003   :  { %v7439_v2 = vpop.xlane.xlu1 %7438 }
0x3004   :  { %10282 = vrcp.f32 %v7439_v2  ;;  %v8675_v2 = vld [vmem:[#allocation14 + $0x2] ss:$0 sm:$0xff] }
0x3007   :  { %v7596_v11 = vpop.permute.xlu1 %7595 }
0x3011   :  { %v10283_v0 = vpop.eup %10282 }
0x3012   :  { %v7441_v6 = vmul.f32 %v10283_v0, %v10281_v61 }
0x3014   :  { %9885 = vmatmul.mubr.msk.f32.vlgmr.msra.gmra.mxu1 %vm6960_vm8, %v7441_v6 }
0x3015   :  { %9893 = vmatpush3.xpose.msk.msra.mxu1 %vm625_vm2, %v7596_v11  ;;  %9894 = vmatprep.mubr.msk.f32.mxu1 %vm10702_vm4, %v10701_v42 }
0x3016   :  { %9902 = vmatprep.subr.mxu1 %v10701_v42 }
0x3018   :  { %9895 = vmatmul.mubr.msk.f32.vlgmr.msra.gmra.mxu1 %vm625_vm2, %v7594_v56 }
0x3019   :  { %9904 = vmatprep.mubr.msk.f32.mxu1 %vm10702_vm4, %v10701_v42  ;;  %9903 = vmatpush3.msra.mxu1 %v8645_v29  ;;  %v8677_v29 = vld [vmem:[#allocation16 + $0x2] ss:$0 sm:$0xff] }
0x301a   :  { %9918 = vmatprep.subr.mxu1 %v10701_v42 }
0x30d4   :  { %v7515_v15 = vpop.f32.mrf.mxu1 }
0x30d5   :  { %9890 = vmatmul.mubr.msk.f32.vlgmr.msra.gmra.mxu0 %vm625_vm2, %v7515_v15 }
0x30d6   :  { %v9886_v48 = vpop.f32.mrf.mxu1  ;;  %9899 = vmatprep.mubr.msk.f32.mxu0 %vm10702_vm4, %v10701_v42 }
0x30d8   :  { %v7667_v37 = vpop.f32.mrf.mxu1 }
0x30d9   :  { %v7671_v14 = vmul.f32 0.35355338, %v7667_v37 }
0x30da   :  { %v9896_v31 = vpop.f32.mrf.mxu1 }
0x30db   :  { %v7672_v50 = vadd.f32 %v7671_v14, %v12528_v51 }
0x30dd   :  { %v7673_v7 = vsel %vm6946_vm6, %v7672_v50, -inf }
0x30de   :  { %7674 = vmax.xlane.f32.xlu1 %v7673_v7  ;;  %v8085_v7 = vld [vmem:[%s12690_s2 + $0x10] sm:$0xff] }
0x3167   :  { %v7675_v12 = vpop.xlane.xlu1 %7674 }
0x3168   :  { %v7676_v18 = vsub.f32 %v7672_v50, %v7675_v12  ;;  %v8086_v50 = vld [vmem:[%s12690_s2 + $0x18] sm:$0xff]  ;;  %v8084_v12 = vld [vmem:[%s12690_s2 + $0x8] sm:$0xff] }
0x316a   :  { %v7677_v19 = vmul.f32 1.442695, %v7676_v18  ;;  %v8083_v18 = vld [vmem:[%s12690_s2] sm:$0xff] }
0x316c   :  { %10284 = vpow2.f32 %v7677_v19 }
0x3179   :  { %v10285_v54 = vpop.eup %10284 }
0x317a   :  { %v7679_v8 = vsel %vm6946_vm6, %v10285_v54, 0.0 }
0x317b   :  { %7680 = vadd.xlane.f32.xlu0 %v7679_v8 }
0x3191   :  { %7684 = vrot.lane.b32.xlu0 %v12508_v57, %s10700_s26 }
0x3195   :  { %v7588_v58 = vpop.f32.mrf.mxu0 }
0x3196   :  { %v7592_v59 = vadd.f32 %v7588_v58, %v7348_v55  ;;  %v8667_v55 = vld [vmem:[#allocation8 + $0x2] ss:$0 sm:$0xff] }
0x3197   :  { %v9891_v38 = vpop.f32.mrf.mxu0 }
0x3198   :  { %v8678_v38 = vld [vmem:[#allocation17 + $0x2] ss:$0 sm:$0xff] }
0x3204   :  { %v7681_v51 = vpop.xlane.xlu0 %7680 }
0x3205   :  { %10286 = vrcp.f32 %v7681_v51 }
0x3208   :  { %v7685_v27 = vpop.permute.xlu0 %7684 }
0x3209   :  { %9898 = vmatpush3.msk.msra.mxu0 %vm6964_vm7, %v7685_v27 }
0x320a   :  { %9907 = vmatprep.subr.mxu0 %v10701_v42 }
0x3212   :  { %v10287_v35 = vpop.eup %10286 }
0x3213   :  { %v7683_v62 = vmul.f32 %v10287_v35, %v10285_v54 }
0x3215   :  { %9900 = vmatmul.mubr.msk.f32.vlgmr.msra.gmra.mxu0 %vm6960_vm8, %v7683_v62  ;;  %v8679_v62 = vld [vmem:[#allocation26] ss:$0 sm:$0xff] }
0x3216   :  { %9915 = vmatprep.mubr.msk.f32.mxu0 %vm10702_vm4, %v10701_v42  ;;  %9908 = vmatpush3.msra.mxu0 %v8672_v36 }
0x3217   :  { %9909 = vmatprep.subr.mxu0 %v10701_v42 }
0x3218   :  { %9910 = vmatpush3.msra.mxu0 %v8671_v16 }
0x3219   :  { %9911 = vmatprep.subr.mxu0 %v10701_v42 }
0x321a   :  { %9912 = vmatpush3.msra.mxu0 %v8670_v1 }
0x321b   :  { %9913 = vmatprep.subr.mxu0 %v10701_v42 }
0x321c   :  { %9914 = vmatpush3.msra.mxu0 %v8669_v44  ;;  %v8681_v44 = vld [vmem:[%s12691_s19] ss:$0 sm:$0xff] }
0x321d   :  { %9929 = vmatprep.subr.mxu0 %v10701_v42 }
0x32d5   :  { %v7757_v57 = vpop.f32.mrf.mxu0 }
0x32d6   :  { %9905 = vmatmul.mubr.msk.f32.vlgmr.msra.gmra.mxu1 %vm625_vm2, %v7757_v57 }
0x32d7   :  { %v9901_v34 = vpop.f32.mrf.mxu0  ;;  %9926 = vmatprep.mubr.msk.f32.mxu1 %vm10702_vm4, %v10701_v42  ;;  %9919 = vmatpush3.msra.mxu1 %v7968_v21 }
0x32d8   :  { %9920 = vmatprep.subr.mxu1 %v10701_v42 }
0x32d9   :  { %9921 = vmatpush3.msra.mxu1 %v7967_v25 }
0x32da   :  { %9922 = vmatprep.subr.mxu1 %v10701_v42 }
0x32db   :  { %9923 = vmatpush3.msra.mxu1 %v7966_v4 }
0x32dc   :  { %9924 = vmatprep.subr.mxu1 %v10701_v42 }
0x32dd   :  { %9925 = vmatpush3.msra.mxu1 %v7965_v9 }
0x32de   :  { %9940 = vmatprep.subr.mxu1 %v10701_v42 }
0x3396   :  { %v7830_v26 = vpop.f32.mrf.mxu1 }
0x3397   :  { %v7834_v32 = vadd.f32 %v7830_v26, %v7592_v59 }
0x3398   :  { %v9906_v22 = vpop.f32.mrf.mxu1 }
0x3399   :  { %v7843_v30 = vadd.f32 %v8666_v28, %v7834_v32 }
0x339b   :  { %v7844_v39 = vadd.f32 %v7843_v30, %v12502_v3 }
0x339d   :  { %v7850_v20 = vsel %vm7849_vm9, %v7844_v39, 0.0 }
0x339e   :  { %7851 = vadd.xlane.f32.xlu1 %v7850_v20 }
0x3427   :  { %v7852_v45 = vpop.xlane.xlu1 %7851 }
0x3428   :  { %v7853_v23 = vmul.f32 0.03125, %v7852_v45 }
0x342a   :  { %v7854_v43 = vsub.f32 %v7844_v39, %v7853_v23  ;;  %v8199_v23 = vld [vmem:[%s10861_s29 + $0x10] sm:$0xff] }
0x342c   :  { %v7855_v33 = vmul.f32 %v7854_v43, %v7854_v43 }
0x342e   :  { %v7856_v47 = vsel %vm7849_vm9, %v7855_v33, 0.0  ;;  %v8197_v33 = vld [vmem:[%s10861_s29] sm:$0xff] }
0x342f   :  { %7857 = vadd.xlane.f32.xlu1 %v7856_v47 }
0x34b8   :  { %v7858_v46 = vpop.xlane.xlu1 %7857 }
0x34b9   :  { %v7859_v41 = vmul.f32 0.03125, %v7858_v46  ;;  %v8682_v46 = vld [vmem:[%s10856_s8] ss:$0 sm:$0xff] }
0x34bb   :  { %v7860_v40 = vadd.f32 1e-05, %v7859_v41 }
0x34bd   :  { %10288 = vrsqrt.f32 %v7860_v40 }
0x34ca   :  { %v10289_v17 = vpop.eup %10288 }
0x34cb   :  { %v7862_v5 = vmul.f32 %v10289_v17, %v7854_v43  ;;  %v8198_v43 = vld [vmem:[%s10861_s29 + $0x8] sm:$0xff]  ;;  %v8683_v17 = vld [vmem:[#allocation2] ss:$0 sm:$0xff] }
0x34cd   :  { %v7869_v52 = vmul.f32 %v8667_v55, %v7862_v5 }
0x34cf   :  { %v7876_v10 = vadd.f32 %v8668_v49, %v7869_v52 }
0x34d1   :  { %9916 = vmatmul.mubr.msk.f32.vlgmr.msra.gmra.mxu0 %vm489_vm1, %v7876_v10 }
0x34d2   :  { %9937 = vmatprep.mubr.msk.f32.mxu0 %vm10702_vm4, %v10701_v42  ;;  %9930 = vmatpush3.msra.mxu0 %v8086_v50 }
0x34d3   :  { %9931 = vmatprep.subr.mxu0 %v10701_v42 }
0x34d4   :  { %9932 = vmatpush3.msra.mxu0 %v8085_v7 }
0x34d5   :  { %9933 = vmatprep.subr.mxu0 %v10701_v42 }
0x34d6   :  { %9934 = vmatpush3.msra.mxu0 %v8084_v12 }
0x34d7   :  { %9935 = vmatprep.subr.mxu0 %v10701_v42 }
0x34d8   :  { %9936 = vmatpush3.msra.mxu0 %v8083_v18 }
0x3591   :  { %v7959_v24 = vpop.f32.mrf.mxu0 }
0x3592   :  { %v7960_v63 = vadd.f32 %v8673_v60, %v7959_v24 }
0x3593   :  { %v9917_v61 = vpop.f32.mrf.mxu0 }
0x3594   :  { %v7963_v53 = vmax.f32 %v7960_v63, 0.0 }
0x3596   :  { %9927 = vmatmul.mubr.msk.f32.vlgmr.msra.gmra.mxu1 %vm489_vm1, %v7963_v53 }
0x3597   :  { %9948 = vmatprep.mubr.msk.f32.mxu1 %vm10702_vm4, %v10701_v42 }
0x3656   :  { %v8046_v0 = vpop.f32.mrf.mxu1 }
0x3657   :  { %v8047_v6 = vadd.f32 %v8675_v2, %v8046_v0 }
0x3658   :  { %v9928_v11 = vpop.f32.mrf.mxu1 }
0x3659   :  { %v8050_v56 = vadd.f32 %v8047_v6, %v7876_v10 }
0x365b   :  { %v8055_v13 = vsel %vm7849_vm9, %v8050_v56, 0.0 }
0x365c   :  { %8056 = vadd.xlane.f32.xlu1 %v8055_v13 }
0x36e5   :  { %v8057_v15 = vpop.xlane.xlu1 %8056 }
0x36e6   :  { %v8058_v48 = vmul.f32 0.03125, %v8057_v15 }
0x36e8   :  { %v8059_v37 = vsub.f32 %v8050_v56, %v8058_v48 }
0x36ea   :  { %v8060_v14 = vmul.f32 %v8059_v37, %v8059_v37 }
0x36ec   :  { %v8061_v31 = vsel %vm7849_vm9, %v8060_v14, 0.0 }
0x36ed   :  { %8062 = vadd.xlane.f32.xlu1 %v8061_v31 }
0x3776   :  { %v8063_v19 = vpop.xlane.xlu1 %8062 }
0x3777   :  { %v8064_v54 = vmul.f32 0.03125, %v8063_v19 }
0x3779   :  { %v8065_v8 = vadd.f32 1e-05, %v8064_v54 }
0x377b   :  { %10290 = vrsqrt.f32 %v8065_v8 }
0x3788   :  { %v10291_v58 = vpop.eup %10290 }
0x3789   :  { %v8067_v59 = vmul.f32 %v10291_v58, %v8059_v37 }
0x378b   :  { %v8074_v51 = vmul.f32 %v8677_v29, %v8067_v59 }
0x378d   :  { %v8081_v27 = vadd.f32 %v8678_v38, %v8074_v51 }
0x378f   :  { %v8082_v35 = vadd.f32 %v8081_v27, %v12502_v3  ;;  %v8200_v3 = vld [vmem:[%s10861_s29 + $0x18] sm:$0xff] }
0x3790   :  { %9941 = vmatpush3.msra.mxu1 %v8200_v3 }
0x3791   :  { %9938 = vmatmul.mubr.msk.f32.vlgmr.msra.gmra.mxu0 %vm489_vm1, %v8082_v35  ;;  %9942 = vmatprep.subr.mxu1 %v10701_v42 }
0x3792   :  { %9943 = vmatpush3.msra.mxu1 %v8199_v23 }
0x3793   :  { %9944 = vmatprep.subr.mxu1 %v10701_v42 }
0x3794   :  { %9945 = vmatpush3.msra.mxu1 %v8198_v43 }
0x3795   :  { %9946 = vmatprep.subr.mxu1 %v10701_v42 }
0x3796   :  { %9947 = vmatpush3.msra.mxu1 %v8197_v33 }
0x3851   :  { %v8163_v57 = vpop.f32.mrf.mxu0 }
0x3852   :  { %v8164_v34 = vadd.f32 %v8679_v62, %v8163_v57 }
0x3853   :  { %v9939_v26 = vpop.f32.mrf.mxu0 }
0x3854   :  { %v8167_v28 = vmax.f32 %v8164_v34, 0.0 }
0x3856   :  { %v8170_v32 = vsel %vm7849_vm9, %v8167_v28, 0.0 }
0x3857   :  { %8171 = vadd.xlane.f32.xlu1 %v8170_v32 }
0x38e0   :  { %v8172_v22 = vpop.xlane.xlu1 %8171 }
0x38e1   :  { %v8173_v30 = vmul.f32 0.03125, %v8172_v22 }
0x38e3   :  { %v8174_v39 = vsub.f32 %v8167_v28, %v8173_v30 }
0x38e5   :  { %v8175_v20 = vmul.f32 %v8174_v39, %v8174_v39 }
0x38e7   :  { %v8176_v45 = vsel %vm7849_vm9, %v8175_v20, 0.0 }
0x38e8   :  { %8177 = vadd.xlane.f32.xlu1 %v8176_v45 }
0x3971   :  { %v8178_v47 = vpop.xlane.xlu1 %8177 }
0x3972   :  { %v8179_v36 = vmul.f32 0.03125, %v8178_v47 }
0x3974   :  { %v8180_v16 = vadd.f32 1e-05, %v8179_v36 }
0x3976   :  { %10292 = vrsqrt.f32 %v8180_v16 }
0x3983   :  { %v10293_v1 = vpop.eup %10292 }
0x3984   :  { %v8182_v21 = vmul.f32 %v10293_v1, %v8174_v39 }
0x3986   :  { %v8189_v41 = vmul.f32 %v8681_v44, %v8182_v21 }
0x3988   :  { %v8196_v40 = vadd.f32 %v8682_v46, %v8189_v41 }
0x398a   :  { %9949 = vmatmul.mubr.msk.f32.vlgmr.msra.gmra.mxu1 %vm489_vm1, %v8196_v40 }
0x3a4a   :  { %v8277_v55 = vpop.f32.mrf.mxu1 }
0x3a4b   :  { %v8278_v5 = vadd.f32 %v8683_v17, %v8277_v55 }
0x3a4c   :  { %v9950_v49 = vpop.f32.mrf.mxu1 }
0x3a4d   :  { %8282 = vst.msk [vmem:[%s10869_s25] sm:$0x3f] %vm8281_vm10, %v8278_v5 }
0x3a4e   :  { %8287 = vsyncpa [#allocation4], 1 }
0x3a4f   :  { %8288 = vsyncpa [#allocation6], 1 }
0x3a50   :  { %8289 = vsyncpa [#allocation9], 1 }
0x3a51   :  { %8290 = vsyncpa [#allocation12], 1 }
0x3a52   :  { %8291 = vsyncpa [#allocation15], 1 }
0x3a53   :  { %8292 = vsyncpa [#allocation18], 1 }
0x3a54   :  { %8293 = vsyncpa [#allocation21], 1 }
0x3a55   :  { %8294 = vsyncpa [#allocation24], 1 }
0x3a56   :  { %8295 = vsyncpa [#allocation27], 1 }

</bundles_post_ra>
